<compile_context>
chip_gen: v7x
topology: tpu7x:2x2x1
jax: 0.10.0
libtpu: 0.0.40
codegen_flags: <defaults>
</compile_context>

<pallas_src>
import math
from functools import partial

import numpy as np
import jax
import jax.numpy as jnp
from jax.experimental import pallas as pl
from jax.experimental.pallas import tpu as pltpu


# ----------------------------------------------------------------------------
# helpers
# ----------------------------------------------------------------------------
def _round_up(x, m):
    return ((x + m - 1) // m) * m


def _pick_tile(candidates, k, budget_bytes=2 << 20):
    """Largest tile (rows) whose f32 slab of width k fits the per-buffer budget."""
    for t in candidates:
        if t * k * 4 <= budget_bytes:
            return t
    return candidates[-1]


def _apply_act(y, act):
    if act == "relu":
        return jnp.maximum(y, 0.0)
    if act == "gelu":
        # TODO(synk): torch nn.GELU default is exact erf-GELU; tanh approximation used here.
        c = math.sqrt(2.0 / math.pi)
        return 0.5 * y * (1.0 + jnp.tanh(c * (y + 0.044715 * y * y * y)))
    return y


# ----------------------------------------------------------------------------
# Pallas kernels
# ----------------------------------------------------------------------------
def _linear_kernel(x_ref, w_ref, b_ref, o_ref, *, act):
    x = x_ref[...].astype(jnp.bfloat16)
    w = w_ref[...].astype(jnp.bfloat16)
    y = jnp.dot(x, w, preferred_element_type=jnp.float32) + b_ref[...]
    o_ref[...] = _apply_act(y, act).astype(o_ref.dtype)


def _ln_linear_kernel(x_ref, g_ref, bb_ref, w_ref, b_ref, o_ref, *, act):
    # fused LayerNorm prologue (full K resident in the block) + matmul
    x = x_ref[...].astype(jnp.float32)
    mu = jnp.mean(x, axis=-1, keepdims=True)
    var = jnp.mean(jnp.square(x - mu), axis=-1, keepdims=True)
    xn = (x - mu) * jax.lax.rsqrt(var + 1e-5)
    xn = xn * g_ref[...] + bb_ref[...]
    y = jnp.dot(xn.astype(jnp.bfloat16), w_ref[...].astype(jnp.bfloat16),
                preferred_element_type=jnp.float32) + b_ref[...]
    o_ref[...] = _apply_act(y, act).astype(o_ref.dtype)


def linear(x, w, b, act=None, ln=None):
    """y = act(LN?(x) @ w + b).  x: (..., K), w: (K, N), b: (N,).

    Tiled over rows and (when wide) output columns, K kept whole per block so the
    LayerNorm prologue can be fused.  bf16 MXU operands, f32 accumulate.
    """
    orig_shape = x.shape
    K = orig_shape[-1]
    N = w.shape[1]
    x2 = x.reshape(-1, K)
    M = x2.shape[0]

    tm_cand = _pick_tile((1024, 512, 256), K)
    if M <= tm_cand:
        tm, Mp = M, M
    else:
        tm = tm_cand
        Mp = _round_up(M, tm)
        x2 = jnp.pad(x2, ((0, Mp - M), (0, 0)))

    tn_cand = _pick_tile((512, 256), K)
    if N <= tn_cand:
        tn, Np = N, N
        w2, b2 = w, b
    else:
        tn = tn_cand
        Np = _round_up(N, tn)
        w2 = jnp.pad(w, ((0, 0), (0, Np - N)))
        b2 = jnp.pad(b, ((0, Np - N),))
    b2 = b2.reshape(1, Np)

    grid = (Mp // tm, Np // tn)

    if ln is None:
        kern = partial(_linear_kernel, act=act)
        in_specs = [
            pl.BlockSpec((tm, K), lambda i, j: (i, 0)),
            pl.BlockSpec((K, tn), lambda i, j: (0, j)),
            pl.BlockSpec((1, tn), lambda i, j: (0, j)),
        ]
        args = (x2, w2, b2)
    else:
        g, bb = ln
        kern = partial(_ln_linear_kernel, act=act)
        in_specs = [
            pl.BlockSpec((tm, K), lambda i, j: (i, 0)),
            pl.BlockSpec((1, K), lambda i, j: (0, 0)),
            pl.BlockSpec((1, K), lambda i, j: (0, 0)),
            pl.BlockSpec((K, tn), lambda i, j: (0, j)),
            pl.BlockSpec((1, tn), lambda i, j: (0, j)),
        ]
        args = (x2, g.reshape(1, K), bb.reshape(1, K), w2, b2)

    out = pl.pallas_call(
        kern,
        out_shape=jax.ShapeDtypeStruct((Mp, Np), jnp.float32),
        grid=grid,
        in_specs=in_specs,
        out_specs=pl.BlockSpec((tm, tn), lambda i, j: (i, j)),
        compiler_params=pltpu.CompilerParams(
            dimension_semantics=("parallel", "parallel")),
    )(*args)
    out = out[:M, :N]
    return out.reshape(orig_shape[:-1] + (N,))


def _layernorm_kernel(x_ref, g_ref, b_ref, o_ref):
    x = x_ref[...].astype(jnp.float32)
    mu = jnp.mean(x, axis=-1, keepdims=True)
    var = jnp.mean(jnp.square(x - mu), axis=-1, keepdims=True)
    y = (x - mu) * jax.lax.rsqrt(var + 1e-5)
    o_ref[...] = (y * g_ref[...] + b_ref[...]).astype(o_ref.dtype)


def layernorm(x, g, b):
    orig_shape = x.shape
    C = orig_shape[-1]
    x2 = x.reshape(-1, C)
    M = x2.shape[0]
    if M <= 1024:
        tm, Mp = M, M
    else:
        tm = 1024
        Mp = _round_up(M, tm)
        x2 = jnp.pad(x2, ((0, Mp - M), (0, 0)))
    out = pl.pallas_call(
        _layernorm_kernel,
        out_shape=jax.ShapeDtypeStruct((Mp, C), jnp.float32),
        grid=(Mp // tm,),
        in_specs=[
            pl.BlockSpec((tm, C), lambda i: (i, 0)),
            pl.BlockSpec((1, C), lambda i: (0, 0)),
            pl.BlockSpec((1, C), lambda i: (0, 0)),
        ],
        out_specs=pl.BlockSpec((tm, C), lambda i: (i, 0)),
        compiler_params=pltpu.CompilerParams(dimension_semantics=("parallel",)),
    )(x2, g.reshape(1, C), b.reshape(1, C))
    return out[:M].reshape(orig_shape)


def _attn_kernel(qkv_ref, bias_ref, o_ref, *, scale, nh):
    qkv = qkv_ref[...].astype(jnp.float32)        # (Wc, N, 3C)
    bias = bias_ref[...]                          # (Wc, nh, N, N) f32
    Wc, N, C3 = qkv.shape
    C = C3 // 3
    hd = C // nh
    outs = []
    for h in range(nh):
        q = qkv[:, :, h * hd:(h + 1) * hd].astype(jnp.bfloat16)
        k = qkv[:, :, C + h * hd:C + (h + 1) * hd].astype(jnp.bfloat16)
        v = qkv[:, :, 2 * C + h * hd:2 * C + (h + 1) * hd].astype(jnp.bfloat16)
        s = jnp.einsum("wqd,wkd->wqk", q, k, preferred_element_type=jnp.float32)
        s = s * scale + bias[:, h]
        s = s - jnp.max(s, axis=-1, keepdims=True)
        p = jnp.exp(s)
        denom = jnp.sum(p, axis=-1, keepdims=True)
        p = p * pl.reciprocal(denom, approx=True)
        o = jnp.einsum("wqk,wkd->wqd", p.astype(jnp.bfloat16), v,
                       preferred_element_type=jnp.float32)
        outs.append(o)
    # merge heads inside the kernel -> single lane-dense store of (Wc, N, C)
    o_ref[...] = jnp.concatenate(outs, axis=-1).astype(o_ref.dtype)


def window_attention(qkv, bias, scale, nh, nW):
    """qkv: (B*nW, N, 3C) straight from the qkv projection (no relayout),
    bias: (nW, nh, N, N) (pos bias + optional shift mask, NOT tiled over batch).
    Several windows processed per grid step; bias reused via a modulo index_map.
    """
    Bw, N, C3 = qkv.shape
    C = C3 // 3
    target = max(1, 1024 // max(N, 1))
    Wc = 1
    for d in range(1, nW + 1):        # largest divisor of nW within the budget
        if nW % d == 0 and d <= target:
            Wc = d
    nWb = nW // Wc
    grid = (Bw // Wc,)
    return pl.pallas_call(
        partial(_attn_kernel, scale=scale, nh=nh),
        out_shape=jax.ShapeDtypeStruct((Bw, N, C), jnp.float32),
        grid=grid,
        in_specs=[
            pl.BlockSpec((Wc, N, C3), lambda g: (g, 0, 0)),
            pl.BlockSpec((Wc, nh, N, N), lambda g: (g % nWb, 0, 0, 0)),
        ],
        out_specs=pl.BlockSpec((Wc, N, C), lambda g: (g, 0, 0)),
        compiler_params=pltpu.CompilerParams(dimension_semantics=("parallel",)),
    )(qkv, bias)


def _mean_tokens_kernel(x_ref, o_ref):
    x = x_ref[...].astype(jnp.float32)
    o_ref[...] = jnp.mean(x, axis=1).astype(o_ref.dtype)


def mean_tokens(x):
    B, L, C = x.shape
    if B <= 8:
        bt, Bp = B, B
        xp = x
    else:
        bt = 8
        Bp = _round_up(B, 8)
        xp = jnp.pad(x, ((0, Bp - B), (0, 0), (0, 0)))
    out = pl.pallas_call(
        _mean_tokens_kernel,
        out_shape=jax.ShapeDtypeStruct((Bp, C), jnp.float32),
        grid=(Bp // bt,),
        in_specs=[pl.BlockSpec((bt, L, C), lambda i: (i, 0, 0))],
        out_specs=pl.BlockSpec((bt, C), lambda i: (i, 0)),
        compiler_params=pltpu.CompilerParams(dimension_semantics=("parallel",)),
    )(xp)
    return out[:B]


# ----------------------------------------------------------------------------
# Model glue (windowing, shifts, patchify)
# ----------------------------------------------------------------------------
def window_partition(x, ws):
    B, H, W, C = x.shape
    x = x.reshape(B, H // ws, ws, W // ws, ws, C)
    x = x.transpose(0, 1, 3, 2, 4, 5)
    return x.reshape(-1, ws, ws, C)


def window_reverse(windows, ws, H, W, B):
    C = windows.shape[-1]
    x = windows.reshape(B, H // ws, W // ws, ws, ws, C)
    x = x.transpose(0, 1, 3, 2, 4, 5)
    return x.reshape(B, H, W, C)


def make_shift_mask(H, W, ws, shift):
    """Standard Swin shifted-window attention mask, computed statically (numpy)."""
    assert 0 < shift < ws
    img_mask = np.zeros((1, H, W, 1), dtype=np.float32)
    cnt = 0
    for hs in (slice(0, -ws), slice(-ws, -shift), slice(-shift, None)):
        for wsl in (slice(0, -ws), slice(-ws, -shift), slice(-shift, None)):
            img_mask[:, hs, wsl, :] = cnt
            cnt += 1
    mw = window_partition(img_mask, ws).reshape(-1, ws * ws)
    attn_mask = mw[:, None, :] - mw[:, :, None]
    attn_mask = np.where(attn_mask != 0, -100.0, 0.0).astype(np.float32)
    return jnp.asarray(attn_mask)                                  # (nW, N, N)


def patch_embed(x, p, patch_size):
    """Conv2d(k=p, stride=p) as patchify + matmul, then LayerNorm."""
    B, C, H, W = x.shape
    ph, pw = H // patch_size, W // patch_size
    xp = x.reshape(B, C, ph, patch_size, pw, patch_size)
    xp = xp.transpose(0, 2, 4, 1, 3, 5).reshape(B, ph * pw, C * patch_size * patch_size)
    y = linear(xp, p["proj_w"], p["proj_b"])
    y = layernorm(y, p["norm_g"], p["norm_b"])
    return y, (ph, pw)


def patch_merge(x, pos_hw, p, H, W):
    """PatchMerge: Conv2d(k=2, stride=2) as patchify + matmul, then LayerNorm."""
    B, L, C = x.shape
    xg = x.reshape(B, H, W, C)
    xg = xg.reshape(B, H // 2, 2, W // 2, 2, C)
    xg = xg.transpose(0, 1, 3, 5, 2, 4).reshape(B, (H // 2) * (W // 2), C * 4)
    y = linear(xg, p["proj_w"], p["proj_b"])
    y = layernorm(y, p["norm_g"], p["norm_b"])
    # TODO(synk): PatchMerge source not provided; coords are 2x2 average-pooled
    # so pos_hw tracks the downsampled token grid.
    pos = pos_hw.reshape(1, H // 2, 2, W // 2, 2, 2).mean(axis=(2, 4))
    return y, pos


def swin_block(x, pos_hw, p, cfg, cache):
    H, W = cfg["input_resolution"]
    if cfg["downsample"]:
        x, pos_hw = patch_merge(x, pos_hw, p["merge"], 2 * H, 2 * W)

    nh = cfg["num_heads"]
    ws = cfg["window_size"]
    shift = cfg["shift_size"]
    if min(H, W) <= ws:           # standard Swin clamping
        ws = min(H, W)
        shift = 0

    B, L, C = x.shape
    hd = C // nh
    scale = hd ** -0.5
    N = ws * ws
    nW = (H // ws) * (W // ws)

    # ---- relative coords + shift mask: identical for all blocks at this stage/shift
    key = (H, W, ws, shift)
    if key not in cache:
        pos = pos_hw
        if shift > 0:
            pos = jnp.roll(pos, (-shift, -shift), axis=(1, 2))
        pw_ = window_partition(pos, ws).reshape(-1, N, 2)          # (nW, N, 2)
        rel = pw_[:, :, None, :] - pw_[:, None, :, :]              # (nW, N, N, 2)
        mask = make_shift_mask(H, W, ws, shift) if shift > 0 else None
        cache[key] = (rel, mask)
    rel, mask = cache[key]

    # dynamic position bias: per-block MLP(2 -> posmlp_dim -> num_heads)
    bias = linear(rel, p["pos_w1"], p["pos_b1"], act="relu")
    bias = linear(bias, p["pos_w2"], p["pos_b2"])                  # (nW, N, N, nh)
    bias = bias.transpose(0, 3, 1, 2)                              # (nW, nh, N, N)
    if mask is not None:
        bias = bias + mask[:, None, :, :]

    # ---- window attention branch -------------------------------------------
    shortcut = x
    xg = x.reshape(B, H, W, C)
    if shift > 0:
        xg = jnp.roll(xg, (-shift, -shift), axis=(1, 2))
    xw = window_partition(xg, ws).reshape(-1, N, C)                # (B*nW, N, C)

    # LayerNorm (norm1) is per-token, so it commutes with roll/window-partition
    # -> fuse it directly into the qkv projection kernel.
    qkv = linear(xw, p["qkv_w"], p["qkv_b"],
                 ln=(p["norm1_g"], p["norm1_b"]))                  # (B*nW, N, 3C)

    attn = window_attention(qkv, bias, scale, nh, nW)              # (B*nW, N, C)
    attn = linear(attn, p["proj_w"], p["proj_b"])

    xg = window_reverse(attn.reshape(-1, ws, ws, C), ws, H, W, B)
    if shift > 0:
        xg = jnp.roll(xg, (shift, shift), axis=(1, 2))
    x = shortcut + xg.reshape(B, L, C)                             # drop_path = id at eval

    # ---- MLP branch (norm2 fused into fc1) -----------------------------------
    y = linear(x, p["fc1_w"], p["fc1_b"], act="gelu",
               ln=(p["norm2_g"], p["norm2_b"]))
    y = linear(y, p["fc2_w"], p["fc2_b"])
    x = x + y
    return x, pos_hw


def swin_forward(params, x, cfgs, patch_size):
    tok, (ph, pw) = patch_embed(x, params["patch_embed"], patch_size)
    pos_h = jnp.tile(jnp.arange(ph, dtype=jnp.float32)[None, :, None, None], (1, 1, pw, 1))
    pos_w = jnp.tile(jnp.arange(pw, dtype=jnp.float32)[None, None, :, None], (1, ph, 1, 1))
    pos_hw = jnp.concatenate([pos_h, pos_w], axis=-1)              # (1, ph, pw, 2)
    cache = {}                                                     # per-stage rel/mask reuse
    for p, cfg in zip(params["blocks"], cfgs):
        tok, pos_hw = swin_block(tok, pos_hw, p, cfg, cache)
    feat = mean_tokens(tok)                                        # x.mean(dim=1)
    logits = linear(feat, params["head_w"], params["head_b"],
                    ln=(params["fc_norm_g"], params["fc_norm_b"]))  # fc_norm fused into head
    return logits


# ----------------------------------------------------------------------------
# Deterministic parameter initialisation (mirrors the module's _init_weights)
# ----------------------------------------------------------------------------
def xavier_uniform(key, shape):
    fan_in, fan_out = shape
    limit = math.sqrt(6.0 / (fan_in + fan_out))
    return jax.random.uniform(key, shape, jnp.float32, -limit, limit)


def init_params(key, *, img_size, patch_size, in_chans, embed_dim, depths,
                num_heads, mlp_ratio, window_size, posmlp_dim, num_classes):
    keys = iter(jax.random.split(key, 256))
    params = {}

    fan_out = patch_size * patch_size * embed_dim
    params["patch_embed"] = dict(
        proj_w=jax.random.normal(next(keys), (in_chans * patch_size * patch_size, embed_dim),
                                 jnp.float32) * math.sqrt(2.0 / fan_out),
        proj_b=jnp.zeros((embed_dim,), jnp.float32),
        norm_g=jnp.ones((embed_dim,), jnp.float32),
        norm_b=jnp.zeros((embed_dim,), jnp.float32),
    )

    pr = img_size // patch_size
    cfgs, blocks = [], []
    for i_layer in range(len(depths)):
        for dep in range(depths[i_layer]):
            dim = embed_dim * 2 ** i_layer
            nh = num_heads[i_layer]
            cfg = dict(
                dim=dim,
                input_resolution=(pr // 2 ** i_layer, pr // 2 ** i_layer),
                num_heads=nh,
                window_size=window_size,
                shift_size=0 if dep % 2 == 0 else window_size // 2,
                downsample=(i_layer > 0 and dep == 0),
            )
            p = {}
            if cfg["downsample"]:
                in_c = dim // 2
                fo = 2 * 2 * dim
                p["merge"] = dict(
                    proj_w=jax.random.normal(next(keys), (in_c * 4, dim), jnp.float32)
                    * math.sqrt(2.0 / fo),
                    proj_b=jnp.zeros((dim,), jnp.float32),
                    norm_g=jnp.ones((dim,), jnp.float32),
                    norm_b=jnp.zeros((dim,), jnp.float32),
                )
            hidden = dim * mlp_ratio
            p["norm1_g"] = jnp.ones((dim,), jnp.float32)
            p["norm1_b"] = jnp.zeros((dim,), jnp.float32)
            p["qkv_w"] = xavier_uniform(next(keys), (dim, 3 * dim))
            p["qkv_b"] = jnp.zeros((3 * dim,), jnp.float32)
            p["pos_w1"] = xavier_uniform(next(keys), (2, posmlp_dim))
            p["pos_b1"] = jnp.zeros((posmlp_dim,), jnp.float32)
            p["pos_w2"] = xavier_uniform(next(keys), (posmlp_dim, nh))
            p["pos_b2"] = jnp.zeros((nh,), jnp.float32)
            p["proj_w"] = xavier_uniform(next(keys), (dim, dim))
            p["proj_b"] = jnp.zeros((dim,), jnp.float32)
            p["norm2_g"] = jnp.ones((dim,), jnp.float32)
            p["norm2_b"] = jnp.zeros((dim,), jnp.float32)
            p["fc1_w"] = xavier_uniform(next(keys), (dim, hidden))
            p["fc1_b"] = jnp.zeros((hidden,), jnp.float32)
            p["fc2_w"] = xavier_uniform(next(keys), (hidden, dim))
            p["fc2_b"] = jnp.zeros((dim,), jnp.float32)
            blocks.append(p)
            cfgs.append(cfg)

    out_dim = embed_dim * 2 ** (len(depths) - 1)
    params["blocks"] = blocks
    params["fc_norm_g"] = jnp.ones((out_dim,), jnp.float32)
    params["fc_norm_b"] = jnp.zeros((out_dim,), jnp.float32)
    params["head_w"] = xavier_uniform(next(keys), (out_dim, num_classes))
    params["head_b"] = jnp.zeros((num_classes,), jnp.float32)
    return params, cfgs


# ----------------------------------------------------------------------------
if __name__ == "__main__":
    key = jax.random.PRNGKey(0)
    kp, kx = jax.random.split(key)

    # Small config consistent with the module's constructor arguments.
    img_size, patch_size, in_chans = 32, 4, 3
    embed_dim, depths, num_heads = 32, [2, 2], [2, 4]
    mlp_ratio, window_size, posmlp_dim, num_classes = 2, 4, 8, 8

    params, cfgs = init_params(
        kp, img_size=img_size, patch_size=patch_size, in_chans=in_chans,
        embed_dim=embed_dim, depths=depths, num_heads=num_heads,
        mlp_ratio=mlp_ratio, window_size=window_size,
        posmlp_dim=posmlp_dim, num_classes=num_classes)

    x = jax.random.normal(kx, (2, in_chans, img_size, img_size), jnp.float32)  # NCHW

    fwd = jax.jit(partial(swin_forward, cfgs=cfgs, patch_size=patch_size))
    out = fwd(params, x)
    jax.block_until_ready(out)
    assert out.shape == (2, num_classes)
    assert bool(jnp.all(jnp.isfinite(out)))
    print("KERNEL_OK")
</pallas_src>

<mosaic_0001>
module attributes {stable_mosaic.version = 11 : i64} {
  func.func @_linear_kernel(%arg0: i32, %arg1: i32, %arg2: memref<128x48xf32, #tpu.memory_space<vmem>>, %arg3: memref<48x32xf32, #tpu.memory_space<vmem>>, %arg4: memref<1x32xf32, #tpu.memory_space<vmem>>, %arg5: memref<128x32xf32, #tpu.memory_space<vmem>>) attributes {dimension_semantics = [#tpu.dimension_semantics<parallel>, #tpu.dimension_semantics<parallel>], iteration_bounds = array<i64: 1, 1>, scalar_prefetch = 0 : i64, scratch_operands = 0 : i64, tpu.core_type = #tpu.core_type<tc>, window_params = [{transform_indices = @transform_0, window_bounds = array<i64: 128, 48>}, {transform_indices = @transform_1, window_bounds = array<i64: 48, 32>}, {transform_indices = @transform_2, window_bounds = array<i64: 1, 32>}, {transform_indices = @transform_3, window_bounds = array<i64: 128, 32>}]} {
    %c0 = arith.constant 0 : index
    %c0_0 = arith.constant 0 : index
    %0 = vector.load %arg2[%c0, %c0_0] : memref<128x48xf32, #tpu.memory_space<vmem>>, vector<128x48xf32>
    %1 = arith.truncf %0 : vector<128x48xf32> to vector<128x48xbf16>
    %c0_1 = arith.constant 0 : index
    %c0_2 = arith.constant 0 : index
    %2 = vector.load %arg3[%c0_1, %c0_2] : memref<48x32xf32, #tpu.memory_space<vmem>>, vector<48x32xf32>
    %3 = arith.truncf %2 : vector<48x32xf32> to vector<48x32xbf16>
    %cst = arith.constant dense<0.000000e+00> : vector<128x32xf32>
    %4 = tpu.matmul %1, %3, %cst {dimension_numbers = #tpu.dot_dimension_numbers<[1], [0], [0], [1], [0, 0, 1, 1], [], []>} : vector<128x48xbf16>, vector<48x32xbf16>, vector<128x32xf32> -> vector<128x32xf32>
    %c0_3 = arith.constant 0 : index
    %c0_4 = arith.constant 0 : index
    %5 = vector.load %arg4[%c0_3, %c0_4] : memref<1x32xf32, #tpu.memory_space<vmem>>, vector<1x32xf32>
    %6 = vector.broadcast %5 : vector<1x32xf32> to vector<128x32xf32>
    %7 = arith.addf %4, %6 : vector<128x32xf32>
    %c0_5 = arith.constant 0 : index
    %c0_6 = arith.constant 0 : index
    %8 = vector.load %arg5[%c0_5, %c0_6] : memref<128x32xf32, #tpu.memory_space<vmem>>, vector<128x32xf32>
    tpu.vector_store %arg5[%c0_5, %c0_6], %7 {strides = array<i32>} : memref<128x32xf32, #tpu.memory_space<vmem>>, vector<128x32xf32>,
    return
  }
  func.func @transform_0(%arg0: i32, %arg1: i32) -> (i32, i32) {
    %c0_i32 = arith.constant 0 : i32
    %c0_i32_0 = arith.constant 0 : i32
    return %arg0, %c0_i32 : i32, i32
  }
  func.func @transform_1(%arg0: i32, %arg1: i32) -> (i32, i32) {
    %c0_i32 = arith.constant 0 : i32
    %c0_i32_0 = arith.constant 0 : i32
    return %c0_i32, %arg1 : i32, i32
  }
  func.func @transform_2(%arg0: i32, %arg1: i32) -> (i32, i32) {
    %c0_i32 = arith.constant 0 : i32
    %c0_i32_0 = arith.constant 0 : i32
    return %c0_i32, %arg1 : i32, i32
  }
  func.func @transform_3(%arg0: i32, %arg1: i32) -> (i32, i32) {
    %c0_i32 = arith.constant 0 : i32
    return %arg0, %arg1 : i32, i32
  }
}

module attributes {stable_mosaic.version = 11 : i64} {
  func.func @_layernorm_kernel(%arg0: i32, %arg1: memref<128x32xf32, #tpu.memory_space<vmem>>, %arg2: memref<1x32xf32, #tpu.memory_space<vmem>>, %arg3: memref<1x32xf32, #tpu.memory_space<vmem>>, %arg4: memref<128x32xf32, #tpu.memory_space<vmem>>) attributes {dimension_semantics = [#tpu.dimension_semantics<parallel>], iteration_bounds = array<i64: 1>, scalar_prefetch = 0 : i64, scratch_operands = 0 : i64, tpu.core_type = #tpu.core_type<tc>, window_params = [{transform_indices = @transform_0, window_bounds = array<i64: 128, 32>}, {pipeline_mode = #tpu.pipeline_mode<synchronous>, transform_indices = @transform_1, window_bounds = array<i64: 1, 32>}, {pipeline_mode = #tpu.pipeline_mode<synchronous>, transform_indices = @transform_2, window_bounds = array<i64: 1, 32>}, {transform_indices = @transform_3, window_bounds = array<i64: 128, 32>}]} {
    %c0 = arith.constant 0 : index
    %c0_0 = arith.constant 0 : index
    %0 = vector.load %arg1[%c0, %c0_0] : memref<128x32xf32, #tpu.memory_space<vmem>>, vector<128x32xf32>
    %cst = arith.constant dense<0.000000e+00> : vector<128xf32>
    %1 = vector.multi_reduction <add>, %0, %cst [1] : vector<128x32xf32> to vector<128xf32>
    %2 = vector.shape_cast %1 : vector<128xf32> to vector<128x1xf32>
    %cst_1 = arith.constant 3.200000e+01 : f32
    %3 = vector.broadcast %cst_1 : f32 to vector<128x1xf32>
    %4 = arith.divf %2, %3 : vector<128x1xf32>
    %5 = vector.broadcast %4 : vector<128x1xf32> to vector<128x32xf32>
    %6 = arith.subf %0, %5 : vector<128x32xf32>
    %7 = arith.mulf %6, %6 : vector<128x32xf32>
    %cst_2 = arith.constant dense<0.000000e+00> : vector<128xf32>
    %8 = vector.multi_reduction <add>, %7, %cst_2 [1] : vector<128x32xf32> to vector<128xf32>
    %9 = vector.shape_cast %8 : vector<128xf32> to vector<128x1xf32>
    %cst_3 = arith.constant 3.200000e+01 : f32
    %10 = vector.broadcast %cst_3 : f32 to vector<128x1xf32>
    %11 = arith.divf %9, %10 : vector<128x1xf32>
    %12 = vector.broadcast %4 : vector<128x1xf32> to vector<128x32xf32>
    %13 = arith.subf %0, %12 : vector<128x32xf32>
    %cst_4 = arith.constant 9.99999974E-6 : f32
    %14 = vector.broadcast %cst_4 : f32 to vector<128x1xf32>
    %15 = arith.addf %11, %14 : vector<128x1xf32>
    %16 = math.rsqrt %15 : vector<128x1xf32>
    %17 = vector.broadcast %16 : vector<128x1xf32> to vector<128x32xf32>
    %18 = arith.mulf %13, %17 : vector<128x32xf32>
    %c0_5 = arith.constant 0 : index
    %c0_6 = arith.constant 0 : index
    %19 = vector.load %arg2[%c0_5, %c0_6] : memref<1x32xf32, #tpu.memory_space<vmem>>, vector<1x32xf32>
    %20 = vector.broadcast %19 : vector<1x32xf32> to vector<128x32xf32>
    %21 = arith.mulf %18, %20 : vector<128x32xf32>
    %c0_7 = arith.constant 0 : index
    %c0_8 = arith.constant 0 : index
    %22 = vector.load %arg3[%c0_7, %c0_8] : memref<1x32xf32, #tpu.memory_space<vmem>>, vector<1x32xf32>
    %23 = vector.broadcast %22 : vector<1x32xf32> to vector<128x32xf32>
    %24 = arith.addf %21, %23 : vector<128x32xf32>
    %c0_9 = arith.constant 0 : index
    %c0_10 = arith.constant 0 : index
    %25 = vector.load %arg4[%c0_9, %c0_10] : memref<128x32xf32, #tpu.memory_space<vmem>>, vector<128x32xf32>
    tpu.vector_store %arg4[%c0_9, %c0_10], %24 {strides = array<i32>} : memref<128x32xf32, #tpu.memory_space<vmem>>, vector<128x32xf32>,
    return
  }
  func.func @transform_0(%arg0: i32) -> (i32, i32) {
    %c0_i32 = arith.constant 0 : i32
    %c0_i32_0 = arith.constant 0 : i32
    return %arg0, %c0_i32 : i32, i32
  }
  func.func @transform_1(%arg0: i32) -> (i32, i32) {
    %c0_i32 = arith.constant 0 : i32
    %c0_i32_0 = arith.constant 0 : i32
    %c0_i32_1 = arith.constant 0 : i32
    return %c0_i32, %c0_i32_0 : i32, i32
  }
  func.func @transform_2(%arg0: i32) -> (i32, i32) {
    %c0_i32 = arith.constant 0 : i32
    %c0_i32_0 = arith.constant 0 : i32
    %c0_i32_1 = arith.constant 0 : i32
    return %c0_i32, %c0_i32_0 : i32, i32
  }
  func.func @transform_3(%arg0: i32) -> (i32, i32) {
    %c0_i32 = arith.constant 0 : i32
    %c0_i32_0 = arith.constant 0 : i32
    return %arg0, %c0_i32 : i32, i32
  }
}

module attributes {stable_mosaic.version = 11 : i64} {
  func.func @_ln_linear_kernel(%arg0: i32, %arg1: i32, %arg2: memref<128x32xf32, #tpu.memory_space<vmem>>, %arg3: memref<1x32xf32, #tpu.memory_space<vmem>>, %arg4: memref<1x32xf32, #tpu.memory_space<vmem>>, %arg5: memref<32x96xf32, #tpu.memory_space<vmem>>, %arg6: memref<1x96xf32, #tpu.memory_space<vmem>>, %arg7: memref<128x96xf32, #tpu.memory_space<vmem>>) attributes {dimension_semantics = [#tpu.dimension_semantics<parallel>, #tpu.dimension_semantics<parallel>], iteration_bounds = array<i64: 1, 1>, scalar_prefetch = 0 : i64, scratch_operands = 0 : i64, tpu.core_type = #tpu.core_type<tc>, window_params = [{transform_indices = @transform_0, window_bounds = array<i64: 128, 32>}, {pipeline_mode = #tpu.pipeline_mode<synchronous>, transform_indices = @transform_1, window_bounds = array<i64: 1, 32>}, {pipeline_mode = #tpu.pipeline_mode<synchronous>, transform_indices = @transform_2, window_bounds = array<i64: 1, 32>}, {transform_indices = @transform_3, window_bounds = array<i64: 32, 96>}, {transform_indices = @transform_4, window_bounds = array<i64: 1, 96>}, {transform_indices = @transform_5, window_bounds = array<i64: 128, 96>}]} {
    %c0 = arith.constant 0 : index
    %c0_0 = arith.constant 0 : index
    %0 = vector.load %arg2[%c0, %c0_0] : memref<128x32xf32, #tpu.memory_space<vmem>>, vector<128x32xf32>
    %cst = arith.constant dense<0.000000e+00> : vector<128xf32>
    %1 = vector.multi_reduction <add>, %0, %cst [1] : vector<128x32xf32> to vector<128xf32>
    %2 = vector.shape_cast %1 : vector<128xf32> to vector<128x1xf32>
    %cst_1 = arith.constant 3.200000e+01 : f32
    %3 = vector.broadcast %cst_1 : f32 to vector<128x1xf32>
    %4 = arith.divf %2, %3 : vector<128x1xf32>
    %5 = vector.broadcast %4 : vector<128x1xf32> to vector<128x32xf32>
    %6 = arith.subf %0, %5 : vector<128x32xf32>
    %7 = arith.mulf %6, %6 : vector<128x32xf32>
    %cst_2 = arith.constant dense<0.000000e+00> : vector<128xf32>
    %8 = vector.multi_reduction <add>, %7, %cst_2 [1] : vector<128x32xf32> to vector<128xf32>
    %9 = vector.shape_cast %8 : vector<128xf32> to vector<128x1xf32>
    %cst_3 = arith.constant 3.200000e+01 : f32
    %10 = vector.broadcast %cst_3 : f32 to vector<128x1xf32>
    %11 = arith.divf %9, %10 : vector<128x1xf32>
    %12 = vector.broadcast %4 : vector<128x1xf32> to vector<128x32xf32>
    %13 = arith.subf %0, %12 : vector<128x32xf32>
    %cst_4 = arith.constant 9.99999974E-6 : f32
    %14 = vector.broadcast %cst_4 : f32 to vector<128x1xf32>
    %15 = arith.addf %11, %14 : vector<128x1xf32>
    %16 = math.rsqrt %15 : vector<128x1xf32>
    %17 = vector.broadcast %16 : vector<128x1xf32> to vector<128x32xf32>
    %18 = arith.mulf %13, %17 : vector<128x32xf32>
    %c0_5 = arith.constant 0 : index
    %c0_6 = arith.constant 0 : index
    %19 = vector.load %arg3[%c0_5, %c0_6] : memref<1x32xf32, #tpu.memory_space<vmem>>, vector<1x32xf32>
    %20 = vector.broadcast %19 : vector<1x32xf32> to vector<128x32xf32>
    %21 = arith.mulf %18, %20 : vector<128x32xf32>
    %c0_7 = arith.constant 0 : index
    %c0_8 = arith.constant 0 : index
    %22 = vector.load %arg4[%c0_7, %c0_8] : memref<1x32xf32, #tpu.memory_space<vmem>>, vector<1x32xf32>
    %23 = vector.broadcast %22 : vector<1x32xf32> to vector<128x32xf32>
    %24 = arith.addf %21, %23 : vector<128x32xf32>
    %25 = arith.truncf %24 : vector<128x32xf32> to vector<128x32xbf16>
    %c0_9 = arith.constant 0 : index
    %c0_10 = arith.constant 0 : index
    %26 = vector.load %arg5[%c0_9, %c0_10] : memref<32x96xf32, #tpu.memory_space<vmem>>, vector<32x96xf32>
    %27 = arith.truncf %26 : vector<32x96xf32> to vector<32x96xbf16>
    %cst_11 = arith.constant dense<0.000000e+00> : vector<128x96xf32>
    %28 = tpu.matmul %25, %27, %cst_11 {dimension_numbers = #tpu.dot_dimension_numbers<[1], [0], [0], [1], [0, 0, 1, 1], [], []>} : vector<128x32xbf16>, vector<32x96xbf16>, vector<128x96xf32> -> vector<128x96xf32>
    %c0_12 = arith.constant 0 : index
    %c0_13 = arith.constant 0 : index
    %29 = vector.load %arg6[%c0_12, %c0_13] : memref<1x96xf32, #tpu.memory_space<vmem>>, vector<1x96xf32>
    %30 = vector.broadcast %29 : vector<1x96xf32> to vector<128x96xf32>
    %31 = arith.addf %28, %30 : vector<128x96xf32>
    %c0_14 = arith.constant 0 : index
    %c0_15 = arith.constant 0 : index
    %32 = vector.load %arg7[%c0_14, %c0_15] : memref<128x96xf32, #tpu.memory_space<vmem>>, vector<128x96xf32>
    tpu.vector_store %arg7[%c0_14, %c0_15], %31 {strides = array<i32>} : memref<128x96xf32, #tpu.memory_space<vmem>>, vector<128x96xf32>,
    return
  }
  func.func @transform_0(%arg0: i32, %arg1: i32) -> (i32, i32) {
    %c0_i32 = arith.constant 0 : i32
    %c0_i32_0 = arith.constant 0 : i32
    return %arg0, %c0_i32 : i32, i32
  }
  func.func @transform_1(%arg0: i32, %arg1: i32) -> (i32, i32) {
    %c0_i32 = arith.constant 0 : i32
    %c0_i32_0 = arith.constant 0 : i32
    %c0_i32_1 = arith.constant 0 : i32
    return %c0_i32, %c0_i32_0 : i32, i32
  }
  func.func @transform_2(%arg0: i32, %arg1: i32) -> (i32, i32) {
    %c0_i32 = arith.constant 0 : i32
    %c0_i32_0 = arith.constant 0 : i32
    %c0_i32_1 = arith.constant 0 : i32
    return %c0_i32, %c0_i32_0 : i32, i32
  }
  func.func @transform_3(%arg0: i32, %arg1: i32) -> (i32, i32) {
    %c0_i32 = arith.constant 0 : i32
    %c0_i32_0 = arith.constant 0 : i32
    return %c0_i32, %arg1 : i32, i32
  }
  func.func @transform_4(%arg0: i32, %arg1: i32) -> (i32, i32) {
    %c0_i32 = arith.constant 0 : i32
    %c0_i32_0 = arith.constant 0 : i32
    return %c0_i32, %arg1 : i32, i32
  }
  func.func @transform_5(%arg0: i32, %arg1: i32) -> (i32, i32) {
    %c0_i32 = arith.constant 0 : i32
    return %arg0, %arg1 : i32, i32
  }
}

module attributes {stable_mosaic.version = 11 : i64} {
  func.func @_linear_kernel(%arg0: i32, %arg1: i32, %arg2: memref<1024x2xf32, #tpu.memory_space<vmem>>, %arg3: memref<2x8xf32, #tpu.memory_space<vmem>>, %arg4: memref<1x8xf32, #tpu.memory_space<vmem>>, %arg5: memref<1024x8xf32, #tpu.memory_space<vmem>>) attributes {dimension_semantics = [#tpu.dimension_semantics<parallel>, #tpu.dimension_semantics<parallel>], iteration_bounds = array<i64: 1, 1>, scalar_prefetch = 0 : i64, scratch_operands = 0 : i64, tpu.core_type = #tpu.core_type<tc>, window_params = [{transform_indices = @transform_0, window_bounds = array<i64: 1024, 2>}, {transform_indices = @transform_1, window_bounds = array<i64: 2, 8>}, {transform_indices = @transform_2, window_bounds = array<i64: 1, 8>}, {transform_indices = @transform_3, window_bounds = array<i64: 1024, 8>}]} {
    %c0 = arith.constant 0 : index
    %c0_0 = arith.constant 0 : index
    %0 = vector.load %arg2[%c0, %c0_0] : memref<1024x2xf32, #tpu.memory_space<vmem>>, vector<1024x2xf32>
    %1 = arith.truncf %0 : vector<1024x2xf32> to vector<1024x2xbf16>
    %c0_1 = arith.constant 0 : index
    %c0_2 = arith.constant 0 : index
    %2 = vector.load %arg3[%c0_1, %c0_2] : memref<2x8xf32, #tpu.memory_space<vmem>>, vector<2x8xf32>
    %3 = arith.truncf %2 : vector<2x8xf32> to vector<2x8xbf16>
    %cst = arith.constant dense<0.000000e+00> : vector<1024x8xf32>
    %4 = tpu.matmul %1, %3, %cst {dimension_numbers = #tpu.dot_dimension_numbers<[1], [0], [0], [1], [0, 0, 1, 1], [], []>} : vector<1024x2xbf16>, vector<2x8xbf16>, vector<1024x8xf32> -> vector<1024x8xf32>
    %c0_3 = arith.constant 0 : index
    %c0_4 = arith.constant 0 : index
    %5 = vector.load %arg4[%c0_3, %c0_4] : memref<1x8xf32, #tpu.memory_space<vmem>>, vector<1x8xf32>
    %6 = vector.broadcast %5 : vector<1x8xf32> to vector<1024x8xf32>
    %7 = arith.addf %4, %6 : vector<1024x8xf32>
    %cst_5 = arith.constant 0.000000e+00 : f32
    %8 = vector.broadcast %cst_5 : f32 to vector<1024x8xf32>
    %9 = arith.maximumf %7, %8 : vector<1024x8xf32>
    %c0_6 = arith.constant 0 : index
    %c0_7 = arith.constant 0 : index
    %10 = vector.load %arg5[%c0_6, %c0_7] : memref<1024x8xf32, #tpu.memory_space<vmem>>, vector<1024x8xf32>
    tpu.vector_store %arg5[%c0_6, %c0_7], %9 {strides = array<i32>} : memref<1024x8xf32, #tpu.memory_space<vmem>>, vector<1024x8xf32>,
    return
  }
  func.func @transform_0(%arg0: i32, %arg1: i32) -> (i32, i32) {
    %c0_i32 = arith.constant 0 : i32
    %c0_i32_0 = arith.constant 0 : i32
    return %arg0, %c0_i32 : i32, i32
  }
  func.func @transform_1(%arg0: i32, %arg1: i32) -> (i32, i32) {
    %c0_i32 = arith.constant 0 : i32
    %c0_i32_0 = arith.constant 0 : i32
    return %c0_i32, %arg1 : i32, i32
  }
  func.func @transform_2(%arg0: i32, %arg1: i32) -> (i32, i32) {
    %c0_i32 = arith.constant 0 : i32
    %c0_i32_0 = arith.constant 0 : i32
    return %c0_i32, %arg1 : i32, i32
  }
  func.func @transform_3(%arg0: i32, %arg1: i32) -> (i32, i32) {
    %c0_i32 = arith.constant 0 : i32
    return %arg0, %arg1 : i32, i32
  }
}

module attributes {stable_mosaic.version = 11 : i64} {
  func.func @_linear_kernel(%arg0: i32, %arg1: i32, %arg2: memref<1024x8xf32, #tpu.memory_space<vmem>>, %arg3: memref<8x2xf32, #tpu.memory_space<vmem>>, %arg4: memref<1x2xf32, #tpu.memory_space<vmem>>, %arg5: memref<1024x2xf32, #tpu.memory_space<vmem>>) attributes {dimension_semantics = [#tpu.dimension_semantics<parallel>, #tpu.dimension_semantics<parallel>], iteration_bounds = array<i64: 1, 1>, scalar_prefetch = 0 : i64, scratch_operands = 0 : i64, tpu.core_type = #tpu.core_type<tc>, window_params = [{transform_indices = @transform_0, window_bounds = array<i64: 1024, 8>}, {transform_indices = @transform_1, window_bounds = array<i64: 8, 2>}, {transform_indices = @transform_2, window_bounds = array<i64: 1, 2>}, {transform_indices = @transform_3, window_bounds = array<i64: 1024, 2>}]} {
    %c0 = arith.constant 0 : index
    %c0_0 = arith.constant 0 : index
    %0 = vector.load %arg2[%c0, %c0_0] : memref<1024x8xf32, #tpu.memory_space<vmem>>, vector<1024x8xf32>
    %1 = arith.truncf %0 : vector<1024x8xf32> to vector<1024x8xbf16>
    %c0_1 = arith.constant 0 : index
    %c0_2 = arith.constant 0 : index
    %2 = vector.load %arg3[%c0_1, %c0_2] : memref<8x2xf32, #tpu.memory_space<vmem>>, vector<8x2xf32>
    %3 = arith.truncf %2 : vector<8x2xf32> to vector<8x2xbf16>
    %cst = arith.constant dense<0.000000e+00> : vector<1024x2xf32>
    %4 = tpu.matmul %1, %3, %cst {dimension_numbers = #tpu.dot_dimension_numbers<[1], [0], [0], [1], [0, 0, 1, 1], [], []>} : vector<1024x8xbf16>, vector<8x2xbf16>, vector<1024x2xf32> -> vector<1024x2xf32>
    %c0_3 = arith.constant 0 : index
    %c0_4 = arith.constant 0 : index
    %5 = vector.load %arg4[%c0_3, %c0_4] : memref<1x2xf32, #tpu.memory_space<vmem>>, vector<1x2xf32>
    %6 = vector.broadcast %5 : vector<1x2xf32> to vector<1024x2xf32>
    %7 = arith.addf %4, %6 : vector<1024x2xf32>
    %c0_5 = arith.constant 0 : index
    %c0_6 = arith.constant 0 : index
    %8 = vector.load %arg5[%c0_5, %c0_6] : memref<1024x2xf32, #tpu.memory_space<vmem>>, vector<1024x2xf32>
    tpu.vector_store %arg5[%c0_5, %c0_6], %7 {strides = array<i32>} : memref<1024x2xf32, #tpu.memory_space<vmem>>, vector<1024x2xf32>,
    return
  }
  func.func @transform_0(%arg0: i32, %arg1: i32) -> (i32, i32) {
    %c0_i32 = arith.constant 0 : i32
    %c0_i32_0 = arith.constant 0 : i32
    return %arg0, %c0_i32 : i32, i32
  }
  func.func @transform_1(%arg0: i32, %arg1: i32) -> (i32, i32) {
    %c0_i32 = arith.constant 0 : i32
    %c0_i32_0 = arith.constant 0 : i32
    return %c0_i32, %arg1 : i32, i32
  }
  func.func @transform_2(%arg0: i32, %arg1: i32) -> (i32, i32) {
    %c0_i32 = arith.constant 0 : i32
    %c0_i32_0 = arith.constant 0 : i32
    return %c0_i32, %arg1 : i32, i32
  }
  func.func @transform_3(%arg0: i32, %arg1: i32) -> (i32, i32) {
    %c0_i32 = arith.constant 0 : i32
    return %arg0, %arg1 : i32, i32
  }
}

module attributes {stable_mosaic.version = 11 : i64} {
  func.func @_attn_kernel(%arg0: i32, %arg1: memref<4x16x96xf32, #tpu.memory_space<vmem>>, %arg2: memref<4x2x16x16xf32, #tpu.memory_space<vmem>>, %arg3: memref<4x16x32xf32, #tpu.memory_space<vmem>>) attributes {dimension_semantics = [#tpu.dimension_semantics<parallel>], iteration_bounds = array<i64: 2>, scalar_prefetch = 0 : i64, scratch_operands = 0 : i64, tpu.core_type = #tpu.core_type<tc>, window_params = [{transform_indices = @transform_0, window_bounds = array<i64: 4, 16, 96>}, {transform_indices = @transform_1, window_bounds = array<i64: 4, 2, 16, 16>}, {transform_indices = @transform_2, window_bounds = array<i64: 4, 16, 32>}]} {
    %c0 = arith.constant 0 : index
    %c0_0 = arith.constant 0 : index
    %c0_1 = arith.constant 0 : index
    %0 = vector.load %arg1[%c0, %c0_0, %c0_1] : memref<4x16x96xf32, #tpu.memory_space<vmem>>, vector<4x16x96xf32>
    %c0_2 = arith.constant 0 : index
    %c0_3 = arith.constant 0 : index
    %c0_4 = arith.constant 0 : index
    %c0_5 = arith.constant 0 : index
    %1 = vector.load %arg2[%c0_2, %c0_3, %c0_4, %c0_5] : memref<4x2x16x16xf32, #tpu.memory_space<vmem>>, vector<4x2x16x16xf32>
    %2 = vector.extract_strided_slice %0 {offsets = [0, 0, 0], sizes = [4, 16, 16], strides = [1, 1, 1]} : vector<4x16x96xf32> to vector<4x16x16xf32>
    %3 = arith.truncf %2 : vector<4x16x16xf32> to vector<4x16x16xbf16>
    %4 = vector.extract_strided_slice %0 {offsets = [0, 0, 32], sizes = [4, 16, 16], strides = [1, 1, 1]} : vector<4x16x96xf32> to vector<4x16x16xf32>
    %5 = arith.truncf %4 : vector<4x16x16xf32> to vector<4x16x16xbf16>
    %6 = vector.extract_strided_slice %0 {offsets = [0, 0, 64], sizes = [4, 16, 16], strides = [1, 1, 1]} : vector<4x16x96xf32> to vector<4x16x16xf32>
    %7 = arith.truncf %6 : vector<4x16x16xf32> to vector<4x16x16xbf16>
    "tpu.trace_start"() <{level = 10 : i32, message = "wqd,wkd->wqk"}> : () -> ()
    %cst = arith.constant dense<0.000000e+00> : vector<4x16x16xf32>
    %8 = tpu.matmul %3, %5, %cst {dimension_numbers = #tpu.dot_dimension_numbers<[2], [2], [1], [1], [0, 0, 0, 1, 1, 1], [0], [0]>} : vector<4x16x16xbf16>, vector<4x16x16xbf16>, vector<4x16x16xf32> -> vector<4x16x16xf32>
    "tpu.trace_stop"() : () -> ()
    %cst_6 = arith.constant 2.500000e-01 : f32
    %9 = vector.broadcast %cst_6 : f32 to vector<4x16x16xf32>
    %10 = arith.mulf %8, %9 : vector<4x16x16xf32>
    %11 = vector.extract_strided_slice %1 {offsets = [0, 0, 0, 0], sizes = [4, 1, 16, 16], strides = [1, 1, 1, 1]} : vector<4x2x16x16xf32> to vector<4x1x16x16xf32>
    %12 = vector.shape_cast %11 : vector<4x1x16x16xf32> to vector<4x16x16xf32>
    %13 = arith.addf %10, %12 : vector<4x16x16xf32>
    %cst_7 = arith.constant dense<0xFF800000> : vector<4x16xf32>
    %14 = vector.multi_reduction <maximumf>, %13, %cst_7 [2] : vector<4x16x16xf32> to vector<4x16xf32>
    %15 = vector.shape_cast %14 : vector<4x16xf32> to vector<4x16x1xf32>
    %16 = vector.broadcast %15 : vector<4x16x1xf32> to vector<4x16x16xf32>
    %17 = arith.subf %13, %16 : vector<4x16x16xf32>
    %18 = math.exp %17 : vector<4x16x16xf32>
    %cst_8 = arith.constant dense<0.000000e+00> : vector<4x16xf32>
    %19 = vector.multi_reduction <add>, %18, %cst_8 [2] : vector<4x16x16xf32> to vector<4x16xf32>
    %20 = vector.shape_cast %19 : vector<4x16xf32> to vector<4x16x1xf32>
    %21 = tpu.reciprocal %20 {approx = true} : vector<4x16x1xf32> -> vector<4x16x1xf32>
    %22 = vector.broadcast %21 : vector<4x16x1xf32> to vector<4x16x16xf32>
    %23 = arith.mulf %18, %22 : vector<4x16x16xf32>
    %24 = arith.truncf %23 : vector<4x16x16xf32> to vector<4x16x16xbf16>
    "tpu.trace_start"() <{level = 10 : i32, message = "wqk,wkd->wqd"}> : () -> ()
    %cst_9 = arith.constant dense<0.000000e+00> : vector<4x16x16xf32>
    %25 = tpu.matmul %24, %7, %cst_9 {dimension_numbers = #tpu.dot_dimension_numbers<[2], [1], [1], [2], [0, 0, 0, 1, 1, 2], [0], [0]>} : vector<4x16x16xbf16>, vector<4x16x16xbf16>, vector<4x16x16xf32> -> vector<4x16x16xf32>
    "tpu.trace_stop"() : () -> ()
    %26 = vector.extract_strided_slice %0 {offsets = [0, 0, 16], sizes = [4, 16, 16], strides = [1, 1, 1]} : vector<4x16x96xf32> to vector<4x16x16xf32>
    %27 = arith.truncf %26 : vector<4x16x16xf32> to vector<4x16x16xbf16>
    %28 = vector.extract_strided_slice %0 {offsets = [0, 0, 48], sizes = [4, 16, 16], strides = [1, 1, 1]} : vector<4x16x96xf32> to vector<4x16x16xf32>
    %29 = arith.truncf %28 : vector<4x16x16xf32> to vector<4x16x16xbf16>
    %30 = vector.extract_strided_slice %0 {offsets = [0, 0, 80], sizes = [4, 16, 16], strides = [1, 1, 1]} : vector<4x16x96xf32> to vector<4x16x16xf32>
    %31 = arith.truncf %30 : vector<4x16x16xf32> to vector<4x16x16xbf16>
    "tpu.trace_start"() <{level = 10 : i32, message = "wqd,wkd->wqk"}> : () -> ()
    %cst_10 = arith.constant dense<0.000000e+00> : vector<4x16x16xf32>
    %32 = tpu.matmul %27, %29, %cst_10 {dimension_numbers = #tpu.dot_dimension_numbers<[2], [2], [1], [1], [0, 0, 0, 1, 1, 1], [0], [0]>} : vector<4x16x16xbf16>, vector<4x16x16xbf16>, vector<4x16x16xf32> -> vector<4x16x16xf32>
    "tpu.trace_stop"() : () -> ()
    %cst_11 = arith.constant 2.500000e-01 : f32
    %33 = vector.broadcast %cst_11 : f32 to vector<4x16x16xf32>
    %34 = arith.mulf %32, %33 : vector<4x16x16xf32>
    %35 = vector.extract_strided_slice %1 {offsets = [0, 1, 0, 0], sizes = [4, 1, 16, 16], strides = [1, 1, 1, 1]} : vector<4x2x16x16xf32> to vector<4x1x16x16xf32>
    %36 = vector.shape_cast %35 : vector<4x1x16x16xf32> to vector<4x16x16xf32>
    %37 = arith.addf %34, %36 : vector<4x16x16xf32>
    %cst_12 = arith.constant dense<0xFF800000> : vector<4x16xf32>
    %38 = vector.multi_reduction <maximumf>, %37, %cst_12 [2] : vector<4x16x16xf32> to vector<4x16xf32>
    %39 = vector.shape_cast %38 : vector<4x16xf32> to vector<4x16x1xf32>
    %40 = vector.broadcast %39 : vector<4x16x1xf32> to vector<4x16x16xf32>
    %41 = arith.subf %37, %40 : vector<4x16x16xf32>
    %42 = math.exp %41 : vector<4x16x16xf32>
    %cst_13 = arith.constant dense<0.000000e+00> : vector<4x16xf32>
    %43 = vector.multi_reduction <add>, %42, %cst_13 [2] : vector<4x16x16xf32> to vector<4x16xf32>
    %44 = vector.shape_cast %43 : vector<4x16xf32> to vector<4x16x1xf32>
    %45 = tpu.reciprocal %44 {approx = true} : vector<4x16x1xf32> -> vector<4x16x1xf32>
    %46 = vector.broadcast %45 : vector<4x16x1xf32> to vector<4x16x16xf32>
    %47 = arith.mulf %42, %46 : vector<4x16x16xf32>
    %48 = arith.truncf %47 : vector<4x16x16xf32> to vector<4x16x16xbf16>
    "tpu.trace_start"() <{level = 10 : i32, message = "wqk,wkd->wqd"}> : () -> ()
    %cst_14 = arith.constant dense<0.000000e+00> : vector<4x16x16xf32>
    %49 = tpu.matmul %48, %31, %cst_14 {dimension_numbers = #tpu.dot_dimension_numbers<[2], [1], [1], [2], [0, 0, 0, 1, 1, 2], [0], [0]>} : vector<4x16x16xbf16>, vector<4x16x16xbf16>, vector<4x16x16xf32> -> vector<4x16x16xf32>
    "tpu.trace_stop"() : () -> ()
    %50 = tpu.concatenate %25, %49 in 2 : vector<4x16x16xf32>, vector<4x16x16xf32> -> vector<4x16x32xf32>
    %c0_15 = arith.constant 0 : index
    %c0_16 = arith.constant 0 : index
    %c0_17 = arith.constant 0 : index
    %51 = vector.load %arg3[%c0_15, %c0_16, %c0_17] : memref<4x16x32xf32, #tpu.memory_space<vmem>>, vector<4x16x32xf32>
    tpu.vector_store %arg3[%c0_15, %c0_16, %c0_17], %50 {strides = array<i32>} : memref<4x16x32xf32, #tpu.memory_space<vmem>>, vector<4x16x32xf32>,
    return
  }
  func.func @transform_0(%arg0: i32) -> (i32, i32, i32) {
    %c0_i32 = arith.constant 0 : i32
    %c0_i32_0 = arith.constant 0 : i32
    %c0_i32_1 = arith.constant 0 : i32
    return %arg0, %c0_i32, %c0_i32_0 : i32, i32, i32
  }
  func.func @transform_1(%arg0: i32) -> (i32, i32, i32, i32) {
    %c1_i32 = arith.constant 1 : i32
    %c0_i32 = arith.constant 0 : i32
    %0 = arith.cmpi eq, %c1_i32, %c0_i32 : i32
    %c1_i32_0 = arith.constant 1 : i32
    %1 = arith.select %0, %c1_i32_0, %c1_i32 : i32
    %2 = arith.remsi %arg0, %1 : i32
    %c0_i32_1 = arith.constant 0 : i32
    %3 = arith.cmpi ne, %2, %c0_i32_1 : i32
    %c0_i32_2 = arith.constant 0 : i32
    %4 = arith.cmpi slt, %2, %c0_i32_2 : i32
    %c0_i32_3 = arith.constant 0 : i32
    %5 = arith.cmpi slt, %1, %c0_i32_3 : i32
    %6 = arith.xori %4, %5 : i1
    %7 = arith.andi %6, %3 : i1
    %8 = arith.addi %2, %1 : i32
    %9 = arith.select %7, %8, %2 : i32
    %c0_i32_4 = arith.constant 0 : i32
    %c0_i32_5 = arith.constant 0 : i32
    %c0_i32_6 = arith.constant 0 : i32
    %c0_i32_7 = arith.constant 0 : i32
    return %9, %c0_i32_4, %c0_i32_5, %c0_i32_6 : i32, i32, i32, i32
  }
  func.func @transform_2(%arg0: i32) -> (i32, i32, i32) {
    %c0_i32 = arith.constant 0 : i32
    %c0_i32_0 = arith.constant 0 : i32
    %c0_i32_1 = arith.constant 0 : i32
    return %arg0, %c0_i32, %c0_i32_0 : i32, i32, i32
  }
}

module attributes {stable_mosaic.version = 11 : i64} {
  func.func @_linear_kernel(%arg0: i32, %arg1: i32, %arg2: memref<128x32xf32, #tpu.memory_space<vmem>>, %arg3: memref<32x32xf32, #tpu.memory_space<vmem>>, %arg4: memref<1x32xf32, #tpu.memory_space<vmem>>, %arg5: memref<128x32xf32, #tpu.memory_space<vmem>>) attributes {dimension_semantics = [#tpu.dimension_semantics<parallel>, #tpu.dimension_semantics<parallel>], iteration_bounds = array<i64: 1, 1>, scalar_prefetch = 0 : i64, scratch_operands = 0 : i64, tpu.core_type = #tpu.core_type<tc>, window_params = [{transform_indices = @transform_0, window_bounds = array<i64: 128, 32>}, {transform_indices = @transform_1, window_bounds = array<i64: 32, 32>}, {transform_indices = @transform_2, window_bounds = array<i64: 1, 32>}, {transform_indices = @transform_3, window_bounds = array<i64: 128, 32>}]} {
    %c0 = arith.constant 0 : index
    %c0_0 = arith.constant 0 : index
    %0 = vector.load %arg2[%c0, %c0_0] : memref<128x32xf32, #tpu.memory_space<vmem>>, vector<128x32xf32>
    %1 = arith.truncf %0 : vector<128x32xf32> to vector<128x32xbf16>
    %c0_1 = arith.constant 0 : index
    %c0_2 = arith.constant 0 : index
    %2 = vector.load %arg3[%c0_1, %c0_2] : memref<32x32xf32, #tpu.memory_space<vmem>>, vector<32x32xf32>
    %3 = arith.truncf %2 : vector<32x32xf32> to vector<32x32xbf16>
    %cst = arith.constant dense<0.000000e+00> : vector<128x32xf32>
    %4 = tpu.matmul %1, %3, %cst {dimension_numbers = #tpu.dot_dimension_numbers<[1], [0], [0], [1], [0, 0, 1, 1], [], []>} : vector<128x32xbf16>, vector<32x32xbf16>, vector<128x32xf32> -> vector<128x32xf32>
    %c0_3 = arith.constant 0 : index
    %c0_4 = arith.constant 0 : index
    %5 = vector.load %arg4[%c0_3, %c0_4] : memref<1x32xf32, #tpu.memory_space<vmem>>, vector<1x32xf32>
    %6 = vector.broadcast %5 : vector<1x32xf32> to vector<128x32xf32>
    %7 = arith.addf %4, %6 : vector<128x32xf32>
    %c0_5 = arith.constant 0 : index
    %c0_6 = arith.constant 0 : index
    %8 = vector.load %arg5[%c0_5, %c0_6] : memref<128x32xf32, #tpu.memory_space<vmem>>, vector<128x32xf32>
    tpu.vector_store %arg5[%c0_5, %c0_6], %7 {strides = array<i32>} : memref<128x32xf32, #tpu.memory_space<vmem>>, vector<128x32xf32>,
    return
  }
  func.func @transform_0(%arg0: i32, %arg1: i32) -> (i32, i32) {
    %c0_i32 = arith.constant 0 : i32
    %c0_i32_0 = arith.constant 0 : i32
    return %arg0, %c0_i32 : i32, i32
  }
  func.func @transform_1(%arg0: i32, %arg1: i32) -> (i32, i32) {
    %c0_i32 = arith.constant 0 : i32
    %c0_i32_0 = arith.constant 0 : i32
    return %c0_i32, %arg1 : i32, i32
  }
  func.func @transform_2(%arg0: i32, %arg1: i32) -> (i32, i32) {
    %c0_i32 = arith.constant 0 : i32
    %c0_i32_0 = arith.constant 0 : i32
    return %c0_i32, %arg1 : i32, i32
  }
  func.func @transform_3(%arg0: i32, %arg1: i32) -> (i32, i32) {
    %c0_i32 = arith.constant 0 : i32
    return %arg0, %arg1 : i32, i32
  }
}

module attributes {stable_mosaic.version = 11 : i64} {
  func.func @_ln_linear_kernel(%arg0: i32, %arg1: i32, %arg2: memref<128x32xf32, #tpu.memory_space<vmem>>, %arg3: memref<1x32xf32, #tpu.memory_space<vmem>>, %arg4: memref<1x32xf32, #tpu.memory_space<vmem>>, %arg5: memref<32x64xf32, #tpu.memory_space<vmem>>, %arg6: memref<1x64xf32, #tpu.memory_space<vmem>>, %arg7: memref<128x64xf32, #tpu.memory_space<vmem>>) attributes {dimension_semantics = [#tpu.dimension_semantics<parallel>, #tpu.dimension_semantics<parallel>], iteration_bounds = array<i64: 1, 1>, scalar_prefetch = 0 : i64, scratch_operands = 0 : i64, tpu.core_type = #tpu.core_type<tc>, window_params = [{transform_indices = @transform_0, window_bounds = array<i64: 128, 32>}, {pipeline_mode = #tpu.pipeline_mode<synchronous>, transform_indices = @transform_1, window_bounds = array<i64: 1, 32>}, {pipeline_mode = #tpu.pipeline_mode<synchronous>, transform_indices = @transform_2, window_bounds = array<i64: 1, 32>}, {transform_indices = @transform_3, window_bounds = array<i64: 32, 64>}, {transform_indices = @transform_4, window_bounds = array<i64: 1, 64>}, {transform_indices = @transform_5, window_bounds = array<i64: 128, 64>}]} {
    %c0 = arith.constant 0 : index
    %c0_0 = arith.constant 0 : index
    %0 = vector.load %arg2[%c0, %c0_0] : memref<128x32xf32, #tpu.memory_space<vmem>>, vector<128x32xf32>
    %cst = arith.constant dense<0.000000e+00> : vector<128xf32>
    %1 = vector.multi_reduction <add>, %0, %cst [1] : vector<128x32xf32> to vector<128xf32>
    %2 = vector.shape_cast %1 : vector<128xf32> to vector<128x1xf32>
    %cst_1 = arith.constant 3.200000e+01 : f32
    %3 = vector.broadcast %cst_1 : f32 to vector<128x1xf32>
    %4 = arith.divf %2, %3 : vector<128x1xf32>
    %5 = vector.broadcast %4 : vector<128x1xf32> to vector<128x32xf32>
    %6 = arith.subf %0, %5 : vector<128x32xf32>
    %7 = arith.mulf %6, %6 : vector<128x32xf32>
    %cst_2 = arith.constant dense<0.000000e+00> : vector<128xf32>
    %8 = vector.multi_reduction <add>, %7, %cst_2 [1] : vector<128x32xf32> to vector<128xf32>
    %9 = vector.shape_cast %8 : vector<128xf32> to vector<128x1xf32>
    %cst_3 = arith.constant 3.200000e+01 : f32
    %10 = vector.broadcast %cst_3 : f32 to vector<128x1xf32>
    %11 = arith.divf %9, %10 : vector<128x1xf32>
    %12 = vector.broadcast %4 : vector<128x1xf32> to vector<128x32xf32>
    %13 = arith.subf %0, %12 : vector<128x32xf32>
    %cst_4 = arith.constant 9.99999974E-6 : f32
    %14 = vector.broadcast %cst_4 : f32 to vector<128x1xf32>
    %15 = arith.addf %11, %14 : vector<128x1xf32>
    %16 = math.rsqrt %15 : vector<128x1xf32>
    %17 = vector.broadcast %16 : vector<128x1xf32> to vector<128x32xf32>
    %18 = arith.mulf %13, %17 : vector<128x32xf32>
    %c0_5 = arith.constant 0 : index
    %c0_6 = arith.constant 0 : index
    %19 = vector.load %arg3[%c0_5, %c0_6] : memref<1x32xf32, #tpu.memory_space<vmem>>, vector<1x32xf32>
    %20 = vector.broadcast %19 : vector<1x32xf32> to vector<128x32xf32>
    %21 = arith.mulf %18, %20 : vector<128x32xf32>
    %c0_7 = arith.constant 0 : index
    %c0_8 = arith.constant 0 : index
    %22 = vector.load %arg4[%c0_7, %c0_8] : memref<1x32xf32, #tpu.memory_space<vmem>>, vector<1x32xf32>
    %23 = vector.broadcast %22 : vector<1x32xf32> to vector<128x32xf32>
    %24 = arith.addf %21, %23 : vector<128x32xf32>
    %25 = arith.truncf %24 : vector<128x32xf32> to vector<128x32xbf16>
    %c0_9 = arith.constant 0 : index
    %c0_10 = arith.constant 0 : index
    %26 = vector.load %arg5[%c0_9, %c0_10] : memref<32x64xf32, #tpu.memory_space<vmem>>, vector<32x64xf32>
    %27 = arith.truncf %26 : vector<32x64xf32> to vector<32x64xbf16>
    %cst_11 = arith.constant dense<0.000000e+00> : vector<128x64xf32>
    %28 = tpu.matmul %25, %27, %cst_11 {dimension_numbers = #tpu.dot_dimension_numbers<[1], [0], [0], [1], [0, 0, 1, 1], [], []>} : vector<128x32xbf16>, vector<32x64xbf16>, vector<128x64xf32> -> vector<128x64xf32>
    %c0_12 = arith.constant 0 : index
    %c0_13 = arith.constant 0 : index
    %29 = vector.load %arg6[%c0_12, %c0_13] : memref<1x64xf32, #tpu.memory_space<vmem>>, vector<1x64xf32>
    %30 = vector.broadcast %29 : vector<1x64xf32> to vector<128x64xf32>
    %31 = arith.addf %28, %30 : vector<128x64xf32>
    %cst_14 = arith.constant 5.000000e-01 : f32
    %32 = vector.broadcast %cst_14 : f32 to vector<128x64xf32>
    %33 = arith.mulf %32, %31 : vector<128x64xf32>
    %cst_15 = arith.constant 4.471500e-02 : f32
    %34 = vector.broadcast %cst_15 : f32 to vector<128x64xf32>
    %35 = arith.mulf %34, %31 : vector<128x64xf32>
    %36 = arith.mulf %35, %31 : vector<128x64xf32>
    %37 = arith.mulf %36, %31 : vector<128x64xf32>
    %38 = arith.addf %31, %37 : vector<128x64xf32>
    %cst_16 = arith.constant 0.797884583 : f32
    %39 = vector.broadcast %cst_16 : f32 to vector<128x64xf32>
    %40 = arith.mulf %39, %38 : vector<128x64xf32>
    %41 = math.tanh %40 : vector<128x64xf32>
    %cst_17 = arith.constant 1.000000e+00 : f32
    %42 = vector.broadcast %cst_17 : f32 to vector<128x64xf32>
    %43 = arith.addf %42, %41 : vector<128x64xf32>
    %44 = arith.mulf %33, %43 : vector<128x64xf32>
    %c0_18 = arith.constant 0 : index
    %c0_19 = arith.constant 0 : index
    %45 = vector.load %arg7[%c0_18, %c0_19] : memref<128x64xf32, #tpu.memory_space<vmem>>, vector<128x64xf32>
    tpu.vector_store %arg7[%c0_18, %c0_19], %44 {strides = array<i32>} : memref<128x64xf32, #tpu.memory_space<vmem>>, vector<128x64xf32>,
    return
  }
  func.func @transform_0(%arg0: i32, %arg1: i32) -> (i32, i32) {
    %c0_i32 = arith.constant 0 : i32
    %c0_i32_0 = arith.constant 0 : i32
    return %arg0, %c0_i32 : i32, i32
  }
  func.func @transform_1(%arg0: i32, %arg1: i32) -> (i32, i32) {
    %c0_i32 = arith.constant 0 : i32
    %c0_i32_0 = arith.constant 0 : i32
    %c0_i32_1 = arith.constant 0 : i32
    return %c0_i32, %c0_i32_0 : i32, i32
  }
  func.func @transform_2(%arg0: i32, %arg1: i32) -> (i32, i32) {
    %c0_i32 = arith.constant 0 : i32
    %c0_i32_0 = arith.constant 0 : i32
    %c0_i32_1 = arith.constant 0 : i32
    return %c0_i32, %c0_i32_0 : i32, i32
  }
  func.func @transform_3(%arg0: i32, %arg1: i32) -> (i32, i32) {
    %c0_i32 = arith.constant 0 : i32
    %c0_i32_0 = arith.constant 0 : i32
    return %c0_i32, %arg1 : i32, i32
  }
  func.func @transform_4(%arg0: i32, %arg1: i32) -> (i32, i32) {
    %c0_i32 = arith.constant 0 : i32
    %c0_i32_0 = arith.constant 0 : i32
    return %c0_i32, %arg1 : i32, i32
  }
  func.func @transform_5(%arg0: i32, %arg1: i32) -> (i32, i32) {
    %c0_i32 = arith.constant 0 : i32
    return %arg0, %arg1 : i32, i32
  }
}

module attributes {stable_mosaic.version = 11 : i64} {
  func.func @_linear_kernel(%arg0: i32, %arg1: i32, %arg2: memref<128x64xf32, #tpu.memory_space<vmem>>, %arg3: memref<64x32xf32, #tpu.memory_space<vmem>>, %arg4: memref<1x32xf32, #tpu.memory_space<vmem>>, %arg5: memref<128x32xf32, #tpu.memory_space<vmem>>) attributes {dimension_semantics = [#tpu.dimension_semantics<parallel>, #tpu.dimension_semantics<parallel>], iteration_bounds = array<i64: 1, 1>, scalar_prefetch = 0 : i64, scratch_operands = 0 : i64, tpu.core_type = #tpu.core_type<tc>, window_params = [{transform_indices = @transform_0, window_bounds = array<i64: 128, 64>}, {transform_indices = @transform_1, window_bounds = array<i64: 64, 32>}, {transform_indices = @transform_2, window_bounds = array<i64: 1, 32>}, {transform_indices = @transform_3, window_bounds = array<i64: 128, 32>}]} {
    %c0 = arith.constant 0 : index
    %c0_0 = arith.constant 0 : index
    %0 = vector.load %arg2[%c0, %c0_0] : memref<128x64xf32, #tpu.memory_space<vmem>>, vector<128x64xf32>
    %1 = arith.truncf %0 : vector<128x64xf32> to vector<128x64xbf16>
    %c0_1 = arith.constant 0 : index
    %c0_2 = arith.constant 0 : index
    %2 = vector.load %arg3[%c0_1, %c0_2] : memref<64x32xf32, #tpu.memory_space<vmem>>, vector<64x32xf32>
    %3 = arith.truncf %2 : vector<64x32xf32> to vector<64x32xbf16>
    %cst = arith.constant dense<0.000000e+00> : vector<128x32xf32>
    %4 = tpu.matmul %1, %3, %cst {dimension_numbers = #tpu.dot_dimension_numbers<[1], [0], [0], [1], [0, 0, 1, 1], [], []>} : vector<128x64xbf16>, vector<64x32xbf16>, vector<128x32xf32> -> vector<128x32xf32>
    %c0_3 = arith.constant 0 : index
    %c0_4 = arith.constant 0 : index
    %5 = vector.load %arg4[%c0_3, %c0_4] : memref<1x32xf32, #tpu.memory_space<vmem>>, vector<1x32xf32>
    %6 = vector.broadcast %5 : vector<1x32xf32> to vector<128x32xf32>
    %7 = arith.addf %4, %6 : vector<128x32xf32>
    %c0_5 = arith.constant 0 : index
    %c0_6 = arith.constant 0 : index
    %8 = vector.load %arg5[%c0_5, %c0_6] : memref<128x32xf32, #tpu.memory_space<vmem>>, vector<128x32xf32>
    tpu.vector_store %arg5[%c0_5, %c0_6], %7 {strides = array<i32>} : memref<128x32xf32, #tpu.memory_space<vmem>>, vector<128x32xf32>,
    return
  }
  func.func @transform_0(%arg0: i32, %arg1: i32) -> (i32, i32) {
    %c0_i32 = arith.constant 0 : i32
    %c0_i32_0 = arith.constant 0 : i32
    return %arg0, %c0_i32 : i32, i32
  }
  func.func @transform_1(%arg0: i32, %arg1: i32) -> (i32, i32) {
    %c0_i32 = arith.constant 0 : i32
    %c0_i32_0 = arith.constant 0 : i32
    return %c0_i32, %arg1 : i32, i32
  }
  func.func @transform_2(%arg0: i32, %arg1: i32) -> (i32, i32) {
    %c0_i32 = arith.constant 0 : i32
    %c0_i32_0 = arith.constant 0 : i32
    return %c0_i32, %arg1 : i32, i32
  }
  func.func @transform_3(%arg0: i32, %arg1: i32) -> (i32, i32) {
    %c0_i32 = arith.constant 0 : i32
    return %arg0, %arg1 : i32, i32
  }
}

module attributes {stable_mosaic.version = 11 : i64} {
  func.func @_linear_kernel(%arg0: i32, %arg1: i32, %arg2: memref<32x128xf32, #tpu.memory_space<vmem>>, %arg3: memref<128x64xf32, #tpu.memory_space<vmem>>, %arg4: memref<1x64xf32, #tpu.memory_space<vmem>>, %arg5: memref<32x64xf32, #tpu.memory_space<vmem>>) attributes {dimension_semantics = [#tpu.dimension_semantics<parallel>, #tpu.dimension_semantics<parallel>], iteration_bounds = array<i64: 1, 1>, scalar_prefetch = 0 : i64, scratch_operands = 0 : i64, tpu.core_type = #tpu.core_type<tc>, window_params = [{transform_indices = @transform_0, window_bounds = array<i64: 32, 128>}, {transform_indices = @transform_1, window_bounds = array<i64: 128, 64>}, {transform_indices = @transform_2, window_bounds = array<i64: 1, 64>}, {transform_indices = @transform_3, window_bounds = array<i64: 32, 64>}]} {
    %c0 = arith.constant 0 : index
    %c0_0 = arith.constant 0 : index
    %0 = vector.load %arg2[%c0, %c0_0] : memref<32x128xf32, #tpu.memory_space<vmem>>, vector<32x128xf32>
    %1 = arith.truncf %0 : vector<32x128xf32> to vector<32x128xbf16>
    %c0_1 = arith.constant 0 : index
    %c0_2 = arith.constant 0 : index
    %2 = vector.load %arg3[%c0_1, %c0_2] : memref<128x64xf32, #tpu.memory_space<vmem>>, vector<128x64xf32>
    %3 = arith.truncf %2 : vector<128x64xf32> to vector<128x64xbf16>
    %cst = arith.constant dense<0.000000e+00> : vector<32x64xf32>
    %4 = tpu.matmul %1, %3, %cst {dimension_numbers = #tpu.dot_dimension_numbers<[1], [0], [0], [1], [0, 0, 1, 1], [], []>} : vector<32x128xbf16>, vector<128x64xbf16>, vector<32x64xf32> -> vector<32x64xf32>
    %c0_3 = arith.constant 0 : index
    %c0_4 = arith.constant 0 : index
    %5 = vector.load %arg4[%c0_3, %c0_4] : memref<1x64xf32, #tpu.memory_space<vmem>>, vector<1x64xf32>
    %6 = vector.broadcast %5 : vector<1x64xf32> to vector<32x64xf32>
    %7 = arith.addf %4, %6 : vector<32x64xf32>
    %c0_5 = arith.constant 0 : index
    %c0_6 = arith.constant 0 : index
    %8 = vector.load %arg5[%c0_5, %c0_6] : memref<32x64xf32, #tpu.memory_space<vmem>>, vector<32x64xf32>
    tpu.vector_store %arg5[%c0_5, %c0_6], %7 {strides = array<i32>} : memref<32x64xf32, #tpu.memory_space<vmem>>, vector<32x64xf32>,
    return
  }
  func.func @transform_0(%arg0: i32, %arg1: i32) -> (i32, i32) {
    %c0_i32 = arith.constant 0 : i32
    %c0_i32_0 = arith.constant 0 : i32
    return %arg0, %c0_i32 : i32, i32
  }
  func.func @transform_1(%arg0: i32, %arg1: i32) -> (i32, i32) {
    %c0_i32 = arith.constant 0 : i32
    %c0_i32_0 = arith.constant 0 : i32
    return %c0_i32, %arg1 : i32, i32
  }
  func.func @transform_2(%arg0: i32, %arg1: i32) -> (i32, i32) {
    %c0_i32 = arith.constant 0 : i32
    %c0_i32_0 = arith.constant 0 : i32
    return %c0_i32, %arg1 : i32, i32
  }
  func.func @transform_3(%arg0: i32, %arg1: i32) -> (i32, i32) {
    %c0_i32 = arith.constant 0 : i32
    return %arg0, %arg1 : i32, i32
  }
}

module attributes {stable_mosaic.version = 11 : i64} {
  func.func @_layernorm_kernel(%arg0: i32, %arg1: memref<32x64xf32, #tpu.memory_space<vmem>>, %arg2: memref<1x64xf32, #tpu.memory_space<vmem>>, %arg3: memref<1x64xf32, #tpu.memory_space<vmem>>, %arg4: memref<32x64xf32, #tpu.memory_space<vmem>>) attributes {dimension_semantics = [#tpu.dimension_semantics<parallel>], iteration_bounds = array<i64: 1>, scalar_prefetch = 0 : i64, scratch_operands = 0 : i64, tpu.core_type = #tpu.core_type<tc>, window_params = [{transform_indices = @transform_0, window_bounds = array<i64: 32, 64>}, {pipeline_mode = #tpu.pipeline_mode<synchronous>, transform_indices = @transform_1, window_bounds = array<i64: 1, 64>}, {pipeline_mode = #tpu.pipeline_mode<synchronous>, transform_indices = @transform_2, window_bounds = array<i64: 1, 64>}, {transform_indices = @transform_3, window_bounds = array<i64: 32, 64>}]} {
    %c0 = arith.constant 0 : index
    %c0_0 = arith.constant 0 : index
    %0 = vector.load %arg1[%c0, %c0_0] : memref<32x64xf32, #tpu.memory_space<vmem>>, vector<32x64xf32>
    %cst = arith.constant dense<0.000000e+00> : vector<32xf32>
    %1 = vector.multi_reduction <add>, %0, %cst [1] : vector<32x64xf32> to vector<32xf32>
    %2 = vector.shape_cast %1 : vector<32xf32> to vector<32x1xf32>
    %cst_1 = arith.constant 6.400000e+01 : f32
    %3 = vector.broadcast %cst_1 : f32 to vector<32x1xf32>
    %4 = arith.divf %2, %3 : vector<32x1xf32>
    %5 = vector.broadcast %4 : vector<32x1xf32> to vector<32x64xf32>
    %6 = arith.subf %0, %5 : vector<32x64xf32>
    %7 = arith.mulf %6, %6 : vector<32x64xf32>
    %cst_2 = arith.constant dense<0.000000e+00> : vector<32xf32>
    %8 = vector.multi_reduction <add>, %7, %cst_2 [1] : vector<32x64xf32> to vector<32xf32>
    %9 = vector.shape_cast %8 : vector<32xf32> to vector<32x1xf32>
    %cst_3 = arith.constant 6.400000e+01 : f32
    %10 = vector.broadcast %cst_3 : f32 to vector<32x1xf32>
    %11 = arith.divf %9, %10 : vector<32x1xf32>
    %12 = vector.broadcast %4 : vector<32x1xf32> to vector<32x64xf32>
    %13 = arith.subf %0, %12 : vector<32x64xf32>
    %cst_4 = arith.constant 9.99999974E-6 : f32
    %14 = vector.broadcast %cst_4 : f32 to vector<32x1xf32>
    %15 = arith.addf %11, %14 : vector<32x1xf32>
    %16 = math.rsqrt %15 : vector<32x1xf32>
    %17 = vector.broadcast %16 : vector<32x1xf32> to vector<32x64xf32>
    %18 = arith.mulf %13, %17 : vector<32x64xf32>
    %c0_5 = arith.constant 0 : index
    %c0_6 = arith.constant 0 : index
    %19 = vector.load %arg2[%c0_5, %c0_6] : memref<1x64xf32, #tpu.memory_space<vmem>>, vector<1x64xf32>
    %20 = vector.broadcast %19 : vector<1x64xf32> to vector<32x64xf32>
    %21 = arith.mulf %18, %20 : vector<32x64xf32>
    %c0_7 = arith.constant 0 : index
    %c0_8 = arith.constant 0 : index
    %22 = vector.load %arg3[%c0_7, %c0_8] : memref<1x64xf32, #tpu.memory_space<vmem>>, vector<1x64xf32>
    %23 = vector.broadcast %22 : vector<1x64xf32> to vector<32x64xf32>
    %24 = arith.addf %21, %23 : vector<32x64xf32>
    %c0_9 = arith.constant 0 : index
    %c0_10 = arith.constant 0 : index
    %25 = vector.load %arg4[%c0_9, %c0_10] : memref<32x64xf32, #tpu.memory_space<vmem>>, vector<32x64xf32>
    tpu.vector_store %arg4[%c0_9, %c0_10], %24 {strides = array<i32>} : memref<32x64xf32, #tpu.memory_space<vmem>>, vector<32x64xf32>,
    return
  }
  func.func @transform_0(%arg0: i32) -> (i32, i32) {
    %c0_i32 = arith.constant 0 : i32
    %c0_i32_0 = arith.constant 0 : i32
    return %arg0, %c0_i32 : i32, i32
  }
  func.func @transform_1(%arg0: i32) -> (i32, i32) {
    %c0_i32 = arith.constant 0 : i32
    %c0_i32_0 = arith.constant 0 : i32
    %c0_i32_1 = arith.constant 0 : i32
    return %c0_i32, %c0_i32_0 : i32, i32
  }
  func.func @transform_2(%arg0: i32) -> (i32, i32) {
    %c0_i32 = arith.constant 0 : i32
    %c0_i32_0 = arith.constant 0 : i32
    %c0_i32_1 = arith.constant 0 : i32
    return %c0_i32, %c0_i32_0 : i32, i32
  }
  func.func @transform_3(%arg0: i32) -> (i32, i32) {
    %c0_i32 = arith.constant 0 : i32
    %c0_i32_0 = arith.constant 0 : i32
    return %arg0, %c0_i32 : i32, i32
  }
}

module attributes {stable_mosaic.version = 11 : i64} {
  func.func @_ln_linear_kernel(%arg0: i32, %arg1: i32, %arg2: memref<32x64xf32, #tpu.memory_space<vmem>>, %arg3: memref<1x64xf32, #tpu.memory_space<vmem>>, %arg4: memref<1x64xf32, #tpu.memory_space<vmem>>, %arg5: memref<64x192xf32, #tpu.memory_space<vmem>>, %arg6: memref<1x192xf32, #tpu.memory_space<vmem>>, %arg7: memref<32x192xf32, #tpu.memory_space<vmem>>) attributes {dimension_semantics = [#tpu.dimension_semantics<parallel>, #tpu.dimension_semantics<parallel>], iteration_bounds = array<i64: 1, 1>, scalar_prefetch = 0 : i64, scratch_operands = 0 : i64, tpu.core_type = #tpu.core_type<tc>, window_params = [{transform_indices = @transform_0, window_bounds = array<i64: 32, 64>}, {pipeline_mode = #tpu.pipeline_mode<synchronous>, transform_indices = @transform_1, window_bounds = array<i64: 1, 64>}, {pipeline_mode = #tpu.pipeline_mode<synchronous>, transform_indices = @transform_2, window_bounds = array<i64: 1, 64>}, {transform_indices = @transform_3, window_bounds = array<i64: 64, 192>}, {transform_indices = @transform_4, window_bounds = array<i64: 1, 192>}, {transform_indices = @transform_5, window_bounds = array<i64: 32, 192>}]} {
    %c0 = arith.constant 0 : index
    %c0_0 = arith.constant 0 : index
    %0 = vector.load %arg2[%c0, %c0_0] : memref<32x64xf32, #tpu.memory_space<vmem>>, vector<32x64xf32>
    %cst = arith.constant dense<0.000000e+00> : vector<32xf32>
    %1 = vector.multi_reduction <add>, %0, %cst [1] : vector<32x64xf32> to vector<32xf32>
    %2 = vector.shape_cast %1 : vector<32xf32> to vector<32x1xf32>
    %cst_1 = arith.constant 6.400000e+01 : f32
    %3 = vector.broadcast %cst_1 : f32 to vector<32x1xf32>
    %4 = arith.divf %2, %3 : vector<32x1xf32>
    %5 = vector.broadcast %4 : vector<32x1xf32> to vector<32x64xf32>
    %6 = arith.subf %0, %5 : vector<32x64xf32>
    %7 = arith.mulf %6, %6 : vector<32x64xf32>
    %cst_2 = arith.constant dense<0.000000e+00> : vector<32xf32>
    %8 = vector.multi_reduction <add>, %7, %cst_2 [1] : vector<32x64xf32> to vector<32xf32>
    %9 = vector.shape_cast %8 : vector<32xf32> to vector<32x1xf32>
    %cst_3 = arith.constant 6.400000e+01 : f32
    %10 = vector.broadcast %cst_3 : f32 to vector<32x1xf32>
    %11 = arith.divf %9, %10 : vector<32x1xf32>
    %12 = vector.broadcast %4 : vector<32x1xf32> to vector<32x64xf32>
    %13 = arith.subf %0, %12 : vector<32x64xf32>
    %cst_4 = arith.constant 9.99999974E-6 : f32
    %14 = vector.broadcast %cst_4 : f32 to vector<32x1xf32>
    %15 = arith.addf %11, %14 : vector<32x1xf32>
    %16 = math.rsqrt %15 : vector<32x1xf32>
    %17 = vector.broadcast %16 : vector<32x1xf32> to vector<32x64xf32>
    %18 = arith.mulf %13, %17 : vector<32x64xf32>
    %c0_5 = arith.constant 0 : index
    %c0_6 = arith.constant 0 : index
    %19 = vector.load %arg3[%c0_5, %c0_6] : memref<1x64xf32, #tpu.memory_space<vmem>>, vector<1x64xf32>
    %20 = vector.broadcast %19 : vector<1x64xf32> to vector<32x64xf32>
    %21 = arith.mulf %18, %20 : vector<32x64xf32>
    %c0_7 = arith.constant 0 : index
    %c0_8 = arith.constant 0 : index
    %22 = vector.load %arg4[%c0_7, %c0_8] : memref<1x64xf32, #tpu.memory_space<vmem>>, vector<1x64xf32>
    %23 = vector.broadcast %22 : vector<1x64xf32> to vector<32x64xf32>
    %24 = arith.addf %21, %23 : vector<32x64xf32>
    %25 = arith.truncf %24 : vector<32x64xf32> to vector<32x64xbf16>
    %c0_9 = arith.constant 0 : index
    %c0_10 = arith.constant 0 : index
    %26 = vector.load %arg5[%c0_9, %c0_10] : memref<64x192xf32, #tpu.memory_space<vmem>>, vector<64x192xf32>
    %27 = arith.truncf %26 : vector<64x192xf32> to vector<64x192xbf16>
    %cst_11 = arith.constant dense<0.000000e+00> : vector<32x192xf32>
    %28 = tpu.matmul %25, %27, %cst_11 {dimension_numbers = #tpu.dot_dimension_numbers<[1], [0], [0], [1], [0, 0, 1, 1], [], []>} : vector<32x64xbf16>, vector<64x192xbf16>, vector<32x192xf32> -> vector<32x192xf32>
    %c0_12 = arith.constant 0 : index
    %c0_13 = arith.constant 0 : index
    %29 = vector.load %arg6[%c0_12, %c0_13] : memref<1x192xf32, #tpu.memory_space<vmem>>, vector<1x192xf32>
    %30 = vector.broadcast %29 : vector<1x192xf32> to vector<32x192xf32>
    %31 = arith.addf %28, %30 : vector<32x192xf32>
    %c0_14 = arith.constant 0 : index
    %c0_15 = arith.constant 0 : index
    %32 = vector.load %arg7[%c0_14, %c0_15] : memref<32x192xf32, #tpu.memory_space<vmem>>, vector<32x192xf32>
    tpu.vector_store %arg7[%c0_14, %c0_15], %31 {strides = array<i32>} : memref<32x192xf32, #tpu.memory_space<vmem>>, vector<32x192xf32>,
    return
  }
  func.func @transform_0(%arg0: i32, %arg1: i32) -> (i32, i32) {
    %c0_i32 = arith.constant 0 : i32
    %c0_i32_0 = arith.constant 0 : i32
    return %arg0, %c0_i32 : i32, i32
  }
  func.func @transform_1(%arg0: i32, %arg1: i32) -> (i32, i32) {
    %c0_i32 = arith.constant 0 : i32
    %c0_i32_0 = arith.constant 0 : i32
    %c0_i32_1 = arith.constant 0 : i32
    return %c0_i32, %c0_i32_0 : i32, i32
  }
  func.func @transform_2(%arg0: i32, %arg1: i32) -> (i32, i32) {
    %c0_i32 = arith.constant 0 : i32
    %c0_i32_0 = arith.constant 0 : i32
    %c0_i32_1 = arith.constant 0 : i32
    return %c0_i32, %c0_i32_0 : i32, i32
  }
  func.func @transform_3(%arg0: i32, %arg1: i32) -> (i32, i32) {
    %c0_i32 = arith.constant 0 : i32
    %c0_i32_0 = arith.constant 0 : i32
    return %c0_i32, %arg1 : i32, i32
  }
  func.func @transform_4(%arg0: i32, %arg1: i32) -> (i32, i32) {
    %c0_i32 = arith.constant 0 : i32
    %c0_i32_0 = arith.constant 0 : i32
    return %c0_i32, %arg1 : i32, i32
  }
  func.func @transform_5(%arg0: i32, %arg1: i32) -> (i32, i32) {
    %c0_i32 = arith.constant 0 : i32
    return %arg0, %arg1 : i32, i32
  }
}

module attributes {stable_mosaic.version = 11 : i64} {
  func.func @_linear_kernel(%arg0: i32, %arg1: i32, %arg2: memref<256x2xf32, #tpu.memory_space<vmem>>, %arg3: memref<2x8xf32, #tpu.memory_space<vmem>>, %arg4: memref<1x8xf32, #tpu.memory_space<vmem>>, %arg5: memref<256x8xf32, #tpu.memory_space<vmem>>) attributes {dimension_semantics = [#tpu.dimension_semantics<parallel>, #tpu.dimension_semantics<parallel>], iteration_bounds = array<i64: 1, 1>, scalar_prefetch = 0 : i64, scratch_operands = 0 : i64, tpu.core_type = #tpu.core_type<tc>, window_params = [{transform_indices = @transform_0, window_bounds = array<i64: 256, 2>}, {transform_indices = @transform_1, window_bounds = array<i64: 2, 8>}, {transform_indices = @transform_2, window_bounds = array<i64: 1, 8>}, {transform_indices = @transform_3, window_bounds = array<i64: 256, 8>}]} {
    %c0 = arith.constant 0 : index
    %c0_0 = arith.constant 0 : index
    %0 = vector.load %arg2[%c0, %c0_0] : memref<256x2xf32, #tpu.memory_space<vmem>>, vector<256x2xf32>
    %1 = arith.truncf %0 : vector<256x2xf32> to vector<256x2xbf16>
    %c0_1 = arith.constant 0 : index
    %c0_2 = arith.constant 0 : index
    %2 = vector.load %arg3[%c0_1, %c0_2] : memref<2x8xf32, #tpu.memory_space<vmem>>, vector<2x8xf32>
    %3 = arith.truncf %2 : vector<2x8xf32> to vector<2x8xbf16>
    %cst = arith.constant dense<0.000000e+00> : vector<256x8xf32>
    %4 = tpu.matmul %1, %3, %cst {dimension_numbers = #tpu.dot_dimension_numbers<[1], [0], [0], [1], [0, 0, 1, 1], [], []>} : vector<256x2xbf16>, vector<2x8xbf16>, vector<256x8xf32> -> vector<256x8xf32>
    %c0_3 = arith.constant 0 : index
    %c0_4 = arith.constant 0 : index
    %5 = vector.load %arg4[%c0_3, %c0_4] : memref<1x8xf32, #tpu.memory_space<vmem>>, vector<1x8xf32>
    %6 = vector.broadcast %5 : vector<1x8xf32> to vector<256x8xf32>
    %7 = arith.addf %4, %6 : vector<256x8xf32>
    %cst_5 = arith.constant 0.000000e+00 : f32
    %8 = vector.broadcast %cst_5 : f32 to vector<256x8xf32>
    %9 = arith.maximumf %7, %8 : vector<256x8xf32>
    %c0_6 = arith.constant 0 : index
    %c0_7 = arith.constant 0 : index
    %10 = vector.load %arg5[%c0_6, %c0_7] : memref<256x8xf32, #tpu.memory_space<vmem>>, vector<256x8xf32>
    tpu.vector_store %arg5[%c0_6, %c0_7], %9 {strides = array<i32>} : memref<256x8xf32, #tpu.memory_space<vmem>>, vector<256x8xf32>,
    return
  }
  func.func @transform_0(%arg0: i32, %arg1: i32) -> (i32, i32) {
    %c0_i32 = arith.constant 0 : i32
    %c0_i32_0 = arith.constant 0 : i32
    return %arg0, %c0_i32 : i32, i32
  }
  func.func @transform_1(%arg0: i32, %arg1: i32) -> (i32, i32) {
    %c0_i32 = arith.constant 0 : i32
    %c0_i32_0 = arith.constant 0 : i32
    return %c0_i32, %arg1 : i32, i32
  }
  func.func @transform_2(%arg0: i32, %arg1: i32) -> (i32, i32) {
    %c0_i32 = arith.constant 0 : i32
    %c0_i32_0 = arith.constant 0 : i32
    return %c0_i32, %arg1 : i32, i32
  }
  func.func @transform_3(%arg0: i32, %arg1: i32) -> (i32, i32) {
    %c0_i32 = arith.constant 0 : i32
    return %arg0, %arg1 : i32, i32
  }
}

module attributes {stable_mosaic.version = 11 : i64} {
  func.func @_attn_kernel(%arg0: i32, %arg1: memref<1x16x192xf32, #tpu.memory_space<vmem>>, %arg2: memref<1x4x16x16xf32, #tpu.memory_space<vmem>>, %arg3: memref<1x16x64xf32, #tpu.memory_space<vmem>>) attributes {dimension_semantics = [#tpu.dimension_semantics<parallel>], iteration_bounds = array<i64: 2>, scalar_prefetch = 0 : i64, scratch_operands = 0 : i64, tpu.core_type = #tpu.core_type<tc>, window_params = [{transform_indices = @transform_0, window_bounds = array<i64: 1, 16, 192>}, {transform_indices = @transform_1, window_bounds = array<i64: 1, 4, 16, 16>}, {transform_indices = @transform_2, window_bounds = array<i64: 1, 16, 64>}]} {
    %c0 = arith.constant 0 : index
    %c0_0 = arith.constant 0 : index
    %c0_1 = arith.constant 0 : index
    %0 = vector.load %arg1[%c0, %c0_0, %c0_1] : memref<1x16x192xf32, #tpu.memory_space<vmem>>, vector<1x16x192xf32>
    %c0_2 = arith.constant 0 : index
    %c0_3 = arith.constant 0 : index
    %c0_4 = arith.constant 0 : index
    %c0_5 = arith.constant 0 : index
    %1 = vector.load %arg2[%c0_2, %c0_3, %c0_4, %c0_5] : memref<1x4x16x16xf32, #tpu.memory_space<vmem>>, vector<1x4x16x16xf32>
    %2 = vector.extract_strided_slice %0 {offsets = [0, 0, 0], sizes = [1, 16, 16], strides = [1, 1, 1]} : vector<1x16x192xf32> to vector<1x16x16xf32>
    %3 = arith.truncf %2 : vector<1x16x16xf32> to vector<1x16x16xbf16>
    %4 = vector.extract_strided_slice %0 {offsets = [0, 0, 64], sizes = [1, 16, 16], strides = [1, 1, 1]} : vector<1x16x192xf32> to vector<1x16x16xf32>
    %5 = arith.truncf %4 : vector<1x16x16xf32> to vector<1x16x16xbf16>
    %6 = vector.extract_strided_slice %0 {offsets = [0, 0, 128], sizes = [1, 16, 16], strides = [1, 1, 1]} : vector<1x16x192xf32> to vector<1x16x16xf32>
    %7 = arith.truncf %6 : vector<1x16x16xf32> to vector<1x16x16xbf16>
    "tpu.trace_start"() <{level = 10 : i32, message = "wqd,wkd->wqk"}> : () -> ()
    %cst = arith.constant dense<0.000000e+00> : vector<1x16x16xf32>
    %8 = tpu.matmul %3, %5, %cst {dimension_numbers = #tpu.dot_dimension_numbers<[2], [2], [1], [1], [0, 0, 0, 1, 1, 1], [0], [0]>} : vector<1x16x16xbf16>, vector<1x16x16xbf16>, vector<1x16x16xf32> -> vector<1x16x16xf32>
    "tpu.trace_stop"() : () -> ()
    %cst_6 = arith.constant 2.500000e-01 : f32
    %9 = vector.broadcast %cst_6 : f32 to vector<1x16x16xf32>
    %10 = arith.mulf %8, %9 : vector<1x16x16xf32>
    %11 = vector.extract_strided_slice %1 {offsets = [0, 0, 0, 0], sizes = [1, 1, 16, 16], strides = [1, 1, 1, 1]} : vector<1x4x16x16xf32> to vector<1x1x16x16xf32>
    %12 = vector.shape_cast %11 : vector<1x1x16x16xf32> to vector<1x16x16xf32>
    %13 = arith.addf %10, %12 : vector<1x16x16xf32>
    %cst_7 = arith.constant dense<0xFF800000> : vector<1x16xf32>
    %14 = vector.multi_reduction <maximumf>, %13, %cst_7 [2] : vector<1x16x16xf32> to vector<1x16xf32>
    %15 = vector.shape_cast %14 : vector<1x16xf32> to vector<1x16x1xf32>
    %16 = vector.broadcast %15 : vector<1x16x1xf32> to vector<1x16x16xf32>
    %17 = arith.subf %13, %16 : vector<1x16x16xf32>
    %18 = math.exp %17 : vector<1x16x16xf32>
    %cst_8 = arith.constant dense<0.000000e+00> : vector<1x16xf32>
    %19 = vector.multi_reduction <add>, %18, %cst_8 [2] : vector<1x16x16xf32> to vector<1x16xf32>
    %20 = vector.shape_cast %19 : vector<1x16xf32> to vector<1x16x1xf32>
    %21 = tpu.reciprocal %20 {approx = true} : vector<1x16x1xf32> -> vector<1x16x1xf32>
    %22 = vector.broadcast %21 : vector<1x16x1xf32> to vector<1x16x16xf32>
    %23 = arith.mulf %18, %22 : vector<1x16x16xf32>
    %24 = arith.truncf %23 : vector<1x16x16xf32> to vector<1x16x16xbf16>
    "tpu.trace_start"() <{level = 10 : i32, message = "wqk,wkd->wqd"}> : () -> ()
    %cst_9 = arith.constant dense<0.000000e+00> : vector<1x16x16xf32>
    %25 = tpu.matmul %24, %7, %cst_9 {dimension_numbers = #tpu.dot_dimension_numbers<[2], [1], [1], [2], [0, 0, 0, 1, 1, 2], [0], [0]>} : vector<1x16x16xbf16>, vector<1x16x16xbf16>, vector<1x16x16xf32> -> vector<1x16x16xf32>
    "tpu.trace_stop"() : () -> ()
    %26 = vector.extract_strided_slice %0 {offsets = [0, 0, 16], sizes = [1, 16, 16], strides = [1, 1, 1]} : vector<1x16x192xf32> to vector<1x16x16xf32>
    %27 = arith.truncf %26 : vector<1x16x16xf32> to vector<1x16x16xbf16>
    %28 = vector.extract_strided_slice %0 {offsets = [0, 0, 80], sizes = [1, 16, 16], strides = [1, 1, 1]} : vector<1x16x192xf32> to vector<1x16x16xf32>
    %29 = arith.truncf %28 : vector<1x16x16xf32> to vector<1x16x16xbf16>
    %30 = vector.extract_strided_slice %0 {offsets = [0, 0, 144], sizes = [1, 16, 16], strides = [1, 1, 1]} : vector<1x16x192xf32> to vector<1x16x16xf32>
    %31 = arith.truncf %30 : vector<1x16x16xf32> to vector<1x16x16xbf16>
    "tpu.trace_start"() <{level = 10 : i32, message = "wqd,wkd->wqk"}> : () -> ()
    %cst_10 = arith.constant dense<0.000000e+00> : vector<1x16x16xf32>
    %32 = tpu.matmul %27, %29, %cst_10 {dimension_numbers = #tpu.dot_dimension_numbers<[2], [2], [1], [1], [0, 0, 0, 1, 1, 1], [0], [0]>} : vector<1x16x16xbf16>, vector<1x16x16xbf16>, vector<1x16x16xf32> -> vector<1x16x16xf32>
    "tpu.trace_stop"() : () -> ()
    %cst_11 = arith.constant 2.500000e-01 : f32
    %33 = vector.broadcast %cst_11 : f32 to vector<1x16x16xf32>
    %34 = arith.mulf %32, %33 : vector<1x16x16xf32>
    %35 = vector.extract_strided_slice %1 {offsets = [0, 1, 0, 0], sizes = [1, 1, 16, 16], strides = [1, 1, 1, 1]} : vector<1x4x16x16xf32> to vector<1x1x16x16xf32>
    %36 = vector.shape_cast %35 : vector<1x1x16x16xf32> to vector<1x16x16xf32>
    %37 = arith.addf %34, %36 : vector<1x16x16xf32>
    %cst_12 = arith.constant dense<0xFF800000> : vector<1x16xf32>
    %38 = vector.multi_reduction <maximumf>, %37, %cst_12 [2] : vector<1x16x16xf32> to vector<1x16xf32>
    %39 = vector.shape_cast %38 : vector<1x16xf32> to vector<1x16x1xf32>
    %40 = vector.broadcast %39 : vector<1x16x1xf32> to vector<1x16x16xf32>
    %41 = arith.subf %37, %40 : vector<1x16x16xf32>
    %42 = math.exp %41 : vector<1x16x16xf32>
    %cst_13 = arith.constant dense<0.000000e+00> : vector<1x16xf32>
    %43 = vector.multi_reduction <add>, %42, %cst_13 [2] : vector<1x16x16xf32> to vector<1x16xf32>
    %44 = vector.shape_cast %43 : vector<1x16xf32> to vector<1x16x1xf32>
    %45 = tpu.reciprocal %44 {approx = true} : vector<1x16x1xf32> -> vector<1x16x1xf32>
    %46 = vector.broadcast %45 : vector<1x16x1xf32> to vector<1x16x16xf32>
    %47 = arith.mulf %42, %46 : vector<1x16x16xf32>
    %48 = arith.truncf %47 : vector<1x16x16xf32> to vector<1x16x16xbf16>
    "tpu.trace_start"() <{level = 10 : i32, message = "wqk,wkd->wqd"}> : () -> ()
    %cst_14 = arith.constant dense<0.000000e+00> : vector<1x16x16xf32>
    %49 = tpu.matmul %48, %31, %cst_14 {dimension_numbers = #tpu.dot_dimension_numbers<[2], [1], [1], [2], [0, 0, 0, 1, 1, 2], [0], [0]>} : vector<1x16x16xbf16>, vector<1x16x16xbf16>, vector<1x16x16xf32> -> vector<1x16x16xf32>
    "tpu.trace_stop"() : () -> ()
    %50 = vector.extract_strided_slice %0 {offsets = [0, 0, 32], sizes = [1, 16, 16], strides = [1, 1, 1]} : vector<1x16x192xf32> to vector<1x16x16xf32>
    %51 = arith.truncf %50 : vector<1x16x16xf32> to vector<1x16x16xbf16>
    %52 = vector.extract_strided_slice %0 {offsets = [0, 0, 96], sizes = [1, 16, 16], strides = [1, 1, 1]} : vector<1x16x192xf32> to vector<1x16x16xf32>
    %53 = arith.truncf %52 : vector<1x16x16xf32> to vector<1x16x16xbf16>
    %54 = vector.extract_strided_slice %0 {offsets = [0, 0, 160], sizes = [1, 16, 16], strides = [1, 1, 1]} : vector<1x16x192xf32> to vector<1x16x16xf32>
    %55 = arith.truncf %54 : vector<1x16x16xf32> to vector<1x16x16xbf16>
    "tpu.trace_start"() <{level = 10 : i32, message = "wqd,wkd->wqk"}> : () -> ()
    %cst_15 = arith.constant dense<0.000000e+00> : vector<1x16x16xf32>
    %56 = tpu.matmul %51, %53, %cst_15 {dimension_numbers = #tpu.dot_dimension_numbers<[2], [2], [1], [1], [0, 0, 0, 1, 1, 1], [0], [0]>} : vector<1x16x16xbf16>, vector<1x16x16xbf16>, vector<1x16x16xf32> -> vector<1x16x16xf32>
    "tpu.trace_stop"() : () -> ()
    %cst_16 = arith.constant 2.500000e-01 : f32
    %57 = vector.broadcast %cst_16 : f32 to vector<1x16x16xf32>
    %58 = arith.mulf %56, %57 : vector<1x16x16xf32>
    %59 = vector.extract_strided_slice %1 {offsets = [0, 2, 0, 0], sizes = [1, 1, 16, 16], strides = [1, 1, 1, 1]} : vector<1x4x16x16xf32> to vector<1x1x16x16xf32>
    %60 = vector.shape_cast %59 : vector<1x1x16x16xf32> to vector<1x16x16xf32>
    %61 = arith.addf %58, %60 : vector<1x16x16xf32>
    %cst_17 = arith.constant dense<0xFF800000> : vector<1x16xf32>
    %62 = vector.multi_reduction <maximumf>, %61, %cst_17 [2] : vector<1x16x16xf32> to vector<1x16xf32>
    %63 = vector.shape_cast %62 : vector<1x16xf32> to vector<1x16x1xf32>
    %64 = vector.broadcast %63 : vector<1x16x1xf32> to vector<1x16x16xf32>
    %65 = arith.subf %61, %64 : vector<1x16x16xf32>
    %66 = math.exp %65 : vector<1x16x16xf32>
    %cst_18 = arith.constant dense<0.000000e+00> : vector<1x16xf32>
    %67 = vector.multi_reduction <add>, %66, %cst_18 [2] : vector<1x16x16xf32> to vector<1x16xf32>
    %68 = vector.shape_cast %67 : vector<1x16xf32> to vector<1x16x1xf32>
    %69 = tpu.reciprocal %68 {approx = true} : vector<1x16x1xf32> -> vector<1x16x1xf32>
    %70 = vector.broadcast %69 : vector<1x16x1xf32> to vector<1x16x16xf32>
    %71 = arith.mulf %66, %70 : vector<1x16x16xf32>
    %72 = arith.truncf %71 : vector<1x16x16xf32> to vector<1x16x16xbf16>
    "tpu.trace_start"() <{level = 10 : i32, message = "wqk,wkd->wqd"}> : () -> ()
    %cst_19 = arith.constant dense<0.000000e+00> : vector<1x16x16xf32>
    %73 = tpu.matmul %72, %55, %cst_19 {dimension_numbers = #tpu.dot_dimension_numbers<[2], [1], [1], [2], [0, 0, 0, 1, 1, 2], [0], [0]>} : vector<1x16x16xbf16>, vector<1x16x16xbf16>, vector<1x16x16xf32> -> vector<1x16x16xf32>
    "tpu.trace_stop"() : () -> ()
    %74 = vector.extract_strided_slice %0 {offsets = [0, 0, 48], sizes = [1, 16, 16], strides = [1, 1, 1]} : vector<1x16x192xf32> to vector<1x16x16xf32>
    %75 = arith.truncf %74 : vector<1x16x16xf32> to vector<1x16x16xbf16>
    %76 = vector.extract_strided_slice %0 {offsets = [0, 0, 112], sizes = [1, 16, 16], strides = [1, 1, 1]} : vector<1x16x192xf32> to vector<1x16x16xf32>
    %77 = arith.truncf %76 : vector<1x16x16xf32> to vector<1x16x16xbf16>
    %78 = vector.extract_strided_slice %0 {offsets = [0, 0, 176], sizes = [1, 16, 16], strides = [1, 1, 1]} : vector<1x16x192xf32> to vector<1x16x16xf32>
    %79 = arith.truncf %78 : vector<1x16x16xf32> to vector<1x16x16xbf16>
    "tpu.trace_start"() <{level = 10 : i32, message = "wqd,wkd->wqk"}> : () -> ()
    %cst_20 = arith.constant dense<0.000000e+00> : vector<1x16x16xf32>
    %80 = tpu.matmul %75, %77, %cst_20 {dimension_numbers = #tpu.dot_dimension_numbers<[2], [2], [1], [1], [0, 0, 0, 1, 1, 1], [0], [0]>} : vector<1x16x16xbf16>, vector<1x16x16xbf16>, vector<1x16x16xf32> -> vector<1x16x16xf32>
    "tpu.trace_stop"() : () -> ()
    %cst_21 = arith.constant 2.500000e-01 : f32
    %81 = vector.broadcast %cst_21 : f32 to vector<1x16x16xf32>
    %82 = arith.mulf %80, %81 : vector<1x16x16xf32>
    %83 = vector.extract_strided_slice %1 {offsets = [0, 3, 0, 0], sizes = [1, 1, 16, 16], strides = [1, 1, 1, 1]} : vector<1x4x16x16xf32> to vector<1x1x16x16xf32>
    %84 = vector.shape_cast %83 : vector<1x1x16x16xf32> to vector<1x16x16xf32>
    %85 = arith.addf %82, %84 : vector<1x16x16xf32>
    %cst_22 = arith.constant dense<0xFF800000> : vector<1x16xf32>
    %86 = vector.multi_reduction <maximumf>, %85, %cst_22 [2] : vector<1x16x16xf32> to vector<1x16xf32>
    %87 = vector.shape_cast %86 : vector<1x16xf32> to vector<1x16x1xf32>
    %88 = vector.broadcast %87 : vector<1x16x1xf32> to vector<1x16x16xf32>
    %89 = arith.subf %85, %88 : vector<1x16x16xf32>
    %90 = math.exp %89 : vector<1x16x16xf32>
    %cst_23 = arith.constant dense<0.000000e+00> : vector<1x16xf32>
    %91 = vector.multi_reduction <add>, %90, %cst_23 [2] : vector<1x16x16xf32> to vector<1x16xf32>
    %92 = vector.shape_cast %91 : vector<1x16xf32> to vector<1x16x1xf32>
    %93 = tpu.reciprocal %92 {approx = true} : vector<1x16x1xf32> -> vector<1x16x1xf32>
    %94 = vector.broadcast %93 : vector<1x16x1xf32> to vector<1x16x16xf32>
    %95 = arith.mulf %90, %94 : vector<1x16x16xf32>
    %96 = arith.truncf %95 : vector<1x16x16xf32> to vector<1x16x16xbf16>
    "tpu.trace_start"() <{level = 10 : i32, message = "wqk,wkd->wqd"}> : () -> ()
    %cst_24 = arith.constant dense<0.000000e+00> : vector<1x16x16xf32>
    %97 = tpu.matmul %96, %79, %cst_24 {dimension_numbers = #tpu.dot_dimension_numbers<[2], [1], [1], [2], [0, 0, 0, 1, 1, 2], [0], [0]>} : vector<1x16x16xbf16>, vector<1x16x16xbf16>, vector<1x16x16xf32> -> vector<1x16x16xf32>
    "tpu.trace_stop"() : () -> ()
    %98 = tpu.concatenate %25, %49, %73, %97 in 2 : vector<1x16x16xf32>, vector<1x16x16xf32>, vector<1x16x16xf32>, vector<1x16x16xf32> -> vector<1x16x64xf32>
    %c0_25 = arith.constant 0 : index
    %c0_26 = arith.constant 0 : index
    %c0_27 = arith.constant 0 : index
    %99 = vector.load %arg3[%c0_25, %c0_26, %c0_27] : memref<1x16x64xf32, #tpu.memory_space<vmem>>, vector<1x16x64xf32>
    tpu.vector_store %arg3[%c0_25, %c0_26, %c0_27], %98 {strides = array<i32>} : memref<1x16x64xf32, #tpu.memory_space<vmem>>, vector<1x16x64xf32>,
    return
  }
  func.func @transform_0(%arg0: i32) -> (i32, i32, i32) {
    %c0_i32 = arith.constant 0 : i32
    %c0_i32_0 = arith.constant 0 : i32
    %c0_i32_1 = arith.constant 0 : i32
    return %arg0, %c0_i32, %c0_i32_0 : i32, i32, i32
  }
  func.func @transform_1(%arg0: i32) -> (i32, i32, i32, i32) {
    %c1_i32 = arith.constant 1 : i32
    %c0_i32 = arith.constant 0 : i32
    %0 = arith.cmpi eq, %c1_i32, %c0_i32 : i32
    %c1_i32_0 = arith.constant 1 : i32
    %1 = arith.select %0, %c1_i32_0, %c1_i32 : i32
    %2 = arith.remsi %arg0, %1 : i32
    %c0_i32_1 = arith.constant 0 : i32
    %3 = arith.cmpi ne, %2, %c0_i32_1 : i32
    %c0_i32_2 = arith.constant 0 : i32
    %4 = arith.cmpi slt, %2, %c0_i32_2 : i32
    %c0_i32_3 = arith.constant 0 : i32
    %5 = arith.cmpi slt, %1, %c0_i32_3 : i32
    %6 = arith.xori %4, %5 : i1
    %7 = arith.andi %6, %3 : i1
    %8 = arith.addi %2, %1 : i32
    %9 = arith.select %7, %8, %2 : i32
    %c0_i32_4 = arith.constant 0 : i32
    %c0_i32_5 = arith.constant 0 : i32
    %c0_i32_6 = arith.constant 0 : i32
    %c0_i32_7 = arith.constant 0 : i32
    return %9, %c0_i32_4, %c0_i32_5, %c0_i32_6 : i32, i32, i32, i32
  }
  func.func @transform_2(%arg0: i32) -> (i32, i32, i32) {
    %c0_i32 = arith.constant 0 : i32
    %c0_i32_0 = arith.constant 0 : i32
    %c0_i32_1 = arith.constant 0 : i32
    return %arg0, %c0_i32, %c0_i32_0 : i32, i32, i32
  }
}

module attributes {stable_mosaic.version = 11 : i64} {
  func.func @_linear_kernel(%arg0: i32, %arg1: i32, %arg2: memref<256x8xf32, #tpu.memory_space<vmem>>, %arg3: memref<8x4xf32, #tpu.memory_space<vmem>>, %arg4: memref<1x4xf32, #tpu.memory_space<vmem>>, %arg5: memref<256x4xf32, #tpu.memory_space<vmem>>) attributes {dimension_semantics = [#tpu.dimension_semantics<parallel>, #tpu.dimension_semantics<parallel>], iteration_bounds = array<i64: 1, 1>, scalar_prefetch = 0 : i64, scratch_operands = 0 : i64, tpu.core_type = #tpu.core_type<tc>, window_params = [{transform_indices = @transform_0, window_bounds = array<i64: 256, 8>}, {transform_indices = @transform_1, window_bounds = array<i64: 8, 4>}, {transform_indices = @transform_2, window_bounds = array<i64: 1, 4>}, {transform_indices = @transform_3, window_bounds = array<i64: 256, 4>}]} {
    %c0 = arith.constant 0 : index
    %c0_0 = arith.constant 0 : index
    %0 = vector.load %arg2[%c0, %c0_0] : memref<256x8xf32, #tpu.memory_space<vmem>>, vector<256x8xf32>
    %1 = arith.truncf %0 : vector<256x8xf32> to vector<256x8xbf16>
    %c0_1 = arith.constant 0 : index
    %c0_2 = arith.constant 0 : index
    %2 = vector.load %arg3[%c0_1, %c0_2] : memref<8x4xf32, #tpu.memory_space<vmem>>, vector<8x4xf32>
    %3 = arith.truncf %2 : vector<8x4xf32> to vector<8x4xbf16>
    %cst = arith.constant dense<0.000000e+00> : vector<256x4xf32>
    %4 = tpu.matmul %1, %3, %cst {dimension_numbers = #tpu.dot_dimension_numbers<[1], [0], [0], [1], [0, 0, 1, 1], [], []>} : vector<256x8xbf16>, vector<8x4xbf16>, vector<256x4xf32> -> vector<256x4xf32>
    %c0_3 = arith.constant 0 : index
    %c0_4 = arith.constant 0 : index
    %5 = vector.load %arg4[%c0_3, %c0_4] : memref<1x4xf32, #tpu.memory_space<vmem>>, vector<1x4xf32>
    %6 = vector.broadcast %5 : vector<1x4xf32> to vector<256x4xf32>
    %7 = arith.addf %4, %6 : vector<256x4xf32>
    %c0_5 = arith.constant 0 : index
    %c0_6 = arith.constant 0 : index
    %8 = vector.load %arg5[%c0_5, %c0_6] : memref<256x4xf32, #tpu.memory_space<vmem>>, vector<256x4xf32>
    tpu.vector_store %arg5[%c0_5, %c0_6], %7 {strides = array<i32>} : memref<256x4xf32, #tpu.memory_space<vmem>>, vector<256x4xf32>,
    return
  }
  func.func @transform_0(%arg0: i32, %arg1: i32) -> (i32, i32) {
    %c0_i32 = arith.constant 0 : i32
    %c0_i32_0 = arith.constant 0 : i32
    return %arg0, %c0_i32 : i32, i32
  }
  func.func @transform_1(%arg0: i32, %arg1: i32) -> (i32, i32) {
    %c0_i32 = arith.constant 0 : i32
    %c0_i32_0 = arith.constant 0 : i32
    return %c0_i32, %arg1 : i32, i32
  }
  func.func @transform_2(%arg0: i32, %arg1: i32) -> (i32, i32) {
    %c0_i32 = arith.constant 0 : i32
    %c0_i32_0 = arith.constant 0 : i32
    return %c0_i32, %arg1 : i32, i32
  }
  func.func @transform_3(%arg0: i32, %arg1: i32) -> (i32, i32) {
    %c0_i32 = arith.constant 0 : i32
    return %arg0, %arg1 : i32, i32
  }
}

module attributes {stable_mosaic.version = 11 : i64} {
  func.func @_linear_kernel(%arg0: i32, %arg1: i32, %arg2: memref<32x64xf32, #tpu.memory_space<vmem>>, %arg3: memref<64x64xf32, #tpu.memory_space<vmem>>, %arg4: memref<1x64xf32, #tpu.memory_space<vmem>>, %arg5: memref<32x64xf32, #tpu.memory_space<vmem>>) attributes {dimension_semantics = [#tpu.dimension_semantics<parallel>, #tpu.dimension_semantics<parallel>], iteration_bounds = array<i64: 1, 1>, scalar_prefetch = 0 : i64, scratch_operands = 0 : i64, tpu.core_type = #tpu.core_type<tc>, window_params = [{transform_indices = @transform_0, window_bounds = array<i64: 32, 64>}, {transform_indices = @transform_1, window_bounds = array<i64: 64, 64>}, {transform_indices = @transform_2, window_bounds = array<i64: 1, 64>}, {transform_indices = @transform_3, window_bounds = array<i64: 32, 64>}]} {
    %c0 = arith.constant 0 : index
    %c0_0 = arith.constant 0 : index
    %0 = vector.load %arg2[%c0, %c0_0] : memref<32x64xf32, #tpu.memory_space<vmem>>, vector<32x64xf32>
    %1 = arith.truncf %0 : vector<32x64xf32> to vector<32x64xbf16>
    %c0_1 = arith.constant 0 : index
    %c0_2 = arith.constant 0 : index
    %2 = vector.load %arg3[%c0_1, %c0_2] : memref<64x64xf32, #tpu.memory_space<vmem>>, vector<64x64xf32>
    %3 = arith.truncf %2 : vector<64x64xf32> to vector<64x64xbf16>
    %cst = arith.constant dense<0.000000e+00> : vector<32x64xf32>
    %4 = tpu.matmul %1, %3, %cst {dimension_numbers = #tpu.dot_dimension_numbers<[1], [0], [0], [1], [0, 0, 1, 1], [], []>} : vector<32x64xbf16>, vector<64x64xbf16>, vector<32x64xf32> -> vector<32x64xf32>
    %c0_3 = arith.constant 0 : index
    %c0_4 = arith.constant 0 : index
    %5 = vector.load %arg4[%c0_3, %c0_4] : memref<1x64xf32, #tpu.memory_space<vmem>>, vector<1x64xf32>
    %6 = vector.broadcast %5 : vector<1x64xf32> to vector<32x64xf32>
    %7 = arith.addf %4, %6 : vector<32x64xf32>
    %c0_5 = arith.constant 0 : index
    %c0_6 = arith.constant 0 : index
    %8 = vector.load %arg5[%c0_5, %c0_6] : memref<32x64xf32, #tpu.memory_space<vmem>>, vector<32x64xf32>
    tpu.vector_store %arg5[%c0_5, %c0_6], %7 {strides = array<i32>} : memref<32x64xf32, #tpu.memory_space<vmem>>, vector<32x64xf32>,
    return
  }
  func.func @transform_0(%arg0: i32, %arg1: i32) -> (i32, i32) {
    %c0_i32 = arith.constant 0 : i32
    %c0_i32_0 = arith.constant 0 : i32
    return %arg0, %c0_i32 : i32, i32
  }
  func.func @transform_1(%arg0: i32, %arg1: i32) -> (i32, i32) {
    %c0_i32 = arith.constant 0 : i32
    %c0_i32_0 = arith.constant 0 : i32
    return %c0_i32, %arg1 : i32, i32
  }
  func.func @transform_2(%arg0: i32, %arg1: i32) -> (i32, i32) {
    %c0_i32 = arith.constant 0 : i32
    %c0_i32_0 = arith.constant 0 : i32
    return %c0_i32, %arg1 : i32, i32
  }
  func.func @transform_3(%arg0: i32, %arg1: i32) -> (i32, i32) {
    %c0_i32 = arith.constant 0 : i32
    return %arg0, %arg1 : i32, i32
  }
}

module attributes {stable_mosaic.version = 11 : i64} {
  func.func @_ln_linear_kernel(%arg0: i32, %arg1: i32, %arg2: memref<32x64xf32, #tpu.memory_space<vmem>>, %arg3: memref<1x64xf32, #tpu.memory_space<vmem>>, %arg4: memref<1x64xf32, #tpu.memory_space<vmem>>, %arg5: memref<64x128xf32, #tpu.memory_space<vmem>>, %arg6: memref<1x128xf32, #tpu.memory_space<vmem>>, %arg7: memref<32x128xf32, #tpu.memory_space<vmem>>) attributes {dimension_semantics = [#tpu.dimension_semantics<parallel>, #tpu.dimension_semantics<parallel>], iteration_bounds = array<i64: 1, 1>, scalar_prefetch = 0 : i64, scratch_operands = 0 : i64, tpu.core_type = #tpu.core_type<tc>, window_params = [{transform_indices = @transform_0, window_bounds = array<i64: 32, 64>}, {pipeline_mode = #tpu.pipeline_mode<synchronous>, transform_indices = @transform_1, window_bounds = array<i64: 1, 64>}, {pipeline_mode = #tpu.pipeline_mode<synchronous>, transform_indices = @transform_2, window_bounds = array<i64: 1, 64>}, {transform_indices = @transform_3, window_bounds = array<i64: 64, 128>}, {transform_indices = @transform_4, window_bounds = array<i64: 1, 128>}, {transform_indices = @transform_5, window_bounds = array<i64: 32, 128>}]} {
    %c0 = arith.constant 0 : index
    %c0_0 = arith.constant 0 : index
    %0 = vector.load %arg2[%c0, %c0_0] : memref<32x64xf32, #tpu.memory_space<vmem>>, vector<32x64xf32>
    %cst = arith.constant dense<0.000000e+00> : vector<32xf32>
    %1 = vector.multi_reduction <add>, %0, %cst [1] : vector<32x64xf32> to vector<32xf32>
    %2 = vector.shape_cast %1 : vector<32xf32> to vector<32x1xf32>
    %cst_1 = arith.constant 6.400000e+01 : f32
    %3 = vector.broadcast %cst_1 : f32 to vector<32x1xf32>
    %4 = arith.divf %2, %3 : vector<32x1xf32>
    %5 = vector.broadcast %4 : vector<32x1xf32> to vector<32x64xf32>
    %6 = arith.subf %0, %5 : vector<32x64xf32>
    %7 = arith.mulf %6, %6 : vector<32x64xf32>
    %cst_2 = arith.constant dense<0.000000e+00> : vector<32xf32>
    %8 = vector.multi_reduction <add>, %7, %cst_2 [1] : vector<32x64xf32> to vector<32xf32>
    %9 = vector.shape_cast %8 : vector<32xf32> to vector<32x1xf32>
    %cst_3 = arith.constant 6.400000e+01 : f32
    %10 = vector.broadcast %cst_3 : f32 to vector<32x1xf32>
    %11 = arith.divf %9, %10 : vector<32x1xf32>
    %12 = vector.broadcast %4 : vector<32x1xf32> to vector<32x64xf32>
    %13 = arith.subf %0, %12 : vector<32x64xf32>
    %cst_4 = arith.constant 9.99999974E-6 : f32
    %14 = vector.broadcast %cst_4 : f32 to vector<32x1xf32>
    %15 = arith.addf %11, %14 : vector<32x1xf32>
    %16 = math.rsqrt %15 : vector<32x1xf32>
    %17 = vector.broadcast %16 : vector<32x1xf32> to vector<32x64xf32>
    %18 = arith.mulf %13, %17 : vector<32x64xf32>
    %c0_5 = arith.constant 0 : index
    %c0_6 = arith.constant 0 : index
    %19 = vector.load %arg3[%c0_5, %c0_6] : memref<1x64xf32, #tpu.memory_space<vmem>>, vector<1x64xf32>
    %20 = vector.broadcast %19 : vector<1x64xf32> to vector<32x64xf32>
    %21 = arith.mulf %18, %20 : vector<32x64xf32>
    %c0_7 = arith.constant 0 : index
    %c0_8 = arith.constant 0 : index
    %22 = vector.load %arg4[%c0_7, %c0_8] : memref<1x64xf32, #tpu.memory_space<vmem>>, vector<1x64xf32>
    %23 = vector.broadcast %22 : vector<1x64xf32> to vector<32x64xf32>
    %24 = arith.addf %21, %23 : vector<32x64xf32>
    %25 = arith.truncf %24 : vector<32x64xf32> to vector<32x64xbf16>
    %c0_9 = arith.constant 0 : index
    %c0_10 = arith.constant 0 : index
    %26 = vector.load %arg5[%c0_9, %c0_10] : memref<64x128xf32, #tpu.memory_space<vmem>>, vector<64x128xf32>
    %27 = arith.truncf %26 : vector<64x128xf32> to vector<64x128xbf16>
    %cst_11 = arith.constant dense<0.000000e+00> : vector<32x128xf32>
    %28 = tpu.matmul %25, %27, %cst_11 {dimension_numbers = #tpu.dot_dimension_numbers<[1], [0], [0], [1], [0, 0, 1, 1], [], []>} : vector<32x64xbf16>, vector<64x128xbf16>, vector<32x128xf32> -> vector<32x128xf32>
    %c0_12 = arith.constant 0 : index
    %c0_13 = arith.constant 0 : index
    %29 = vector.load %arg6[%c0_12, %c0_13] : memref<1x128xf32, #tpu.memory_space<vmem>>, vector<1x128xf32>
    %30 = vector.broadcast %29 : vector<1x128xf32> to vector<32x128xf32>
    %31 = arith.addf %28, %30 : vector<32x128xf32>
    %cst_14 = arith.constant 5.000000e-01 : f32
    %32 = vector.broadcast %cst_14 : f32 to vector<32x128xf32>
    %33 = arith.mulf %32, %31 : vector<32x128xf32>
    %cst_15 = arith.constant 4.471500e-02 : f32
    %34 = vector.broadcast %cst_15 : f32 to vector<32x128xf32>
    %35 = arith.mulf %34, %31 : vector<32x128xf32>
    %36 = arith.mulf %35, %31 : vector<32x128xf32>
    %37 = arith.mulf %36, %31 : vector<32x128xf32>
    %38 = arith.addf %31, %37 : vector<32x128xf32>
    %cst_16 = arith.constant 0.797884583 : f32
    %39 = vector.broadcast %cst_16 : f32 to vector<32x128xf32>
    %40 = arith.mulf %39, %38 : vector<32x128xf32>
    %41 = math.tanh %40 : vector<32x128xf32>
    %cst_17 = arith.constant 1.000000e+00 : f32
    %42 = vector.broadcast %cst_17 : f32 to vector<32x128xf32>
    %43 = arith.addf %42, %41 : vector<32x128xf32>
    %44 = arith.mulf %33, %43 : vector<32x128xf32>
    %c0_18 = arith.constant 0 : index
    %c0_19 = arith.constant 0 : index
    %45 = vector.load %arg7[%c0_18, %c0_19] : memref<32x128xf32, #tpu.memory_space<vmem>>, vector<32x128xf32>
    tpu.vector_store %arg7[%c0_18, %c0_19], %44 {strides = array<i32>} : memref<32x128xf32, #tpu.memory_space<vmem>>, vector<32x128xf32>,
    return
  }
  func.func @transform_0(%arg0: i32, %arg1: i32) -> (i32, i32) {
    %c0_i32 = arith.constant 0 : i32
    %c0_i32_0 = arith.constant 0 : i32
    return %arg0, %c0_i32 : i32, i32
  }
  func.func @transform_1(%arg0: i32, %arg1: i32) -> (i32, i32) {
    %c0_i32 = arith.constant 0 : i32
    %c0_i32_0 = arith.constant 0 : i32
    %c0_i32_1 = arith.constant 0 : i32
    return %c0_i32, %c0_i32_0 : i32, i32
  }
  func.func @transform_2(%arg0: i32, %arg1: i32) -> (i32, i32) {
    %c0_i32 = arith.constant 0 : i32
    %c0_i32_0 = arith.constant 0 : i32
    %c0_i32_1 = arith.constant 0 : i32
    return %c0_i32, %c0_i32_0 : i32, i32
  }
  func.func @transform_3(%arg0: i32, %arg1: i32) -> (i32, i32) {
    %c0_i32 = arith.constant 0 : i32
    %c0_i32_0 = arith.constant 0 : i32
    return %c0_i32, %arg1 : i32, i32
  }
  func.func @transform_4(%arg0: i32, %arg1: i32) -> (i32, i32) {
    %c0_i32 = arith.constant 0 : i32
    %c0_i32_0 = arith.constant 0 : i32
    return %c0_i32, %arg1 : i32, i32
  }
  func.func @transform_5(%arg0: i32, %arg1: i32) -> (i32, i32) {
    %c0_i32 = arith.constant 0 : i32
    return %arg0, %arg1 : i32, i32
  }
}

module attributes {stable_mosaic.version = 11 : i64} {
  func.func @_mean_tokens_kernel(%arg0: i32, %arg1: memref<2x16x64xf32, #tpu.memory_space<vmem>>, %arg2: memref<2x64xf32, #tpu.memory_space<vmem>>) attributes {dimension_semantics = [#tpu.dimension_semantics<parallel>], iteration_bounds = array<i64: 1>, scalar_prefetch = 0 : i64, scratch_operands = 0 : i64, tpu.core_type = #tpu.core_type<tc>, window_params = [{transform_indices = @transform_0, window_bounds = array<i64: 2, 16, 64>}, {transform_indices = @transform_1, window_bounds = array<i64: 2, 64>}]} {
    %c0 = arith.constant 0 : index
    %c0_0 = arith.constant 0 : index
    %c0_1 = arith.constant 0 : index
    %0 = vector.load %arg1[%c0, %c0_0, %c0_1] : memref<2x16x64xf32, #tpu.memory_space<vmem>>, vector<2x16x64xf32>
    %cst = arith.constant dense<0.000000e+00> : vector<2x64xf32>
    %1 = vector.multi_reduction <add>, %0, %cst [1] : vector<2x16x64xf32> to vector<2x64xf32>
    %cst_2 = arith.constant 1.600000e+01 : f32
    %2 = vector.broadcast %cst_2 : f32 to vector<2x64xf32>
    %3 = arith.divf %1, %2 : vector<2x64xf32>
    %c0_3 = arith.constant 0 : index
    %c0_4 = arith.constant 0 : index
    %4 = vector.load %arg2[%c0_3, %c0_4] : memref<2x64xf32, #tpu.memory_space<vmem>>, vector<2x64xf32>
    tpu.vector_store %arg2[%c0_3, %c0_4], %3 {strides = array<i32>} : memref<2x64xf32, #tpu.memory_space<vmem>>, vector<2x64xf32>,
    return
  }
  func.func @transform_0(%arg0: i32) -> (i32, i32, i32) {
    %c0_i32 = arith.constant 0 : i32
    %c0_i32_0 = arith.constant 0 : i32
    %c0_i32_1 = arith.constant 0 : i32
    return %arg0, %c0_i32, %c0_i32_0 : i32, i32, i32
  }
  func.func @transform_1(%arg0: i32) -> (i32, i32) {
    %c0_i32 = arith.constant 0 : i32
    %c0_i32_0 = arith.constant 0 : i32
    return %arg0, %c0_i32 : i32, i32
  }
}

module attributes {stable_mosaic.version = 11 : i64} {
  func.func @_ln_linear_kernel(%arg0: i32, %arg1: i32, %arg2: memref<2x64xf32, #tpu.memory_space<vmem>>, %arg3: memref<1x64xf32, #tpu.memory_space<vmem>>, %arg4: memref<1x64xf32, #tpu.memory_space<vmem>>, %arg5: memref<64x8xf32, #tpu.memory_space<vmem>>, %arg6: memref<1x8xf32, #tpu.memory_space<vmem>>, %arg7: memref<2x8xf32, #tpu.memory_space<vmem>>) attributes {dimension_semantics = [#tpu.dimension_semantics<parallel>, #tpu.dimension_semantics<parallel>], iteration_bounds = array<i64: 1, 1>, scalar_prefetch = 0 : i64, scratch_operands = 0 : i64, tpu.core_type = #tpu.core_type<tc>, window_params = [{transform_indices = @transform_0, window_bounds = array<i64: 2, 64>}, {pipeline_mode = #tpu.pipeline_mode<synchronous>, transform_indices = @transform_1, window_bounds = array<i64: 1, 64>}, {pipeline_mode = #tpu.pipeline_mode<synchronous>, transform_indices = @transform_2, window_bounds = array<i64: 1, 64>}, {transform_indices = @transform_3, window_bounds = array<i64: 64, 8>}, {transform_indices = @transform_4, window_bounds = array<i64: 1, 8>}, {transform_indices = @transform_5, window_bounds = array<i64: 2, 8>}]} {
    %c0 = arith.constant 0 : index
    %c0_0 = arith.constant 0 : index
    %0 = vector.load %arg2[%c0, %c0_0] : memref<2x64xf32, #tpu.memory_space<vmem>>, vector<2x64xf32>
    %cst = arith.constant dense<0.000000e+00> : vector<2xf32>
    %1 = vector.multi_reduction <add>, %0, %cst [1] : vector<2x64xf32> to vector<2xf32>
    %2 = vector.shape_cast %1 : vector<2xf32> to vector<2x1xf32>
    %cst_1 = arith.constant 6.400000e+01 : f32
    %3 = vector.broadcast %cst_1 : f32 to vector<2x1xf32>
    %4 = arith.divf %2, %3 : vector<2x1xf32>
    %5 = vector.broadcast %4 : vector<2x1xf32> to vector<2x64xf32>
    %6 = arith.subf %0, %5 : vector<2x64xf32>
    %7 = arith.mulf %6, %6 : vector<2x64xf32>
    %cst_2 = arith.constant dense<0.000000e+00> : vector<2xf32>
    %8 = vector.multi_reduction <add>, %7, %cst_2 [1] : vector<2x64xf32> to vector<2xf32>
    %9 = vector.shape_cast %8 : vector<2xf32> to vector<2x1xf32>
    %cst_3 = arith.constant 6.400000e+01 : f32
    %10 = vector.broadcast %cst_3 : f32 to vector<2x1xf32>
    %11 = arith.divf %9, %10 : vector<2x1xf32>
    %12 = vector.broadcast %4 : vector<2x1xf32> to vector<2x64xf32>
    %13 = arith.subf %0, %12 : vector<2x64xf32>
    %cst_4 = arith.constant 9.99999974E-6 : f32
    %14 = vector.broadcast %cst_4 : f32 to vector<2x1xf32>
    %15 = arith.addf %11, %14 : vector<2x1xf32>
    %16 = math.rsqrt %15 : vector<2x1xf32>
    %17 = vector.broadcast %16 : vector<2x1xf32> to vector<2x64xf32>
    %18 = arith.mulf %13, %17 : vector<2x64xf32>
    %c0_5 = arith.constant 0 : index
    %c0_6 = arith.constant 0 : index
    %19 = vector.load %arg3[%c0_5, %c0_6] : memref<1x64xf32, #tpu.memory_space<vmem>>, vector<1x64xf32>
    %20 = vector.broadcast %19 : vector<1x64xf32> to vector<2x64xf32>
    %21 = arith.mulf %18, %20 : vector<2x64xf32>
    %c0_7 = arith.constant 0 : index
    %c0_8 = arith.constant 0 : index
    %22 = vector.load %arg4[%c0_7, %c0_8] : memref<1x64xf32, #tpu.memory_space<vmem>>, vector<1x64xf32>
    %23 = vector.broadcast %22 : vector<1x64xf32> to vector<2x64xf32>
    %24 = arith.addf %21, %23 : vector<2x64xf32>
    %25 = arith.truncf %24 : vector<2x64xf32> to vector<2x64xbf16>
    %c0_9 = arith.constant 0 : index
    %c0_10 = arith.constant 0 : index
    %26 = vector.load %arg5[%c0_9, %c0_10] : memref<64x8xf32, #tpu.memory_space<vmem>>, vector<64x8xf32>
    %27 = arith.truncf %26 : vector<64x8xf32> to vector<64x8xbf16>
    %cst_11 = arith.constant dense<0.000000e+00> : vector<2x8xf32>
    %28 = tpu.matmul %25, %27, %cst_11 {dimension_numbers = #tpu.dot_dimension_numbers<[1], [0], [0], [1], [0, 0, 1, 1], [], []>} : vector<2x64xbf16>, vector<64x8xbf16>, vector<2x8xf32> -> vector<2x8xf32>
    %c0_12 = arith.constant 0 : index
    %c0_13 = arith.constant 0 : index
    %29 = vector.load %arg6[%c0_12, %c0_13] : memref<1x8xf32, #tpu.memory_space<vmem>>, vector<1x8xf32>
    %30 = vector.broadcast %29 : vector<1x8xf32> to vector<2x8xf32>
    %31 = arith.addf %28, %30 : vector<2x8xf32>
    %c0_14 = arith.constant 0 : index
    %c0_15 = arith.constant 0 : index
    %32 = vector.load %arg7[%c0_14, %c0_15] : memref<2x8xf32, #tpu.memory_space<vmem>>, vector<2x8xf32>
    tpu.vector_store %arg7[%c0_14, %c0_15], %31 {strides = array<i32>} : memref<2x8xf32, #tpu.memory_space<vmem>>, vector<2x8xf32>,
    return
  }
  func.func @transform_0(%arg0: i32, %arg1: i32) -> (i32, i32) {
    %c0_i32 = arith.constant 0 : i32
    %c0_i32_0 = arith.constant 0 : i32
    return %arg0, %c0_i32 : i32, i32
  }
  func.func @transform_1(%arg0: i32, %arg1: i32) -> (i32, i32) {
    %c0_i32 = arith.constant 0 : i32
    %c0_i32_0 = arith.constant 0 : i32
    %c0_i32_1 = arith.constant 0 : i32
    return %c0_i32, %c0_i32_0 : i32, i32
  }
  func.func @transform_2(%arg0: i32, %arg1: i32) -> (i32, i32) {
    %c0_i32 = arith.constant 0 : i32
    %c0_i32_0 = arith.constant 0 : i32
    %c0_i32_1 = arith.constant 0 : i32
    return %c0_i32, %c0_i32_0 : i32, i32
  }
  func.func @transform_3(%arg0: i32, %arg1: i32) -> (i32, i32) {
    %c0_i32 = arith.constant 0 : i32
    %c0_i32_0 = arith.constant 0 : i32
    return %c0_i32, %arg1 : i32, i32
  }
  func.func @transform_4(%arg0: i32, %arg1: i32) -> (i32, i32) {
    %c0_i32 = arith.constant 0 : i32
    %c0_i32_0 = arith.constant 0 : i32
    return %c0_i32, %arg1 : i32, i32
  }
  func.func @transform_5(%arg0: i32, %arg1: i32) -> (i32, i32) {
    %c0_i32 = arith.constant 0 : i32
    return %arg0, %arg1 : i32, i32
  }
}

</mosaic_0001>

<bundles_post_ra>
// kernel: swin_forward.34
= control target key start
LH: loop header
LB: loop body
LE: loop exit
PB: predicated region body
PF: predicated region fallthrough
CT: control target
= control target key end

     0   :  { %vm55_vm0 = vcmask 392192   ;;  %vm177_vm1 = vcmask 261120   ;;  %s407_s1 = inlined_call_operand.vmem [shape: f32[48,32], index: 1, kind: input, shape index: {}]   ;;  %s408_s0 = inlined_call_operand.vmem [shape: f32[128,48], index: 0, kind: input, shape index: {}]   ;;  %s409_s2 = inlined_call_operand.vmem [shape: f32[1,32], index: 2, kind: input, shape index: {}]   ;;  %s410_s3 = inlined_call_operand.vmem [shape: f32[128,32], index: 3, kind: output, shape index: {}]  }
   0x1   :  { %v39_v0 = vld [vmem:[%s407_s1] sm:$0xff]  ;;  %v40_v1 = vld [vmem:[%s407_s1 + $0x8] sm:$0xff]  ;;  %v41_v2 = vld [vmem:[%s407_s1 + $0x10] sm:$0xff] }
   0x2   :  { %v45_v3 = vpack.c.bf16 %v40_v1, %v39_v0  ;;  %v42_v4 = vld [vmem:[%s407_s1 + $0x18] sm:$0xff]  ;;  %v43_v5 = vld [vmem:[%s407_s1 + $0x20] sm:$0xff]  ;;  %v44_v6 = vld [vmem:[%s407_s1 + $0x28] sm:$0xff] }
   0x3   :  { %v46_v7 = vpack.c.bf16 %v42_v4, %v41_v2  ;;  %v15_v8 = vld [vmem:[%s408_s0] sm:$0xff]  ;;  %v16_v9 = vld [vmem:[%s408_s0 + $0x8] sm:$0xff]  ;;  %v47_v14 = vpack.c.bf16 %v44_v6, %v43_v5  ;;  %v17_v15 = vld [vmem:[%s408_s0 + $0x10] sm:$0xff] }
   0x4   :  { %v23_v10 = vld [vmem:[%s408_s0 + $0x40] sm:$0xff]  ;;  %218 = vmatprep.subr.bf16.mxu0 %v45_v3  ;;  %240 = vmatprep.subr.bf16.mxu1 %v45_v3  ;;  %v31_v11 = vpack.c.bf16 %v16_v9, %v15_v8  ;;  %v24_v12 = vld [vmem:[%s408_s0 + $0x48] sm:$0xff]  ;;  %v18_v16 = vld [vmem:[%s408_s0 + $0x18] sm:$0xff] }
   0x5   :  { %219 = vmatpush3.bf16.msra.mxu0 %v45_v3  ;;  %243 = vmatpush3.bf16.msra.mxu1 %v45_v3  ;;  %v35_v13 = vpack.c.bf16 %v24_v12, %v23_v10  ;;  %v25_v17 = vld [vmem:[%s408_s0 + $0x50] sm:$0xff]  ;;  %v26_v18 = vld [vmem:[%s408_s0 + $0x58] sm:$0xff]  ;;  %v19_v19 = vld [vmem:[%s408_s0 + $0x20] sm:$0xff]  ;;  %v32_v23 = vpack.c.bf16 %v18_v16, %v17_v15 }
   0x6   :  { %220 = vmatprep.subr.bf16.mxu0 %v46_v7  ;;  %241 = vmatprep.subr.bf16.mxu1 %v46_v7  ;;  %v20_v20 = vld [vmem:[%s408_s0 + $0x28] sm:$0xff]  ;;  %v27_v21 = vld [vmem:[%s408_s0 + $0x60] sm:$0xff]  ;;  %v36_v24 = vpack.c.bf16 %v26_v18, %v25_v17  ;;  %v21_v27 = vld [vmem:[%s408_s0 + $0x30] sm:$0xff] }
   0x7   :  { %224 = vmatprep.mubr.msk.bf16.mxu0 %vm55_vm0, %v31_v11  ;;  %232 = vmatprep.mubr.msk.bf16.mxu1 %vm55_vm0, %v35_v13  ;;  %v28_v22 = vld [vmem:[%s408_s0 + $0x68] sm:$0xff]  ;;  %v33_v25 = vpack.c.bf16 %v20_v20, %v19_v19  ;;  %v22_v28 = vld [vmem:[%s408_s0 + $0x38] sm:$0xff]  ;;  %v29_v29 = vld [vmem:[%s408_s0 + $0x70] sm:$0xff] }
   0x8   :  { %v37_v26 = vpack.c.bf16 %v28_v22, %v27_v21  ;;  %v30_v30 = vld [vmem:[%s408_s0 + $0x78] sm:$0xff]  ;;  %v34_v31 = vpack.c.bf16 %v22_v28, %v21_v27  ;;  %v198_v33 = vld [vmem:[%s409_s2] ss:$0 sm:$0xff] }
   0x9   :  { %221 = vmatpush3.bf16.msra.mxu0 %v46_v7  ;;  %244 = vmatpush3.bf16.msra.mxu1 %v46_v7  ;;  %v38_v32 = vpack.c.bf16 %v30_v30, %v29_v29 }
   0xa   :  { %222 = vmatprep.subr.bf16.mxu0 %v47_v14  ;;  %242 = vmatprep.subr.bf16.mxu1 %v47_v14 }
   0xd   :  { %223 = vmatpush3.bf16.msra.mxu0 %v47_v14  ;;  %245 = vmatpush3.bf16.msra.mxu1 %v47_v14 }
  0x10   :  { %225 = vmatmul.mubr.msk.bf16.vlgmr.msra.gmra.mrb[0].mxu0 %vm55_vm0, %v32_v23  ;;  %233 = vmatmul.mubr.msk.bf16.vlgmr.msra.gmra.mrb[0].mxu1 %vm55_vm0, %v36_v24 }
  0x11   :  { %228 = vmatprep.mubr.msk.bf16.mxu0 %vm55_vm0, %v33_v25  ;;  %236 = vmatprep.mubr.msk.bf16.mxu1 %vm55_vm0, %v37_v26 }
  0x18   :  { %229 = vmatmul.mubr.msk.bf16.gmra.mrb[4].mxu0 %vm55_vm0, %v34_v31  ;;  %237 = vmatmul.mubr.msk.bf16.gmra.mrb[4].mxu1 %vm55_vm0, %v38_v32 }
  0xe3   :  { %v226_v34 = vpop.f32.mrb[0].mxu0  ;;  %v234_v35 = vpop.f32.mrb[0].mxu1 }
  0xe4   :  { %v123_v36 = vadd.f32 %v226_v34, %v198_v33  ;;  %v155_v37 = vadd.f32 %v234_v35, %v198_v33  ;;  %v114_v38 = vpop.f32.mrb[1].mxu0  ;;  %v146_v39 = vpop.f32.mrb[1].mxu1 }
  0xe5   :  { %v115_v40 = vadd.f32 %v198_v33, %v114_v38  ;;  %v147_v41 = vadd.f32 %v198_v33, %v146_v39  ;;  %v227_v42 = vpop.f32.mrb[2].mxu0  ;;  %v235_v43 = vpop.f32.mrb[2].mxu1 }
  0xe6   :  { %180 = vst.msk [vmem:[%s410_s3 + $0x10] sm:$0xff] %vm177_vm1, %v123_v36  ;;  %188 = vst.msk [vmem:[%s410_s3 + $0x50] sm:$0xff] %vm177_vm1, %v155_v37  ;;  %v126_v44 = vadd.f32 %v227_v42, %v198_v33  ;;  %v158_v45 = vadd.f32 %v235_v43, %v198_v33  ;;  %v117_v46 = vpop.f32.mrb[3].mxu0  ;;  %v149_v47 = vpop.f32.mrb[3].mxu1 }
  0xe7   :  { %178 = vst.msk [vmem:[%s410_s3] sm:$0xff] %vm177_vm1, %v115_v40  ;;  %186 = vst.msk [vmem:[%s410_s3 + $0x40] sm:$0xff] %vm177_vm1, %v147_v41  ;;  %v118_v48 = vadd.f32 %v198_v33, %v117_v46  ;;  %v150_v49 = vadd.f32 %v198_v33, %v149_v47 }
  0xe8   :  { %181 = vst.msk [vmem:[%s410_s3 + $0x18] sm:$0xff] %vm177_vm1, %v126_v44  ;;  %189 = vst.msk [vmem:[%s410_s3 + $0x58] sm:$0xff] %vm177_vm1, %v158_v45 }
  0xe9   :  { %179 = vst.msk [vmem:[%s410_s3 + $0x8] sm:$0xff] %vm177_vm1, %v118_v48  ;;  %187 = vst.msk [vmem:[%s410_s3 + $0x48] sm:$0xff] %vm177_vm1, %v150_v49 }
  0xeb   :  { %v230_v50 = vpop.f32.mrb[4].mxu0  ;;  %v238_v51 = vpop.f32.mrb[4].mxu1 }
  0xec   :  { %v139_v52 = vadd.f32 %v230_v50, %v198_v33  ;;  %v171_v53 = vadd.f32 %v238_v51, %v198_v33  ;;  %v130_v54 = vpop.f32.mrb[5].mxu0  ;;  %v162_v55 = vpop.f32.mrb[5].mxu1 }
  0xed   :  { %v131_v56 = vadd.f32 %v198_v33, %v130_v54  ;;  %v163_v57 = vadd.f32 %v198_v33, %v162_v55  ;;  %v231_v58 = vpop.f32.mrb[6].mxu0  ;;  %v239_v59 = vpop.f32.mrb[6].mxu1 }
  0xee   :  { %184 = vst.msk [vmem:[%s410_s3 + $0x30] sm:$0xff] %vm177_vm1, %v139_v52  ;;  %192 = vst.msk [vmem:[%s410_s3 + $0x70] sm:$0xff] %vm177_vm1, %v171_v53  ;;  %v142_v60 = vadd.f32 %v231_v58, %v198_v33  ;;  %v174_v61 = vadd.f32 %v239_v59, %v198_v33  ;;  %v133_v62 = vpop.f32.mrb[7].mxu0  ;;  %v165_v63 = vpop.f32.mrb[7].mxu1 }
  0xef   :  { %182 = vst.msk [vmem:[%s410_s3 + $0x20] sm:$0xff] %vm177_vm1, %v131_v56  ;;  %190 = vst.msk [vmem:[%s410_s3 + $0x60] sm:$0xff] %vm177_vm1, %v163_v57  ;;  %v134_v0 = vadd.f32 %v198_v33, %v133_v62  ;;  %v166_v1 = vadd.f32 %v198_v33, %v165_v63 }
  0xf0   :  { %185 = vst.msk [vmem:[%s410_s3 + $0x38] sm:$0xff] %vm177_vm1, %v142_v60  ;;  %193 = vst.msk [vmem:[%s410_s3 + $0x78] sm:$0xff] %vm177_vm1, %v174_v61 }
  0xf1   :  { %183 = vst.msk [vmem:[%s410_s3 + $0x28] sm:$0xff] %vm177_vm1, %v134_v0  ;;  %191 = vst.msk [vmem:[%s410_s3 + $0x68] sm:$0xff] %vm177_vm1, %v166_v1 }

// kernel: swin_forward.38
= control target key start
LH: loop header
LB: loop body
LE: loop exit
PB: predicated region body
PF: predicated region fallthrough
CT: control target
= control target key end

     0   :  { %vm37_vm0 = vcmask 261120   ;;  %vm435_vm1 = vcmask 785408   ;;  %s892_s0 = inlined_call_operand.vmem [shape: f32[128,32], index: 0, kind: input, shape index: {}]   ;;  %s893_s3 = inlined_call_operand.vmem [shape: f32[32,96], index: 3, kind: input, shape index: {}]   ;;  %s894_s1 = inlined_call_operand.vmem [shape: f32[1,32], index: 1, kind: input, shape index: {}]   ;;  %s895_s2 = inlined_call_operand.vmem [shape: f32[1,32], index: 2, kind: input, shape index: {}]   ;;  %s896_s4 = inlined_call_operand.vmem [shape: f32[1,96], index: 4, kind: input, shape index: {}]   ;;  %s897_s5 = inlined_call_operand.vmem [shape: f32[128,96], index: 5, kind: output, shape index: {}]  }
   0x1   :  { %v21_v0 = vld [vmem:[%s892_s0] sm:$0xff]  ;;  %v22_v2 = vld [vmem:[%s892_s0 + $0x8] sm:$0xff]  ;;  %v23_v8 = vld [vmem:[%s892_s0 + $0x10] sm:$0xff] }
   0x2   :  { %v29_v1 = vld [vmem:[%s892_s0 + $0x40] sm:$0xff]  ;;  %v38_v3 = vsel %vm37_vm0, %v21_v0, 0.0  ;;  %v30_v5 = vld [vmem:[%s892_s0 + $0x48] sm:$0xff]  ;;  %v41_v6 = vsel %vm37_vm0, %v22_v2, 0.0  ;;  %v24_v9 = vld [vmem:[%s892_s0 + $0x18] sm:$0xff]  ;;  %v44_v10 = vsel %vm37_vm0, %v23_v8, 0.0 }
   0x3   :  { %v62_v4 = vsel %vm37_vm0, %v29_v1, 0.0  ;;  %39 = vadd.xlane.f32.xlu0 %v38_v3  ;;  %v65_v7 = vsel %vm37_vm0, %v30_v5, 0.0  ;;  %v47_v11 = vsel %vm37_vm0, %v24_v9, 0.0  ;;  %v590_v12 = vld [vmem:[%s892_s0 + $0x50] sm:$0xff]  ;;  %v595_v13 = vld [vmem:[%s892_s0 + $0x58] sm:$0xff]  ;;  %v604_v16 = vld [vmem:[%s892_s0 + $0x20] sm:$0xff] }
   0x4   :  { %63 = vadd.xlane.f32.xlu1 %v62_v4  ;;  %v68_v14 = vsel %vm37_vm0, %v590_v12, 0.0  ;;  %v71_v15 = vsel %vm37_vm0, %v595_v13, 0.0  ;;  %v609_v17 = vld [vmem:[%s892_s0 + $0x28] sm:$0xff]  ;;  %v50_v18 = vsel %vm37_vm0, %v604_v16, 0.0  ;;  %v618_v20 = vld [vmem:[%s892_s0 + $0x60] sm:$0xff]  ;;  %v632_v24 = vld [vmem:[%s892_s0 + $0x30] sm:$0xff] }
   0x5   :  { %v53_v19 = vsel %vm37_vm0, %v609_v17, 0.0  ;;  %v623_v21 = vld [vmem:[%s892_s0 + $0x68] sm:$0xff]  ;;  %v74_v22 = vsel %vm37_vm0, %v618_v20, 0.0  ;;  %v637_v25 = vld [vmem:[%s892_s0 + $0x38] sm:$0xff]  ;;  %v56_v26 = vsel %vm37_vm0, %v632_v24, 0.0  ;;  %v646_v28 = vld [vmem:[%s892_s0 + $0x70] sm:$0xff] }
   0x6   :  { %v77_v23 = vsel %vm37_vm0, %v623_v21, 0.0  ;;  %v59_v27 = vsel %vm37_vm0, %v637_v25, 0.0  ;;  %v651_v29 = vld [vmem:[%s892_s0 + $0x78] sm:$0xff]  ;;  %v80_v30 = vsel %vm37_vm0, %v646_v28, 0.0 }
   0x7   :  { %42 = vadd.xlane.f32.xlu0 %v41_v6  ;;  %v83_v31 = vsel %vm37_vm0, %v651_v29, 0.0 }
   0x8   :  { %66 = vadd.xlane.f32.xlu1 %v65_v7 }
   0xb   :  { %45 = vadd.xlane.f32.xlu0 %v44_v10 }
   0xc   :  { %48 = vadd.xlane.f32.xlu1 %v47_v11 }
   0xf   :  { %69 = vadd.xlane.f32.xlu0 %v68_v14 }
  0x10   :  { %72 = vadd.xlane.f32.xlu1 %v71_v15 }
  0x13   :  { %51 = vadd.xlane.f32.xlu0 %v50_v18 }
  0x14   :  { %54 = vadd.xlane.f32.xlu1 %v53_v19 }
  0x17   :  { %75 = vadd.xlane.f32.xlu0 %v74_v22 }
  0x18   :  { %78 = vadd.xlane.f32.xlu1 %v77_v23 }
  0x1b   :  { %57 = vadd.xlane.f32.xlu0 %v56_v26 }
  0x1c   :  { %60 = vadd.xlane.f32.xlu1 %v59_v27 }
  0x1f   :  { %81 = vadd.xlane.f32.xlu0 %v80_v30 }
  0x20   :  { %84 = vadd.xlane.f32.xlu1 %v83_v31 }
  0x90   :  { %v40_v32 = vpop.xlane.xlu0 %39 }
  0x91   :  { %v64_v33 = vpop.xlane.xlu1 %63  ;;  %v87_v34 = vmul.f32 0.03125, %v40_v32 }
  0x92   :  { %v95_v35 = vmul.f32 0.03125, %v64_v33 }
  0x93   :  { %v657_v36 = vsub.f32 %v21_v0, %v87_v34 }
  0x94   :  { %v659_v37 = vsub.f32 %v29_v1, %v95_v35  ;;  %v43_v38 = vpop.xlane.xlu0 %42 }
  0x95   :  { %v67_v39 = vpop.xlane.xlu1 %66  ;;  %v88_v40 = vmul.f32 0.03125, %v43_v38  ;;  %v119_v42 = vmul.f32 %v657_v36, %v657_v36 }
  0x96   :  { %v96_v41 = vmul.f32 0.03125, %v67_v39  ;;  %v127_v43 = vmul.f32 %v659_v37, %v659_v37 }
  0x97   :  { %v665_v44 = vsub.f32 %v22_v2, %v88_v40  ;;  %v135_v46 = vsel %vm37_vm0, %v119_v42, 0.0 }
  0x98   :  { %v667_v45 = vsub.f32 %v30_v5, %v96_v41  ;;  %136 = vadd.xlane.f32.xlu0 %v135_v46  ;;  %v46_v47 = vpop.xlane.xlu0 %45  ;;  %v159_v49 = vsel %vm37_vm0, %v127_v43, 0.0 }
  0x99   :  { %v49_v48 = vpop.xlane.xlu1 %48  ;;  %v89_v50 = vmul.f32 0.03125, %v46_v47  ;;  %v120_v52 = vmul.f32 %v665_v44, %v665_v44 }
  0x9a   :  { %v90_v51 = vmul.f32 0.03125, %v49_v48  ;;  %v128_v53 = vmul.f32 %v667_v45, %v667_v45 }
  0x9b   :  { %v675_v54 = vsub.f32 %v23_v8, %v89_v50  ;;  %v138_v56 = vsel %vm37_vm0, %v120_v52, 0.0 }
  0x9c   :  { %v677_v55 = vsub.f32 %v24_v9, %v90_v51  ;;  %160 = vadd.xlane.f32.xlu0 %v159_v49  ;;  %139 = vadd.xlane.f32.xlu1 %v138_v56  ;;  %v70_v57 = vpop.xlane.xlu0 %69  ;;  %v162_v59 = vsel %vm37_vm0, %v128_v53, 0.0  ;;  %v302_v53 = vld [vmem:[%s893_s3 + $0x8] sm:$0xff] }
  0x9d   :  { %v73_v58 = vpop.xlane.xlu1 %72  ;;  %v97_v60 = vmul.f32 0.03125, %v70_v57  ;;  %v121_v62 = vmul.f32 %v675_v54, %v675_v54  ;;  %v303_v57 = vld [vmem:[%s893_s3 + $0x10] sm:$0xff] }
  0x9e   :  { %v98_v61 = vmul.f32 0.03125, %v73_v58  ;;  %v122_v63 = vmul.f32 %v677_v55, %v677_v55  ;;  %v304_v58 = vld [vmem:[%s893_s3 + $0x18] sm:$0xff] }
  0x9f   :  { %v686_v0 = vsub.f32 %v590_v12, %v97_v60  ;;  %v141_v2 = vsel %vm37_vm0, %v121_v62, 0.0 }
  0xa0   :  { %v689_v1 = vsub.f32 %v595_v13, %v98_v61  ;;  %163 = vadd.xlane.f32.xlu1 %v162_v59  ;;  %142 = vadd.xlane.f32.xlu0 %v141_v2  ;;  %v52_v3 = vpop.xlane.xlu0 %51  ;;  %v144_v5 = vsel %vm37_vm0, %v122_v63, 0.0  ;;  %v306_v59 = vpack.c.bf16 %v304_v58, %v303_v57 }
  0xa1   :  { %v55_v4 = vpop.xlane.xlu1 %54  ;;  %v91_v6 = vmul.f32 0.03125, %v52_v3  ;;  %v129_v8 = vmul.f32 %v686_v0, %v686_v0 }
  0xa2   :  { %v92_v7 = vmul.f32 0.03125, %v55_v4  ;;  %v130_v9 = vmul.f32 %v689_v1, %v689_v1 }
  0xa3   :  { %v698_v10 = vsub.f32 %v604_v16, %v91_v6  ;;  %v165_v12 = vsel %vm37_vm0, %v129_v8, 0.0 }
  0xa4   :  { %v701_v11 = vsub.f32 %v609_v17, %v92_v7  ;;  %145 = vadd.xlane.f32.xlu1 %v144_v5  ;;  %166 = vadd.xlane.f32.xlu0 %v165_v12  ;;  %v76_v13 = vpop.xlane.xlu0 %75  ;;  %v168_v15 = vsel %vm37_vm0, %v130_v9, 0.0 }
  0xa5   :  { %v79_v14 = vpop.xlane.xlu1 %78  ;;  %v99_v18 = vmul.f32 0.03125, %v76_v13  ;;  %v123_v22 = vmul.f32 %v698_v10, %v698_v10 }
  0xa6   :  { %v100_v19 = vmul.f32 0.03125, %v79_v14  ;;  %v124_v16 = vmul.f32 %v701_v11, %v701_v11 }
  0xa7   :  { %v710_v23 = vsub.f32 %v618_v20, %v99_v18  ;;  %v147_v26 = vsel %vm37_vm0, %v123_v22, 0.0 }
  0xa8   :  { %v713_v17 = vsub.f32 %v623_v21, %v100_v19  ;;  %169 = vadd.xlane.f32.xlu1 %v168_v15  ;;  %148 = vadd.xlane.f32.xlu0 %v147_v26  ;;  %v58_v27 = vpop.xlane.xlu0 %57  ;;  %v150_v31 = vsel %vm37_vm0, %v124_v16, 0.0 }
  0xa9   :  { %v61_v30 = vpop.xlane.xlu1 %60  ;;  %v93_v32 = vmul.f32 0.03125, %v58_v27  ;;  %v131_v34 = vmul.f32 %v710_v23, %v710_v23 }
  0xaa   :  { %v94_v33 = vmul.f32 0.03125, %v61_v30  ;;  %v132_v20 = vmul.f32 %v713_v17, %v713_v17 }
  0xab   :  { %v722_v35 = vsub.f32 %v632_v24, %v93_v32  ;;  %v171_v38 = vsel %vm37_vm0, %v131_v34, 0.0 }
  0xac   :  { %v725_v21 = vsub.f32 %v637_v25, %v94_v33  ;;  %151 = vadd.xlane.f32.xlu1 %v150_v31  ;;  %172 = vadd.xlane.f32.xlu0 %v171_v38  ;;  %v82_v39 = vpop.xlane.xlu0 %81  ;;  %v174_v41 = vsel %vm37_vm0, %v132_v20, 0.0  ;;  %v763_v20 = vld [vmem:[%s894_s1] ss:$0 sm:$0xff] }
  0xad   :  { %v85_v40 = vpop.xlane.xlu1 %84  ;;  %v101_v42 = vmul.f32 0.03125, %v82_v39  ;;  %v125_v46 = vmul.f32 %v722_v35, %v722_v35 }
  0xae   :  { %v102_v43 = vmul.f32 0.03125, %v85_v40  ;;  %v126_v24 = vmul.f32 %v725_v21, %v725_v21 }
  0xaf   :  { %v734_v47 = vsub.f32 %v646_v28, %v101_v42  ;;  %v153_v48 = vsel %vm37_vm0, %v125_v46, 0.0 }
  0xb0   :  { %v737_v25 = vsub.f32 %v651_v29, %v102_v43  ;;  %175 = vadd.xlane.f32.xlu1 %v174_v41  ;;  %154 = vadd.xlane.f32.xlu0 %v153_v48  ;;  %v156_v49 = vsel %vm37_vm0, %v126_v24, 0.0  ;;  %v301_v29 = vld [vmem:[%s893_s3] sm:$0xff] }
  0xb1   :  { %v133_v50 = vmul.f32 %v734_v47, %v734_v47  ;;  %v305_v56 = vpack.c.bf16 %v302_v53, %v301_v29 }
  0xb2   :  { %v134_v51 = vmul.f32 %v737_v25, %v737_v25 }
  0xb3   :  { %v177_v52 = vsel %vm37_vm0, %v133_v50, 0.0  ;;  %477 = vmatprep.subr.bf16.mxu0 %v305_v56  ;;  %497 = vmatprep.subr.bf16.mxu1 %v305_v56 }
  0xb4   :  { %157 = vadd.xlane.f32.xlu1 %v156_v49  ;;  %178 = vadd.xlane.f32.xlu0 %v177_v52  ;;  %v180_v28 = vsel %vm37_vm0, %v134_v51, 0.0  ;;  %v770_v49 = vld [vmem:[%s895_s2] ss:$0 sm:$0xff] }
  0xb5   :  { %478 = vmatpush3.bf16.msra.mxu0 %v305_v56  ;;  %499 = vmatpush3.bf16.msra.mxu1 %v305_v56 }
  0xb6   :  { %479 = vmatprep.subr.bf16.mxu0 %v306_v59  ;;  %498 = vmatprep.subr.bf16.mxu1 %v306_v59 }
  0xb8   :  { %181 = vadd.xlane.f32.xlu1 %v180_v28 }
  0xb9   :  { %480 = vmatpush3.bf16.msra.mxu0 %v306_v59  ;;  %500 = vmatpush3.bf16.msra.mxu1 %v306_v59 }
 0x125   :  { %v137_v60 = vpop.xlane.xlu0 %136 }
 0x126   :  { %v183_v61 = vmul.f32 0.03125, %v137_v60 }
 0x128   :  { %v199_v62 = vadd.f32 1e-05, %v183_v61 }
 0x129   :  { %v140_v63 = vpop.xlane.xlu1 %139  ;;  %v161_v2 = vpop.xlane.xlu0 %160 }
 0x12a   :  { %501 = vrsqrt.f32 %v199_v62  ;;  %v184_v3 = vmul.f32 0.03125, %v140_v63  ;;  %v191_v4 = vmul.f32 0.03125, %v161_v2 }
 0x12c   :  { %v200_v5 = vadd.f32 1e-05, %v184_v3  ;;  %v207_v6 = vadd.f32 1e-05, %v191_v4 }
 0x12d   :  { %v164_v7 = vpop.xlane.xlu1 %163  ;;  %v143_v8 = vpop.xlane.xlu0 %142 }
 0x12e   :  { %503 = vrsqrt.f32 %v200_v5  ;;  %v192_v9 = vmul.f32 0.03125, %v164_v7  ;;  %v185_v12 = vmul.f32 0.03125, %v143_v8 }
 0x12f   :  { %505 = vrsqrt.f32 %v207_v6 }
 0x130   :  { %v208_v13 = vadd.f32 1e-05, %v192_v9  ;;  %v201_v14 = vadd.f32 1e-05, %v185_v12 }
 0x131   :  { %v146_v15 = vpop.xlane.xlu1 %145  ;;  %v167_v18 = vpop.xlane.xlu0 %166 }
 0x132   :  { %507 = vrsqrt.f32 %v208_v13  ;;  %v186_v19 = vmul.f32 0.03125, %v146_v15  ;;  %v193_v22 = vmul.f32 0.03125, %v167_v18 }
 0x133   :  { %509 = vrsqrt.f32 %v201_v14 }
 0x134   :  { %v502_v16 = vpop.eup %501  ;;  %v202_v26 = vadd.f32 1e-05, %v186_v19  ;;  %v209_v27 = vadd.f32 1e-05, %v193_v22 }
 0x135   :  { %v170_v30 = vpop.xlane.xlu1 %169  ;;  %v149_v31 = vpop.xlane.xlu0 %148  ;;  %v231_v32 = vmul.f32 %v502_v16, %v657_v36 }
 0x136   :  { %511 = vrsqrt.f32 %v202_v26  ;;  %v194_v33 = vmul.f32 0.03125, %v170_v30  ;;  %v187_v34 = vmul.f32 0.03125, %v149_v31 }
 0x137   :  { %513 = vrsqrt.f32 %v209_v27  ;;  %v254_v24 = vmul.f32 %v763_v20, %v231_v32 }
 0x138   :  { %v504_v38 = vpop.eup %503  ;;  %v210_v39 = vadd.f32 1e-05, %v194_v33  ;;  %v203_v40 = vadd.f32 1e-05, %v187_v34 }
 0x139   :  { %v506_v41 = vpop.eup %505  ;;  %v152_v42 = vpop.xlane.xlu1 %151  ;;  %v232_v46 = vmul.f32 %v504_v38, %v665_v44  ;;  %v277_v57 = vadd.f32 %v770_v49, %v254_v24 }
 0x13a   :  { %v173_v43 = vpop.xlane.xlu0 %172  ;;  %515 = vrsqrt.f32 %v210_v39  ;;  %v188_v36 = vmul.f32 0.03125, %v152_v42  ;;  %v239_v50 = vmul.f32 %v506_v41, %v659_v37 }
 0x13b   :  { %v195_v48 = vmul.f32 0.03125, %v173_v43  ;;  %517 = vrsqrt.f32 %v203_v40  ;;  %v255_v51 = vmul.f32 %v763_v20, %v232_v46 }
 0x13c   :  { %v508_v52 = vpop.eup %507  ;;  %v204_v28 = vadd.f32 1e-05, %v188_v36  ;;  %v262_v60 = vmul.f32 %v763_v20, %v239_v50 }
 0x13d   :  { %v211_v29 = vadd.f32 1e-05, %v195_v48  ;;  %v510_v53 = vpop.eup %509  ;;  %v176_v44 = vpop.xlane.xlu1 %175  ;;  %v278_v58 = vadd.f32 %v770_v49, %v255_v51  ;;  %v240_v59 = vmul.f32 %v508_v52, %v667_v45 }
 0x13e   :  { %v155_v56 = vpop.xlane.xlu0 %154  ;;  %v233_v61 = vmul.f32 %v510_v53, %v675_v54  ;;  %519 = vrsqrt.f32 %v204_v28  ;;  %v196_v37 = vmul.f32 0.03125, %v176_v44  ;;  %v285_v9 = vadd.f32 %v770_v49, %v262_v60 }
 0x13f   :  { %v189_v62 = vmul.f32 0.03125, %v155_v56  ;;  %521 = vrsqrt.f32 %v211_v29  ;;  %v293_v63 = vpack.c.bf16 %v278_v58, %v277_v57  ;;  %v263_v2 = vmul.f32 %v763_v20, %v240_v59 }
 0x140   :  { %v512_v3 = vpop.eup %511  ;;  %v212_v4 = vadd.f32 1e-05, %v196_v37  ;;  %v256_v12 = vmul.f32 %v763_v20, %v233_v61 }
 0x141   :  { %v205_v5 = vadd.f32 1e-05, %v189_v62  ;;  %v514_v6 = vpop.eup %513  ;;  %v234_v7 = vmul.f32 %v512_v3, %v677_v55  ;;  %v158_v8 = vpop.xlane.xlu1 %157  ;;  %481 = vmatprep.mubr.msk.bf16.mxu0 %vm37_vm0, %v293_v63  ;;  %v286_v54 = vadd.f32 %v770_v49, %v263_v2 }
 0x142   :  { %v179_v45 = vpop.xlane.xlu0 %178  ;;  %v241_v13 = vmul.f32 %v514_v6, %v686_v0  ;;  %523 = vrsqrt.f32 %v212_v4  ;;  %v190_v14 = vmul.f32 0.03125, %v158_v8  ;;  %v279_v31 = vadd.f32 %v770_v49, %v256_v12 }
 0x143   :  { %v197_v15 = vmul.f32 0.03125, %v179_v45  ;;  %525 = vrsqrt.f32 %v205_v5  ;;  %v297_v18 = vpack.c.bf16 %v286_v54, %v285_v9  ;;  %v257_v19 = vmul.f32 %v763_v20, %v234_v7 }
 0x144   :  { %v516_v55 = vpop.eup %515  ;;  %v206_v22 = vadd.f32 1e-05, %v190_v14  ;;  %v264_v32 = vmul.f32 %v763_v20, %v241_v13 }
 0x145   :  { %v213_v16 = vadd.f32 1e-05, %v197_v15  ;;  %v518_v26 = vpop.eup %517  ;;  %v242_v27 = vmul.f32 %v516_v55, %v689_v1  ;;  %v182_v30 = vpop.xlane.xlu1 %181  ;;  %489 = vmatprep.mubr.msk.bf16.mxu1 %vm37_vm0, %v297_v18  ;;  %v280_v0 = vadd.f32 %v770_v49, %v257_v19 }
 0x146   :  { %v235_v33 = vmul.f32 %v518_v26, %v698_v10  ;;  %527 = vrsqrt.f32 %v206_v22  ;;  %v198_v34 = vmul.f32 0.03125, %v182_v30  ;;  %v287_v43 = vadd.f32 %v770_v49, %v264_v32 }
 0x147   :  { %529 = vrsqrt.f32 %v213_v16  ;;  %v294_v38 = vpack.c.bf16 %v280_v0, %v279_v31  ;;  %v265_v39 = vmul.f32 %v763_v20, %v242_v27 }
 0x148   :  { %v520_v40 = vpop.eup %519  ;;  %v214_v41 = vadd.f32 1e-05, %v198_v34  ;;  %v258_v24 = vmul.f32 %v763_v20, %v235_v33 }
 0x149   :  { %v522_v1 = vpop.eup %521  ;;  %v236_v42 = vmul.f32 %v520_v40, %v701_v11  ;;  %482 = vmatmul.mubr.msk.bf16.vlgmr.msra.gmra.mrb[0].mxu0 %vm37_vm0, %v294_v38  ;;  %v288_v46 = vadd.f32 %v770_v49, %v265_v39 }
 0x14a   :  { %v243_v10 = vmul.f32 %v522_v1, %v710_v23  ;;  %531 = vrsqrt.f32 %v214_v41  ;;  %v281_v11 = vadd.f32 %v770_v49, %v258_v24 }
 0x14b   :  { %v298_v36 = vpack.c.bf16 %v288_v46, %v287_v43  ;;  %v259_v48 = vmul.f32 %v763_v20, %v236_v42 }
 0x14c   :  { %v524_v50 = vpop.eup %523  ;;  %v266_v29 = vmul.f32 %v763_v20, %v243_v10 }
 0x14d   :  { %v526_v51 = vpop.eup %525  ;;  %v244_v52 = vmul.f32 %v524_v50, %v713_v17  ;;  %490 = vmatmul.mubr.msk.bf16.vlgmr.msra.gmra.mrb[0].mxu1 %vm37_vm0, %v298_v36  ;;  %v282_v28 = vadd.f32 %v770_v49, %v259_v48 }
 0x14e   :  { %v237_v53 = vmul.f32 %v526_v51, %v722_v35  ;;  %v289_v17 = vadd.f32 %v770_v49, %v266_v29 }
 0x14f   :  { %v295_v44 = vpack.c.bf16 %v282_v28, %v281_v11  ;;  %v267_v23 = vmul.f32 %v763_v20, %v244_v52 }
 0x150   :  { %v528_v56 = vpop.eup %527  ;;  %v260_v60 = vmul.f32 %v763_v20, %v237_v53 }
 0x151   :  { %v530_v57 = vpop.eup %529  ;;  %v238_v58 = vmul.f32 %v528_v56, %v725_v21  ;;  %485 = vmatprep.mubr.msk.bf16.mxu0 %vm37_vm0, %v295_v44  ;;  %v290_v59 = vadd.f32 %v770_v49, %v267_v23 }
 0x152   :  { %v245_v61 = vmul.f32 %v530_v57, %v734_v47  ;;  %v283_v21 = vadd.f32 %v770_v49, %v260_v60 }
 0x153   :  { %v299_v37 = vpack.c.bf16 %v290_v59, %v289_v17  ;;  %v261_v35 = vmul.f32 %v763_v20, %v238_v58 }
 0x154   :  { %v532_v62 = vpop.eup %531  ;;  %v268_v3 = vmul.f32 %v763_v20, %v245_v61 }
 0x155   :  { %v246_v63 = vmul.f32 %v532_v62, %v737_v25  ;;  %493 = vmatprep.mubr.msk.bf16.mxu1 %vm37_vm0, %v299_v37  ;;  %v284_v2 = vadd.f32 %v770_v49, %v261_v35  ;;  %v458_v25 = vld [vmem:[%s896_s4] ss:$0 sm:$0xff] }
 0x156   :  { %v291_v47 = vadd.f32 %v770_v49, %v268_v3 }
 0x157   :  { %v296_v4 = vpack.c.bf16 %v284_v2, %v283_v21  ;;  %v269_v5 = vmul.f32 %v763_v20, %v246_v63 }
 0x159   :  { %486 = vmatmul.mubr.msk.bf16.gmra.mrb[4].mxu0 %vm37_vm0, %v296_v4  ;;  %v292_v6 = vadd.f32 %v770_v49, %v269_v5 }
 0x15b   :  { %v300_v7 = vpack.c.bf16 %v292_v6, %v291_v47 }
 0x15d   :  { %494 = vmatmul.mubr.msk.bf16.gmra.mrb[4].mxu1 %vm37_vm0, %v300_v7 }
 0x21c   :  { %v483_v8 = vpop.f32.mrb[0].mxu0 }
 0x21d   :  { %v381_v45 = vadd.f32 %v483_v8, %v458_v25  ;;  %v372_v9 = vpop.f32.mrb[1].mxu0 }
 0x21e   :  { %v373_v54 = vadd.f32 %v458_v25, %v372_v9  ;;  %v484_v12 = vpop.f32.mrb[2].mxu0 }
 0x21f   :  { %438 = vst.msk [vmem:[%s897_s5 + $0x10] sm:$0xff] %vm435_vm1, %v381_v45  ;;  %v384_v20 = vadd.f32 %v484_v12, %v458_v25  ;;  %v375_v49 = vpop.f32.mrb[3].mxu0 }
 0x220   :  { %436 = vst.msk [vmem:[%s897_s5] sm:$0xff] %vm435_vm1, %v373_v54  ;;  %v376_v13 = vadd.f32 %v458_v25, %v375_v49  ;;  %v491_v14 = vpop.f32.mrb[0].mxu1 }
 0x221   :  { %439 = vst.msk [vmem:[%s897_s5 + $0x18] sm:$0xff] %vm435_vm1, %v384_v20  ;;  %v413_v15 = vadd.f32 %v491_v14, %v458_v25  ;;  %v404_v18 = vpop.f32.mrb[1].mxu1 }
 0x222   :  { %437 = vst.msk [vmem:[%s897_s5 + $0x8] sm:$0xff] %vm435_vm1, %v376_v13  ;;  %v405_v19 = vadd.f32 %v458_v25, %v404_v18  ;;  %v492_v55 = vpop.f32.mrb[2].mxu1 }
 0x223   :  { %446 = vst.msk [vmem:[%s897_s5 + $0x50] sm:$0xff] %vm435_vm1, %v413_v15  ;;  %v416_v22 = vadd.f32 %v492_v55, %v458_v25  ;;  %v407_v16 = vpop.f32.mrb[3].mxu1 }
 0x224   :  { %444 = vst.msk [vmem:[%s897_s5 + $0x40] sm:$0xff] %vm435_vm1, %v405_v19  ;;  %v408_v26 = vadd.f32 %v458_v25, %v407_v16 }
 0x225   :  { %447 = vst.msk [vmem:[%s897_s5 + $0x58] sm:$0xff] %vm435_vm1, %v416_v22 }
 0x226   :  { %445 = vst.msk [vmem:[%s897_s5 + $0x48] sm:$0xff] %vm435_vm1, %v408_v26 }
 0x22c   :  { %v487_v27 = vpop.f32.mrb[4].mxu0 }
 0x22d   :  { %v397_v30 = vadd.f32 %v487_v27, %v458_v25  ;;  %v388_v31 = vpop.f32.mrb[5].mxu0 }
 0x22e   :  { %v389_v0 = vadd.f32 %v458_v25, %v388_v31  ;;  %v488_v32 = vpop.f32.mrb[6].mxu0 }
 0x22f   :  { %442 = vst.msk [vmem:[%s897_s5 + $0x30] sm:$0xff] %vm435_vm1, %v397_v30  ;;  %v400_v33 = vadd.f32 %v488_v32, %v458_v25  ;;  %v391_v34 = vpop.f32.mrb[7].mxu0 }
 0x230   :  { %440 = vst.msk [vmem:[%s897_s5 + $0x20] sm:$0xff] %vm435_vm1, %v389_v0  ;;  %v392_v38 = vadd.f32 %v458_v25, %v391_v34  ;;  %v495_v39 = vpop.f32.mrb[4].mxu1 }
 0x231   :  { %443 = vst.msk [vmem:[%s897_s5 + $0x38] sm:$0xff] %vm435_vm1, %v400_v33  ;;  %v429_v40 = vadd.f32 %v495_v39, %v458_v25  ;;  %v420_v41 = vpop.f32.mrb[5].mxu1 }
 0x232   :  { %441 = vst.msk [vmem:[%s897_s5 + $0x28] sm:$0xff] %vm435_vm1, %v392_v38  ;;  %v421_v1 = vadd.f32 %v458_v25, %v420_v41  ;;  %v496_v42 = vpop.f32.mrb[6].mxu1 }
 0x233   :  { %450 = vst.msk [vmem:[%s897_s5 + $0x70] sm:$0xff] %vm435_vm1, %v429_v40  ;;  %v432_v43 = vadd.f32 %v496_v42, %v458_v25  ;;  %v423_v46 = vpop.f32.mrb[7].mxu1 }
 0x234   :  { %448 = vst.msk [vmem:[%s897_s5 + $0x60] sm:$0xff] %vm435_vm1, %v421_v1  ;;  %v424_v24 = vadd.f32 %v458_v25, %v423_v46 }
 0x235   :  { %451 = vst.msk [vmem:[%s897_s5 + $0x78] sm:$0xff] %vm435_vm1, %v432_v43 }
 0x236   :  { %449 = vst.msk [vmem:[%s897_s5 + $0x68] sm:$0xff] %vm435_vm1, %v424_v24 }

// kernel: swin_forward.35
= control target key start
LH: loop header
LB: loop body
LE: loop exit
PB: predicated region body
PF: predicated region fallthrough
CT: control target
= control target key end

     0   :  { %vm30_vm0 = vcmask 261120   ;;  %s666_s0 = inlined_call_operand.vmem [shape: f32[128,32], index: 0, kind: input, shape index: {}]   ;;  %s667_s1 = inlined_call_operand.vmem [shape: f32[1,32], index: 1, kind: input, shape index: {}]   ;;  %s668_s2 = inlined_call_operand.vmem [shape: f32[1,32], index: 2, kind: input, shape index: {}]   ;;  %s669_s3 = inlined_call_operand.vmem [shape: f32[128,32], index: 3, kind: output, shape index: {}]  }
   0x1   :  { %v14_v0 = vld [vmem:[%s666_s0] sm:$0xff]  ;;  %v16_v1 = vld [vmem:[%s666_s0 + $0x10] sm:$0xff]  ;;  %v15_v2 = vld [vmem:[%s666_s0 + $0x8] sm:$0xff] }
   0x2   :  { %v31_v3 = vsel %vm30_vm0, %v14_v0, 0.0  ;;  %v37_v4 = vsel %vm30_vm0, %v16_v1, 0.0  ;;  %v17_v5 = vld [vmem:[%s666_s0 + $0x18] sm:$0xff]  ;;  %v34_v6 = vsel %vm30_vm0, %v15_v2, 0.0  ;;  %v18_v8 = vld [vmem:[%s666_s0 + $0x20] sm:$0xff]  ;;  %v19_v9 = vld [vmem:[%s666_s0 + $0x28] sm:$0xff] }
   0x3   :  { %32 = vadd.xlane.f32.xlu0 %v31_v3  ;;  %38 = vadd.xlane.f32.xlu1 %v37_v4  ;;  %v40_v7 = vsel %vm30_vm0, %v17_v5, 0.0  ;;  %v43_v10 = vsel %vm30_vm0, %v18_v8, 0.0  ;;  %v46_v11 = vsel %vm30_vm0, %v19_v9, 0.0  ;;  %v387_v12 = vld [vmem:[%s666_s0 + $0x30] sm:$0xff]  ;;  %v392_v13 = vld [vmem:[%s666_s0 + $0x38] sm:$0xff]  ;;  %v401_v16 = vld [vmem:[%s666_s0 + $0x40] sm:$0xff] }
   0x4   :  { %v49_v14 = vsel %vm30_vm0, %v387_v12, 0.0  ;;  %v52_v15 = vsel %vm30_vm0, %v392_v13, 0.0  ;;  %v406_v17 = vld [vmem:[%s666_s0 + $0x48] sm:$0xff]  ;;  %v55_v18 = vsel %vm30_vm0, %v401_v16, 0.0  ;;  %v415_v20 = vld [vmem:[%s666_s0 + $0x50] sm:$0xff]  ;;  %v420_v21 = vld [vmem:[%s666_s0 + $0x58] sm:$0xff] }
   0x5   :  { %v58_v19 = vsel %vm30_vm0, %v406_v17, 0.0  ;;  %v61_v22 = vsel %vm30_vm0, %v415_v20, 0.0  ;;  %v64_v23 = vsel %vm30_vm0, %v420_v21, 0.0  ;;  %v429_v24 = vld [vmem:[%s666_s0 + $0x60] sm:$0xff]  ;;  %v434_v25 = vld [vmem:[%s666_s0 + $0x68] sm:$0xff]  ;;  %v443_v28 = vld [vmem:[%s666_s0 + $0x70] sm:$0xff] }
   0x6   :  { %v67_v26 = vsel %vm30_vm0, %v429_v24, 0.0  ;;  %v70_v27 = vsel %vm30_vm0, %v434_v25, 0.0  ;;  %v448_v29 = vld [vmem:[%s666_s0 + $0x78] sm:$0xff]  ;;  %v73_v30 = vsel %vm30_vm0, %v443_v28, 0.0 }
   0x7   :  { %35 = vadd.xlane.f32.xlu0 %v34_v6  ;;  %41 = vadd.xlane.f32.xlu1 %v40_v7  ;;  %v76_v31 = vsel %vm30_vm0, %v448_v29, 0.0 }
   0xb   :  { %44 = vadd.xlane.f32.xlu0 %v43_v10  ;;  %47 = vadd.xlane.f32.xlu1 %v46_v11 }
   0xf   :  { %50 = vadd.xlane.f32.xlu0 %v49_v14  ;;  %53 = vadd.xlane.f32.xlu1 %v52_v15 }
  0x13   :  { %56 = vadd.xlane.f32.xlu0 %v55_v18  ;;  %59 = vadd.xlane.f32.xlu1 %v58_v19 }
  0x17   :  { %62 = vadd.xlane.f32.xlu0 %v61_v22  ;;  %65 = vadd.xlane.f32.xlu1 %v64_v23 }
  0x1b   :  { %68 = vadd.xlane.f32.xlu0 %v67_v26  ;;  %71 = vadd.xlane.f32.xlu1 %v70_v27 }
  0x1f   :  { %74 = vadd.xlane.f32.xlu0 %v73_v30  ;;  %77 = vadd.xlane.f32.xlu1 %v76_v31 }
  0x90   :  { %v33_v32 = vpop.xlane.xlu0 %32  ;;  %v39_v33 = vpop.xlane.xlu1 %38 }
  0x91   :  { %v80_v34 = vmul.f32 0.03125, %v33_v32  ;;  %v82_v35 = vmul.f32 0.03125, %v39_v33 }
  0x93   :  { %v454_v36 = vsub.f32 %v14_v0, %v80_v34  ;;  %v456_v37 = vsub.f32 %v16_v1, %v82_v35 }
  0x94   :  { %v36_v38 = vpop.xlane.xlu0 %35  ;;  %v42_v39 = vpop.xlane.xlu1 %41 }
  0x95   :  { %v81_v40 = vmul.f32 0.03125, %v36_v38  ;;  %v83_v41 = vmul.f32 0.03125, %v42_v39  ;;  %v112_v42 = vmul.f32 %v454_v36, %v454_v36  ;;  %v114_v43 = vmul.f32 %v456_v37, %v456_v37 }
  0x97   :  { %v462_v44 = vsub.f32 %v15_v2, %v81_v40  ;;  %v464_v45 = vsub.f32 %v17_v5, %v83_v41  ;;  %v128_v46 = vsel %vm30_vm0, %v112_v42, 0.0  ;;  %v134_v49 = vsel %vm30_vm0, %v114_v43, 0.0 }
  0x98   :  { %129 = vadd.xlane.f32.xlu0 %v128_v46  ;;  %v45_v47 = vpop.xlane.xlu0 %44  ;;  %v48_v48 = vpop.xlane.xlu1 %47 }
  0x99   :  { %v84_v50 = vmul.f32 0.03125, %v45_v47  ;;  %v85_v51 = vmul.f32 0.03125, %v48_v48  ;;  %v113_v52 = vmul.f32 %v462_v44, %v462_v44  ;;  %v115_v53 = vmul.f32 %v464_v45, %v464_v45 }
  0x9b   :  { %v472_v54 = vsub.f32 %v18_v8, %v84_v50  ;;  %v474_v55 = vsub.f32 %v19_v9, %v85_v51  ;;  %v131_v56 = vsel %vm30_vm0, %v113_v52, 0.0  ;;  %v137_v59 = vsel %vm30_vm0, %v115_v53, 0.0 }
  0x9c   :  { %135 = vadd.xlane.f32.xlu0 %v134_v49  ;;  %132 = vadd.xlane.f32.xlu1 %v131_v56  ;;  %v51_v57 = vpop.xlane.xlu0 %50  ;;  %v54_v58 = vpop.xlane.xlu1 %53 }
  0x9d   :  { %v86_v60 = vmul.f32 0.03125, %v51_v57  ;;  %v87_v61 = vmul.f32 0.03125, %v54_v58  ;;  %v116_v62 = vmul.f32 %v472_v54, %v472_v54  ;;  %v117_v63 = vmul.f32 %v474_v55, %v474_v55 }
  0x9f   :  { %v483_v0 = vsub.f32 %v387_v12, %v86_v60  ;;  %v486_v1 = vsub.f32 %v392_v13, %v87_v61  ;;  %v140_v2 = vsel %vm30_vm0, %v116_v62, 0.0  ;;  %v143_v5 = vsel %vm30_vm0, %v117_v63, 0.0 }
  0xa0   :  { %138 = vadd.xlane.f32.xlu1 %v137_v59  ;;  %141 = vadd.xlane.f32.xlu0 %v140_v2  ;;  %v57_v3 = vpop.xlane.xlu0 %56  ;;  %v60_v4 = vpop.xlane.xlu1 %59 }
  0xa1   :  { %v88_v6 = vmul.f32 0.03125, %v57_v3  ;;  %v89_v7 = vmul.f32 0.03125, %v60_v4  ;;  %v118_v8 = vmul.f32 %v483_v0, %v483_v0  ;;  %v119_v9 = vmul.f32 %v486_v1, %v486_v1 }
  0xa3   :  { %v495_v10 = vsub.f32 %v401_v16, %v88_v6  ;;  %v498_v11 = vsub.f32 %v406_v17, %v89_v7  ;;  %v146_v12 = vsel %vm30_vm0, %v118_v8, 0.0  ;;  %v149_v15 = vsel %vm30_vm0, %v119_v9, 0.0 }
  0xa4   :  { %144 = vadd.xlane.f32.xlu1 %v143_v5  ;;  %147 = vadd.xlane.f32.xlu0 %v146_v12  ;;  %v63_v13 = vpop.xlane.xlu0 %62  ;;  %v66_v14 = vpop.xlane.xlu1 %65 }
  0xa5   :  { %v90_v18 = vmul.f32 0.03125, %v63_v13  ;;  %v91_v19 = vmul.f32 0.03125, %v66_v14  ;;  %v120_v22 = vmul.f32 %v495_v10, %v495_v10  ;;  %v121_v16 = vmul.f32 %v498_v11, %v498_v11  ;;  %v547_v14 = vld [vmem:[%s667_s1] ss:$0 sm:$0xff] }
  0xa7   :  { %v507_v23 = vsub.f32 %v415_v20, %v90_v18  ;;  %v510_v17 = vsub.f32 %v420_v21, %v91_v19  ;;  %v152_v26 = vsel %vm30_vm0, %v120_v22, 0.0  ;;  %v155_v31 = vsel %vm30_vm0, %v121_v16, 0.0 }
  0xa8   :  { %150 = vadd.xlane.f32.xlu1 %v149_v15  ;;  %153 = vadd.xlane.f32.xlu0 %v152_v26  ;;  %v69_v27 = vpop.xlane.xlu0 %68  ;;  %v72_v30 = vpop.xlane.xlu1 %71  ;;  %v553_v26 = vld [vmem:[%s668_s2] ss:$0 sm:$0xff] }
  0xa9   :  { %v92_v32 = vmul.f32 0.03125, %v69_v27  ;;  %v93_v33 = vmul.f32 0.03125, %v72_v30  ;;  %v122_v34 = vmul.f32 %v507_v23, %v507_v23  ;;  %v123_v20 = vmul.f32 %v510_v17, %v510_v17 }
  0xab   :  { %v519_v35 = vsub.f32 %v429_v24, %v92_v32  ;;  %v522_v21 = vsub.f32 %v434_v25, %v93_v33  ;;  %v158_v38 = vsel %vm30_vm0, %v122_v34, 0.0  ;;  %v161_v41 = vsel %vm30_vm0, %v123_v20, 0.0 }
  0xac   :  { %156 = vadd.xlane.f32.xlu1 %v155_v31  ;;  %159 = vadd.xlane.f32.xlu0 %v158_v38  ;;  %v75_v39 = vpop.xlane.xlu0 %74  ;;  %v78_v40 = vpop.xlane.xlu1 %77 }
  0xad   :  { %v94_v42 = vmul.f32 0.03125, %v75_v39  ;;  %v95_v43 = vmul.f32 0.03125, %v78_v40  ;;  %v124_v46 = vmul.f32 %v519_v35, %v519_v35  ;;  %v125_v24 = vmul.f32 %v522_v21, %v522_v21 }
  0xaf   :  { %v531_v47 = vsub.f32 %v443_v28, %v94_v42  ;;  %v534_v25 = vsub.f32 %v448_v29, %v95_v43  ;;  %v164_v48 = vsel %vm30_vm0, %v124_v46, 0.0  ;;  %v167_v49 = vsel %vm30_vm0, %v125_v24, 0.0 }
  0xb0   :  { %162 = vadd.xlane.f32.xlu1 %v161_v41  ;;  %165 = vadd.xlane.f32.xlu0 %v164_v48 }
  0xb1   :  { %v126_v50 = vmul.f32 %v531_v47, %v531_v47  ;;  %v127_v51 = vmul.f32 %v534_v25, %v534_v25 }
  0xb3   :  { %v170_v52 = vsel %vm30_vm0, %v126_v50, 0.0  ;;  %v173_v28 = vsel %vm30_vm0, %v127_v51, 0.0 }
  0xb4   :  { %168 = vadd.xlane.f32.xlu1 %v167_v49  ;;  %171 = vadd.xlane.f32.xlu0 %v170_v52 }
  0xb8   :  { %174 = vadd.xlane.f32.xlu1 %v173_v28 }
 0x125   :  { %v130_v29 = vpop.xlane.xlu0 %129 }
 0x126   :  { %v176_v53 = vmul.f32 0.03125, %v130_v29 }
 0x128   :  { %v192_v56 = vadd.f32 1e-05, %v176_v53 }
 0x129   :  { %v133_v57 = vpop.xlane.xlu1 %132  ;;  %v136_v58 = vpop.xlane.xlu0 %135 }
 0x12a   :  { %308 = vrsqrt.f32 %v192_v56  ;;  %v177_v59 = vmul.f32 0.03125, %v133_v57  ;;  %v178_v60 = vmul.f32 0.03125, %v136_v58 }
 0x12c   :  { %v193_v61 = vadd.f32 1e-05, %v177_v59  ;;  %v194_v62 = vadd.f32 1e-05, %v178_v60 }
 0x12d   :  { %v139_v63 = vpop.xlane.xlu1 %138  ;;  %v142_v2 = vpop.xlane.xlu0 %141 }
 0x12e   :  { %310 = vrsqrt.f32 %v193_v61  ;;  %v179_v3 = vmul.f32 0.03125, %v139_v63  ;;  %v180_v4 = vmul.f32 0.03125, %v142_v2 }
 0x12f   :  { %312 = vrsqrt.f32 %v194_v62 }
 0x130   :  { %v195_v5 = vadd.f32 1e-05, %v179_v3  ;;  %v196_v6 = vadd.f32 1e-05, %v180_v4 }
 0x131   :  { %v145_v7 = vpop.xlane.xlu1 %144  ;;  %v148_v8 = vpop.xlane.xlu0 %147 }
 0x132   :  { %314 = vrsqrt.f32 %v195_v5  ;;  %v181_v9 = vmul.f32 0.03125, %v145_v7  ;;  %v182_v12 = vmul.f32 0.03125, %v148_v8 }
 0x133   :  { %316 = vrsqrt.f32 %v196_v6 }
 0x134   :  { %v309_v13 = vpop.eup %308  ;;  %v197_v15 = vadd.f32 1e-05, %v181_v9  ;;  %v198_v18 = vadd.f32 1e-05, %v182_v12 }
 0x135   :  { %v224_v19 = vmul.f32 %v309_v13, %v454_v36  ;;  %v151_v22 = vpop.xlane.xlu1 %150  ;;  %v154_v16 = vpop.xlane.xlu0 %153 }
 0x136   :  { %318 = vrsqrt.f32 %v197_v15  ;;  %v183_v27 = vmul.f32 0.03125, %v151_v22  ;;  %v184_v30 = vmul.f32 0.03125, %v154_v16 }
 0x137   :  { %v247_v31 = vmul.f32 %v547_v14, %v224_v19  ;;  %320 = vrsqrt.f32 %v198_v18 }
 0x138   :  { %v311_v32 = vpop.eup %310  ;;  %v199_v33 = vadd.f32 1e-05, %v183_v27  ;;  %v200_v34 = vadd.f32 1e-05, %v184_v30 }
 0x139   :  { %v313_v20 = vpop.eup %312  ;;  %v270_v38 = vadd.f32 %v553_v26, %v247_v31  ;;  %v225_v36 = vmul.f32 %v311_v32, %v462_v44  ;;  %v157_v39 = vpop.xlane.xlu1 %156 }
 0x13a   :  { %v160_v40 = vpop.xlane.xlu0 %159  ;;  %v226_v41 = vmul.f32 %v313_v20, %v456_v37  ;;  %322 = vrsqrt.f32 %v199_v33  ;;  %v185_v42 = vmul.f32 0.03125, %v157_v39 }
 0x13b   :  { %v186_v43 = vmul.f32 0.03125, %v160_v40  ;;  %286 = vst.msk [vmem:[%s669_s3] sm:$0xff] %vm30_vm0, %v270_v38  ;;  %v248_v46 = vmul.f32 %v547_v14, %v225_v36  ;;  %324 = vrsqrt.f32 %v200_v34 }
 0x13c   :  { %v315_v24 = vpop.eup %314  ;;  %v249_v48 = vmul.f32 %v547_v14, %v226_v41  ;;  %v201_v49 = vadd.f32 1e-05, %v185_v42 }
 0x13d   :  { %v202_v44 = vadd.f32 1e-05, %v186_v43  ;;  %v317_v50 = vpop.eup %316  ;;  %v271_v51 = vadd.f32 %v553_v26, %v248_v46  ;;  %v227_v37 = vmul.f32 %v315_v24, %v464_v45  ;;  %v163_v52 = vpop.xlane.xlu1 %162 }
 0x13e   :  { %v166_v28 = vpop.xlane.xlu0 %165  ;;  %v272_v29 = vadd.f32 %v553_v26, %v249_v48  ;;  %v228_v53 = vmul.f32 %v317_v50, %v472_v54  ;;  %326 = vrsqrt.f32 %v201_v49  ;;  %v187_v56 = vmul.f32 0.03125, %v163_v52 }
 0x13f   :  { %287 = vst.msk [vmem:[%s669_s3 + $0x8] sm:$0xff] %vm30_vm0, %v271_v51  ;;  %v250_v57 = vmul.f32 %v547_v14, %v227_v37  ;;  %328 = vrsqrt.f32 %v202_v44  ;;  %v188_v58 = vmul.f32 0.03125, %v166_v28 }
 0x140   :  { %v319_v59 = vpop.eup %318  ;;  %288 = vst.msk [vmem:[%s669_s3 + $0x10] sm:$0xff] %vm30_vm0, %v272_v29  ;;  %v251_v45 = vmul.f32 %v547_v14, %v228_v53  ;;  %v203_v54 = vadd.f32 1e-05, %v187_v56 }
 0x141   :  { %v321_v60 = vpop.eup %320  ;;  %v273_v61 = vadd.f32 %v553_v26, %v250_v57  ;;  %v229_v62 = vmul.f32 %v319_v59, %v474_v55  ;;  %v204_v63 = vadd.f32 1e-05, %v188_v58  ;;  %v169_v2 = vpop.xlane.xlu1 %168 }
 0x142   :  { %v172_v3 = vpop.xlane.xlu0 %171  ;;  %v274_v4 = vadd.f32 %v553_v26, %v251_v45  ;;  %v230_v5 = vmul.f32 %v321_v60, %v483_v0  ;;  %330 = vrsqrt.f32 %v203_v54  ;;  %v189_v6 = vmul.f32 0.03125, %v169_v2 }
 0x143   :  { %289 = vst.msk [vmem:[%s669_s3 + $0x18] sm:$0xff] %vm30_vm0, %v273_v61  ;;  %v252_v7 = vmul.f32 %v547_v14, %v229_v62  ;;  %332 = vrsqrt.f32 %v204_v63  ;;  %v190_v8 = vmul.f32 0.03125, %v172_v3 }
 0x144   :  { %v323_v9 = vpop.eup %322  ;;  %290 = vst.msk [vmem:[%s669_s3 + $0x20] sm:$0xff] %vm30_vm0, %v274_v4  ;;  %v253_v55 = vmul.f32 %v547_v14, %v230_v5  ;;  %v205_v0 = vadd.f32 1e-05, %v189_v6 }
 0x145   :  { %v325_v12 = vpop.eup %324  ;;  %v275_v13 = vadd.f32 %v553_v26, %v252_v7  ;;  %v231_v15 = vmul.f32 %v323_v9, %v486_v1  ;;  %v206_v18 = vadd.f32 1e-05, %v190_v8  ;;  %v175_v19 = vpop.xlane.xlu1 %174 }
 0x146   :  { %v276_v22 = vadd.f32 %v553_v26, %v253_v55  ;;  %v232_v16 = vmul.f32 %v325_v12, %v495_v10  ;;  %334 = vrsqrt.f32 %v205_v0  ;;  %v191_v27 = vmul.f32 0.03125, %v175_v19 }
 0x147   :  { %291 = vst.msk [vmem:[%s669_s3 + $0x28] sm:$0xff] %vm30_vm0, %v275_v13  ;;  %v254_v30 = vmul.f32 %v547_v14, %v231_v15  ;;  %336 = vrsqrt.f32 %v206_v18 }
 0x148   :  { %v327_v31 = vpop.eup %326  ;;  %292 = vst.msk [vmem:[%s669_s3 + $0x30] sm:$0xff] %vm30_vm0, %v276_v22  ;;  %v255_v1 = vmul.f32 %v547_v14, %v232_v16  ;;  %v207_v32 = vadd.f32 1e-05, %v191_v27 }
 0x149   :  { %v329_v10 = vpop.eup %328  ;;  %v277_v33 = vadd.f32 %v553_v26, %v254_v30  ;;  %v233_v34 = vmul.f32 %v327_v31, %v498_v11 }
 0x14a   :  { %v278_v20 = vadd.f32 %v553_v26, %v255_v1  ;;  %v234_v38 = vmul.f32 %v329_v10, %v507_v23  ;;  %338 = vrsqrt.f32 %v207_v32 }
 0x14b   :  { %293 = vst.msk [vmem:[%s669_s3 + $0x38] sm:$0xff] %vm30_vm0, %v277_v33  ;;  %v256_v36 = vmul.f32 %v547_v14, %v233_v34 }
 0x14c   :  { %v331_v39 = vpop.eup %330  ;;  %294 = vst.msk [vmem:[%s669_s3 + $0x40] sm:$0xff] %vm30_vm0, %v278_v20  ;;  %v257_v11 = vmul.f32 %v547_v14, %v234_v38 }
 0x14d   :  { %v333_v40 = vpop.eup %332  ;;  %v279_v41 = vadd.f32 %v553_v26, %v256_v36  ;;  %v235_v23 = vmul.f32 %v331_v39, %v510_v17 }
 0x14e   :  { %v280_v42 = vadd.f32 %v553_v26, %v257_v11  ;;  %v236_v43 = vmul.f32 %v333_v40, %v519_v35 }
 0x14f   :  { %295 = vst.msk [vmem:[%s669_s3 + $0x48] sm:$0xff] %vm30_vm0, %v279_v41  ;;  %v258_v46 = vmul.f32 %v547_v14, %v235_v23 }
 0x150   :  { %v335_v24 = vpop.eup %334  ;;  %296 = vst.msk [vmem:[%s669_s3 + $0x50] sm:$0xff] %vm30_vm0, %v280_v42  ;;  %v259_v48 = vmul.f32 %v547_v14, %v236_v43 }
 0x151   :  { %v337_v17 = vpop.eup %336  ;;  %v281_v49 = vadd.f32 %v553_v26, %v258_v46  ;;  %v237_v35 = vmul.f32 %v335_v24, %v522_v21 }
 0x152   :  { %v282_v44 = vadd.f32 %v553_v26, %v259_v48  ;;  %v238_v50 = vmul.f32 %v337_v17, %v531_v47 }
 0x153   :  { %297 = vst.msk [vmem:[%s669_s3 + $0x58] sm:$0xff] %vm30_vm0, %v281_v49  ;;  %v260_v51 = vmul.f32 %v547_v14, %v237_v35 }
 0x154   :  { %v339_v37 = vpop.eup %338  ;;  %298 = vst.msk [vmem:[%s669_s3 + $0x60] sm:$0xff] %vm30_vm0, %v282_v44  ;;  %v261_v52 = vmul.f32 %v547_v14, %v238_v50 }
 0x155   :  { %v283_v21 = vadd.f32 %v553_v26, %v260_v51  ;;  %v239_v28 = vmul.f32 %v339_v37, %v534_v25 }
 0x156   :  { %v284_v47 = vadd.f32 %v553_v26, %v261_v52 }
 0x157   :  { %299 = vst.msk [vmem:[%s669_s3 + $0x68] sm:$0xff] %vm30_vm0, %v283_v21  ;;  %v262_v29 = vmul.f32 %v547_v14, %v239_v28 }
 0x158   :  { %300 = vst.msk [vmem:[%s669_s3 + $0x70] sm:$0xff] %vm30_vm0, %v284_v47 }
 0x159   :  { %v285_v53 = vadd.f32 %v553_v26, %v262_v29 }
 0x15b   :  { %301 = vst.msk [vmem:[%s669_s3 + $0x78] sm:$0xff] %vm30_vm0, %v285_v53 }

// kernel: swin_forward.39
= control target key start
LH: loop header
LB: loop body
LE: loop exit
PB: predicated region body
PF: predicated region fallthrough
CT: control target
= control target key end

     0   :  { %s1555_s9 = smov 0   ;;  %s1819_s0 = inlined_call_operand.vmem [shape: f32[8,16,96], index: 0, kind: input, shape index: {}]   ;;  %s1820_s1 = inlined_call_operand.vmem [shape: f32[4,2,16,16], index: 1, kind: input, shape index: {}]   ;;  %s1821_s2 = inlined_call_operand.vmem [shape: f32[8,16,32], index: 2, kind: output, shape index: {}]  }
   0x1 LB: > { %s1285_s10 = sadd.s32 4294967295, %s1530_s9   ;;  %p1289_p0 = scmp.ge.s32.totalorder %s1530_s9, 1  ;;  %s1530_s9 = sphi %s1555_s9, %s12_s9  }
   0x2   : > { %p114_p1 = scmp.lt.s32.totalorder %s1530_s9, 3 }
   0x4   : > { %p115_p2 = pnand %p1289_p0, %p114_p1 }
   0x5   : > { %s1290_s11 = sshll.u32 (!%p115_p2), %s1285_s10, 2  ;;  %v1532_v0 = vmov (!%p115_p2), 0.0   ;;  %vm1533_vm0 = vmmov (!%p115_p2), 0   ;;  %s1534_s16 = smov (!%p115_p2), 96   ;;  %vm184_vm1 = vcmask (!%p115_p2), 130048   ;;  %v161_v22 = vld [vmem:[%s1820_s1] sm:$0xff] (!%p115_p2) }
   0x6   : > { %118 = sbr.rel (%p115_p2) target bundleno = 1576 (0x628), region = 28  ;;  %p139_p3 = scmp.lt.s32.totalorder (!%p115_p2), %s1290_s11, 7  ;;  %1348 = vmatprep.subr.bf16.mxu0 (!%p115_p2), %v1532_v0  ;;  %1354 = vmatprep.subr.bf16.mxu1 (!%p115_p2), %v1532_v0  ;;  %v162_v26 = vld [vmem:[%s1820_s1 + $0x8] sm:$0xff] (!%p115_p2)  ;;  %v165_v31 = vld [vmem:[%s1820_s1 + $0x20] sm:$0xff] (!%p115_p2)  ;;  %vm1218_vm2 = vcmask (!%p115_p2), 261120  }
   0x7   : > { %1350 = vmatprep.mubr.msk.bf16.mxu0 (!%p115_p2), %vm1533_vm0, %v1532_v0  ;;  %1356 = vmatprep.mubr.msk.bf16.mxu1 (!%p115_p2), %vm1533_vm0, %v1532_v0  ;;  %v166_v37 = vld [vmem:[%s1820_s1 + $0x28] sm:$0xff] (!%p115_p2)  ;;  %v169_v43 = vld [vmem:[%s1820_s1 + $0x40] sm:$0xff] (!%p115_p2)  ;;  %s1535_s5 = smov (!%p115_p2), 64   ;;  %s1536_s6 = smov (!%p115_p2), 80  }
   0x8   : > { %v170_v49 = vld [vmem:[%s1820_s1 + $0x48] sm:$0xff] (!%p115_p2)  ;;  %v173_v54 = vld [vmem:[%s1820_s1 + $0x60] sm:$0xff] (!%p115_p2)  ;;  %s1537_s7 = smov (!%p115_p2), 112   ;;  %s1538_s27 = smov (!%p115_p2), 48  }
   0x9   : > { %v174_v61 = vld [vmem:[%s1820_s1 + $0x68] sm:$0xff] (!%p115_p2)  ;;  %s1539_s28 = smov (!%p115_p2), 16  }
   0xd   : > { %s1823_s11 = smov (!%p139_p3, %s1290_s11), 7 }
   0xe   : > { %s1314_s12 = sshll.u32 %s1823_s11, 4 }
   0xf   : > { %s143_s15 = scalar_lea.vmem %s1819_s0, %s1314_s12  ;;  %s150_s3 = scalar_lea.vmem %s1821_s2, %s1314_s12 }
  0x10   : > { %v153_v1 = vld [vmem:[%s143_s15] sm:$0xff]  ;;  %v154_v2 = vld [vmem:[%s143_s15 + $0x8] sm:$0xff]  ;;  %v155_v3 = vld [vmem:[%s143_s15 + $0x10] sm:$0xff] }
  0x11   : > { %v1577_v4 = vpack.c.bf16 %v154_v2, %v153_v1  ;;  %v156_v5 = vld [vmem:[%s143_s15 + $0x18] sm:$0xff]  ;;  %v157_v6 = vld [vmem:[%s143_s15 + $0x20] sm:$0xff]  ;;  %v158_v7 = vld [vmem:[%s143_s15 + $0x28] sm:$0xff] }
  0x12   : > { %v1579_v8 = vpack.c.bf16 %v158_v7, %v157_v6  ;;  %v159_v9 = vld [vmem:[%s143_s15 + $0x30] sm:$0xff]  ;;  %v160_v10 = vld [vmem:[%s143_s15 + $0x38] sm:$0xff]  ;;  %v1582_v11 = vpack.c.bf16 %v156_v5, %v155_v3 }
  0x13   : > { %182 = vrot.lane.b32.xlu0 %v1577_v4, %s1534_s16  ;;  %v1585_v12 = vpack.c.bf16 %v160_v10, %v159_v9 }
  0x14   : > { %283 = vrot.lane.b32.xlu1 %v1579_v8, %s1534_s16 }
  0x17   : > { %233 = vrot.lane.b32.xlu0 %v1582_v11, %s1534_s16 }
  0x18   : > { %333 = vrot.lane.b32.xlu1 %v1585_v12, %s1534_s16 }
  0x85   : > { %v183_v13 = vpop.permute.xlu0 %182 }
  0x86   : > { %v189_v14 = vsel %vm184_vm1, %v183_v13, 0  ;;  %v284_v15 = vpop.permute.xlu1 %283 }
  0x87   : > { %1349 = vmatpush3.bf16.xpose.msra.mxu0 %v189_v14  ;;  %v289_v18 = vsel %vm184_vm1, %v284_v15, 0 }
  0x88   : > { %1360 = vmatprep.subr.bf16.mxu0 %v1532_v0 }
  0x89   : > { %v234_v16 = vpop.permute.xlu0 %233 }
  0x8a   : > { %v239_v17 = vsel %vm184_vm1, %v234_v16, 0  ;;  %v334_v19 = vpop.permute.xlu1 %333 }
  0x8b   : > { %1355 = vmatpush3.bf16.xpose.msra.mxu1 %v239_v17  ;;  %v339_v20 = vsel %vm184_vm1, %v334_v19, 0 }
  0x8c   : > { %1366 = vmatprep.subr.bf16.mxu1 %v1532_v0 }
  0x8e   : > { %1351 = vmatmul.mubr.msk.bf16.vlgmr.msra.gmra.mrb[0].mxu0 %vm184_vm1, %v1577_v4 }
  0x8f   : > { %1361 = vmatpush3.bf16.xpose.msra.mxu0 %v289_v18  ;;  %1362 = vmatprep.mubr.msk.bf16.mxu0 %vm1533_vm0, %v1532_v0 }
  0x90   : > { %1372 = vmatprep.subr.bf16.mxu0 %v1532_v0 }
  0x92   : > { %1357 = vmatmul.mubr.msk.bf16.vlgmr.msra.gmra.mrb[0].mxu1 %vm184_vm1, %v1582_v11 }
  0x93   : > { %1367 = vmatpush3.bf16.xpose.msra.mxu1 %v339_v20  ;;  %1368 = vmatprep.mubr.msk.bf16.mxu1 %vm1533_vm0, %v1532_v0 }
  0x94   : > { %1378 = vmatprep.subr.bf16.mxu1 %v1532_v0 }
  0x96   : > { %1363 = vmatmul.mubr.msk.bf16.vlgmr.msra.gmra.mrb[4].mxu0 %vm184_vm1, %v1579_v8 }
  0x97   : > { %1374 = vmatprep.mubr.msk.bf16.mxu0 %vm1533_vm0, %v1532_v0 }
  0x9a   : > { %1369 = vmatmul.mubr.msk.bf16.vlgmr.msra.gmra.mrb[4].mxu1 %vm184_vm1, %v1585_v12 }
  0x9b   : > { %1380 = vmatprep.mubr.msk.bf16.mxu1 %vm1533_vm0, %v1532_v0 }
 0x161   : > { %v225_v21 = vpop.f32.mrb[0].mxu0 }
 0x162   : > { %v382_v23 = vmul.f32 0.25, %v225_v21  ;;  %v1352_v24 = vpop.f32.mrb[1].mxu0 }
 0x163   : > { %v228_v25 = vpop.f32.mrb[2].mxu0 }
 0x164   : > { %v383_v27 = vmul.f32 0.25, %v228_v25  ;;  %v1353_v28 = vpop.f32.mrb[3].mxu0  ;;  %v390_v29 = vadd.f32 %v382_v23, %v161_v22 }
 0x165   : > { %v275_v30 = vpop.f32.mrb[0].mxu1 }
 0x166   : > { %v384_v32 = vmul.f32 0.25, %v275_v30  ;;  %v1358_v33 = vpop.f32.mrb[1].mxu1  ;;  %v398_v34 = vsel %vm184_vm1, %v390_v29, -inf  ;;  %v391_v35 = vadd.f32 %v383_v27, %v162_v26 }
 0x167   : > { %399 = vmax.xlane.f32.xlu0 %v398_v34  ;;  %v278_v36 = vpop.f32.mrb[2].mxu1 }
 0x168   : > { %v385_v38 = vmul.f32 0.25, %v278_v36  ;;  %v1359_v39 = vpop.f32.mrb[3].mxu1  ;;  %v401_v40 = vsel %vm184_vm1, %v391_v35, -inf  ;;  %v392_v41 = vadd.f32 %v384_v32, %v165_v31 }
 0x169   : > { %402 = vmax.xlane.f32.xlu1 %v401_v40  ;;  %v325_v42 = vpop.f32.mrb[4].mxu0 }
 0x16a   : > { %v386_v44 = vmul.f32 0.25, %v325_v42  ;;  %v1364_v45 = vpop.f32.mrb[5].mxu0  ;;  %v404_v46 = vsel %vm184_vm1, %v392_v41, -inf  ;;  %v393_v47 = vadd.f32 %v385_v38, %v166_v37 }
 0x16b   : > { %v328_v48 = vpop.f32.mrb[6].mxu0  ;;  %405 = vmax.xlane.f32.xlu0 %v404_v46 }
 0x16c   : > { %v387_v50 = vmul.f32 0.25, %v328_v48  ;;  %v1365_v51 = vpop.f32.mrb[7].mxu0  ;;  %v394_v52 = vadd.f32 %v386_v44, %v169_v43  ;;  %v407_v58 = vsel %vm184_vm1, %v393_v47, -inf }
 0x16d   : > { %v375_v53 = vpop.f32.mrb[4].mxu1 }
 0x16e   : > { %v388_v55 = vmul.f32 0.25, %v375_v53  ;;  %v1370_v56 = vpop.f32.mrb[5].mxu1  ;;  %v410_v57 = vsel %vm184_vm1, %v394_v52, -inf  ;;  %v395_v59 = vadd.f32 %v387_v50, %v170_v49 }
 0x16f   : > { %411 = vmax.xlane.f32.xlu1 %v410_v57  ;;  %408 = vmax.xlane.f32.xlu0 %v407_v58  ;;  %v378_v60 = vpop.f32.mrb[6].mxu1 }
 0x170   : > { %v389_v62 = vmul.f32 0.25, %v378_v60  ;;  %v1371_v63 = vpop.f32.mrb[7].mxu1  ;;  %v396_v1 = vadd.f32 %v388_v55, %v173_v54  ;;  %v413_v2 = vsel %vm184_vm1, %v395_v59, -inf }
 0x172   : > { %v416_v3 = vsel %vm184_vm1, %v396_v1, -inf  ;;  %v397_v5 = vadd.f32 %v389_v62, %v174_v61 }
 0x173   : > { %414 = vmax.xlane.f32.xlu0 %v413_v2  ;;  %417 = vmax.xlane.f32.xlu1 %v416_v3 }
 0x174   : > { %v419_v6 = vsel %vm184_vm1, %v397_v5, -inf }
 0x177   : > { %420 = vmax.xlane.f32.xlu0 %v419_v6 }
 0x184   : > { %490 = vrot.lane.b32.xlu1 %v1577_v4, %s1535_s5 }
 0x188   : > { %584 = vrot.lane.b32.xlu1 %v1579_v8, %s1535_s5 }
 0x18c   : > { %631 = vrot.lane.b32.xlu1 %v1585_v12, %s1535_s5 }
 0x18d   : > { %537 = vrot.lane.b32.xlu0 %v1582_v11, %s1535_s5 }
 0x1f4   : > { %v400_v7 = vpop.xlane.xlu0 %399 }
 0x1f5   : > { %v422_v9 = vsub.f32 %v390_v29, %v400_v7 }
 0x1f6   : > { %v403_v10 = vpop.xlane.xlu1 %402 }
 0x1f7   : > { %v430_v13 = vmul.f32 1.442695, %v422_v9  ;;  %v423_v14 = vsub.f32 %v391_v35, %v403_v10 }
 0x1f8   : > { %v406_v15 = vpop.xlane.xlu0 %405 }
 0x1f9   : > { %1460 = vpow2.f32 %v430_v13  ;;  %v432_v16 = vmul.f32 1.442695, %v423_v14  ;;  %v424_v17 = vsub.f32 %v392_v41, %v406_v15 }
 0x1fb   : > { %1462 = vpow2.f32 %v432_v16  ;;  %v434_v18 = vmul.f32 1.442695, %v424_v17 }
 0x1fc   : > { %v412_v19 = vpop.xlane.xlu1 %411  ;;  %v409_v20 = vpop.xlane.xlu0 %408 }
 0x1fd   : > { %1464 = vpow2.f32 %v434_v18  ;;  %v426_v21 = vsub.f32 %v394_v52, %v412_v19  ;;  %v425_v22 = vsub.f32 %v393_v47, %v409_v20 }
 0x1ff   : > { %v438_v23 = vmul.f32 1.442695, %v426_v21  ;;  %v436_v24 = vmul.f32 1.442695, %v425_v22 }
 0x200   : > { %v418_v25 = vpop.xlane.xlu1 %417  ;;  %v415_v26 = vpop.xlane.xlu0 %414 }
 0x201   : > { %1466 = vpow2.f32 %v438_v23  ;;  %v428_v27 = vsub.f32 %v396_v1, %v418_v25  ;;  %v427_v28 = vsub.f32 %v395_v59, %v415_v26 }
 0x202   : > { %1468 = vpow2.f32 %v436_v24 }
 0x203   : > { %v1649_v29 = vpop.eup %1460  ;;  %v442_v30 = vmul.f32 1.442695, %v428_v27  ;;  %v440_v31 = vmul.f32 1.442695, %v427_v28 }
 0x204   : > { %v421_v32 = vpop.xlane.xlu0 %420  ;;  %v446_v33 = vsel %vm184_vm1, %v1649_v29, 0.0  ;;  %v491_v34 = vpop.permute.xlu1 %490 }
 0x205   : > { %v1463_v35 = vpop.eup %1462  ;;  %1470 = vpow2.f32 %v442_v30  ;;  %v429_v36 = vsub.f32 %v397_v5, %v421_v32  ;;  %447 = vadd.xlane.f32.xlu1 %v446_v33  ;;  %1373 = vmatpush3.bf16.msra.mxu0 %v491_v34 }
 0x206   : > { %1472 = vpow2.f32 %v440_v31  ;;  %v449_v37 = vsel %vm184_vm1, %v1463_v35, 0.0  ;;  %1384 = vmatprep.subr.bf16.mxu0 %v1532_v0 }
 0x207   : > { %v1655_v38 = vpop.eup %1464  ;;  %v444_v39 = vmul.f32 1.442695, %v429_v36  ;;  %450 = vadd.xlane.f32.xlu0 %v449_v37 }
 0x208   : > { %v452_v40 = vsel %vm184_vm1, %v1655_v38, 0.0  ;;  %v538_v41 = vpop.permute.xlu0 %537  ;;  %v585_v52 = vpop.permute.xlu1 %584 }
 0x209   : > { %1474 = vpow2.f32 %v444_v39  ;;  %453 = vadd.xlane.f32.xlu1 %v452_v40  ;;  %1379 = vmatpush3.bf16.msra.mxu1 %v538_v41 }
 0x20a   : > { %1390 = vmatprep.subr.bf16.mxu1 %v1532_v0 }
 0x20b   : > { %v1467_v42 = vpop.eup %1466 }
 0x20c   : > { %v1469_v43 = vpop.eup %1468  ;;  %v458_v44 = vsel %vm184_vm1, %v1467_v42, 0.0  ;;  %v632_v53 = vpop.permute.xlu1 %631 }
 0x20d   : > { %459 = vadd.xlane.f32.xlu1 %v458_v44  ;;  %v455_v45 = vsel %vm184_vm1, %v1469_v43, 0.0 }
 0x20e   : > { %456 = vadd.xlane.f32.xlu0 %v455_v45 }
 0x20f   : > { %v1662_v46 = vpop.eup %1470 }
 0x210   : > { %v1473_v47 = vpop.eup %1472  ;;  %v464_v48 = vsel %vm184_vm1, %v1662_v46, 0.0 }
 0x211   : > { %465 = vadd.xlane.f32.xlu1 %v464_v48  ;;  %v461_v49 = vsel %vm184_vm1, %v1473_v47, 0.0 }
 0x212   : > { %462 = vadd.xlane.f32.xlu0 %v461_v49 }
 0x213   : > { %v1475_v50 = vpop.eup %1474 }
 0x214   : > { %v467_v51 = vsel %vm184_vm1, %v1475_v50, 0.0 }
 0x216   : > { %468 = vadd.xlane.f32.xlu0 %v467_v51 }
 0x222   : > { %731 = vrot.lane.b32.xlu1 %v1582_v11, %s1536_s6 }
 0x226   : > { %782 = vrot.lane.b32.xlu1 %v1579_v8, %s1536_s6 }
 0x22a   : > { %833 = vrot.lane.b32.xlu1 %v1585_v12, %s1536_s6 }
 0x22c   : > { %680 = vrot.lane.b32.xlu0 %v1577_v4, %s1536_s6 }
 0x22e   : > { %831 = vrot.lane.b32.xlu1 %v1585_v12, %s1537_s7 }
 0x230   : > { %678 = vrot.lane.b32.xlu0 %v1577_v4, %s1537_s7 }
 0x234   : > { %729 = vrot.lane.b32.xlu0 %v1582_v11, %s1537_s7 }
 0x238   : > { %780 = vrot.lane.b32.xlu0 %v1579_v8, %s1537_s7 }
 0x292   : > { %v448_v54 = vpop.xlane.xlu1 %447 }
 0x293   : > { %1476 = vrcp.f32 %v448_v54 }
 0x294   : > { %v451_v55 = vpop.xlane.xlu0 %450 }
 0x295   : > { %1478 = vrcp.f32 %v451_v55 }
 0x296   : > { %v454_v56 = vpop.xlane.xlu1 %453 }
 0x297   : > { %1480 = vrcp.f32 %v454_v56  ;;  %v164_v56 = vld [vmem:[%s1820_s1 + $0x18] sm:$0xff] }
 0x29a   : > { %v460_v57 = vpop.xlane.xlu1 %459 }
 0x29b   : > { %v457_v58 = vpop.xlane.xlu0 %456 }
 0x29c   : > { %1482 = vrcp.f32 %v457_v58 }
 0x29d   : > { %v1477_v59 = vpop.eup %1476  ;;  %1484 = vrcp.f32 %v460_v57 }
 0x29e   : > { %v466_v61 = vpop.xlane.xlu1 %465  ;;  %v478_v63 = vmul.f32 %v1477_v59, %v1649_v29 }
 0x29f   : > { %v1479_v60 = vpop.eup %1478  ;;  %v463_v62 = vpop.xlane.xlu0 %462 }
 0x2a0   : > { %v479_v1 = vmul.f32 %v1479_v60, %v1463_v35  ;;  %1486 = vrcp.f32 %v463_v62 }
 0x2a1   : > { %1488 = vrcp.f32 %v466_v61  ;;  %v1481_v5 = vpop.eup %1480 }
 0x2a2   : > { %v486_v2 = vpack.c.bf16 %v479_v1, %v478_v63  ;;  %v480_v7 = vmul.f32 %v1481_v5, %v1655_v38  ;;  %v732_v18 = vpop.permute.xlu1 %731  ;;  %v167_v63 = vld [vmem:[%s1820_s1 + $0x30] sm:$0xff] }
 0x2a3   : > { %v469_v3 = vpop.xlane.xlu0 %468  ;;  %v737_v28 = vsel %vm184_vm1, %v732_v18, 0 }
 0x2a4   : > { %1490 = vrcp.f32 %v469_v3  ;;  %1375 = vmatmul.mubr.msk.bf16.vlgmr.msra.gmra.mrb[8].mxu0 %vm184_vm1, %v486_v2 }
 0x2a5   : > { %1385 = vmatpush3.bf16.msra.mxu0 %v585_v52  ;;  %1386 = vmatprep.mubr.msk.bf16.mxu0 %vm1533_vm0, %v1532_v0  ;;  %v163_v52 = vld [vmem:[%s1820_s1 + $0x10] sm:$0xff] }
 0x2a6   : > { %v1483_v6 = vpop.eup %1482  ;;  %1396 = vmatprep.subr.bf16.mxu0 %v1532_v0  ;;  %v783_v27 = vpop.permute.xlu1 %782 }
 0x2a7   : > { %v481_v9 = vmul.f32 %v1483_v6, %v1469_v43  ;;  %v1485_v10 = vpop.eup %1484  ;;  %v681_v15 = vpop.permute.xlu0 %680  ;;  %v788_v29 = vsel %vm184_vm1, %v783_v27, 0  ;;  %v168_v6 = vld [vmem:[%s1820_s1 + $0x38] sm:$0xff] }
 0x2a8   : > { %v482_v16 = vmul.f32 %v1485_v10, %v1467_v42  ;;  %v686_v20 = vsel %vm184_vm1, %v681_v15, 0 }
 0x2a9   : > { %v487_v13 = vpack.c.bf16 %v481_v9, %v480_v7 }
 0x2aa   : > { %v1487_v14 = vpop.eup %1486  ;;  %v834_v31 = vpop.permute.xlu1 %833 }
 0x2ab   : > { %v483_v17 = vmul.f32 %v1487_v14, %v1473_v47  ;;  %1381 = vmatmul.mubr.msk.bf16.vlgmr.msra.gmra.mrb[8].mxu1 %vm184_vm1, %v487_v13  ;;  %v1489_v19 = vpop.eup %1488  ;;  %v679_v25 = vpop.permute.xlu0 %678  ;;  %v839_v32 = vsel %vm184_vm1, %v834_v31, 0  ;;  %v171_v14 = vld [vmem:[%s1820_s1 + $0x50] sm:$0xff] }
 0x2ac   : > { %1391 = vmatpush3.bf16.msra.mxu1 %v632_v53  ;;  %1392 = vmatprep.mubr.msk.bf16.mxu1 %vm1533_vm0, %v1532_v0  ;;  %v484_v23 = vmul.f32 %v1489_v19, %v1662_v46 }
 0x2ad   : > { %v488_v21 = vpack.c.bf16 %v483_v17, %v482_v16  ;;  %1402 = vmatprep.subr.bf16.mxu1 %v1532_v0 }
 0x2ae   : > { %v1491_v22 = vpop.eup %1490  ;;  %v832_v34 = vpop.permute.xlu1 %831 }
 0x2af   : > { %v485_v24 = vmul.f32 %v1491_v22, %v1475_v50  ;;  %1387 = vmatmul.mubr.msk.bf16.vlgmr.msra.gmra.mrb[12].mxu0 %vm184_vm1, %v488_v21  ;;  %v730_v30 = vpop.permute.xlu0 %729 }
 0x2b0   : > { %1397 = vmatpush3.bf16.xpose.msra.mxu0 %v686_v20  ;;  %1398 = vmatprep.mubr.msk.bf16.mxu0 %vm1533_vm0, %v1532_v0 }
 0x2b1   : > { %v489_v26 = vpack.c.bf16 %v485_v24, %v484_v23  ;;  %1408 = vmatprep.subr.bf16.mxu0 %v1532_v0  ;;  %v172_v23 = vld [vmem:[%s1820_s1 + $0x58] sm:$0xff] }
 0x2b3   : > { %1393 = vmatmul.mubr.msk.bf16.vlgmr.msra.gmra.mrb[12].mxu1 %vm184_vm1, %v489_v26  ;;  %v781_v33 = vpop.permute.xlu0 %780  ;;  %v175_v26 = vld [vmem:[%s1820_s1 + $0x70] sm:$0xff] }
 0x2b4   : > { %1404 = vmatprep.mubr.msk.bf16.mxu1 %vm1533_vm0, %v1532_v0 }
 0x2b5   : > { %1403 = vmatpush3.bf16.xpose.msra.mxu1 %v737_v28 }
 0x2b6   : > { %1414 = vmatprep.subr.bf16.mxu1 %v1532_v0 }
 0x2b7   : > { %1399 = vmatmul.mubr.msk.bf16.vlgmr.msra.gmra.mrb[16].mxu0 %vm184_vm1, %v679_v25 }
 0x2b8   : > { %1409 = vmatpush3.bf16.xpose.msra.mxu0 %v788_v29  ;;  %1410 = vmatprep.mubr.msk.bf16.mxu0 %vm1533_vm0, %v1532_v0 }
 0x2b9   : > { %1420 = vmatprep.subr.bf16.mxu0 %v1532_v0 }
 0x2bc   : > { %1405 = vmatmul.mubr.msk.bf16.vlgmr.msra.gmra.mrb[16].mxu1 %vm184_vm1, %v730_v30 }
 0x2bd   : > { %1415 = vmatpush3.bf16.xpose.msra.mxu1 %v839_v32  ;;  %1416 = vmatprep.mubr.msk.bf16.mxu1 %vm1533_vm0, %v1532_v0  ;;  %v176_v32 = vld [vmem:[%s1820_s1 + $0x78] sm:$0xff] }
 0x2be   : > { %1426 = vmatprep.subr.bf16.mxu1 %v1532_v0 }
 0x2bf   : > { %1411 = vmatmul.mubr.msk.bf16.vlgmr.msra.gmra.mrb[20].mxu0 %vm184_vm1, %v781_v33 }
 0x2c0   : > { %1422 = vmatprep.mubr.msk.bf16.mxu0 %vm1533_vm0, %v1532_v0 }
 0x2c4   : > { %1417 = vmatmul.mubr.msk.bf16.vlgmr.msra.gmra.mrb[20].mxu1 %vm184_vm1, %v832_v34 }
 0x2c5   : > { %1428 = vmatprep.mubr.msk.bf16.mxu1 %vm1533_vm0, %v1532_v0 }
 0x377   : > { %v1713_v35 = vpop.f32.mrb[8].mxu0 }
 0x378   : > { %v1376_v36 = vpop.f32.mrb[9].mxu0 }
 0x379   : > { %v1715_v37 = vpop.f32.mrb[10].mxu0 }
 0x37a   : > { %v1377_v38 = vpop.f32.mrb[11].mxu0 }
 0x37e   : > { %v1717_v39 = vpop.f32.mrb[8].mxu1 }
 0x37f   : > { %v1382_v40 = vpop.f32.mrb[9].mxu1 }
 0x380   : > { %v1719_v41 = vpop.f32.mrb[10].mxu1 }
 0x381   : > { %v1383_v42 = vpop.f32.mrb[11].mxu1 }
 0x382   : > { %v1721_v43 = vpop.f32.mrb[12].mxu0 }
 0x383   : > { %v1388_v44 = vpop.f32.mrb[13].mxu0 }
 0x384   : > { %v1723_v45 = vpop.f32.mrb[14].mxu0 }
 0x385   : > { %v1389_v46 = vpop.f32.mrb[15].mxu0 }
 0x386   : > { %v1725_v47 = vpop.f32.mrb[12].mxu1 }
 0x387   : > { %v1394_v48 = vpop.f32.mrb[13].mxu1 }
 0x388   : > { %v1727_v49 = vpop.f32.mrb[14].mxu1 }
 0x389   : > { %v1395_v50 = vpop.f32.mrb[15].mxu1 }
 0x38a   : > { %v722_v51 = vpop.f32.mrb[16].mxu0 }
 0x38b   : > { %v882_v53 = vmul.f32 0.25, %v722_v51  ;;  %v1400_v54 = vpop.f32.mrb[17].mxu0 }
 0x38c   : > { %v725_v55 = vpop.f32.mrb[18].mxu0 }
 0x38d   : > { %v883_v57 = vmul.f32 0.25, %v725_v55  ;;  %v1401_v58 = vpop.f32.mrb[19].mxu0  ;;  %v890_v59 = vadd.f32 %v882_v53, %v163_v52 }
 0x38f   : > { %v773_v60 = vpop.f32.mrb[16].mxu1  ;;  %v898_v61 = vsel %vm184_vm1, %v890_v59, -inf  ;;  %v891_v62 = vadd.f32 %v883_v57, %v164_v56 }
 0x390   : > { %v884_v1 = vmul.f32 0.25, %v773_v60  ;;  %v1406_v2 = vpop.f32.mrb[17].mxu1  ;;  %899 = vmax.xlane.f32.xlu0 %v898_v61 }
 0x391   : > { %v776_v3 = vpop.f32.mrb[18].mxu1  ;;  %v901_v5 = vsel %vm184_vm1, %v891_v62, -inf }
 0x392   : > { %v885_v7 = vmul.f32 0.25, %v776_v3  ;;  %v1407_v9 = vpop.f32.mrb[19].mxu1  ;;  %902 = vmax.xlane.f32.xlu1 %v901_v5  ;;  %v824_v10 = vpop.f32.mrb[20].mxu0  ;;  %v892_v13 = vadd.f32 %v884_v1, %v167_v63 }
 0x393   : > { %v886_v15 = vmul.f32 0.25, %v824_v10  ;;  %v1412_v16 = vpop.f32.mrb[21].mxu0 }
 0x394   : > { %v904_v17 = vsel %vm184_vm1, %v892_v13, -inf  ;;  %v827_v18 = vpop.f32.mrb[22].mxu0  ;;  %v893_v19 = vadd.f32 %v885_v7, %v168_v6 }
 0x395   : > { %905 = vmax.xlane.f32.xlu0 %v904_v17  ;;  %v887_v20 = vmul.f32 0.25, %v827_v18  ;;  %v1413_v21 = vpop.f32.mrb[23].mxu0  ;;  %v894_v22 = vadd.f32 %v886_v15, %v171_v14 }
 0x396   : > { %v907_v29 = vsel %vm184_vm1, %v893_v19, -inf }
 0x397   : > { %v875_v24 = vpop.f32.mrb[20].mxu1  ;;  %v910_v25 = vsel %vm184_vm1, %v894_v22, -inf  ;;  %v895_v30 = vadd.f32 %v887_v20, %v172_v23 }
 0x398   : > { %v888_v27 = vmul.f32 0.25, %v875_v24  ;;  %v1418_v28 = vpop.f32.mrb[21].mxu1  ;;  %911 = vmax.xlane.f32.xlu1 %v910_v25 }
 0x399   : > { %908 = vmax.xlane.f32.xlu0 %v907_v29  ;;  %v878_v31 = vpop.f32.mrb[22].mxu1  ;;  %v913_v40 = vsel %vm184_vm1, %v895_v30, -inf }
 0x39a   : > { %v889_v33 = vmul.f32 0.25, %v878_v31  ;;  %v1419_v34 = vpop.f32.mrb[23].mxu1  ;;  %v896_v36 = vadd.f32 %v888_v27, %v175_v26 }
 0x39c   : > { %v916_v38 = vsel %vm184_vm1, %v896_v36, -inf  ;;  %v897_v42 = vadd.f32 %v889_v33, %v176_v32 }
 0x39d   : > { %917 = vmax.xlane.f32.xlu1 %v916_v38  ;;  %914 = vmax.xlane.f32.xlu0 %v913_v40 }
 0x39e   : > { %v919_v44 = vsel %vm184_vm1, %v897_v42, -inf }
 0x3a1   : > { %920 = vmax.xlane.f32.xlu0 %v919_v44 }
 0x3ae   : > { %990 = vrot.lane.b32.xlu1 %v1577_v4, %s1538_s27 }
 0x41d   : > { %v900_v46 = vpop.xlane.xlu0 %899 }
 0x41e   : > { %v922_v48 = vsub.f32 %v890_v59, %v900_v46 }
 0x41f   : > { %v903_v50 = vpop.xlane.xlu1 %902 }
 0x420   : > { %v930_v51 = vmul.f32 1.442695, %v922_v48  ;;  %v923_v52 = vsub.f32 %v891_v62, %v903_v50 }
 0x422   : > { %1492 = vpow2.f32 %v930_v51  ;;  %v932_v53 = vmul.f32 1.442695, %v923_v52  ;;  %v906_v54 = vpop.xlane.xlu0 %905 }
 0x423   : > { %v924_v55 = vsub.f32 %v892_v13, %v906_v54 }
 0x424   : > { %1494 = vpow2.f32 %v932_v53 }
 0x425   : > { %v934_v56 = vmul.f32 1.442695, %v924_v55  ;;  %v912_v57 = vpop.xlane.xlu1 %911 }
 0x426   : > { %v926_v58 = vsub.f32 %v894_v22, %v912_v57  ;;  %v909_v60 = vpop.xlane.xlu0 %908 }
 0x427   : > { %1496 = vpow2.f32 %v934_v56  ;;  %v925_v61 = vsub.f32 %v893_v19, %v909_v60 }
 0x428   : > { %v938_v63 = vmul.f32 1.442695, %v926_v58 }
 0x429   : > { %v936_v1 = vmul.f32 1.442695, %v925_v61 }
 0x42a   : > { %1498 = vpow2.f32 %v938_v63  ;;  %v918_v4 = vpop.xlane.xlu1 %917  ;;  %v915_v2 = vpop.xlane.xlu0 %914 }
 0x42b   : > { %1500 = vpow2.f32 %v936_v1  ;;  %v928_v59 = vsub.f32 %v896_v36, %v918_v4  ;;  %v927_v3 = vsub.f32 %v895_v30, %v915_v2 }
 0x42c   : > { %v1493_v62 = vpop.eup %1492 }
 0x42d   : > { %v942_v5 = vmul.f32 1.442695, %v928_v59  ;;  %v940_v6 = vmul.f32 1.442695, %v927_v3  ;;  %v946_v7 = vsel %vm184_vm1, %v1493_v62, 0.0 }
 0x42e   : > { %v1495_v9 = vpop.eup %1494  ;;  %v921_v10 = vpop.xlane.xlu0 %920  ;;  %947 = vadd.xlane.f32.xlu1 %v946_v7 }
 0x42f   : > { %v991_v13 = vpop.permute.xlu1 %990  ;;  %1502 = vpow2.f32 %v942_v5  ;;  %v929_v14 = vsub.f32 %v897_v42, %v921_v10  ;;  %v949_v15 = vsel %vm184_vm1, %v1495_v9, 0.0 }
 0x430   : > { %1421 = vmatpush3.bf16.msra.mxu0 %v991_v13  ;;  %1504 = vpow2.f32 %v940_v6  ;;  %950 = vadd.xlane.f32.xlu0 %v949_v15 }
 0x431   : > { %1432 = vmatprep.subr.bf16.mxu0 %v1532_v0  ;;  %v1497_v16 = vpop.eup %1496  ;;  %v944_v17 = vmul.f32 1.442695, %v929_v14 }
 0x432   : > { %v952_v18 = vsel %vm184_vm1, %v1497_v16, 0.0 }
 0x433   : > { %1506 = vpow2.f32 %v944_v17  ;;  %953 = vadd.xlane.f32.xlu1 %v952_v18 }
 0x434   : > { %v1499_v19 = vpop.eup %1498 }
 0x435   : > { %v1501_v20 = vpop.eup %1500  ;;  %v958_v21 = vsel %vm184_vm1, %v1499_v19, 0.0 }
 0x436   : > { %v955_v22 = vsel %vm184_vm1, %v1501_v20, 0.0 }
 0x437   : > { %959 = vadd.xlane.f32.xlu1 %v958_v21  ;;  %956 = vadd.xlane.f32.xlu0 %v955_v22 }
 0x439   : > { %v1503_v23 = vpop.eup %1502 }
 0x43a   : > { %v1505_v24 = vpop.eup %1504  ;;  %v964_v25 = vsel %vm184_vm1, %v1503_v23, 0.0 }
 0x43b   : > { %965 = vadd.xlane.f32.xlu1 %v964_v25  ;;  %v961_v26 = vsel %vm184_vm1, %v1505_v24, 0.0 }
 0x43c   : > { %962 = vadd.xlane.f32.xlu0 %v961_v26 }
 0x43d   : > { %v1507_v27 = vpop.eup %1506 }
 0x43e   : > { %v967_v28 = vsel %vm184_vm1, %v1507_v27, 0.0 }
 0x440   : > { %968 = vadd.xlane.f32.xlu0 %v967_v28 }
 0x44c   : > { %1084 = vrot.lane.b32.xlu1 %v1579_v8, %s1538_s27 }
 0x450   : > { %1131 = vrot.lane.b32.xlu1 %v1585_v12, %s1538_s27 }
 0x456   : > { %1037 = vrot.lane.b32.xlu0 %v1582_v11, %s1538_s27 }
 0x4bb   : > { %v948_v29 = vpop.xlane.xlu1 %947 }
 0x4bc   : > { %1508 = vrcp.f32 %v948_v29 }
 0x4bd   : > { %v951_v30 = vpop.xlane.xlu0 %950 }
 0x4be   : > { %1510 = vrcp.f32 %v951_v30 }
 0x4c0   : > { %v954_v31 = vpop.xlane.xlu1 %953 }
 0x4c1   : > { %1512 = vrcp.f32 %v954_v31 }
 0x4c4   : > { %v960_v32 = vpop.xlane.xlu1 %959  ;;  %v957_v33 = vpop.xlane.xlu0 %956 }
 0x4c5   : > { %1514 = vrcp.f32 %v957_v33 }
 0x4c6   : > { %v1509_v34 = vpop.eup %1508  ;;  %1516 = vrcp.f32 %v960_v32 }
 0x4c7   : > { %v978_v8 = vmul.f32 %v1509_v34, %v1493_v62 }
 0x4c8   : > { %v1511_v36 = vpop.eup %1510  ;;  %v966_v38 = vpop.xlane.xlu1 %965 }
 0x4c9   : > { %v979_v40 = vmul.f32 %v1511_v36, %v1495_v9  ;;  %v963_v42 = vpop.xlane.xlu0 %962 }
 0x4ca   : > { %1518 = vrcp.f32 %v963_v42 }
 0x4cb   : > { %v986_v12 = vpack.c.bf16 %v979_v40, %v978_v8  ;;  %1520 = vrcp.f32 %v966_v38  ;;  %v1513_v46 = vpop.eup %1512 }
 0x4cc   : > { %v1085_v11 = vpop.permute.xlu1 %1084  ;;  %v980_v50 = vmul.f32 %v1513_v46, %v1497_v16 }
 0x4cd   : > { %v969_v44 = vpop.xlane.xlu0 %968  ;;  %1423 = vmatmul.mubr.msk.bf16.vlgmr.msra.gmra.mrb[24].mxu0 %vm184_vm1, %v986_v12 }
 0x4ce   : > { %1522 = vrcp.f32 %v969_v44  ;;  %1433 = vmatpush3.bf16.msra.mxu0 %v1085_v11  ;;  %1434 = vmatprep.mubr.msk.bf16.mxu0 %vm1533_vm0, %v1532_v0 }
 0x4cf   : > { %v1515_v48 = vpop.eup %1514 }
 0x4d0   : > { %v981_v51 = vmul.f32 %v1515_v48, %v1501_v20  ;;  %v1517_v53 = vpop.eup %1516  ;;  %v1132_v55 = vpop.permute.xlu1 %1131 }
 0x4d1   : > { %v1038_v52 = vpop.permute.xlu0 %1037  ;;  %v982_v57 = vmul.f32 %v1517_v53, %v1499_v19 }
 0x4d2   : > { %1427 = vmatpush3.bf16.msra.mxu1 %v1038_v52  ;;  %v987_v54 = vpack.c.bf16 %v981_v51, %v980_v50 }
 0x4d3   : > { %1438 = vmatprep.subr.bf16.mxu1 %v1532_v0 }
 0x4d4   : > { %v1519_v56 = vpop.eup %1518 }
 0x4d5   : > { %v983_v58 = vmul.f32 %v1519_v56, %v1505_v24  ;;  %1429 = vmatmul.mubr.msk.bf16.vlgmr.msra.gmra.mrb[24].mxu1 %vm184_vm1, %v987_v54  ;;  %v1521_v60 = vpop.eup %1520 }
 0x4d6   : > { %1439 = vmatpush3.bf16.msra.mxu1 %v1132_v55  ;;  %1440 = vmatprep.mubr.msk.bf16.mxu1 %vm1533_vm0, %v1532_v0  ;;  %v984_v1 = vmul.f32 %v1521_v60, %v1503_v23 }
 0x4d7   : > { %v988_v61 = vpack.c.bf16 %v983_v58, %v982_v57 }
 0x4d8   : > { %v1523_v63 = vpop.eup %1522 }
 0x4d9   : > { %v985_v4 = vmul.f32 %v1523_v63, %v1507_v27  ;;  %1435 = vmatmul.mubr.msk.bf16.vlgmr.msra.gmra.mrb[28].mxu0 %vm184_vm1, %v988_v61 }
 0x4db   : > { %v989_v2 = vpack.c.bf16 %v985_v4, %v984_v1 }
 0x4dd   : > { %1441 = vmatmul.mubr.msk.bf16.vlgmr.msra.gmra.mrb[28].mxu1 %vm184_vm1, %v989_v2 }
 0x5a0   : > { %v1030_v59 = vpop.f32.mrb[24].mxu0 }
 0x5a1   : > { %1186 = vrot.lane.b32.xlu0 %v1030_v59, %s1539_s28  ;;  %v1424_v3 = vpop.f32.mrb[25].mxu0 }
 0x5a2   : > { %v1033_v62 = vpop.f32.mrb[26].mxu0 }
 0x5a3   : > { %1188 = vrot.lane.b32.xlu1 %v1033_v62, %s1539_s28  ;;  %v1425_v5 = vpop.f32.mrb[27].mxu0 }
 0x5a8   : > { %v1077_v6 = vpop.f32.mrb[24].mxu1 }
 0x5a9   : > { %1190 = vrot.lane.b32.xlu0 %v1077_v6, %s1539_s28  ;;  %v1430_v7 = vpop.f32.mrb[25].mxu1 }
 0x5aa   : > { %v1080_v0 = vpop.f32.mrb[26].mxu1 }
 0x5ab   : > { %1192 = vrot.lane.b32.xlu1 %v1080_v0, %s1539_s28  ;;  %v1431_v9 = vpop.f32.mrb[27].mxu1 }
 0x5ac   : > { %v1124_v10 = vpop.f32.mrb[28].mxu0 }
 0x5ad   : > { %v1436_v13 = vpop.f32.mrb[29].mxu0  ;;  %1194 = vrot.lane.b32.xlu0 %v1124_v10, %s1539_s28 }
 0x5ae   : > { %v1127_v14 = vpop.f32.mrb[30].mxu0 }
 0x5af   : > { %v1437_v15 = vpop.f32.mrb[31].mxu0  ;;  %1196 = vrot.lane.b32.xlu1 %v1127_v14, %s1539_s28 }
 0x5b0   : > { %v1171_v16 = vpop.f32.mrb[28].mxu1 }
 0x5b1   : > { %1198 = vrot.lane.b32.xlu0 %v1171_v16, %s1539_s28  ;;  %v1442_v17 = vpop.f32.mrb[29].mxu1 }
 0x5b2   : > { %v1174_v18 = vpop.f32.mrb[30].mxu1 }
 0x5b3   : > { %1200 = vrot.lane.b32.xlu1 %v1174_v18, %s1539_s28  ;;  %v1443_v19 = vpop.f32.mrb[31].mxu1 }
 0x613   : > { %v1187_v20 = vpop.permute.xlu0 %1186 }
 0x614   : > { %v1210_v21 = vsel %vm184_vm1, %v1713_v35, %v1187_v20 }
 0x615   : > { %1219 = vst.msk [vmem:[%s150_s3] sm:$0xff] %vm1218_vm2, %v1210_v21  ;;  %v1189_v22 = vpop.permute.xlu1 %1188 }
 0x616   : > { %v1211_v23 = vsel %vm184_vm1, %v1715_v37, %v1189_v22 }
 0x617   : > { %1220 = vst.msk [vmem:[%s150_s3 + $0x8] sm:$0xff] %vm1218_vm2, %v1211_v23 }
 0x61b   : > { %v1191_v24 = vpop.permute.xlu0 %1190 }
 0x61c   : > { %v1212_v25 = vsel %vm184_vm1, %v1717_v39, %v1191_v24 }
 0x61d   : > { %1221 = vst.msk [vmem:[%s150_s3 + $0x10] sm:$0xff] %vm1218_vm2, %v1212_v25  ;;  %v1193_v26 = vpop.permute.xlu1 %1192 }
 0x61e   : > { %v1213_v27 = vsel %vm184_vm1, %v1719_v41, %v1193_v26 }
 0x61f   : > { %1222 = vst.msk [vmem:[%s150_s3 + $0x18] sm:$0xff] %vm1218_vm2, %v1213_v27  ;;  %v1195_v35 = vpop.permute.xlu0 %1194 }
 0x620   : > { %v1214_v28 = vsel %vm184_vm1, %v1721_v43, %v1195_v35 }
 0x621   : > { %1223 = vst.msk [vmem:[%s150_s3 + $0x20] sm:$0xff] %vm1218_vm2, %v1214_v28  ;;  %v1197_v37 = vpop.permute.xlu1 %1196 }
 0x622   : > { %v1215_v29 = vsel %vm184_vm1, %v1723_v45, %v1197_v37 }
 0x623   : > { %1224 = vst.msk [vmem:[%s150_s3 + $0x28] sm:$0xff] %vm1218_vm2, %v1215_v29  ;;  %v1199_v39 = vpop.permute.xlu0 %1198 }
 0x624   : > { %v1216_v30 = vsel %vm184_vm1, %v1725_v47, %v1199_v39 }
 0x625   : > { %1225 = vst.msk [vmem:[%s150_s3 + $0x30] sm:$0xff] %vm1218_vm2, %v1216_v30  ;;  %v1201_v41 = vpop.permute.xlu1 %1200 }
 0x626   : > { %v1217_v31 = vsel %vm184_vm1, %v1727_v49, %v1201_v41 }
 0x627   : > { %1226 = vst.msk [vmem:[%s150_s3 + $0x38] sm:$0xff] %vm1218_vm2, %v1217_v31 }
 0x628 PF: > { %s12_s9 = sadd.s32 1, %s1530_s9  }
 0x629   : > { %p9_p4 = scmp.ge.s32.totalorder %s12_s9, 4  }
 0x62b   :  { %11 = sbr.rel (!%p9_p4) target bundleno = 1 (0x1), region = 58 }

// kernel: swin_forward.40
= control target key start
LH: loop header
LB: loop body
LE: loop exit
PB: predicated region body
PF: predicated region fallthrough
CT: control target
= control target key end

     0   :  { %vm52_vm0 = vcmask 261120   ;;  %s392_s1 = inlined_call_operand.vmem [shape: f32[32,32], index: 1, kind: input, shape index: {}]   ;;  %s393_s0 = inlined_call_operand.vmem [shape: f32[128,32], index: 0, kind: input, shape index: {}]   ;;  %s394_s2 = inlined_call_operand.vmem [shape: f32[1,32], index: 2, kind: input, shape index: {}]   ;;  %s395_s3 = inlined_call_operand.vmem [shape: f32[128,32], index: 3, kind: output, shape index: {}]  }
   0x1   :  { %v39_v0 = vld [vmem:[%s392_s1] sm:$0xff]  ;;  %v40_v1 = vld [vmem:[%s392_s1 + $0x8] sm:$0xff]  ;;  %v41_v2 = vld [vmem:[%s392_s1 + $0x10] sm:$0xff] }
   0x2   :  { %v43_v3 = vpack.c.bf16 %v40_v1, %v39_v0  ;;  %v42_v4 = vld [vmem:[%s392_s1 + $0x18] sm:$0xff]  ;;  %v15_v5 = vld [vmem:[%s393_s0] sm:$0xff]  ;;  %v16_v6 = vld [vmem:[%s393_s0 + $0x8] sm:$0xff] }
   0x3   :  { %v44_v7 = vpack.c.bf16 %v42_v4, %v41_v2  ;;  %v31_v8 = vpack.c.bf16 %v16_v6, %v15_v5  ;;  %v23_v9 = vld [vmem:[%s393_s0 + $0x40] sm:$0xff]  ;;  %v24_v10 = vld [vmem:[%s393_s0 + $0x48] sm:$0xff]  ;;  %v17_v12 = vld [vmem:[%s393_s0 + $0x10] sm:$0xff] }
   0x4   :  { %213 = vmatprep.subr.bf16.mxu0 %v43_v3  ;;  %233 = vmatprep.subr.bf16.mxu1 %v43_v3  ;;  %v35_v11 = vpack.c.bf16 %v24_v10, %v23_v9  ;;  %v18_v13 = vld [vmem:[%s393_s0 + $0x18] sm:$0xff]  ;;  %v25_v14 = vld [vmem:[%s393_s0 + $0x50] sm:$0xff]  ;;  %v19_v16 = vld [vmem:[%s393_s0 + $0x20] sm:$0xff] }
   0x5   :  { %214 = vmatpush3.bf16.msra.mxu0 %v43_v3  ;;  %235 = vmatpush3.bf16.msra.mxu1 %v43_v3  ;;  %v26_v15 = vld [vmem:[%s393_s0 + $0x58] sm:$0xff]  ;;  %v20_v17 = vld [vmem:[%s393_s0 + $0x28] sm:$0xff]  ;;  %v27_v18 = vld [vmem:[%s393_s0 + $0x60] sm:$0xff]  ;;  %v32_v20 = vpack.c.bf16 %v18_v13, %v17_v12 }
   0x6   :  { %215 = vmatprep.subr.bf16.mxu0 %v44_v7  ;;  %234 = vmatprep.subr.bf16.mxu1 %v44_v7  ;;  %v28_v19 = vld [vmem:[%s393_s0 + $0x68] sm:$0xff]  ;;  %v36_v21 = vpack.c.bf16 %v26_v15, %v25_v14  ;;  %v33_v22 = vpack.c.bf16 %v20_v17, %v19_v16  ;;  %v21_v24 = vld [vmem:[%s393_s0 + $0x30] sm:$0xff]  ;;  %v22_v25 = vld [vmem:[%s393_s0 + $0x38] sm:$0xff] }
   0x7   :  { %217 = vmatprep.mubr.msk.bf16.mxu0 %vm52_vm0, %v31_v8  ;;  %225 = vmatprep.mubr.msk.bf16.mxu1 %vm52_vm0, %v35_v11  ;;  %v37_v23 = vpack.c.bf16 %v28_v19, %v27_v18  ;;  %v29_v26 = vld [vmem:[%s393_s0 + $0x70] sm:$0xff]  ;;  %v30_v27 = vld [vmem:[%s393_s0 + $0x78] sm:$0xff]  ;;  %v34_v28 = vpack.c.bf16 %v22_v25, %v21_v24  ;;  %v194_v30 = vld [vmem:[%s394_s2] ss:$0 sm:$0xff] }
   0x8   :  { %v38_v29 = vpack.c.bf16 %v30_v27, %v29_v26 }
   0x9   :  { %216 = vmatpush3.bf16.msra.mxu0 %v44_v7  ;;  %236 = vmatpush3.bf16.msra.mxu1 %v44_v7 }
   0xc   :  { %218 = vmatmul.mubr.msk.bf16.vlgmr.msra.gmra.mrb[0].mxu0 %vm52_vm0, %v32_v20  ;;  %226 = vmatmul.mubr.msk.bf16.vlgmr.msra.gmra.mrb[0].mxu1 %vm52_vm0, %v36_v21 }
   0xd   :  { %221 = vmatprep.mubr.msk.bf16.mxu0 %vm52_vm0, %v33_v22  ;;  %229 = vmatprep.mubr.msk.bf16.mxu1 %vm52_vm0, %v37_v23 }
  0x14   :  { %222 = vmatmul.mubr.msk.bf16.gmra.mrb[4].mxu0 %vm52_vm0, %v34_v28  ;;  %230 = vmatmul.mubr.msk.bf16.gmra.mrb[4].mxu1 %vm52_vm0, %v38_v29 }
  0xdf   :  { %v219_v31 = vpop.f32.mrb[0].mxu0  ;;  %v227_v32 = vpop.f32.mrb[0].mxu1 }
  0xe0   :  { %v120_v33 = vadd.f32 %v219_v31, %v194_v30  ;;  %v152_v34 = vadd.f32 %v227_v32, %v194_v30  ;;  %v111_v35 = vpop.f32.mrb[1].mxu0  ;;  %v143_v36 = vpop.f32.mrb[1].mxu1 }
  0xe1   :  { %v112_v37 = vadd.f32 %v194_v30, %v111_v35  ;;  %v144_v38 = vadd.f32 %v194_v30, %v143_v36  ;;  %v220_v39 = vpop.f32.mrb[2].mxu0  ;;  %v228_v40 = vpop.f32.mrb[2].mxu1 }
  0xe2   :  { %176 = vst.msk [vmem:[%s395_s3 + $0x10] sm:$0xff] %vm52_vm0, %v120_v33  ;;  %184 = vst.msk [vmem:[%s395_s3 + $0x50] sm:$0xff] %vm52_vm0, %v152_v34  ;;  %v123_v41 = vadd.f32 %v220_v39, %v194_v30  ;;  %v155_v42 = vadd.f32 %v228_v40, %v194_v30  ;;  %v114_v43 = vpop.f32.mrb[3].mxu0  ;;  %v146_v44 = vpop.f32.mrb[3].mxu1 }
  0xe3   :  { %174 = vst.msk [vmem:[%s395_s3] sm:$0xff] %vm52_vm0, %v112_v37  ;;  %182 = vst.msk [vmem:[%s395_s3 + $0x40] sm:$0xff] %vm52_vm0, %v144_v38  ;;  %v115_v45 = vadd.f32 %v194_v30, %v114_v43  ;;  %v147_v46 = vadd.f32 %v194_v30, %v146_v44 }
  0xe4   :  { %177 = vst.msk [vmem:[%s395_s3 + $0x18] sm:$0xff] %vm52_vm0, %v123_v41  ;;  %185 = vst.msk [vmem:[%s395_s3 + $0x58] sm:$0xff] %vm52_vm0, %v155_v42 }
  0xe5   :  { %175 = vst.msk [vmem:[%s395_s3 + $0x8] sm:$0xff] %vm52_vm0, %v115_v45  ;;  %183 = vst.msk [vmem:[%s395_s3 + $0x48] sm:$0xff] %vm52_vm0, %v147_v46 }
  0xe7   :  { %v223_v47 = vpop.f32.mrb[4].mxu0  ;;  %v231_v48 = vpop.f32.mrb[4].mxu1 }
  0xe8   :  { %v136_v49 = vadd.f32 %v223_v47, %v194_v30  ;;  %v168_v50 = vadd.f32 %v231_v48, %v194_v30  ;;  %v127_v51 = vpop.f32.mrb[5].mxu0  ;;  %v159_v52 = vpop.f32.mrb[5].mxu1 }
  0xe9   :  { %v128_v53 = vadd.f32 %v194_v30, %v127_v51  ;;  %v160_v54 = vadd.f32 %v194_v30, %v159_v52  ;;  %v224_v55 = vpop.f32.mrb[6].mxu0  ;;  %v232_v56 = vpop.f32.mrb[6].mxu1 }
  0xea   :  { %180 = vst.msk [vmem:[%s395_s3 + $0x30] sm:$0xff] %vm52_vm0, %v136_v49  ;;  %188 = vst.msk [vmem:[%s395_s3 + $0x70] sm:$0xff] %vm52_vm0, %v168_v50  ;;  %v139_v57 = vadd.f32 %v224_v55, %v194_v30  ;;  %v171_v58 = vadd.f32 %v232_v56, %v194_v30  ;;  %v130_v59 = vpop.f32.mrb[7].mxu0  ;;  %v162_v60 = vpop.f32.mrb[7].mxu1 }
  0xeb   :  { %178 = vst.msk [vmem:[%s395_s3 + $0x20] sm:$0xff] %vm52_vm0, %v128_v53  ;;  %186 = vst.msk [vmem:[%s395_s3 + $0x60] sm:$0xff] %vm52_vm0, %v160_v54  ;;  %v131_v61 = vadd.f32 %v194_v30, %v130_v59  ;;  %v163_v62 = vadd.f32 %v194_v30, %v162_v60 }
  0xec   :  { %181 = vst.msk [vmem:[%s395_s3 + $0x38] sm:$0xff] %vm52_vm0, %v139_v57  ;;  %189 = vst.msk [vmem:[%s395_s3 + $0x78] sm:$0xff] %vm52_vm0, %v171_v58 }
  0xed   :  { %179 = vst.msk [vmem:[%s395_s3 + $0x28] sm:$0xff] %vm52_vm0, %v131_v61  ;;  %187 = vst.msk [vmem:[%s395_s3 + $0x68] sm:$0xff] %vm52_vm0, %v163_v62 }

// kernel: swin_forward.37
= control target key start
LH: loop header
LB: loop body
LE: loop exit
PB: predicated region body
PF: predicated region fallthrough
CT: control target
= control target key end

     0   :  { %vm409_vm0 = vcmask 1043456   ;;  %vm216_vm1 = vcmask 64512   ;;  %vm958_vm2 = vcmask 15360   ;;  %s2471_s1 = inlined_call_operand.vmem [shape: f32[8,2], index: 1, kind: input, shape index: {}]   ;;  %s2472_s0 = inlined_call_operand.vmem [shape: f32[1024,8], index: 0, kind: input, shape index: {}]   ;;  %s2473_s2 = inlined_call_operand.vmem [shape: f32[1,2], index: 2, kind: input, shape index: {}]   ;;  %s2474_s3 = inlined_call_operand.vmem [shape: f32[1024,2], index: 3, kind: output, shape index: {}]  }
   0x1   :  { %v207_v0 = vld [vmem:[%s2471_s1] sm:$0xff]  ;;  %v16_v2 = vld [vmem:[%s2472_s0 + $0x8] sm:$0xff]  ;;  %v17_v7 = vld [vmem:[%s2472_s0 + $0x10] sm:$0xff] }
   0x2   :  { %v15_v1 = vld [vmem:[%s2472_s0] sm:$0xff]  ;;  %v208_v3 = vpack.c.bf16 %v207_v0, %v207_v0  ;;  %v80_v6 = vld [vmem:[%s2472_s0 + $0x208] sm:$0xff]  ;;  %v18_v9 = vld [vmem:[%s2472_s0 + $0x18] sm:$0xff] }
   0x3   :  { %v143_v4 = vpack.c.bf16 %v16_v2, %v15_v1  ;;  %v79_v5 = vld [vmem:[%s2472_s0 + $0x200] sm:$0xff]  ;;  %v81_v10 = vld [vmem:[%s2472_s0 + $0x210] sm:$0xff]  ;;  %v82_v11 = vld [vmem:[%s2472_s0 + $0x218] sm:$0xff]  ;;  %v144_v13 = vpack.c.bf16 %v18_v9, %v17_v7 }
   0x4   :  { %v175_v8 = vpack.c.bf16 %v80_v6, %v79_v5  ;;  %1353 = vmatprep.subr.msk.bf16.mxu0 %vm409_vm0, %v208_v3  ;;  %1354 = vmatprep.subr.msk.bf16.mxu1 %vm409_vm0, %v208_v3  ;;  %v411_v12 = vsel %vm409_vm0, %v208_v3, 0  ;;  %v176_v14 = vpack.c.bf16 %v82_v11, %v81_v10  ;;  %v19_v15 = vld [vmem:[%s2472_s0 + $0x20] sm:$0xff]  ;;  %v20_v16 = vld [vmem:[%s2472_s0 + $0x28] sm:$0xff]  ;;  %v21_v21 = vld [vmem:[%s2472_s0 + $0x30] sm:$0xff] }
   0x5   :  { %v83_v17 = vld [vmem:[%s2472_s0 + $0x220] sm:$0xff]  ;;  %1222 = vmatpush3.bf16.msra.mxu0 %v411_v12  ;;  %1352 = vmatpush3.bf16.msra.mxu1 %v411_v12  ;;  %v145_v18 = vpack.c.bf16 %v20_v16, %v19_v15  ;;  %v84_v19 = vld [vmem:[%s2472_s0 + $0x228] sm:$0xff]  ;;  %v22_v22 = vld [vmem:[%s2472_s0 + $0x38] sm:$0xff] }
   0x6   :  { %1223 = vmatprep.mubr.msk.bf16.mxu0 %vm216_vm1, %v143_v4  ;;  %1287 = vmatprep.mubr.msk.bf16.mxu1 %vm216_vm1, %v175_v8  ;;  %v177_v20 = vpack.c.bf16 %v84_v19, %v83_v17  ;;  %v85_v23 = vld [vmem:[%s2472_s0 + $0x230] sm:$0xff]  ;;  %v86_v24 = vld [vmem:[%s2472_s0 + $0x238] sm:$0xff]  ;;  %v23_v25 = vld [vmem:[%s2472_s0 + $0x40] sm:$0xff]  ;;  %v146_v29 = vpack.c.bf16 %v22_v22, %v21_v21 }
   0x7   :  { %v24_v26 = vld [vmem:[%s2472_s0 + $0x48] sm:$0xff]  ;;  %v87_v27 = vld [vmem:[%s2472_s0 + $0x240] sm:$0xff]  ;;  %v178_v30 = vpack.c.bf16 %v86_v24, %v85_v23  ;;  %v25_v33 = vld [vmem:[%s2472_s0 + $0x50] sm:$0xff] }
   0x8   :  { %1224 = vmatmul.mubr.msk.bf16.vlgmr.msra.gmra.mrb[0].mxu0 %vm216_vm1, %v144_v13  ;;  %1288 = vmatmul.mubr.msk.bf16.vlgmr.msra.gmra.mrb[0].mxu1 %vm216_vm1, %v176_v14  ;;  %v88_v28 = vld [vmem:[%s2472_s0 + $0x248] sm:$0xff]  ;;  %v147_v31 = vpack.c.bf16 %v24_v26, %v23_v25  ;;  %v26_v34 = vld [vmem:[%s2472_s0 + $0x58] sm:$0xff]  ;;  %v89_v35 = vld [vmem:[%s2472_s0 + $0x250] sm:$0xff] }
   0x9   :  { %1227 = vmatprep.mubr.msk.bf16.mxu0 %vm216_vm1, %v145_v18  ;;  %1291 = vmatprep.mubr.msk.bf16.mxu1 %vm216_vm1, %v177_v20  ;;  %v179_v32 = vpack.c.bf16 %v88_v28, %v87_v27  ;;  %v90_v36 = vld [vmem:[%s2472_s0 + $0x258] sm:$0xff]  ;;  %v27_v37 = vld [vmem:[%s2472_s0 + $0x60] sm:$0xff]  ;;  %v28_v38 = vld [vmem:[%s2472_s0 + $0x68] sm:$0xff]  ;;  %v148_v41 = vpack.c.bf16 %v26_v34, %v25_v33 }
   0xa   :  { %v91_v39 = vld [vmem:[%s2472_s0 + $0x260] sm:$0xff]  ;;  %v92_v40 = vld [vmem:[%s2472_s0 + $0x268] sm:$0xff]  ;;  %v180_v42 = vpack.c.bf16 %v90_v36, %v89_v35  ;;  %v149_v43 = vpack.c.bf16 %v28_v38, %v27_v37  ;;  %v29_v45 = vld [vmem:[%s2472_s0 + $0x70] sm:$0xff] }
   0xb   :  { %v181_v44 = vpack.c.bf16 %v92_v40, %v91_v39  ;;  %v30_v46 = vld [vmem:[%s2472_s0 + $0x78] sm:$0xff]  ;;  %v93_v47 = vld [vmem:[%s2472_s0 + $0x270] sm:$0xff]  ;;  %v31_v49 = vld [vmem:[%s2472_s0 + $0x80] sm:$0xff] }
   0xc   :  { %v94_v48 = vld [vmem:[%s2472_s0 + $0x278] sm:$0xff]  ;;  %v32_v50 = vld [vmem:[%s2472_s0 + $0x88] sm:$0xff]  ;;  %v95_v51 = vld [vmem:[%s2472_s0 + $0x280] sm:$0xff]  ;;  %v150_v53 = vpack.c.bf16 %v30_v46, %v29_v45 }
   0xd   :  { %v96_v52 = vld [vmem:[%s2472_s0 + $0x288] sm:$0xff]  ;;  %v182_v54 = vpack.c.bf16 %v94_v48, %v93_v47  ;;  %v151_v55 = vpack.c.bf16 %v32_v50, %v31_v49  ;;  %v33_v57 = vld [vmem:[%s2472_s0 + $0x90] sm:$0xff]  ;;  %v34_v58 = vld [vmem:[%s2472_s0 + $0x98] sm:$0xff] }
   0xe   :  { %v183_v56 = vpack.c.bf16 %v96_v52, %v95_v51  ;;  %v97_v59 = vld [vmem:[%s2472_s0 + $0x290] sm:$0xff]  ;;  %v98_v60 = vld [vmem:[%s2472_s0 + $0x298] sm:$0xff]  ;;  %v35_v61 = vld [vmem:[%s2472_s0 + $0xa0] sm:$0xff]  ;;  %v152_v1 = vpack.c.bf16 %v34_v58, %v33_v57 }
   0xf   :  { %v36_v62 = vld [vmem:[%s2472_s0 + $0xa8] sm:$0xff]  ;;  %v99_v63 = vld [vmem:[%s2472_s0 + $0x2a0] sm:$0xff]  ;;  %v184_v2 = vpack.c.bf16 %v98_v60, %v97_v59  ;;  %v37_v5 = vld [vmem:[%s2472_s0 + $0xb0] sm:$0xff] }
  0x10   :  { %1228 = vmatmul.mubr.msk.bf16.gmra.mrb[4].mxu0 %vm216_vm1, %v146_v29  ;;  %1292 = vmatmul.mubr.msk.bf16.gmra.mrb[4].mxu1 %vm216_vm1, %v178_v30  ;;  %v100_v0 = vld [vmem:[%s2472_s0 + $0x2a8] sm:$0xff]  ;;  %v153_v3 = vpack.c.bf16 %v36_v62, %v35_v61  ;;  %v38_v6 = vld [vmem:[%s2472_s0 + $0xb8] sm:$0xff]  ;;  %v101_v7 = vld [vmem:[%s2472_s0 + $0x2b0] sm:$0xff] }
  0x11   :  { %1231 = vmatprep.mubr.msk.bf16.mxu0 %vm216_vm1, %v147_v31  ;;  %1295 = vmatprep.mubr.msk.bf16.mxu1 %vm216_vm1, %v179_v32  ;;  %v185_v4 = vpack.c.bf16 %v100_v0, %v99_v63  ;;  %v102_v8 = vld [vmem:[%s2472_s0 + $0x2b8] sm:$0xff]  ;;  %v39_v9 = vld [vmem:[%s2472_s0 + $0xc0] sm:$0xff]  ;;  %v40_v10 = vld [vmem:[%s2472_s0 + $0xc8] sm:$0xff]  ;;  %v154_v13 = vpack.c.bf16 %v38_v6, %v37_v5 }
  0x12   :  { %v103_v11 = vld [vmem:[%s2472_s0 + $0x2c0] sm:$0xff]  ;;  %v104_v12 = vld [vmem:[%s2472_s0 + $0x2c8] sm:$0xff]  ;;  %v186_v14 = vpack.c.bf16 %v102_v8, %v101_v7  ;;  %v155_v15 = vpack.c.bf16 %v40_v10, %v39_v9  ;;  %v41_v17 = vld [vmem:[%s2472_s0 + $0xd0] sm:$0xff] }
  0x13   :  { %v187_v16 = vpack.c.bf16 %v104_v12, %v103_v11  ;;  %v42_v18 = vld [vmem:[%s2472_s0 + $0xd8] sm:$0xff]  ;;  %v105_v19 = vld [vmem:[%s2472_s0 + $0x2d0] sm:$0xff]  ;;  %v43_v21 = vld [vmem:[%s2472_s0 + $0xe0] sm:$0xff] }
  0x14   :  { %v106_v20 = vld [vmem:[%s2472_s0 + $0x2d8] sm:$0xff]  ;;  %v44_v22 = vld [vmem:[%s2472_s0 + $0xe8] sm:$0xff]  ;;  %v107_v23 = vld [vmem:[%s2472_s0 + $0x2e0] sm:$0xff]  ;;  %v156_v25 = vpack.c.bf16 %v42_v18, %v41_v17 }
  0x15   :  { %v108_v24 = vld [vmem:[%s2472_s0 + $0x2e8] sm:$0xff]  ;;  %v188_v26 = vpack.c.bf16 %v106_v20, %v105_v19  ;;  %v157_v27 = vpack.c.bf16 %v44_v22, %v43_v21  ;;  %v45_v29 = vld [vmem:[%s2472_s0 + $0xf0] sm:$0xff]  ;;  %v46_v30 = vld [vmem:[%s2472_s0 + $0xf8] sm:$0xff] }
  0x16   :  { %v189_v28 = vpack.c.bf16 %v108_v24, %v107_v23  ;;  %v109_v31 = vld [vmem:[%s2472_s0 + $0x2f0] sm:$0xff]  ;;  %v110_v32 = vld [vmem:[%s2472_s0 + $0x2f8] sm:$0xff]  ;;  %v47_v33 = vld [vmem:[%s2472_s0 + $0x100] sm:$0xff]  ;;  %v158_v37 = vpack.c.bf16 %v46_v30, %v45_v29 }
  0x17   :  { %v48_v34 = vld [vmem:[%s2472_s0 + $0x108] sm:$0xff]  ;;  %v111_v35 = vld [vmem:[%s2472_s0 + $0x300] sm:$0xff]  ;;  %v190_v38 = vpack.c.bf16 %v110_v32, %v109_v31 }
  0x18   :  { %1232 = vmatmul.mubr.msk.bf16.gmra.mrb[8].mxu0 %vm216_vm1, %v148_v41  ;;  %1296 = vmatmul.mubr.msk.bf16.gmra.mrb[8].mxu1 %vm216_vm1, %v180_v42  ;;  %v112_v36 = vld [vmem:[%s2472_s0 + $0x308] sm:$0xff]  ;;  %v159_v39 = vpack.c.bf16 %v48_v34, %v47_v33  ;;  %v49_v41 = vld [vmem:[%s2472_s0 + $0x110] sm:$0xff]  ;;  %v50_v42 = vld [vmem:[%s2472_s0 + $0x118] sm:$0xff] }
  0x19   :  { %1235 = vmatprep.mubr.msk.bf16.mxu0 %vm216_vm1, %v149_v43  ;;  %1299 = vmatprep.mubr.msk.bf16.mxu1 %vm216_vm1, %v181_v44  ;;  %v191_v40 = vpack.c.bf16 %v112_v36, %v111_v35  ;;  %v113_v43 = vld [vmem:[%s2472_s0 + $0x310] sm:$0xff]  ;;  %v114_v44 = vld [vmem:[%s2472_s0 + $0x318] sm:$0xff]  ;;  %v51_v45 = vld [vmem:[%s2472_s0 + $0x120] sm:$0xff]  ;;  %v160_v49 = vpack.c.bf16 %v50_v42, %v49_v41 }
  0x1a   :  { %v52_v46 = vld [vmem:[%s2472_s0 + $0x128] sm:$0xff]  ;;  %v115_v47 = vld [vmem:[%s2472_s0 + $0x320] sm:$0xff]  ;;  %v192_v50 = vpack.c.bf16 %v114_v44, %v113_v43 }
  0x1b   :  { %v116_v48 = vld [vmem:[%s2472_s0 + $0x328] sm:$0xff]  ;;  %v161_v51 = vpack.c.bf16 %v52_v46, %v51_v45  ;;  %v55_v57 = vld [vmem:[%s2472_s0 + $0x140] sm:$0xff] }
  0x1c   :  { %v193_v52 = vpack.c.bf16 %v116_v48, %v115_v47  ;;  %v56_v58 = vld [vmem:[%s2472_s0 + $0x148] sm:$0xff]  ;;  %v119_v59 = vld [vmem:[%s2472_s0 + $0x340] sm:$0xff] }
  0x1d   :  { %v120_v60 = vld [vmem:[%s2472_s0 + $0x348] sm:$0xff]  ;;  %v163_v63 = vpack.c.bf16 %v56_v58, %v55_v57  ;;  %v59_v5 = vld [vmem:[%s2472_s0 + $0x160] sm:$0xff] }
  0x1e   :  { %v195_v0 = vpack.c.bf16 %v120_v60, %v119_v59  ;;  %v60_v6 = vld [vmem:[%s2472_s0 + $0x168] sm:$0xff]  ;;  %v123_v7 = vld [vmem:[%s2472_s0 + $0x360] sm:$0xff] }
  0x1f   :  { %v124_v8 = vld [vmem:[%s2472_s0 + $0x368] sm:$0xff]  ;;  %v165_v11 = vpack.c.bf16 %v60_v6, %v59_v5  ;;  %v63_v17 = vld [vmem:[%s2472_s0 + $0x180] sm:$0xff] }
  0x20   :  { %1236 = vmatmul.mubr.msk.bf16.gmra.mrb[12].mxu0 %vm216_vm1, %v150_v53  ;;  %1300 = vmatmul.mubr.msk.bf16.gmra.mrb[12].mxu1 %vm216_vm1, %v182_v54  ;;  %v53_v53 = vld [vmem:[%s2472_s0 + $0x130] sm:$0xff]  ;;  %v54_v54 = vld [vmem:[%s2472_s0 + $0x138] sm:$0xff]  ;;  %v197_v12 = vpack.c.bf16 %v124_v8, %v123_v7  ;;  %v64_v18 = vld [vmem:[%s2472_s0 + $0x188] sm:$0xff] }
  0x21   :  { %1239 = vmatprep.mubr.msk.bf16.mxu0 %vm216_vm1, %v151_v55  ;;  %1303 = vmatprep.mubr.msk.bf16.mxu1 %vm216_vm1, %v183_v56  ;;  %v117_v55 = vld [vmem:[%s2472_s0 + $0x330] sm:$0xff]  ;;  %v118_v56 = vld [vmem:[%s2472_s0 + $0x338] sm:$0xff]  ;;  %v162_v61 = vpack.c.bf16 %v54_v54, %v53_v53  ;;  %v127_v19 = vld [vmem:[%s2472_s0 + $0x380] sm:$0xff]  ;;  %v167_v23 = vpack.c.bf16 %v64_v18, %v63_v17 }
  0x22   :  { %v194_v62 = vpack.c.bf16 %v118_v56, %v117_v55  ;;  %v128_v20 = vld [vmem:[%s2472_s0 + $0x388] sm:$0xff]  ;;  %v67_v29 = vld [vmem:[%s2472_s0 + $0x1a0] sm:$0xff] }
  0x23   :  { %v199_v24 = vpack.c.bf16 %v128_v20, %v127_v19  ;;  %v68_v30 = vld [vmem:[%s2472_s0 + $0x1a8] sm:$0xff]  ;;  %v131_v31 = vld [vmem:[%s2472_s0 + $0x3a0] sm:$0xff] }
  0x24   :  { %v132_v32 = vld [vmem:[%s2472_s0 + $0x3a8] sm:$0xff]  ;;  %v169_v35 = vpack.c.bf16 %v68_v30, %v67_v29  ;;  %v71_v41 = vld [vmem:[%s2472_s0 + $0x1c0] sm:$0xff] }
  0x25   :  { %v201_v36 = vpack.c.bf16 %v132_v32, %v131_v31  ;;  %v72_v42 = vld [vmem:[%s2472_s0 + $0x1c8] sm:$0xff]  ;;  %v135_v43 = vld [vmem:[%s2472_s0 + $0x3c0] sm:$0xff] }
  0x26   :  { %v136_v44 = vld [vmem:[%s2472_s0 + $0x3c8] sm:$0xff]  ;;  %v171_v47 = vpack.c.bf16 %v72_v42, %v71_v41  ;;  %v75_v53 = vld [vmem:[%s2472_s0 + $0x1e0] sm:$0xff] }
  0x27   :  { %v203_v48 = vpack.c.bf16 %v136_v44, %v135_v43  ;;  %v76_v54 = vld [vmem:[%s2472_s0 + $0x1e8] sm:$0xff]  ;;  %v139_v55 = vld [vmem:[%s2472_s0 + $0x3e0] sm:$0xff] }
  0x28   :  { %1240 = vmatmul.mubr.msk.bf16.gmra.mrb[16].mxu0 %vm216_vm1, %v152_v1  ;;  %1304 = vmatmul.mubr.msk.bf16.gmra.mrb[16].mxu1 %vm216_vm1, %v184_v2  ;;  %v57_v1 = vld [vmem:[%s2472_s0 + $0x150] sm:$0xff]  ;;  %v58_v2 = vld [vmem:[%s2472_s0 + $0x158] sm:$0xff]  ;;  %v140_v56 = vld [vmem:[%s2472_s0 + $0x3e8] sm:$0xff]  ;;  %v173_v59 = vpack.c.bf16 %v76_v54, %v75_v53 }
  0x29   :  { %1243 = vmatprep.mubr.msk.bf16.mxu0 %vm216_vm1, %v153_v3  ;;  %1307 = vmatprep.mubr.msk.bf16.mxu1 %vm216_vm1, %v185_v4  ;;  %v121_v3 = vld [vmem:[%s2472_s0 + $0x350] sm:$0xff]  ;;  %v122_v4 = vld [vmem:[%s2472_s0 + $0x358] sm:$0xff]  ;;  %v164_v9 = vpack.c.bf16 %v58_v2, %v57_v1  ;;  %v205_v60 = vpack.c.bf16 %v140_v56, %v139_v55 }
  0x2a   :  { %v196_v10 = vpack.c.bf16 %v122_v4, %v121_v3  ;;  %v1829_v3 = vld [vmem:[%s2473_s2] ss:$0 sm:$0xff] }
  0x30   :  { %1244 = vmatmul.mubr.msk.bf16.gmra.mrb[20].mxu0 %vm216_vm1, %v154_v13  ;;  %1308 = vmatmul.mubr.msk.bf16.gmra.mrb[20].mxu1 %vm216_vm1, %v186_v14  ;;  %v61_v13 = vld [vmem:[%s2472_s0 + $0x170] sm:$0xff]  ;;  %v62_v14 = vld [vmem:[%s2472_s0 + $0x178] sm:$0xff] }
  0x31   :  { %1247 = vmatprep.mubr.msk.bf16.mxu0 %vm216_vm1, %v155_v15  ;;  %1311 = vmatprep.mubr.msk.bf16.mxu1 %vm216_vm1, %v187_v16  ;;  %v125_v15 = vld [vmem:[%s2472_s0 + $0x370] sm:$0xff]  ;;  %v126_v16 = vld [vmem:[%s2472_s0 + $0x378] sm:$0xff]  ;;  %v166_v21 = vpack.c.bf16 %v62_v14, %v61_v13 }
  0x32   :  { %v198_v22 = vpack.c.bf16 %v126_v16, %v125_v15 }
  0x38   :  { %1248 = vmatmul.mubr.msk.bf16.gmra.mrb[24].mxu0 %vm216_vm1, %v156_v25  ;;  %1312 = vmatmul.mubr.msk.bf16.gmra.mrb[24].mxu1 %vm216_vm1, %v188_v26  ;;  %v65_v25 = vld [vmem:[%s2472_s0 + $0x190] sm:$0xff]  ;;  %v66_v26 = vld [vmem:[%s2472_s0 + $0x198] sm:$0xff] }
  0x39   :  { %1251 = vmatprep.mubr.msk.bf16.mxu0 %vm216_vm1, %v157_v27  ;;  %1315 = vmatprep.mubr.msk.bf16.mxu1 %vm216_vm1, %v189_v28  ;;  %v129_v27 = vld [vmem:[%s2472_s0 + $0x390] sm:$0xff]  ;;  %v130_v28 = vld [vmem:[%s2472_s0 + $0x398] sm:$0xff]  ;;  %v168_v33 = vpack.c.bf16 %v66_v26, %v65_v25 }
  0x3a   :  { %v200_v34 = vpack.c.bf16 %v130_v28, %v129_v27 }
  0x40   :  { %1252 = vmatmul.mubr.msk.bf16.gmra.mrb[28].mxu0 %vm216_vm1, %v158_v37  ;;  %1316 = vmatmul.mubr.msk.bf16.gmra.mrb[28].mxu1 %vm216_vm1, %v190_v38  ;;  %v69_v37 = vld [vmem:[%s2472_s0 + $0x1b0] sm:$0xff]  ;;  %v70_v38 = vld [vmem:[%s2472_s0 + $0x1b8] sm:$0xff] }
  0x41   :  { %1255 = vmatprep.mubr.msk.bf16.mxu0 %vm216_vm1, %v159_v39  ;;  %1319 = vmatprep.mubr.msk.bf16.mxu1 %vm216_vm1, %v191_v40  ;;  %v133_v39 = vld [vmem:[%s2472_s0 + $0x3b0] sm:$0xff]  ;;  %v134_v40 = vld [vmem:[%s2472_s0 + $0x3b8] sm:$0xff]  ;;  %v170_v45 = vpack.c.bf16 %v70_v38, %v69_v37 }
  0x42   :  { %v202_v46 = vpack.c.bf16 %v134_v40, %v133_v39 }
  0x48   :  { %1256 = vmatmul.mubr.msk.bf16.gmra.mrb[32].mxu0 %vm216_vm1, %v160_v49  ;;  %1320 = vmatmul.mubr.msk.bf16.gmra.mrb[32].mxu1 %vm216_vm1, %v192_v50  ;;  %v73_v49 = vld [vmem:[%s2472_s0 + $0x1d0] sm:$0xff]  ;;  %v74_v50 = vld [vmem:[%s2472_s0 + $0x1d8] sm:$0xff] }
  0x49   :  { %1259 = vmatprep.mubr.msk.bf16.mxu0 %vm216_vm1, %v161_v51  ;;  %1323 = vmatprep.mubr.msk.bf16.mxu1 %vm216_vm1, %v193_v52  ;;  %v137_v51 = vld [vmem:[%s2472_s0 + $0x3d0] sm:$0xff]  ;;  %v138_v52 = vld [vmem:[%s2472_s0 + $0x3d8] sm:$0xff]  ;;  %v172_v57 = vpack.c.bf16 %v74_v50, %v73_v49 }
  0x4a   :  { %v204_v58 = vpack.c.bf16 %v138_v52, %v137_v51 }
  0x50   :  { %1260 = vmatmul.mubr.msk.bf16.gmra.mrb[36].mxu0 %vm216_vm1, %v162_v61  ;;  %1324 = vmatmul.mubr.msk.bf16.gmra.mrb[36].mxu1 %vm216_vm1, %v194_v62  ;;  %v77_v61 = vld [vmem:[%s2472_s0 + $0x1f0] sm:$0xff]  ;;  %v78_v62 = vld [vmem:[%s2472_s0 + $0x1f8] sm:$0xff] }
  0x51   :  { %1263 = vmatprep.mubr.msk.bf16.mxu0 %vm216_vm1, %v163_v63  ;;  %1327 = vmatprep.mubr.msk.bf16.mxu1 %vm216_vm1, %v195_v0  ;;  %v141_v63 = vld [vmem:[%s2472_s0 + $0x3f0] sm:$0xff]  ;;  %v142_v0 = vld [vmem:[%s2472_s0 + $0x3f8] sm:$0xff]  ;;  %v174_v1 = vpack.c.bf16 %v78_v62, %v77_v61 }
  0x52   :  { %v206_v2 = vpack.c.bf16 %v142_v0, %v141_v63 }
  0x58   :  { %1264 = vmatmul.mubr.msk.bf16.gmra.mrb[40].mxu0 %vm216_vm1, %v164_v9  ;;  %1328 = vmatmul.mubr.msk.bf16.gmra.mrb[40].mxu1 %vm216_vm1, %v196_v10 }
  0x59   :  { %1267 = vmatprep.mubr.msk.bf16.mxu0 %vm216_vm1, %v165_v11  ;;  %1331 = vmatprep.mubr.msk.bf16.mxu1 %vm216_vm1, %v197_v12 }
  0x60   :  { %1268 = vmatmul.mubr.msk.bf16.gmra.mrb[44].mxu0 %vm216_vm1, %v166_v21  ;;  %1332 = vmatmul.mubr.msk.bf16.gmra.mrb[44].mxu1 %vm216_vm1, %v198_v22 }
  0x61   :  { %1271 = vmatprep.mubr.msk.bf16.mxu0 %vm216_vm1, %v167_v23  ;;  %1335 = vmatprep.mubr.msk.bf16.mxu1 %vm216_vm1, %v199_v24 }
  0x68   :  { %1272 = vmatmul.mubr.msk.bf16.gmra.mrb[48].mxu0 %vm216_vm1, %v168_v33  ;;  %1336 = vmatmul.mubr.msk.bf16.gmra.mrb[48].mxu1 %vm216_vm1, %v200_v34 }
  0x69   :  { %1275 = vmatprep.mubr.msk.bf16.mxu0 %vm216_vm1, %v169_v35  ;;  %1339 = vmatprep.mubr.msk.bf16.mxu1 %vm216_vm1, %v201_v36 }
  0x70   :  { %1276 = vmatmul.mubr.msk.bf16.gmra.mrb[52].mxu0 %vm216_vm1, %v170_v45  ;;  %1340 = vmatmul.mubr.msk.bf16.gmra.mrb[52].mxu1 %vm216_vm1, %v202_v46 }
  0x71   :  { %1279 = vmatprep.mubr.msk.bf16.mxu0 %vm216_vm1, %v171_v47  ;;  %1343 = vmatprep.mubr.msk.bf16.mxu1 %vm216_vm1, %v203_v48 }
  0x78   :  { %1280 = vmatmul.mubr.msk.bf16.gmra.mrb[56].mxu0 %vm216_vm1, %v172_v57  ;;  %1344 = vmatmul.mubr.msk.bf16.gmra.mrb[56].mxu1 %vm216_vm1, %v204_v58 }
  0x79   :  { %1283 = vmatprep.mubr.msk.bf16.mxu0 %vm216_vm1, %v173_v59  ;;  %1347 = vmatprep.mubr.msk.bf16.mxu1 %vm216_vm1, %v205_v60 }
  0x80   :  { %1284 = vmatmul.mubr.msk.bf16.gmra.mrb[60].mxu0 %vm216_vm1, %v174_v1  ;;  %1348 = vmatmul.mubr.msk.bf16.gmra.mrb[60].mxu1 %vm216_vm1, %v206_v2 }
  0xdb   :  { %v1225_v4 = vpop.f32.mrb[0].mxu0  ;;  %v1289_v5 = vpop.f32.mrb[0].mxu1 }
  0xdc   :  { %v456_v6 = vadd.f32 %v1225_v4, %v1829_v3  ;;  %v712_v7 = vadd.f32 %v1289_v5, %v1829_v3  ;;  %v447_v8 = vpop.f32.mrb[1].mxu0  ;;  %v703_v9 = vpop.f32.mrb[1].mxu1 }
  0xdd   :  { %v448_v10 = vadd.f32 %v1829_v3, %v447_v8  ;;  %v704_v11 = vadd.f32 %v1829_v3, %v703_v9  ;;  %v1226_v12 = vpop.f32.mrb[2].mxu0  ;;  %v1290_v13 = vpop.f32.mrb[2].mxu1 }
  0xde   :  { %961 = vst.msk [vmem:[%s2474_s3 + $0x10] sm:$0xff] %vm958_vm2, %v456_v6  ;;  %1025 = vst.msk [vmem:[%s2474_s3 + $0x210] sm:$0xff] %vm958_vm2, %v712_v7  ;;  %v459_v14 = vadd.f32 %v1226_v12, %v1829_v3  ;;  %v715_v15 = vadd.f32 %v1290_v13, %v1829_v3  ;;  %v450_v16 = vpop.f32.mrb[3].mxu0  ;;  %v706_v17 = vpop.f32.mrb[3].mxu1 }
  0xdf   :  { %959 = vst.msk [vmem:[%s2474_s3] sm:$0xff] %vm958_vm2, %v448_v10  ;;  %1023 = vst.msk [vmem:[%s2474_s3 + $0x200] sm:$0xff] %vm958_vm2, %v704_v11  ;;  %v451_v18 = vadd.f32 %v1829_v3, %v450_v16  ;;  %v707_v19 = vadd.f32 %v1829_v3, %v706_v17 }
  0xe0   :  { %962 = vst.msk [vmem:[%s2474_s3 + $0x18] sm:$0xff] %vm958_vm2, %v459_v14  ;;  %1026 = vst.msk [vmem:[%s2474_s3 + $0x218] sm:$0xff] %vm958_vm2, %v715_v15 }
  0xe1   :  { %960 = vst.msk [vmem:[%s2474_s3 + $0x8] sm:$0xff] %vm958_vm2, %v451_v18  ;;  %1024 = vst.msk [vmem:[%s2474_s3 + $0x208] sm:$0xff] %vm958_vm2, %v707_v19 }
  0xe3   :  { %v1229_v20 = vpop.f32.mrb[4].mxu0  ;;  %v1293_v21 = vpop.f32.mrb[4].mxu1 }
  0xe4   :  { %v472_v22 = vadd.f32 %v1229_v20, %v1829_v3  ;;  %v728_v23 = vadd.f32 %v1293_v21, %v1829_v3  ;;  %v463_v24 = vpop.f32.mrb[5].mxu0  ;;  %v719_v25 = vpop.f32.mrb[5].mxu1 }
  0xe5   :  { %v464_v26 = vadd.f32 %v1829_v3, %v463_v24  ;;  %v720_v27 = vadd.f32 %v1829_v3, %v719_v25  ;;  %v1230_v28 = vpop.f32.mrb[6].mxu0  ;;  %v1294_v29 = vpop.f32.mrb[6].mxu1 }
  0xe6   :  { %965 = vst.msk [vmem:[%s2474_s3 + $0x30] sm:$0xff] %vm958_vm2, %v472_v22  ;;  %1029 = vst.msk [vmem:[%s2474_s3 + $0x230] sm:$0xff] %vm958_vm2, %v728_v23  ;;  %v475_v30 = vadd.f32 %v1230_v28, %v1829_v3  ;;  %v731_v31 = vadd.f32 %v1294_v29, %v1829_v3  ;;  %v466_v32 = vpop.f32.mrb[7].mxu0  ;;  %v722_v33 = vpop.f32.mrb[7].mxu1 }
  0xe7   :  { %963 = vst.msk [vmem:[%s2474_s3 + $0x20] sm:$0xff] %vm958_vm2, %v464_v26  ;;  %1027 = vst.msk [vmem:[%s2474_s3 + $0x220] sm:$0xff] %vm958_vm2, %v720_v27  ;;  %v467_v34 = vadd.f32 %v1829_v3, %v466_v32  ;;  %v723_v35 = vadd.f32 %v1829_v3, %v722_v33 }
  0xe8   :  { %966 = vst.msk [vmem:[%s2474_s3 + $0x38] sm:$0xff] %vm958_vm2, %v475_v30  ;;  %1030 = vst.msk [vmem:[%s2474_s3 + $0x238] sm:$0xff] %vm958_vm2, %v731_v31 }
  0xe9   :  { %964 = vst.msk [vmem:[%s2474_s3 + $0x28] sm:$0xff] %vm958_vm2, %v467_v34  ;;  %1028 = vst.msk [vmem:[%s2474_s3 + $0x228] sm:$0xff] %vm958_vm2, %v723_v35 }
  0xeb   :  { %v1233_v36 = vpop.f32.mrb[8].mxu0  ;;  %v1297_v37 = vpop.f32.mrb[8].mxu1 }
  0xec   :  { %v488_v38 = vadd.f32 %v1233_v36, %v1829_v3  ;;  %v744_v39 = vadd.f32 %v1297_v37, %v1829_v3  ;;  %v479_v40 = vpop.f32.mrb[9].mxu0  ;;  %v735_v41 = vpop.f32.mrb[9].mxu1 }
  0xed   :  { %v480_v42 = vadd.f32 %v1829_v3, %v479_v40  ;;  %v736_v43 = vadd.f32 %v1829_v3, %v735_v41  ;;  %v1234_v44 = vpop.f32.mrb[10].mxu0  ;;  %v1298_v45 = vpop.f32.mrb[10].mxu1 }
  0xee   :  { %969 = vst.msk [vmem:[%s2474_s3 + $0x50] sm:$0xff] %vm958_vm2, %v488_v38  ;;  %1033 = vst.msk [vmem:[%s2474_s3 + $0x250] sm:$0xff] %vm958_vm2, %v744_v39  ;;  %v491_v46 = vadd.f32 %v1234_v44, %v1829_v3  ;;  %v747_v47 = vadd.f32 %v1298_v45, %v1829_v3  ;;  %v482_v48 = vpop.f32.mrb[11].mxu0  ;;  %v738_v49 = vpop.f32.mrb[11].mxu1 }
  0xef   :  { %967 = vst.msk [vmem:[%s2474_s3 + $0x40] sm:$0xff] %vm958_vm2, %v480_v42  ;;  %1031 = vst.msk [vmem:[%s2474_s3 + $0x240] sm:$0xff] %vm958_vm2, %v736_v43  ;;  %v483_v50 = vadd.f32 %v1829_v3, %v482_v48  ;;  %v739_v51 = vadd.f32 %v1829_v3, %v738_v49 }
  0xf0   :  { %970 = vst.msk [vmem:[%s2474_s3 + $0x58] sm:$0xff] %vm958_vm2, %v491_v46  ;;  %1034 = vst.msk [vmem:[%s2474_s3 + $0x258] sm:$0xff] %vm958_vm2, %v747_v47 }
  0xf1   :  { %968 = vst.msk [vmem:[%s2474_s3 + $0x48] sm:$0xff] %vm958_vm2, %v483_v50  ;;  %1032 = vst.msk [vmem:[%s2474_s3 + $0x248] sm:$0xff] %vm958_vm2, %v739_v51 }
  0xf3   :  { %v1237_v52 = vpop.f32.mrb[12].mxu0  ;;  %v1301_v53 = vpop.f32.mrb[12].mxu1 }
  0xf4   :  { %v504_v54 = vadd.f32 %v1237_v52, %v1829_v3  ;;  %v760_v55 = vadd.f32 %v1301_v53, %v1829_v3  ;;  %v495_v56 = vpop.f32.mrb[13].mxu0  ;;  %v751_v57 = vpop.f32.mrb[13].mxu1 }
  0xf5   :  { %v496_v58 = vadd.f32 %v1829_v3, %v495_v56  ;;  %v752_v59 = vadd.f32 %v1829_v3, %v751_v57  ;;  %v1238_v60 = vpop.f32.mrb[14].mxu0  ;;  %v1302_v61 = vpop.f32.mrb[14].mxu1 }
  0xf6   :  { %973 = vst.msk [vmem:[%s2474_s3 + $0x70] sm:$0xff] %vm958_vm2, %v504_v54  ;;  %1037 = vst.msk [vmem:[%s2474_s3 + $0x270] sm:$0xff] %vm958_vm2, %v760_v55  ;;  %v507_v62 = vadd.f32 %v1238_v60, %v1829_v3  ;;  %v763_v63 = vadd.f32 %v1302_v61, %v1829_v3  ;;  %v498_v0 = vpop.f32.mrb[15].mxu0  ;;  %v754_v1 = vpop.f32.mrb[15].mxu1 }
  0xf7   :  { %971 = vst.msk [vmem:[%s2474_s3 + $0x60] sm:$0xff] %vm958_vm2, %v496_v58  ;;  %1035 = vst.msk [vmem:[%s2474_s3 + $0x260] sm:$0xff] %vm958_vm2, %v752_v59  ;;  %v499_v2 = vadd.f32 %v1829_v3, %v498_v0  ;;  %v755_v4 = vadd.f32 %v1829_v3, %v754_v1 }
  0xf8   :  { %974 = vst.msk [vmem:[%s2474_s3 + $0x78] sm:$0xff] %vm958_vm2, %v507_v62  ;;  %1038 = vst.msk [vmem:[%s2474_s3 + $0x278] sm:$0xff] %vm958_vm2, %v763_v63 }
  0xf9   :  { %972 = vst.msk [vmem:[%s2474_s3 + $0x68] sm:$0xff] %vm958_vm2, %v499_v2  ;;  %1036 = vst.msk [vmem:[%s2474_s3 + $0x268] sm:$0xff] %vm958_vm2, %v755_v4 }
  0xfb   :  { %v1241_v5 = vpop.f32.mrb[16].mxu0  ;;  %v1305_v6 = vpop.f32.mrb[16].mxu1 }
  0xfc   :  { %v520_v7 = vadd.f32 %v1241_v5, %v1829_v3  ;;  %v776_v8 = vadd.f32 %v1305_v6, %v1829_v3  ;;  %v511_v9 = vpop.f32.mrb[17].mxu0  ;;  %v767_v10 = vpop.f32.mrb[17].mxu1 }
  0xfd   :  { %v512_v11 = vadd.f32 %v1829_v3, %v511_v9  ;;  %v768_v12 = vadd.f32 %v1829_v3, %v767_v10  ;;  %v1242_v13 = vpop.f32.mrb[18].mxu0  ;;  %v1306_v14 = vpop.f32.mrb[18].mxu1 }
  0xfe   :  { %977 = vst.msk [vmem:[%s2474_s3 + $0x90] sm:$0xff] %vm958_vm2, %v520_v7  ;;  %1041 = vst.msk [vmem:[%s2474_s3 + $0x290] sm:$0xff] %vm958_vm2, %v776_v8  ;;  %v523_v15 = vadd.f32 %v1242_v13, %v1829_v3  ;;  %v779_v16 = vadd.f32 %v1306_v14, %v1829_v3  ;;  %v514_v17 = vpop.f32.mrb[19].mxu0  ;;  %v770_v18 = vpop.f32.mrb[19].mxu1 }
  0xff   :  { %975 = vst.msk [vmem:[%s2474_s3 + $0x80] sm:$0xff] %vm958_vm2, %v512_v11  ;;  %1039 = vst.msk [vmem:[%s2474_s3 + $0x280] sm:$0xff] %vm958_vm2, %v768_v12  ;;  %v515_v19 = vadd.f32 %v1829_v3, %v514_v17  ;;  %v771_v20 = vadd.f32 %v1829_v3, %v770_v18 }
 0x100   :  { %978 = vst.msk [vmem:[%s2474_s3 + $0x98] sm:$0xff] %vm958_vm2, %v523_v15  ;;  %1042 = vst.msk [vmem:[%s2474_s3 + $0x298] sm:$0xff] %vm958_vm2, %v779_v16 }
 0x101   :  { %976 = vst.msk [vmem:[%s2474_s3 + $0x88] sm:$0xff] %vm958_vm2, %v515_v19  ;;  %1040 = vst.msk [vmem:[%s2474_s3 + $0x288] sm:$0xff] %vm958_vm2, %v771_v20 }
 0x103   :  { %v1245_v21 = vpop.f32.mrb[20].mxu0  ;;  %v1309_v22 = vpop.f32.mrb[20].mxu1 }
 0x104   :  { %v536_v23 = vadd.f32 %v1245_v21, %v1829_v3  ;;  %v792_v24 = vadd.f32 %v1309_v22, %v1829_v3  ;;  %v527_v25 = vpop.f32.mrb[21].mxu0  ;;  %v783_v26 = vpop.f32.mrb[21].mxu1 }
 0x105   :  { %v528_v27 = vadd.f32 %v1829_v3, %v527_v25  ;;  %v784_v28 = vadd.f32 %v1829_v3, %v783_v26  ;;  %v1246_v29 = vpop.f32.mrb[22].mxu0  ;;  %v1310_v30 = vpop.f32.mrb[22].mxu1 }
 0x106   :  { %981 = vst.msk [vmem:[%s2474_s3 + $0xb0] sm:$0xff] %vm958_vm2, %v536_v23  ;;  %1045 = vst.msk [vmem:[%s2474_s3 + $0x2b0] sm:$0xff] %vm958_vm2, %v792_v24  ;;  %v539_v31 = vadd.f32 %v1246_v29, %v1829_v3  ;;  %v795_v32 = vadd.f32 %v1310_v30, %v1829_v3  ;;  %v530_v33 = vpop.f32.mrb[23].mxu0  ;;  %v786_v34 = vpop.f32.mrb[23].mxu1 }
 0x107   :  { %979 = vst.msk [vmem:[%s2474_s3 + $0xa0] sm:$0xff] %vm958_vm2, %v528_v27  ;;  %1043 = vst.msk [vmem:[%s2474_s3 + $0x2a0] sm:$0xff] %vm958_vm2, %v784_v28  ;;  %v531_v35 = vadd.f32 %v1829_v3, %v530_v33  ;;  %v787_v36 = vadd.f32 %v1829_v3, %v786_v34 }
 0x108   :  { %982 = vst.msk [vmem:[%s2474_s3 + $0xb8] sm:$0xff] %vm958_vm2, %v539_v31  ;;  %1046 = vst.msk [vmem:[%s2474_s3 + $0x2b8] sm:$0xff] %vm958_vm2, %v795_v32 }
 0x109   :  { %980 = vst.msk [vmem:[%s2474_s3 + $0xa8] sm:$0xff] %vm958_vm2, %v531_v35  ;;  %1044 = vst.msk [vmem:[%s2474_s3 + $0x2a8] sm:$0xff] %vm958_vm2, %v787_v36 }
 0x10b   :  { %v1249_v37 = vpop.f32.mrb[24].mxu0  ;;  %v1313_v38 = vpop.f32.mrb[24].mxu1 }
 0x10c   :  { %v552_v39 = vadd.f32 %v1249_v37, %v1829_v3  ;;  %v808_v40 = vadd.f32 %v1313_v38, %v1829_v3  ;;  %v543_v41 = vpop.f32.mrb[25].mxu0  ;;  %v799_v42 = vpop.f32.mrb[25].mxu1 }
 0x10d   :  { %v544_v43 = vadd.f32 %v1829_v3, %v543_v41  ;;  %v800_v44 = vadd.f32 %v1829_v3, %v799_v42  ;;  %v1250_v45 = vpop.f32.mrb[26].mxu0  ;;  %v1314_v46 = vpop.f32.mrb[26].mxu1 }
 0x10e   :  { %985 = vst.msk [vmem:[%s2474_s3 + $0xd0] sm:$0xff] %vm958_vm2, %v552_v39  ;;  %1049 = vst.msk [vmem:[%s2474_s3 + $0x2d0] sm:$0xff] %vm958_vm2, %v808_v40  ;;  %v555_v47 = vadd.f32 %v1250_v45, %v1829_v3  ;;  %v811_v48 = vadd.f32 %v1314_v46, %v1829_v3  ;;  %v546_v49 = vpop.f32.mrb[27].mxu0  ;;  %v802_v50 = vpop.f32.mrb[27].mxu1 }
 0x10f   :  { %983 = vst.msk [vmem:[%s2474_s3 + $0xc0] sm:$0xff] %vm958_vm2, %v544_v43  ;;  %1047 = vst.msk [vmem:[%s2474_s3 + $0x2c0] sm:$0xff] %vm958_vm2, %v800_v44  ;;  %v547_v51 = vadd.f32 %v1829_v3, %v546_v49  ;;  %v803_v52 = vadd.f32 %v1829_v3, %v802_v50 }
 0x110   :  { %986 = vst.msk [vmem:[%s2474_s3 + $0xd8] sm:$0xff] %vm958_vm2, %v555_v47  ;;  %1050 = vst.msk [vmem:[%s2474_s3 + $0x2d8] sm:$0xff] %vm958_vm2, %v811_v48 }
 0x111   :  { %984 = vst.msk [vmem:[%s2474_s3 + $0xc8] sm:$0xff] %vm958_vm2, %v547_v51  ;;  %1048 = vst.msk [vmem:[%s2474_s3 + $0x2c8] sm:$0xff] %vm958_vm2, %v803_v52 }
 0x113   :  { %v1253_v53 = vpop.f32.mrb[28].mxu0  ;;  %v1317_v54 = vpop.f32.mrb[28].mxu1 }
 0x114   :  { %v568_v55 = vadd.f32 %v1253_v53, %v1829_v3  ;;  %v824_v56 = vadd.f32 %v1317_v54, %v1829_v3  ;;  %v559_v57 = vpop.f32.mrb[29].mxu0  ;;  %v815_v58 = vpop.f32.mrb[29].mxu1 }
 0x115   :  { %v560_v59 = vadd.f32 %v1829_v3, %v559_v57  ;;  %v816_v60 = vadd.f32 %v1829_v3, %v815_v58  ;;  %v1254_v61 = vpop.f32.mrb[30].mxu0  ;;  %v1318_v62 = vpop.f32.mrb[30].mxu1 }
 0x116   :  { %989 = vst.msk [vmem:[%s2474_s3 + $0xf0] sm:$0xff] %vm958_vm2, %v568_v55  ;;  %1053 = vst.msk [vmem:[%s2474_s3 + $0x2f0] sm:$0xff] %vm958_vm2, %v824_v56  ;;  %v571_v63 = vadd.f32 %v1254_v61, %v1829_v3  ;;  %v827_v0 = vadd.f32 %v1318_v62, %v1829_v3  ;;  %v562_v1 = vpop.f32.mrb[31].mxu0  ;;  %v818_v2 = vpop.f32.mrb[31].mxu1 }
 0x117   :  { %987 = vst.msk [vmem:[%s2474_s3 + $0xe0] sm:$0xff] %vm958_vm2, %v560_v59  ;;  %1051 = vst.msk [vmem:[%s2474_s3 + $0x2e0] sm:$0xff] %vm958_vm2, %v816_v60  ;;  %v563_v4 = vadd.f32 %v1829_v3, %v562_v1  ;;  %v819_v5 = vadd.f32 %v1829_v3, %v818_v2 }
 0x118   :  { %990 = vst.msk [vmem:[%s2474_s3 + $0xf8] sm:$0xff] %vm958_vm2, %v571_v63  ;;  %1054 = vst.msk [vmem:[%s2474_s3 + $0x2f8] sm:$0xff] %vm958_vm2, %v827_v0 }
 0x119   :  { %988 = vst.msk [vmem:[%s2474_s3 + $0xe8] sm:$0xff] %vm958_vm2, %v563_v4  ;;  %1052 = vst.msk [vmem:[%s2474_s3 + $0x2e8] sm:$0xff] %vm958_vm2, %v819_v5 }
 0x11b   :  { %v1257_v6 = vpop.f32.mrb[32].mxu0  ;;  %v1321_v7 = vpop.f32.mrb[32].mxu1 }
 0x11c   :  { %v584_v8 = vadd.f32 %v1257_v6, %v1829_v3  ;;  %v840_v9 = vadd.f32 %v1321_v7, %v1829_v3  ;;  %v575_v10 = vpop.f32.mrb[33].mxu0  ;;  %v831_v11 = vpop.f32.mrb[33].mxu1 }
 0x11d   :  { %v576_v12 = vadd.f32 %v1829_v3, %v575_v10  ;;  %v832_v13 = vadd.f32 %v1829_v3, %v831_v11  ;;  %v1258_v14 = vpop.f32.mrb[34].mxu0  ;;  %v1322_v15 = vpop.f32.mrb[34].mxu1 }
 0x11e   :  { %993 = vst.msk [vmem:[%s2474_s3 + $0x110] sm:$0xff] %vm958_vm2, %v584_v8  ;;  %1057 = vst.msk [vmem:[%s2474_s3 + $0x310] sm:$0xff] %vm958_vm2, %v840_v9  ;;  %v587_v16 = vadd.f32 %v1258_v14, %v1829_v3  ;;  %v843_v17 = vadd.f32 %v1322_v15, %v1829_v3  ;;  %v578_v18 = vpop.f32.mrb[35].mxu0  ;;  %v834_v19 = vpop.f32.mrb[35].mxu1 }
 0x11f   :  { %991 = vst.msk [vmem:[%s2474_s3 + $0x100] sm:$0xff] %vm958_vm2, %v576_v12  ;;  %1055 = vst.msk [vmem:[%s2474_s3 + $0x300] sm:$0xff] %vm958_vm2, %v832_v13  ;;  %v579_v20 = vadd.f32 %v1829_v3, %v578_v18  ;;  %v835_v21 = vadd.f32 %v1829_v3, %v834_v19 }
 0x120   :  { %994 = vst.msk [vmem:[%s2474_s3 + $0x118] sm:$0xff] %vm958_vm2, %v587_v16  ;;  %1058 = vst.msk [vmem:[%s2474_s3 + $0x318] sm:$0xff] %vm958_vm2, %v843_v17 }
 0x121   :  { %992 = vst.msk [vmem:[%s2474_s3 + $0x108] sm:$0xff] %vm958_vm2, %v579_v20  ;;  %1056 = vst.msk [vmem:[%s2474_s3 + $0x308] sm:$0xff] %vm958_vm2, %v835_v21 }
 0x123   :  { %v1261_v22 = vpop.f32.mrb[36].mxu0  ;;  %v1325_v23 = vpop.f32.mrb[36].mxu1 }
 0x124   :  { %v600_v24 = vadd.f32 %v1261_v22, %v1829_v3  ;;  %v856_v25 = vadd.f32 %v1325_v23, %v1829_v3  ;;  %v591_v26 = vpop.f32.mrb[37].mxu0  ;;  %v847_v27 = vpop.f32.mrb[37].mxu1 }
 0x125   :  { %v592_v28 = vadd.f32 %v1829_v3, %v591_v26  ;;  %v848_v29 = vadd.f32 %v1829_v3, %v847_v27  ;;  %v1262_v30 = vpop.f32.mrb[38].mxu0  ;;  %v1326_v31 = vpop.f32.mrb[38].mxu1 }
 0x126   :  { %997 = vst.msk [vmem:[%s2474_s3 + $0x130] sm:$0xff] %vm958_vm2, %v600_v24  ;;  %1061 = vst.msk [vmem:[%s2474_s3 + $0x330] sm:$0xff] %vm958_vm2, %v856_v25  ;;  %v603_v32 = vadd.f32 %v1262_v30, %v1829_v3  ;;  %v859_v33 = vadd.f32 %v1326_v31, %v1829_v3  ;;  %v594_v34 = vpop.f32.mrb[39].mxu0  ;;  %v850_v35 = vpop.f32.mrb[39].mxu1 }
 0x127   :  { %995 = vst.msk [vmem:[%s2474_s3 + $0x120] sm:$0xff] %vm958_vm2, %v592_v28  ;;  %1059 = vst.msk [vmem:[%s2474_s3 + $0x320] sm:$0xff] %vm958_vm2, %v848_v29  ;;  %v595_v36 = vadd.f32 %v1829_v3, %v594_v34  ;;  %v851_v37 = vadd.f32 %v1829_v3, %v850_v35 }
 0x128   :  { %998 = vst.msk [vmem:[%s2474_s3 + $0x138] sm:$0xff] %vm958_vm2, %v603_v32  ;;  %1062 = vst.msk [vmem:[%s2474_s3 + $0x338] sm:$0xff] %vm958_vm2, %v859_v33 }
 0x129   :  { %996 = vst.msk [vmem:[%s2474_s3 + $0x128] sm:$0xff] %vm958_vm2, %v595_v36  ;;  %1060 = vst.msk [vmem:[%s2474_s3 + $0x328] sm:$0xff] %vm958_vm2, %v851_v37 }
 0x12b   :  { %v1265_v38 = vpop.f32.mrb[40].mxu0  ;;  %v1329_v39 = vpop.f32.mrb[40].mxu1 }
 0x12c   :  { %v616_v40 = vadd.f32 %v1265_v38, %v1829_v3  ;;  %v872_v41 = vadd.f32 %v1329_v39, %v1829_v3  ;;  %v607_v42 = vpop.f32.mrb[41].mxu0  ;;  %v863_v43 = vpop.f32.mrb[41].mxu1 }
 0x12d   :  { %v608_v44 = vadd.f32 %v1829_v3, %v607_v42  ;;  %v864_v45 = vadd.f32 %v1829_v3, %v863_v43  ;;  %v1266_v46 = vpop.f32.mrb[42].mxu0  ;;  %v1330_v47 = vpop.f32.mrb[42].mxu1 }
 0x12e   :  { %1001 = vst.msk [vmem:[%s2474_s3 + $0x150] sm:$0xff] %vm958_vm2, %v616_v40  ;;  %1065 = vst.msk [vmem:[%s2474_s3 + $0x350] sm:$0xff] %vm958_vm2, %v872_v41  ;;  %v619_v48 = vadd.f32 %v1266_v46, %v1829_v3  ;;  %v875_v49 = vadd.f32 %v1330_v47, %v1829_v3  ;;  %v610_v50 = vpop.f32.mrb[43].mxu0  ;;  %v866_v51 = vpop.f32.mrb[43].mxu1 }
 0x12f   :  { %999 = vst.msk [vmem:[%s2474_s3 + $0x140] sm:$0xff] %vm958_vm2, %v608_v44  ;;  %1063 = vst.msk [vmem:[%s2474_s3 + $0x340] sm:$0xff] %vm958_vm2, %v864_v45  ;;  %v611_v52 = vadd.f32 %v1829_v3, %v610_v50  ;;  %v867_v53 = vadd.f32 %v1829_v3, %v866_v51 }
 0x130   :  { %1002 = vst.msk [vmem:[%s2474_s3 + $0x158] sm:$0xff] %vm958_vm2, %v619_v48  ;;  %1066 = vst.msk [vmem:[%s2474_s3 + $0x358] sm:$0xff] %vm958_vm2, %v875_v49 }
 0x131   :  { %1000 = vst.msk [vmem:[%s2474_s3 + $0x148] sm:$0xff] %vm958_vm2, %v611_v52  ;;  %1064 = vst.msk [vmem:[%s2474_s3 + $0x348] sm:$0xff] %vm958_vm2, %v867_v53 }
 0x133   :  { %v1269_v54 = vpop.f32.mrb[44].mxu0  ;;  %v1333_v55 = vpop.f32.mrb[44].mxu1 }
 0x134   :  { %v632_v56 = vadd.f32 %v1269_v54, %v1829_v3  ;;  %v888_v57 = vadd.f32 %v1333_v55, %v1829_v3  ;;  %v623_v58 = vpop.f32.mrb[45].mxu0  ;;  %v879_v59 = vpop.f32.mrb[45].mxu1 }
 0x135   :  { %v624_v60 = vadd.f32 %v1829_v3, %v623_v58  ;;  %v880_v61 = vadd.f32 %v1829_v3, %v879_v59  ;;  %v1270_v62 = vpop.f32.mrb[46].mxu0  ;;  %v1334_v63 = vpop.f32.mrb[46].mxu1 }
 0x136   :  { %1005 = vst.msk [vmem:[%s2474_s3 + $0x170] sm:$0xff] %vm958_vm2, %v632_v56  ;;  %1069 = vst.msk [vmem:[%s2474_s3 + $0x370] sm:$0xff] %vm958_vm2, %v888_v57  ;;  %v635_v0 = vadd.f32 %v1270_v62, %v1829_v3  ;;  %v891_v1 = vadd.f32 %v1334_v63, %v1829_v3  ;;  %v626_v2 = vpop.f32.mrb[47].mxu0  ;;  %v882_v4 = vpop.f32.mrb[47].mxu1 }
 0x137   :  { %1003 = vst.msk [vmem:[%s2474_s3 + $0x160] sm:$0xff] %vm958_vm2, %v624_v60  ;;  %1067 = vst.msk [vmem:[%s2474_s3 + $0x360] sm:$0xff] %vm958_vm2, %v880_v61  ;;  %v627_v5 = vadd.f32 %v1829_v3, %v626_v2  ;;  %v883_v6 = vadd.f32 %v1829_v3, %v882_v4 }
 0x138   :  { %1006 = vst.msk [vmem:[%s2474_s3 + $0x178] sm:$0xff] %vm958_vm2, %v635_v0  ;;  %1070 = vst.msk [vmem:[%s2474_s3 + $0x378] sm:$0xff] %vm958_vm2, %v891_v1 }
 0x139   :  { %1004 = vst.msk [vmem:[%s2474_s3 + $0x168] sm:$0xff] %vm958_vm2, %v627_v5  ;;  %1068 = vst.msk [vmem:[%s2474_s3 + $0x368] sm:$0xff] %vm958_vm2, %v883_v6 }
 0x13b   :  { %v1273_v7 = vpop.f32.mrb[48].mxu0  ;;  %v1337_v8 = vpop.f32.mrb[48].mxu1 }
 0x13c   :  { %v648_v9 = vadd.f32 %v1273_v7, %v1829_v3  ;;  %v904_v10 = vadd.f32 %v1337_v8, %v1829_v3  ;;  %v639_v11 = vpop.f32.mrb[49].mxu0  ;;  %v895_v12 = vpop.f32.mrb[49].mxu1 }
 0x13d   :  { %v640_v13 = vadd.f32 %v1829_v3, %v639_v11  ;;  %v896_v14 = vadd.f32 %v1829_v3, %v895_v12  ;;  %v1274_v15 = vpop.f32.mrb[50].mxu0  ;;  %v1338_v16 = vpop.f32.mrb[50].mxu1 }
 0x13e   :  { %1009 = vst.msk [vmem:[%s2474_s3 + $0x190] sm:$0xff] %vm958_vm2, %v648_v9  ;;  %1073 = vst.msk [vmem:[%s2474_s3 + $0x390] sm:$0xff] %vm958_vm2, %v904_v10  ;;  %v651_v17 = vadd.f32 %v1274_v15, %v1829_v3  ;;  %v907_v18 = vadd.f32 %v1338_v16, %v1829_v3  ;;  %v642_v19 = vpop.f32.mrb[51].mxu0  ;;  %v898_v20 = vpop.f32.mrb[51].mxu1 }
 0x13f   :  { %1007 = vst.msk [vmem:[%s2474_s3 + $0x180] sm:$0xff] %vm958_vm2, %v640_v13  ;;  %1071 = vst.msk [vmem:[%s2474_s3 + $0x380] sm:$0xff] %vm958_vm2, %v896_v14  ;;  %v643_v21 = vadd.f32 %v1829_v3, %v642_v19  ;;  %v899_v22 = vadd.f32 %v1829_v3, %v898_v20 }
 0x140   :  { %1010 = vst.msk [vmem:[%s2474_s3 + $0x198] sm:$0xff] %vm958_vm2, %v651_v17  ;;  %1074 = vst.msk [vmem:[%s2474_s3 + $0x398] sm:$0xff] %vm958_vm2, %v907_v18 }
 0x141   :  { %1008 = vst.msk [vmem:[%s2474_s3 + $0x188] sm:$0xff] %vm958_vm2, %v643_v21  ;;  %1072 = vst.msk [vmem:[%s2474_s3 + $0x388] sm:$0xff] %vm958_vm2, %v899_v22 }
 0x143   :  { %v1277_v23 = vpop.f32.mrb[52].mxu0  ;;  %v1341_v24 = vpop.f32.mrb[52].mxu1 }
 0x144   :  { %v664_v25 = vadd.f32 %v1277_v23, %v1829_v3  ;;  %v920_v26 = vadd.f32 %v1341_v24, %v1829_v3  ;;  %v655_v27 = vpop.f32.mrb[53].mxu0  ;;  %v911_v28 = vpop.f32.mrb[53].mxu1 }
 0x145   :  { %v656_v29 = vadd.f32 %v1829_v3, %v655_v27  ;;  %v912_v30 = vadd.f32 %v1829_v3, %v911_v28  ;;  %v1278_v31 = vpop.f32.mrb[54].mxu0  ;;  %v1342_v32 = vpop.f32.mrb[54].mxu1 }
 0x146   :  { %1013 = vst.msk [vmem:[%s2474_s3 + $0x1b0] sm:$0xff] %vm958_vm2, %v664_v25  ;;  %1077 = vst.msk [vmem:[%s2474_s3 + $0x3b0] sm:$0xff] %vm958_vm2, %v920_v26  ;;  %v667_v33 = vadd.f32 %v1278_v31, %v1829_v3  ;;  %v923_v34 = vadd.f32 %v1342_v32, %v1829_v3  ;;  %v658_v35 = vpop.f32.mrb[55].mxu0  ;;  %v914_v36 = vpop.f32.mrb[55].mxu1 }
 0x147   :  { %1011 = vst.msk [vmem:[%s2474_s3 + $0x1a0] sm:$0xff] %vm958_vm2, %v656_v29  ;;  %1075 = vst.msk [vmem:[%s2474_s3 + $0x3a0] sm:$0xff] %vm958_vm2, %v912_v30  ;;  %v659_v37 = vadd.f32 %v1829_v3, %v658_v35  ;;  %v915_v38 = vadd.f32 %v1829_v3, %v914_v36 }
 0x148   :  { %1014 = vst.msk [vmem:[%s2474_s3 + $0x1b8] sm:$0xff] %vm958_vm2, %v667_v33  ;;  %1078 = vst.msk [vmem:[%s2474_s3 + $0x3b8] sm:$0xff] %vm958_vm2, %v923_v34 }
 0x149   :  { %1012 = vst.msk [vmem:[%s2474_s3 + $0x1a8] sm:$0xff] %vm958_vm2, %v659_v37  ;;  %1076 = vst.msk [vmem:[%s2474_s3 + $0x3a8] sm:$0xff] %vm958_vm2, %v915_v38 }
 0x14b   :  { %v1281_v39 = vpop.f32.mrb[56].mxu0  ;;  %v1345_v40 = vpop.f32.mrb[56].mxu1 }
 0x14c   :  { %v680_v41 = vadd.f32 %v1281_v39, %v1829_v3  ;;  %v936_v42 = vadd.f32 %v1345_v40, %v1829_v3  ;;  %v671_v43 = vpop.f32.mrb[57].mxu0  ;;  %v927_v44 = vpop.f32.mrb[57].mxu1 }
 0x14d   :  { %v672_v45 = vadd.f32 %v1829_v3, %v671_v43  ;;  %v928_v46 = vadd.f32 %v1829_v3, %v927_v44  ;;  %v1282_v47 = vpop.f32.mrb[58].mxu0  ;;  %v1346_v48 = vpop.f32.mrb[58].mxu1 }
 0x14e   :  { %1017 = vst.msk [vmem:[%s2474_s3 + $0x1d0] sm:$0xff] %vm958_vm2, %v680_v41  ;;  %1081 = vst.msk [vmem:[%s2474_s3 + $0x3d0] sm:$0xff] %vm958_vm2, %v936_v42  ;;  %v683_v49 = vadd.f32 %v1282_v47, %v1829_v3  ;;  %v939_v50 = vadd.f32 %v1346_v48, %v1829_v3  ;;  %v674_v51 = vpop.f32.mrb[59].mxu0  ;;  %v930_v52 = vpop.f32.mrb[59].mxu1 }
 0x14f   :  { %1015 = vst.msk [vmem:[%s2474_s3 + $0x1c0] sm:$0xff] %vm958_vm2, %v672_v45  ;;  %1079 = vst.msk [vmem:[%s2474_s3 + $0x3c0] sm:$0xff] %vm958_vm2, %v928_v46  ;;  %v675_v53 = vadd.f32 %v1829_v3, %v674_v51  ;;  %v931_v54 = vadd.f32 %v1829_v3, %v930_v52 }
 0x150   :  { %1018 = vst.msk [vmem:[%s2474_s3 + $0x1d8] sm:$0xff] %vm958_vm2, %v683_v49  ;;  %1082 = vst.msk [vmem:[%s2474_s3 + $0x3d8] sm:$0xff] %vm958_vm2, %v939_v50 }
 0x151   :  { %1016 = vst.msk [vmem:[%s2474_s3 + $0x1c8] sm:$0xff] %vm958_vm2, %v675_v53  ;;  %1080 = vst.msk [vmem:[%s2474_s3 + $0x3c8] sm:$0xff] %vm958_vm2, %v931_v54 }
 0x153   :  { %v1285_v55 = vpop.f32.mrb[60].mxu0  ;;  %v1349_v56 = vpop.f32.mrb[60].mxu1 }
 0x154   :  { %v696_v57 = vadd.f32 %v1285_v55, %v1829_v3  ;;  %v952_v58 = vadd.f32 %v1349_v56, %v1829_v3  ;;  %v687_v59 = vpop.f32.mrb[61].mxu0  ;;  %v943_v60 = vpop.f32.mrb[61].mxu1 }
 0x155   :  { %v688_v61 = vadd.f32 %v1829_v3, %v687_v59  ;;  %v944_v62 = vadd.f32 %v1829_v3, %v943_v60  ;;  %v1286_v63 = vpop.f32.mrb[62].mxu0  ;;  %v1350_v0 = vpop.f32.mrb[62].mxu1 }
 0x156   :  { %1021 = vst.msk [vmem:[%s2474_s3 + $0x1f0] sm:$0xff] %vm958_vm2, %v696_v57  ;;  %1085 = vst.msk [vmem:[%s2474_s3 + $0x3f0] sm:$0xff] %vm958_vm2, %v952_v58  ;;  %v699_v1 = vadd.f32 %v1286_v63, %v1829_v3  ;;  %v955_v2 = vadd.f32 %v1350_v0, %v1829_v3  ;;  %v690_v4 = vpop.f32.mrb[63].mxu0  ;;  %v946_v5 = vpop.f32.mrb[63].mxu1 }
 0x157   :  { %1019 = vst.msk [vmem:[%s2474_s3 + $0x1e0] sm:$0xff] %vm958_vm2, %v688_v61  ;;  %1083 = vst.msk [vmem:[%s2474_s3 + $0x3e0] sm:$0xff] %vm958_vm2, %v944_v62  ;;  %v691_v6 = vadd.f32 %v1829_v3, %v690_v4  ;;  %v947_v7 = vadd.f32 %v1829_v3, %v946_v5 }
 0x158   :  { %1022 = vst.msk [vmem:[%s2474_s3 + $0x1f8] sm:$0xff] %vm958_vm2, %v699_v1  ;;  %1086 = vst.msk [vmem:[%s2474_s3 + $0x3f8] sm:$0xff] %vm958_vm2, %v955_v2 }
 0x159   :  { %1020 = vst.msk [vmem:[%s2474_s3 + $0x1e8] sm:$0xff] %vm958_vm2, %v691_v6  ;;  %1084 = vst.msk [vmem:[%s2474_s3 + $0x3e8] sm:$0xff] %vm958_vm2, %v947_v7 }

// kernel: swin_forward.36
= control target key start
LH: loop header
LB: loop body
LE: loop exit
PB: predicated region body
PF: predicated region fallthrough
CT: control target
= control target key end

     0   :  { %vm409_vm0 = vcmask 1040384   ;;  %vm216_vm1 = vcmask 15360   ;;  %vm1086_vm2 = vcmask 64512   ;;  %s2599_s1 = inlined_call_operand.vmem [shape: f32[2,8], index: 1, kind: input, shape index: {}]   ;;  %s2600_s0 = inlined_call_operand.vmem [shape: f32[1024,2], index: 0, kind: input, shape index: {}]   ;;  %s2601_s2 = inlined_call_operand.vmem [shape: f32[1,8], index: 2, kind: input, shape index: {}]   ;;  %s2602_s3 = inlined_call_operand.vmem [shape: f32[1024,8], index: 3, kind: output, shape index: {}]  }
   0x1   :  { %v207_v0 = vld [vmem:[%s2599_s1] sm:$0x3]  ;;  %v16_v2 = vld [vmem:[%s2600_s0 + $0x8] sm:$0xff]  ;;  %v17_v7 = vld [vmem:[%s2600_s0 + $0x10] sm:$0xff] }
   0x2   :  { %v15_v1 = vld [vmem:[%s2600_s0] sm:$0xff]  ;;  %v208_v3 = vpack.c.bf16 %v207_v0, %v207_v0  ;;  %v80_v6 = vld [vmem:[%s2600_s0 + $0x208] sm:$0xff]  ;;  %v18_v9 = vld [vmem:[%s2600_s0 + $0x18] sm:$0xff] }
   0x3   :  { %v143_v4 = vpack.c.bf16 %v16_v2, %v15_v1  ;;  %v79_v5 = vld [vmem:[%s2600_s0 + $0x200] sm:$0xff]  ;;  %v81_v10 = vld [vmem:[%s2600_s0 + $0x210] sm:$0xff]  ;;  %v82_v11 = vld [vmem:[%s2600_s0 + $0x218] sm:$0xff]  ;;  %v144_v13 = vpack.c.bf16 %v18_v9, %v17_v7 }
   0x4   :  { %v175_v8 = vpack.c.bf16 %v80_v6, %v79_v5  ;;  %1481 = vmatprep.subr.msk.bf16.mxu0 %vm409_vm0, %v208_v3  ;;  %1482 = vmatprep.subr.msk.bf16.mxu1 %vm409_vm0, %v208_v3  ;;  %v411_v12 = vsel %vm409_vm0, %v208_v3, 0  ;;  %v176_v14 = vpack.c.bf16 %v82_v11, %v81_v10  ;;  %v19_v15 = vld [vmem:[%s2600_s0 + $0x20] sm:$0xff]  ;;  %v20_v16 = vld [vmem:[%s2600_s0 + $0x28] sm:$0xff]  ;;  %v21_v21 = vld [vmem:[%s2600_s0 + $0x30] sm:$0xff] }
   0x5   :  { %v83_v17 = vld [vmem:[%s2600_s0 + $0x220] sm:$0xff]  ;;  %1350 = vmatpush3.bf16.msra.mxu0 %v411_v12  ;;  %1480 = vmatpush3.bf16.msra.mxu1 %v411_v12  ;;  %v145_v18 = vpack.c.bf16 %v20_v16, %v19_v15  ;;  %v84_v19 = vld [vmem:[%s2600_s0 + $0x228] sm:$0xff]  ;;  %v22_v22 = vld [vmem:[%s2600_s0 + $0x38] sm:$0xff] }
   0x6   :  { %1351 = vmatprep.mubr.msk.bf16.mxu0 %vm216_vm1, %v143_v4  ;;  %1415 = vmatprep.mubr.msk.bf16.mxu1 %vm216_vm1, %v175_v8  ;;  %v177_v20 = vpack.c.bf16 %v84_v19, %v83_v17  ;;  %v85_v23 = vld [vmem:[%s2600_s0 + $0x230] sm:$0xff]  ;;  %v86_v24 = vld [vmem:[%s2600_s0 + $0x238] sm:$0xff]  ;;  %v23_v25 = vld [vmem:[%s2600_s0 + $0x40] sm:$0xff]  ;;  %v146_v29 = vpack.c.bf16 %v22_v22, %v21_v21 }
   0x7   :  { %v24_v26 = vld [vmem:[%s2600_s0 + $0x48] sm:$0xff]  ;;  %v87_v27 = vld [vmem:[%s2600_s0 + $0x240] sm:$0xff]  ;;  %v178_v30 = vpack.c.bf16 %v86_v24, %v85_v23  ;;  %v25_v33 = vld [vmem:[%s2600_s0 + $0x50] sm:$0xff] }
   0x8   :  { %1352 = vmatmul.mubr.msk.bf16.vlgmr.msra.gmra.mrb[0].mxu0 %vm216_vm1, %v144_v13  ;;  %1416 = vmatmul.mubr.msk.bf16.vlgmr.msra.gmra.mrb[0].mxu1 %vm216_vm1, %v176_v14  ;;  %v88_v28 = vld [vmem:[%s2600_s0 + $0x248] sm:$0xff]  ;;  %v147_v31 = vpack.c.bf16 %v24_v26, %v23_v25  ;;  %v26_v34 = vld [vmem:[%s2600_s0 + $0x58] sm:$0xff]  ;;  %v89_v35 = vld [vmem:[%s2600_s0 + $0x250] sm:$0xff] }
   0x9   :  { %1355 = vmatprep.mubr.msk.bf16.mxu0 %vm216_vm1, %v145_v18  ;;  %1419 = vmatprep.mubr.msk.bf16.mxu1 %vm216_vm1, %v177_v20  ;;  %v179_v32 = vpack.c.bf16 %v88_v28, %v87_v27  ;;  %v90_v36 = vld [vmem:[%s2600_s0 + $0x258] sm:$0xff]  ;;  %v27_v37 = vld [vmem:[%s2600_s0 + $0x60] sm:$0xff]  ;;  %v28_v38 = vld [vmem:[%s2600_s0 + $0x68] sm:$0xff]  ;;  %v148_v41 = vpack.c.bf16 %v26_v34, %v25_v33 }
   0xa   :  { %v91_v39 = vld [vmem:[%s2600_s0 + $0x260] sm:$0xff]  ;;  %v92_v40 = vld [vmem:[%s2600_s0 + $0x268] sm:$0xff]  ;;  %v180_v42 = vpack.c.bf16 %v90_v36, %v89_v35  ;;  %v149_v43 = vpack.c.bf16 %v28_v38, %v27_v37  ;;  %v29_v45 = vld [vmem:[%s2600_s0 + $0x70] sm:$0xff] }
   0xb   :  { %v181_v44 = vpack.c.bf16 %v92_v40, %v91_v39  ;;  %v30_v46 = vld [vmem:[%s2600_s0 + $0x78] sm:$0xff]  ;;  %v93_v47 = vld [vmem:[%s2600_s0 + $0x270] sm:$0xff]  ;;  %v31_v49 = vld [vmem:[%s2600_s0 + $0x80] sm:$0xff] }
   0xc   :  { %v94_v48 = vld [vmem:[%s2600_s0 + $0x278] sm:$0xff]  ;;  %v32_v50 = vld [vmem:[%s2600_s0 + $0x88] sm:$0xff]  ;;  %v95_v51 = vld [vmem:[%s2600_s0 + $0x280] sm:$0xff]  ;;  %v150_v53 = vpack.c.bf16 %v30_v46, %v29_v45 }
   0xd   :  { %v96_v52 = vld [vmem:[%s2600_s0 + $0x288] sm:$0xff]  ;;  %v182_v54 = vpack.c.bf16 %v94_v48, %v93_v47  ;;  %v151_v55 = vpack.c.bf16 %v32_v50, %v31_v49  ;;  %v33_v57 = vld [vmem:[%s2600_s0 + $0x90] sm:$0xff]  ;;  %v34_v58 = vld [vmem:[%s2600_s0 + $0x98] sm:$0xff] }
   0xe   :  { %v183_v56 = vpack.c.bf16 %v96_v52, %v95_v51  ;;  %v97_v59 = vld [vmem:[%s2600_s0 + $0x290] sm:$0xff]  ;;  %v98_v60 = vld [vmem:[%s2600_s0 + $0x298] sm:$0xff]  ;;  %v35_v61 = vld [vmem:[%s2600_s0 + $0xa0] sm:$0xff]  ;;  %v152_v1 = vpack.c.bf16 %v34_v58, %v33_v57 }
   0xf   :  { %v36_v62 = vld [vmem:[%s2600_s0 + $0xa8] sm:$0xff]  ;;  %v99_v63 = vld [vmem:[%s2600_s0 + $0x2a0] sm:$0xff]  ;;  %v184_v2 = vpack.c.bf16 %v98_v60, %v97_v59  ;;  %v37_v5 = vld [vmem:[%s2600_s0 + $0xb0] sm:$0xff] }
  0x10   :  { %1356 = vmatmul.mubr.msk.bf16.gmra.mrb[4].mxu0 %vm216_vm1, %v146_v29  ;;  %1420 = vmatmul.mubr.msk.bf16.gmra.mrb[4].mxu1 %vm216_vm1, %v178_v30  ;;  %v100_v0 = vld [vmem:[%s2600_s0 + $0x2a8] sm:$0xff]  ;;  %v153_v3 = vpack.c.bf16 %v36_v62, %v35_v61  ;;  %v38_v6 = vld [vmem:[%s2600_s0 + $0xb8] sm:$0xff]  ;;  %v101_v7 = vld [vmem:[%s2600_s0 + $0x2b0] sm:$0xff] }
  0x11   :  { %1359 = vmatprep.mubr.msk.bf16.mxu0 %vm216_vm1, %v147_v31  ;;  %1423 = vmatprep.mubr.msk.bf16.mxu1 %vm216_vm1, %v179_v32  ;;  %v185_v4 = vpack.c.bf16 %v100_v0, %v99_v63  ;;  %v102_v8 = vld [vmem:[%s2600_s0 + $0x2b8] sm:$0xff]  ;;  %v39_v9 = vld [vmem:[%s2600_s0 + $0xc0] sm:$0xff]  ;;  %v40_v10 = vld [vmem:[%s2600_s0 + $0xc8] sm:$0xff]  ;;  %v154_v13 = vpack.c.bf16 %v38_v6, %v37_v5 }
  0x12   :  { %v103_v11 = vld [vmem:[%s2600_s0 + $0x2c0] sm:$0xff]  ;;  %v104_v12 = vld [vmem:[%s2600_s0 + $0x2c8] sm:$0xff]  ;;  %v186_v14 = vpack.c.bf16 %v102_v8, %v101_v7  ;;  %v155_v15 = vpack.c.bf16 %v40_v10, %v39_v9  ;;  %v41_v17 = vld [vmem:[%s2600_s0 + $0xd0] sm:$0xff] }
  0x13   :  { %v187_v16 = vpack.c.bf16 %v104_v12, %v103_v11  ;;  %v42_v18 = vld [vmem:[%s2600_s0 + $0xd8] sm:$0xff]  ;;  %v105_v19 = vld [vmem:[%s2600_s0 + $0x2d0] sm:$0xff]  ;;  %v43_v21 = vld [vmem:[%s2600_s0 + $0xe0] sm:$0xff] }
  0x14   :  { %v106_v20 = vld [vmem:[%s2600_s0 + $0x2d8] sm:$0xff]  ;;  %v44_v22 = vld [vmem:[%s2600_s0 + $0xe8] sm:$0xff]  ;;  %v107_v23 = vld [vmem:[%s2600_s0 + $0x2e0] sm:$0xff]  ;;  %v156_v25 = vpack.c.bf16 %v42_v18, %v41_v17 }
  0x15   :  { %v108_v24 = vld [vmem:[%s2600_s0 + $0x2e8] sm:$0xff]  ;;  %v188_v26 = vpack.c.bf16 %v106_v20, %v105_v19  ;;  %v157_v27 = vpack.c.bf16 %v44_v22, %v43_v21  ;;  %v45_v29 = vld [vmem:[%s2600_s0 + $0xf0] sm:$0xff]  ;;  %v46_v30 = vld [vmem:[%s2600_s0 + $0xf8] sm:$0xff] }
  0x16   :  { %v189_v28 = vpack.c.bf16 %v108_v24, %v107_v23  ;;  %v109_v31 = vld [vmem:[%s2600_s0 + $0x2f0] sm:$0xff]  ;;  %v110_v32 = vld [vmem:[%s2600_s0 + $0x2f8] sm:$0xff]  ;;  %v47_v33 = vld [vmem:[%s2600_s0 + $0x100] sm:$0xff]  ;;  %v158_v37 = vpack.c.bf16 %v46_v30, %v45_v29 }
  0x17   :  { %v48_v34 = vld [vmem:[%s2600_s0 + $0x108] sm:$0xff]  ;;  %v111_v35 = vld [vmem:[%s2600_s0 + $0x300] sm:$0xff]  ;;  %v190_v38 = vpack.c.bf16 %v110_v32, %v109_v31 }
  0x18   :  { %1360 = vmatmul.mubr.msk.bf16.gmra.mrb[8].mxu0 %vm216_vm1, %v148_v41  ;;  %1424 = vmatmul.mubr.msk.bf16.gmra.mrb[8].mxu1 %vm216_vm1, %v180_v42  ;;  %v112_v36 = vld [vmem:[%s2600_s0 + $0x308] sm:$0xff]  ;;  %v159_v39 = vpack.c.bf16 %v48_v34, %v47_v33  ;;  %v49_v41 = vld [vmem:[%s2600_s0 + $0x110] sm:$0xff]  ;;  %v50_v42 = vld [vmem:[%s2600_s0 + $0x118] sm:$0xff] }
  0x19   :  { %1363 = vmatprep.mubr.msk.bf16.mxu0 %vm216_vm1, %v149_v43  ;;  %1427 = vmatprep.mubr.msk.bf16.mxu1 %vm216_vm1, %v181_v44  ;;  %v191_v40 = vpack.c.bf16 %v112_v36, %v111_v35  ;;  %v113_v43 = vld [vmem:[%s2600_s0 + $0x310] sm:$0xff]  ;;  %v114_v44 = vld [vmem:[%s2600_s0 + $0x318] sm:$0xff]  ;;  %v51_v45 = vld [vmem:[%s2600_s0 + $0x120] sm:$0xff]  ;;  %v160_v49 = vpack.c.bf16 %v50_v42, %v49_v41 }
  0x1a   :  { %v52_v46 = vld [vmem:[%s2600_s0 + $0x128] sm:$0xff]  ;;  %v115_v47 = vld [vmem:[%s2600_s0 + $0x320] sm:$0xff]  ;;  %v192_v50 = vpack.c.bf16 %v114_v44, %v113_v43 }
  0x1b   :  { %v116_v48 = vld [vmem:[%s2600_s0 + $0x328] sm:$0xff]  ;;  %v161_v51 = vpack.c.bf16 %v52_v46, %v51_v45  ;;  %v55_v57 = vld [vmem:[%s2600_s0 + $0x140] sm:$0xff] }
  0x1c   :  { %v193_v52 = vpack.c.bf16 %v116_v48, %v115_v47  ;;  %v56_v58 = vld [vmem:[%s2600_s0 + $0x148] sm:$0xff]  ;;  %v119_v59 = vld [vmem:[%s2600_s0 + $0x340] sm:$0xff] }
  0x1d   :  { %v120_v60 = vld [vmem:[%s2600_s0 + $0x348] sm:$0xff]  ;;  %v163_v63 = vpack.c.bf16 %v56_v58, %v55_v57  ;;  %v59_v5 = vld [vmem:[%s2600_s0 + $0x160] sm:$0xff] }
  0x1e   :  { %v195_v0 = vpack.c.bf16 %v120_v60, %v119_v59  ;;  %v60_v6 = vld [vmem:[%s2600_s0 + $0x168] sm:$0xff]  ;;  %v123_v7 = vld [vmem:[%s2600_s0 + $0x360] sm:$0xff] }
  0x1f   :  { %v124_v8 = vld [vmem:[%s2600_s0 + $0x368] sm:$0xff]  ;;  %v165_v11 = vpack.c.bf16 %v60_v6, %v59_v5  ;;  %v63_v17 = vld [vmem:[%s2600_s0 + $0x180] sm:$0xff] }
  0x20   :  { %1364 = vmatmul.mubr.msk.bf16.gmra.mrb[12].mxu0 %vm216_vm1, %v150_v53  ;;  %1428 = vmatmul.mubr.msk.bf16.gmra.mrb[12].mxu1 %vm216_vm1, %v182_v54  ;;  %v53_v53 = vld [vmem:[%s2600_s0 + $0x130] sm:$0xff]  ;;  %v54_v54 = vld [vmem:[%s2600_s0 + $0x138] sm:$0xff]  ;;  %v197_v12 = vpack.c.bf16 %v124_v8, %v123_v7  ;;  %v64_v18 = vld [vmem:[%s2600_s0 + $0x188] sm:$0xff] }
  0x21   :  { %1367 = vmatprep.mubr.msk.bf16.mxu0 %vm216_vm1, %v151_v55  ;;  %1431 = vmatprep.mubr.msk.bf16.mxu1 %vm216_vm1, %v183_v56  ;;  %v117_v55 = vld [vmem:[%s2600_s0 + $0x330] sm:$0xff]  ;;  %v118_v56 = vld [vmem:[%s2600_s0 + $0x338] sm:$0xff]  ;;  %v162_v61 = vpack.c.bf16 %v54_v54, %v53_v53  ;;  %v127_v19 = vld [vmem:[%s2600_s0 + $0x380] sm:$0xff]  ;;  %v167_v23 = vpack.c.bf16 %v64_v18, %v63_v17 }
  0x22   :  { %v194_v62 = vpack.c.bf16 %v118_v56, %v117_v55  ;;  %v128_v20 = vld [vmem:[%s2600_s0 + $0x388] sm:$0xff]  ;;  %v67_v29 = vld [vmem:[%s2600_s0 + $0x1a0] sm:$0xff] }
  0x23   :  { %v199_v24 = vpack.c.bf16 %v128_v20, %v127_v19  ;;  %v68_v30 = vld [vmem:[%s2600_s0 + $0x1a8] sm:$0xff]  ;;  %v131_v31 = vld [vmem:[%s2600_s0 + $0x3a0] sm:$0xff] }
  0x24   :  { %v132_v32 = vld [vmem:[%s2600_s0 + $0x3a8] sm:$0xff]  ;;  %v169_v35 = vpack.c.bf16 %v68_v30, %v67_v29  ;;  %v71_v41 = vld [vmem:[%s2600_s0 + $0x1c0] sm:$0xff] }
  0x25   :  { %v201_v36 = vpack.c.bf16 %v132_v32, %v131_v31  ;;  %v72_v42 = vld [vmem:[%s2600_s0 + $0x1c8] sm:$0xff]  ;;  %v135_v43 = vld [vmem:[%s2600_s0 + $0x3c0] sm:$0xff] }
  0x26   :  { %v136_v44 = vld [vmem:[%s2600_s0 + $0x3c8] sm:$0xff]  ;;  %v171_v47 = vpack.c.bf16 %v72_v42, %v71_v41  ;;  %v75_v53 = vld [vmem:[%s2600_s0 + $0x1e0] sm:$0xff] }
  0x27   :  { %v203_v48 = vpack.c.bf16 %v136_v44, %v135_v43  ;;  %v76_v54 = vld [vmem:[%s2600_s0 + $0x1e8] sm:$0xff]  ;;  %v139_v55 = vld [vmem:[%s2600_s0 + $0x3e0] sm:$0xff] }
  0x28   :  { %1368 = vmatmul.mubr.msk.bf16.gmra.mrb[16].mxu0 %vm216_vm1, %v152_v1  ;;  %1432 = vmatmul.mubr.msk.bf16.gmra.mrb[16].mxu1 %vm216_vm1, %v184_v2  ;;  %v57_v1 = vld [vmem:[%s2600_s0 + $0x150] sm:$0xff]  ;;  %v58_v2 = vld [vmem:[%s2600_s0 + $0x158] sm:$0xff]  ;;  %v140_v56 = vld [vmem:[%s2600_s0 + $0x3e8] sm:$0xff]  ;;  %v173_v59 = vpack.c.bf16 %v76_v54, %v75_v53 }
  0x29   :  { %1371 = vmatprep.mubr.msk.bf16.mxu0 %vm216_vm1, %v153_v3  ;;  %1435 = vmatprep.mubr.msk.bf16.mxu1 %vm216_vm1, %v185_v4  ;;  %v121_v3 = vld [vmem:[%s2600_s0 + $0x350] sm:$0xff]  ;;  %v122_v4 = vld [vmem:[%s2600_s0 + $0x358] sm:$0xff]  ;;  %v164_v9 = vpack.c.bf16 %v58_v2, %v57_v1  ;;  %v205_v60 = vpack.c.bf16 %v140_v56, %v139_v55 }
  0x2a   :  { %v196_v10 = vpack.c.bf16 %v122_v4, %v121_v3  ;;  %v1957_v3 = vld [vmem:[%s2601_s2] ss:$0 sm:$0xff] }
  0x30   :  { %1372 = vmatmul.mubr.msk.bf16.gmra.mrb[20].mxu0 %vm216_vm1, %v154_v13  ;;  %1436 = vmatmul.mubr.msk.bf16.gmra.mrb[20].mxu1 %vm216_vm1, %v186_v14  ;;  %v61_v13 = vld [vmem:[%s2600_s0 + $0x170] sm:$0xff]  ;;  %v62_v14 = vld [vmem:[%s2600_s0 + $0x178] sm:$0xff] }
  0x31   :  { %1375 = vmatprep.mubr.msk.bf16.mxu0 %vm216_vm1, %v155_v15  ;;  %1439 = vmatprep.mubr.msk.bf16.mxu1 %vm216_vm1, %v187_v16  ;;  %v125_v15 = vld [vmem:[%s2600_s0 + $0x370] sm:$0xff]  ;;  %v126_v16 = vld [vmem:[%s2600_s0 + $0x378] sm:$0xff]  ;;  %v166_v21 = vpack.c.bf16 %v62_v14, %v61_v13 }
  0x32   :  { %v198_v22 = vpack.c.bf16 %v126_v16, %v125_v15 }
  0x38   :  { %1376 = vmatmul.mubr.msk.bf16.gmra.mrb[24].mxu0 %vm216_vm1, %v156_v25  ;;  %1440 = vmatmul.mubr.msk.bf16.gmra.mrb[24].mxu1 %vm216_vm1, %v188_v26  ;;  %v65_v25 = vld [vmem:[%s2600_s0 + $0x190] sm:$0xff]  ;;  %v66_v26 = vld [vmem:[%s2600_s0 + $0x198] sm:$0xff] }
  0x39   :  { %1379 = vmatprep.mubr.msk.bf16.mxu0 %vm216_vm1, %v157_v27  ;;  %1443 = vmatprep.mubr.msk.bf16.mxu1 %vm216_vm1, %v189_v28  ;;  %v129_v27 = vld [vmem:[%s2600_s0 + $0x390] sm:$0xff]  ;;  %v130_v28 = vld [vmem:[%s2600_s0 + $0x398] sm:$0xff]  ;;  %v168_v33 = vpack.c.bf16 %v66_v26, %v65_v25 }
  0x3a   :  { %v200_v34 = vpack.c.bf16 %v130_v28, %v129_v27 }
  0x40   :  { %1380 = vmatmul.mubr.msk.bf16.gmra.mrb[28].mxu0 %vm216_vm1, %v158_v37  ;;  %1444 = vmatmul.mubr.msk.bf16.gmra.mrb[28].mxu1 %vm216_vm1, %v190_v38  ;;  %v69_v37 = vld [vmem:[%s2600_s0 + $0x1b0] sm:$0xff]  ;;  %v70_v38 = vld [vmem:[%s2600_s0 + $0x1b8] sm:$0xff] }
  0x41   :  { %1383 = vmatprep.mubr.msk.bf16.mxu0 %vm216_vm1, %v159_v39  ;;  %1447 = vmatprep.mubr.msk.bf16.mxu1 %vm216_vm1, %v191_v40  ;;  %v133_v39 = vld [vmem:[%s2600_s0 + $0x3b0] sm:$0xff]  ;;  %v134_v40 = vld [vmem:[%s2600_s0 + $0x3b8] sm:$0xff]  ;;  %v170_v45 = vpack.c.bf16 %v70_v38, %v69_v37 }
  0x42   :  { %v202_v46 = vpack.c.bf16 %v134_v40, %v133_v39 }
  0x48   :  { %1384 = vmatmul.mubr.msk.bf16.gmra.mrb[32].mxu0 %vm216_vm1, %v160_v49  ;;  %1448 = vmatmul.mubr.msk.bf16.gmra.mrb[32].mxu1 %vm216_vm1, %v192_v50  ;;  %v73_v49 = vld [vmem:[%s2600_s0 + $0x1d0] sm:$0xff]  ;;  %v74_v50 = vld [vmem:[%s2600_s0 + $0x1d8] sm:$0xff] }
  0x49   :  { %1387 = vmatprep.mubr.msk.bf16.mxu0 %vm216_vm1, %v161_v51  ;;  %1451 = vmatprep.mubr.msk.bf16.mxu1 %vm216_vm1, %v193_v52  ;;  %v137_v51 = vld [vmem:[%s2600_s0 + $0x3d0] sm:$0xff]  ;;  %v138_v52 = vld [vmem:[%s2600_s0 + $0x3d8] sm:$0xff]  ;;  %v172_v57 = vpack.c.bf16 %v74_v50, %v73_v49 }
  0x4a   :  { %v204_v58 = vpack.c.bf16 %v138_v52, %v137_v51 }
  0x50   :  { %1388 = vmatmul.mubr.msk.bf16.gmra.mrb[36].mxu0 %vm216_vm1, %v162_v61  ;;  %1452 = vmatmul.mubr.msk.bf16.gmra.mrb[36].mxu1 %vm216_vm1, %v194_v62  ;;  %v77_v61 = vld [vmem:[%s2600_s0 + $0x1f0] sm:$0xff]  ;;  %v78_v62 = vld [vmem:[%s2600_s0 + $0x1f8] sm:$0xff] }
  0x51   :  { %1391 = vmatprep.mubr.msk.bf16.mxu0 %vm216_vm1, %v163_v63  ;;  %1455 = vmatprep.mubr.msk.bf16.mxu1 %vm216_vm1, %v195_v0  ;;  %v141_v63 = vld [vmem:[%s2600_s0 + $0x3f0] sm:$0xff]  ;;  %v142_v0 = vld [vmem:[%s2600_s0 + $0x3f8] sm:$0xff]  ;;  %v174_v1 = vpack.c.bf16 %v78_v62, %v77_v61 }
  0x52   :  { %v206_v2 = vpack.c.bf16 %v142_v0, %v141_v63 }
  0x58   :  { %1392 = vmatmul.mubr.msk.bf16.gmra.mrb[40].mxu0 %vm216_vm1, %v164_v9  ;;  %1456 = vmatmul.mubr.msk.bf16.gmra.mrb[40].mxu1 %vm216_vm1, %v196_v10 }
  0x59   :  { %1395 = vmatprep.mubr.msk.bf16.mxu0 %vm216_vm1, %v165_v11  ;;  %1459 = vmatprep.mubr.msk.bf16.mxu1 %vm216_vm1, %v197_v12 }
  0x60   :  { %1396 = vmatmul.mubr.msk.bf16.gmra.mrb[44].mxu0 %vm216_vm1, %v166_v21  ;;  %1460 = vmatmul.mubr.msk.bf16.gmra.mrb[44].mxu1 %vm216_vm1, %v198_v22 }
  0x61   :  { %1399 = vmatprep.mubr.msk.bf16.mxu0 %vm216_vm1, %v167_v23  ;;  %1463 = vmatprep.mubr.msk.bf16.mxu1 %vm216_vm1, %v199_v24 }
  0x68   :  { %1400 = vmatmul.mubr.msk.bf16.gmra.mrb[48].mxu0 %vm216_vm1, %v168_v33  ;;  %1464 = vmatmul.mubr.msk.bf16.gmra.mrb[48].mxu1 %vm216_vm1, %v200_v34 }
  0x69   :  { %1403 = vmatprep.mubr.msk.bf16.mxu0 %vm216_vm1, %v169_v35  ;;  %1467 = vmatprep.mubr.msk.bf16.mxu1 %vm216_vm1, %v201_v36 }
  0x70   :  { %1404 = vmatmul.mubr.msk.bf16.gmra.mrb[52].mxu0 %vm216_vm1, %v170_v45  ;;  %1468 = vmatmul.mubr.msk.bf16.gmra.mrb[52].mxu1 %vm216_vm1, %v202_v46 }
  0x71   :  { %1407 = vmatprep.mubr.msk.bf16.mxu0 %vm216_vm1, %v171_v47  ;;  %1471 = vmatprep.mubr.msk.bf16.mxu1 %vm216_vm1, %v203_v48 }
  0x78   :  { %1408 = vmatmul.mubr.msk.bf16.gmra.mrb[56].mxu0 %vm216_vm1, %v172_v57  ;;  %1472 = vmatmul.mubr.msk.bf16.gmra.mrb[56].mxu1 %vm216_vm1, %v204_v58 }
  0x79   :  { %1411 = vmatprep.mubr.msk.bf16.mxu0 %vm216_vm1, %v173_v59  ;;  %1475 = vmatprep.mubr.msk.bf16.mxu1 %vm216_vm1, %v205_v60 }
  0x80   :  { %1412 = vmatmul.mubr.msk.bf16.gmra.mrb[60].mxu0 %vm216_vm1, %v174_v1  ;;  %1476 = vmatmul.mubr.msk.bf16.gmra.mrb[60].mxu1 %vm216_vm1, %v206_v2 }
  0xdb   :  { %v1353_v4 = vpop.f32.mrb[0].mxu0  ;;  %v1417_v5 = vpop.f32.mrb[0].mxu1 }
  0xdc   :  { %v456_v6 = vadd.f32 %v1353_v4, %v1957_v3  ;;  %v712_v7 = vadd.f32 %v1417_v5, %v1957_v3  ;;  %v447_v8 = vpop.f32.mrb[1].mxu0  ;;  %v703_v9 = vpop.f32.mrb[1].mxu1 }
  0xdd   :  { %v448_v10 = vadd.f32 %v1957_v3, %v447_v8  ;;  %v704_v11 = vadd.f32 %v1957_v3, %v703_v9  ;;  %v1354_v12 = vpop.f32.mrb[2].mxu0  ;;  %v1418_v13 = vpop.f32.mrb[2].mxu1 }
  0xde   :  { %v960_v14 = vmax.f32 %v456_v6, 0.0  ;;  %v1024_v15 = vmax.f32 %v712_v7, 0.0  ;;  %v459_v16 = vadd.f32 %v1354_v12, %v1957_v3  ;;  %v715_v17 = vadd.f32 %v1418_v13, %v1957_v3  ;;  %v450_v18 = vpop.f32.mrb[3].mxu0  ;;  %v706_v19 = vpop.f32.mrb[3].mxu1 }
  0xdf   :  { %v958_v20 = vmax.f32 %v448_v10, 0.0  ;;  %v1022_v21 = vmax.f32 %v704_v11, 0.0  ;;  %v451_v22 = vadd.f32 %v1957_v3, %v450_v18  ;;  %v707_v23 = vadd.f32 %v1957_v3, %v706_v19 }
  0xe0   :  { %1089 = vst.msk [vmem:[%s2602_s3 + $0x10] sm:$0xff] %vm1086_vm2, %v960_v14  ;;  %1153 = vst.msk [vmem:[%s2602_s3 + $0x210] sm:$0xff] %vm1086_vm2, %v1024_v15  ;;  %v961_v24 = vmax.f32 %v459_v16, 0.0  ;;  %v1025_v25 = vmax.f32 %v715_v17, 0.0 }
  0xe1   :  { %1087 = vst.msk [vmem:[%s2602_s3] sm:$0xff] %vm1086_vm2, %v958_v20  ;;  %1151 = vst.msk [vmem:[%s2602_s3 + $0x200] sm:$0xff] %vm1086_vm2, %v1022_v21  ;;  %v959_v26 = vmax.f32 %v451_v22, 0.0  ;;  %v1023_v27 = vmax.f32 %v707_v23, 0.0 }
  0xe2   :  { %1090 = vst.msk [vmem:[%s2602_s3 + $0x18] sm:$0xff] %vm1086_vm2, %v961_v24  ;;  %1154 = vst.msk [vmem:[%s2602_s3 + $0x218] sm:$0xff] %vm1086_vm2, %v1025_v25 }
  0xe3   :  { %1088 = vst.msk [vmem:[%s2602_s3 + $0x8] sm:$0xff] %vm1086_vm2, %v959_v26  ;;  %1152 = vst.msk [vmem:[%s2602_s3 + $0x208] sm:$0xff] %vm1086_vm2, %v1023_v27  ;;  %v1357_v28 = vpop.f32.mrb[4].mxu0  ;;  %v1421_v29 = vpop.f32.mrb[4].mxu1 }
  0xe4   :  { %v472_v30 = vadd.f32 %v1357_v28, %v1957_v3  ;;  %v728_v31 = vadd.f32 %v1421_v29, %v1957_v3  ;;  %v463_v32 = vpop.f32.mrb[5].mxu0  ;;  %v719_v33 = vpop.f32.mrb[5].mxu1 }
  0xe5   :  { %v464_v34 = vadd.f32 %v1957_v3, %v463_v32  ;;  %v720_v35 = vadd.f32 %v1957_v3, %v719_v33  ;;  %v1358_v36 = vpop.f32.mrb[6].mxu0  ;;  %v1422_v37 = vpop.f32.mrb[6].mxu1 }
  0xe6   :  { %v964_v38 = vmax.f32 %v472_v30, 0.0  ;;  %v1028_v39 = vmax.f32 %v728_v31, 0.0  ;;  %v475_v40 = vadd.f32 %v1358_v36, %v1957_v3  ;;  %v731_v41 = vadd.f32 %v1422_v37, %v1957_v3  ;;  %v466_v42 = vpop.f32.mrb[7].mxu0  ;;  %v722_v43 = vpop.f32.mrb[7].mxu1 }
  0xe7   :  { %v962_v44 = vmax.f32 %v464_v34, 0.0  ;;  %v1026_v45 = vmax.f32 %v720_v35, 0.0  ;;  %v467_v46 = vadd.f32 %v1957_v3, %v466_v42  ;;  %v723_v47 = vadd.f32 %v1957_v3, %v722_v43 }
  0xe8   :  { %1093 = vst.msk [vmem:[%s2602_s3 + $0x30] sm:$0xff] %vm1086_vm2, %v964_v38  ;;  %1157 = vst.msk [vmem:[%s2602_s3 + $0x230] sm:$0xff] %vm1086_vm2, %v1028_v39  ;;  %v965_v48 = vmax.f32 %v475_v40, 0.0  ;;  %v1029_v49 = vmax.f32 %v731_v41, 0.0 }
  0xe9   :  { %1091 = vst.msk [vmem:[%s2602_s3 + $0x20] sm:$0xff] %vm1086_vm2, %v962_v44  ;;  %1155 = vst.msk [vmem:[%s2602_s3 + $0x220] sm:$0xff] %vm1086_vm2, %v1026_v45  ;;  %v963_v50 = vmax.f32 %v467_v46, 0.0  ;;  %v1027_v51 = vmax.f32 %v723_v47, 0.0 }
  0xea   :  { %1094 = vst.msk [vmem:[%s2602_s3 + $0x38] sm:$0xff] %vm1086_vm2, %v965_v48  ;;  %1158 = vst.msk [vmem:[%s2602_s3 + $0x238] sm:$0xff] %vm1086_vm2, %v1029_v49 }
  0xeb   :  { %1092 = vst.msk [vmem:[%s2602_s3 + $0x28] sm:$0xff] %vm1086_vm2, %v963_v50  ;;  %1156 = vst.msk [vmem:[%s2602_s3 + $0x228] sm:$0xff] %vm1086_vm2, %v1027_v51  ;;  %v1361_v52 = vpop.f32.mrb[8].mxu0  ;;  %v1425_v53 = vpop.f32.mrb[8].mxu1 }
  0xec   :  { %v488_v54 = vadd.f32 %v1361_v52, %v1957_v3  ;;  %v744_v55 = vadd.f32 %v1425_v53, %v1957_v3  ;;  %v479_v56 = vpop.f32.mrb[9].mxu0  ;;  %v735_v57 = vpop.f32.mrb[9].mxu1 }
  0xed   :  { %v480_v58 = vadd.f32 %v1957_v3, %v479_v56  ;;  %v736_v59 = vadd.f32 %v1957_v3, %v735_v57  ;;  %v1362_v60 = vpop.f32.mrb[10].mxu0  ;;  %v1426_v61 = vpop.f32.mrb[10].mxu1 }
  0xee   :  { %v968_v62 = vmax.f32 %v488_v54, 0.0  ;;  %v1032_v63 = vmax.f32 %v744_v55, 0.0  ;;  %v491_v0 = vadd.f32 %v1362_v60, %v1957_v3  ;;  %v747_v1 = vadd.f32 %v1426_v61, %v1957_v3  ;;  %v482_v2 = vpop.f32.mrb[11].mxu0  ;;  %v738_v4 = vpop.f32.mrb[11].mxu1 }
  0xef   :  { %v966_v5 = vmax.f32 %v480_v58, 0.0  ;;  %v1030_v6 = vmax.f32 %v736_v59, 0.0  ;;  %v483_v7 = vadd.f32 %v1957_v3, %v482_v2  ;;  %v739_v8 = vadd.f32 %v1957_v3, %v738_v4 }
  0xf0   :  { %1097 = vst.msk [vmem:[%s2602_s3 + $0x50] sm:$0xff] %vm1086_vm2, %v968_v62  ;;  %1161 = vst.msk [vmem:[%s2602_s3 + $0x250] sm:$0xff] %vm1086_vm2, %v1032_v63  ;;  %v969_v9 = vmax.f32 %v491_v0, 0.0  ;;  %v1033_v10 = vmax.f32 %v747_v1, 0.0 }
  0xf1   :  { %1095 = vst.msk [vmem:[%s2602_s3 + $0x40] sm:$0xff] %vm1086_vm2, %v966_v5  ;;  %1159 = vst.msk [vmem:[%s2602_s3 + $0x240] sm:$0xff] %vm1086_vm2, %v1030_v6  ;;  %v967_v11 = vmax.f32 %v483_v7, 0.0  ;;  %v1031_v12 = vmax.f32 %v739_v8, 0.0 }
  0xf2   :  { %1098 = vst.msk [vmem:[%s2602_s3 + $0x58] sm:$0xff] %vm1086_vm2, %v969_v9  ;;  %1162 = vst.msk [vmem:[%s2602_s3 + $0x258] sm:$0xff] %vm1086_vm2, %v1033_v10 }
  0xf3   :  { %1096 = vst.msk [vmem:[%s2602_s3 + $0x48] sm:$0xff] %vm1086_vm2, %v967_v11  ;;  %1160 = vst.msk [vmem:[%s2602_s3 + $0x248] sm:$0xff] %vm1086_vm2, %v1031_v12  ;;  %v1365_v13 = vpop.f32.mrb[12].mxu0  ;;  %v1429_v14 = vpop.f32.mrb[12].mxu1 }
  0xf4   :  { %v504_v15 = vadd.f32 %v1365_v13, %v1957_v3  ;;  %v760_v16 = vadd.f32 %v1429_v14, %v1957_v3  ;;  %v495_v17 = vpop.f32.mrb[13].mxu0  ;;  %v751_v18 = vpop.f32.mrb[13].mxu1 }
  0xf5   :  { %v496_v19 = vadd.f32 %v1957_v3, %v495_v17  ;;  %v752_v20 = vadd.f32 %v1957_v3, %v751_v18  ;;  %v1366_v21 = vpop.f32.mrb[14].mxu0  ;;  %v1430_v22 = vpop.f32.mrb[14].mxu1 }
  0xf6   :  { %v972_v23 = vmax.f32 %v504_v15, 0.0  ;;  %v1036_v24 = vmax.f32 %v760_v16, 0.0  ;;  %v507_v25 = vadd.f32 %v1366_v21, %v1957_v3  ;;  %v763_v26 = vadd.f32 %v1430_v22, %v1957_v3  ;;  %v498_v27 = vpop.f32.mrb[15].mxu0  ;;  %v754_v28 = vpop.f32.mrb[15].mxu1 }
  0xf7   :  { %v970_v29 = vmax.f32 %v496_v19, 0.0  ;;  %v1034_v30 = vmax.f32 %v752_v20, 0.0  ;;  %v499_v31 = vadd.f32 %v1957_v3, %v498_v27  ;;  %v755_v32 = vadd.f32 %v1957_v3, %v754_v28 }
  0xf8   :  { %1101 = vst.msk [vmem:[%s2602_s3 + $0x70] sm:$0xff] %vm1086_vm2, %v972_v23  ;;  %1165 = vst.msk [vmem:[%s2602_s3 + $0x270] sm:$0xff] %vm1086_vm2, %v1036_v24  ;;  %v973_v33 = vmax.f32 %v507_v25, 0.0  ;;  %v1037_v34 = vmax.f32 %v763_v26, 0.0 }
  0xf9   :  { %1099 = vst.msk [vmem:[%s2602_s3 + $0x60] sm:$0xff] %vm1086_vm2, %v970_v29  ;;  %1163 = vst.msk [vmem:[%s2602_s3 + $0x260] sm:$0xff] %vm1086_vm2, %v1034_v30  ;;  %v971_v35 = vmax.f32 %v499_v31, 0.0  ;;  %v1035_v36 = vmax.f32 %v755_v32, 0.0 }
  0xfa   :  { %1102 = vst.msk [vmem:[%s2602_s3 + $0x78] sm:$0xff] %vm1086_vm2, %v973_v33  ;;  %1166 = vst.msk [vmem:[%s2602_s3 + $0x278] sm:$0xff] %vm1086_vm2, %v1037_v34 }
  0xfb   :  { %1100 = vst.msk [vmem:[%s2602_s3 + $0x68] sm:$0xff] %vm1086_vm2, %v971_v35  ;;  %1164 = vst.msk [vmem:[%s2602_s3 + $0x268] sm:$0xff] %vm1086_vm2, %v1035_v36  ;;  %v1369_v37 = vpop.f32.mrb[16].mxu0  ;;  %v1433_v38 = vpop.f32.mrb[16].mxu1 }
  0xfc   :  { %v520_v39 = vadd.f32 %v1369_v37, %v1957_v3  ;;  %v776_v40 = vadd.f32 %v1433_v38, %v1957_v3  ;;  %v511_v41 = vpop.f32.mrb[17].mxu0  ;;  %v767_v42 = vpop.f32.mrb[17].mxu1 }
  0xfd   :  { %v512_v43 = vadd.f32 %v1957_v3, %v511_v41  ;;  %v768_v44 = vadd.f32 %v1957_v3, %v767_v42  ;;  %v1370_v45 = vpop.f32.mrb[18].mxu0  ;;  %v1434_v46 = vpop.f32.mrb[18].mxu1 }
  0xfe   :  { %v976_v47 = vmax.f32 %v520_v39, 0.0  ;;  %v1040_v48 = vmax.f32 %v776_v40, 0.0  ;;  %v523_v49 = vadd.f32 %v1370_v45, %v1957_v3  ;;  %v779_v50 = vadd.f32 %v1434_v46, %v1957_v3  ;;  %v514_v51 = vpop.f32.mrb[19].mxu0  ;;  %v770_v52 = vpop.f32.mrb[19].mxu1 }
  0xff   :  { %v974_v53 = vmax.f32 %v512_v43, 0.0  ;;  %v1038_v54 = vmax.f32 %v768_v44, 0.0  ;;  %v515_v55 = vadd.f32 %v1957_v3, %v514_v51  ;;  %v771_v56 = vadd.f32 %v1957_v3, %v770_v52 }
 0x100   :  { %1105 = vst.msk [vmem:[%s2602_s3 + $0x90] sm:$0xff] %vm1086_vm2, %v976_v47  ;;  %1169 = vst.msk [vmem:[%s2602_s3 + $0x290] sm:$0xff] %vm1086_vm2, %v1040_v48  ;;  %v977_v57 = vmax.f32 %v523_v49, 0.0  ;;  %v1041_v58 = vmax.f32 %v779_v50, 0.0 }
 0x101   :  { %1103 = vst.msk [vmem:[%s2602_s3 + $0x80] sm:$0xff] %vm1086_vm2, %v974_v53  ;;  %1167 = vst.msk [vmem:[%s2602_s3 + $0x280] sm:$0xff] %vm1086_vm2, %v1038_v54  ;;  %v975_v59 = vmax.f32 %v515_v55, 0.0  ;;  %v1039_v60 = vmax.f32 %v771_v56, 0.0 }
 0x102   :  { %1106 = vst.msk [vmem:[%s2602_s3 + $0x98] sm:$0xff] %vm1086_vm2, %v977_v57  ;;  %1170 = vst.msk [vmem:[%s2602_s3 + $0x298] sm:$0xff] %vm1086_vm2, %v1041_v58 }
 0x103   :  { %1104 = vst.msk [vmem:[%s2602_s3 + $0x88] sm:$0xff] %vm1086_vm2, %v975_v59  ;;  %1168 = vst.msk [vmem:[%s2602_s3 + $0x288] sm:$0xff] %vm1086_vm2, %v1039_v60  ;;  %v1373_v61 = vpop.f32.mrb[20].mxu0  ;;  %v1437_v62 = vpop.f32.mrb[20].mxu1 }
 0x104   :  { %v536_v63 = vadd.f32 %v1373_v61, %v1957_v3  ;;  %v792_v0 = vadd.f32 %v1437_v62, %v1957_v3  ;;  %v527_v1 = vpop.f32.mrb[21].mxu0  ;;  %v783_v2 = vpop.f32.mrb[21].mxu1 }
 0x105   :  { %v528_v4 = vadd.f32 %v1957_v3, %v527_v1  ;;  %v784_v5 = vadd.f32 %v1957_v3, %v783_v2  ;;  %v1374_v6 = vpop.f32.mrb[22].mxu0  ;;  %v1438_v7 = vpop.f32.mrb[22].mxu1 }
 0x106   :  { %v980_v8 = vmax.f32 %v536_v63, 0.0  ;;  %v1044_v9 = vmax.f32 %v792_v0, 0.0  ;;  %v539_v10 = vadd.f32 %v1374_v6, %v1957_v3  ;;  %v795_v11 = vadd.f32 %v1438_v7, %v1957_v3  ;;  %v530_v12 = vpop.f32.mrb[23].mxu0  ;;  %v786_v13 = vpop.f32.mrb[23].mxu1 }
 0x107   :  { %v978_v14 = vmax.f32 %v528_v4, 0.0  ;;  %v1042_v15 = vmax.f32 %v784_v5, 0.0  ;;  %v531_v16 = vadd.f32 %v1957_v3, %v530_v12  ;;  %v787_v17 = vadd.f32 %v1957_v3, %v786_v13 }
 0x108   :  { %1109 = vst.msk [vmem:[%s2602_s3 + $0xb0] sm:$0xff] %vm1086_vm2, %v980_v8  ;;  %1173 = vst.msk [vmem:[%s2602_s3 + $0x2b0] sm:$0xff] %vm1086_vm2, %v1044_v9  ;;  %v981_v18 = vmax.f32 %v539_v10, 0.0  ;;  %v1045_v19 = vmax.f32 %v795_v11, 0.0 }
 0x109   :  { %1107 = vst.msk [vmem:[%s2602_s3 + $0xa0] sm:$0xff] %vm1086_vm2, %v978_v14  ;;  %1171 = vst.msk [vmem:[%s2602_s3 + $0x2a0] sm:$0xff] %vm1086_vm2, %v1042_v15  ;;  %v979_v20 = vmax.f32 %v531_v16, 0.0  ;;  %v1043_v21 = vmax.f32 %v787_v17, 0.0 }
 0x10a   :  { %1110 = vst.msk [vmem:[%s2602_s3 + $0xb8] sm:$0xff] %vm1086_vm2, %v981_v18  ;;  %1174 = vst.msk [vmem:[%s2602_s3 + $0x2b8] sm:$0xff] %vm1086_vm2, %v1045_v19 }
 0x10b   :  { %1108 = vst.msk [vmem:[%s2602_s3 + $0xa8] sm:$0xff] %vm1086_vm2, %v979_v20  ;;  %1172 = vst.msk [vmem:[%s2602_s3 + $0x2a8] sm:$0xff] %vm1086_vm2, %v1043_v21  ;;  %v1377_v22 = vpop.f32.mrb[24].mxu0  ;;  %v1441_v23 = vpop.f32.mrb[24].mxu1 }
 0x10c   :  { %v552_v24 = vadd.f32 %v1377_v22, %v1957_v3  ;;  %v808_v25 = vadd.f32 %v1441_v23, %v1957_v3  ;;  %v543_v26 = vpop.f32.mrb[25].mxu0  ;;  %v799_v27 = vpop.f32.mrb[25].mxu1 }
 0x10d   :  { %v544_v28 = vadd.f32 %v1957_v3, %v543_v26  ;;  %v800_v29 = vadd.f32 %v1957_v3, %v799_v27  ;;  %v1378_v30 = vpop.f32.mrb[26].mxu0  ;;  %v1442_v31 = vpop.f32.mrb[26].mxu1 }
 0x10e   :  { %v984_v32 = vmax.f32 %v552_v24, 0.0  ;;  %v1048_v33 = vmax.f32 %v808_v25, 0.0  ;;  %v555_v34 = vadd.f32 %v1378_v30, %v1957_v3  ;;  %v811_v35 = vadd.f32 %v1442_v31, %v1957_v3  ;;  %v546_v36 = vpop.f32.mrb[27].mxu0  ;;  %v802_v37 = vpop.f32.mrb[27].mxu1 }
 0x10f   :  { %v982_v38 = vmax.f32 %v544_v28, 0.0  ;;  %v1046_v39 = vmax.f32 %v800_v29, 0.0  ;;  %v547_v40 = vadd.f32 %v1957_v3, %v546_v36  ;;  %v803_v41 = vadd.f32 %v1957_v3, %v802_v37 }
 0x110   :  { %1113 = vst.msk [vmem:[%s2602_s3 + $0xd0] sm:$0xff] %vm1086_vm2, %v984_v32  ;;  %1177 = vst.msk [vmem:[%s2602_s3 + $0x2d0] sm:$0xff] %vm1086_vm2, %v1048_v33  ;;  %v985_v42 = vmax.f32 %v555_v34, 0.0  ;;  %v1049_v43 = vmax.f32 %v811_v35, 0.0 }
 0x111   :  { %1111 = vst.msk [vmem:[%s2602_s3 + $0xc0] sm:$0xff] %vm1086_vm2, %v982_v38  ;;  %1175 = vst.msk [vmem:[%s2602_s3 + $0x2c0] sm:$0xff] %vm1086_vm2, %v1046_v39  ;;  %v983_v44 = vmax.f32 %v547_v40, 0.0  ;;  %v1047_v45 = vmax.f32 %v803_v41, 0.0 }
 0x112   :  { %1114 = vst.msk [vmem:[%s2602_s3 + $0xd8] sm:$0xff] %vm1086_vm2, %v985_v42  ;;  %1178 = vst.msk [vmem:[%s2602_s3 + $0x2d8] sm:$0xff] %vm1086_vm2, %v1049_v43 }
 0x113   :  { %1112 = vst.msk [vmem:[%s2602_s3 + $0xc8] sm:$0xff] %vm1086_vm2, %v983_v44  ;;  %1176 = vst.msk [vmem:[%s2602_s3 + $0x2c8] sm:$0xff] %vm1086_vm2, %v1047_v45  ;;  %v1381_v46 = vpop.f32.mrb[28].mxu0  ;;  %v1445_v47 = vpop.f32.mrb[28].mxu1 }
 0x114   :  { %v568_v48 = vadd.f32 %v1381_v46, %v1957_v3  ;;  %v824_v49 = vadd.f32 %v1445_v47, %v1957_v3  ;;  %v559_v50 = vpop.f32.mrb[29].mxu0  ;;  %v815_v51 = vpop.f32.mrb[29].mxu1 }
 0x115   :  { %v560_v52 = vadd.f32 %v1957_v3, %v559_v50  ;;  %v816_v53 = vadd.f32 %v1957_v3, %v815_v51  ;;  %v1382_v54 = vpop.f32.mrb[30].mxu0  ;;  %v1446_v55 = vpop.f32.mrb[30].mxu1 }
 0x116   :  { %v988_v56 = vmax.f32 %v568_v48, 0.0  ;;  %v1052_v57 = vmax.f32 %v824_v49, 0.0  ;;  %v571_v58 = vadd.f32 %v1382_v54, %v1957_v3  ;;  %v827_v59 = vadd.f32 %v1446_v55, %v1957_v3  ;;  %v562_v60 = vpop.f32.mrb[31].mxu0  ;;  %v818_v61 = vpop.f32.mrb[31].mxu1 }
 0x117   :  { %v986_v62 = vmax.f32 %v560_v52, 0.0  ;;  %v1050_v63 = vmax.f32 %v816_v53, 0.0  ;;  %v563_v0 = vadd.f32 %v1957_v3, %v562_v60  ;;  %v819_v1 = vadd.f32 %v1957_v3, %v818_v61 }
 0x118   :  { %1117 = vst.msk [vmem:[%s2602_s3 + $0xf0] sm:$0xff] %vm1086_vm2, %v988_v56  ;;  %1181 = vst.msk [vmem:[%s2602_s3 + $0x2f0] sm:$0xff] %vm1086_vm2, %v1052_v57  ;;  %v989_v2 = vmax.f32 %v571_v58, 0.0  ;;  %v1053_v4 = vmax.f32 %v827_v59, 0.0 }
 0x119   :  { %1115 = vst.msk [vmem:[%s2602_s3 + $0xe0] sm:$0xff] %vm1086_vm2, %v986_v62  ;;  %1179 = vst.msk [vmem:[%s2602_s3 + $0x2e0] sm:$0xff] %vm1086_vm2, %v1050_v63  ;;  %v987_v5 = vmax.f32 %v563_v0, 0.0  ;;  %v1051_v6 = vmax.f32 %v819_v1, 0.0 }
 0x11a   :  { %1118 = vst.msk [vmem:[%s2602_s3 + $0xf8] sm:$0xff] %vm1086_vm2, %v989_v2  ;;  %1182 = vst.msk [vmem:[%s2602_s3 + $0x2f8] sm:$0xff] %vm1086_vm2, %v1053_v4 }
 0x11b   :  { %1116 = vst.msk [vmem:[%s2602_s3 + $0xe8] sm:$0xff] %vm1086_vm2, %v987_v5  ;;  %1180 = vst.msk [vmem:[%s2602_s3 + $0x2e8] sm:$0xff] %vm1086_vm2, %v1051_v6  ;;  %v1385_v7 = vpop.f32.mrb[32].mxu0  ;;  %v1449_v8 = vpop.f32.mrb[32].mxu1 }
 0x11c   :  { %v584_v9 = vadd.f32 %v1385_v7, %v1957_v3  ;;  %v840_v10 = vadd.f32 %v1449_v8, %v1957_v3  ;;  %v575_v11 = vpop.f32.mrb[33].mxu0  ;;  %v831_v12 = vpop.f32.mrb[33].mxu1 }
 0x11d   :  { %v576_v13 = vadd.f32 %v1957_v3, %v575_v11  ;;  %v832_v14 = vadd.f32 %v1957_v3, %v831_v12  ;;  %v1386_v15 = vpop.f32.mrb[34].mxu0  ;;  %v1450_v16 = vpop.f32.mrb[34].mxu1 }
 0x11e   :  { %v992_v17 = vmax.f32 %v584_v9, 0.0  ;;  %v1056_v18 = vmax.f32 %v840_v10, 0.0  ;;  %v587_v19 = vadd.f32 %v1386_v15, %v1957_v3  ;;  %v843_v20 = vadd.f32 %v1450_v16, %v1957_v3  ;;  %v578_v21 = vpop.f32.mrb[35].mxu0  ;;  %v834_v22 = vpop.f32.mrb[35].mxu1 }
 0x11f   :  { %v990_v23 = vmax.f32 %v576_v13, 0.0  ;;  %v1054_v24 = vmax.f32 %v832_v14, 0.0  ;;  %v579_v25 = vadd.f32 %v1957_v3, %v578_v21  ;;  %v835_v26 = vadd.f32 %v1957_v3, %v834_v22 }
 0x120   :  { %1121 = vst.msk [vmem:[%s2602_s3 + $0x110] sm:$0xff] %vm1086_vm2, %v992_v17  ;;  %1185 = vst.msk [vmem:[%s2602_s3 + $0x310] sm:$0xff] %vm1086_vm2, %v1056_v18  ;;  %v993_v27 = vmax.f32 %v587_v19, 0.0  ;;  %v1057_v28 = vmax.f32 %v843_v20, 0.0 }
 0x121   :  { %1119 = vst.msk [vmem:[%s2602_s3 + $0x100] sm:$0xff] %vm1086_vm2, %v990_v23  ;;  %1183 = vst.msk [vmem:[%s2602_s3 + $0x300] sm:$0xff] %vm1086_vm2, %v1054_v24  ;;  %v991_v29 = vmax.f32 %v579_v25, 0.0  ;;  %v1055_v30 = vmax.f32 %v835_v26, 0.0 }
 0x122   :  { %1122 = vst.msk [vmem:[%s2602_s3 + $0x118] sm:$0xff] %vm1086_vm2, %v993_v27  ;;  %1186 = vst.msk [vmem:[%s2602_s3 + $0x318] sm:$0xff] %vm1086_vm2, %v1057_v28 }
 0x123   :  { %1120 = vst.msk [vmem:[%s2602_s3 + $0x108] sm:$0xff] %vm1086_vm2, %v991_v29  ;;  %1184 = vst.msk [vmem:[%s2602_s3 + $0x308] sm:$0xff] %vm1086_vm2, %v1055_v30  ;;  %v1389_v31 = vpop.f32.mrb[36].mxu0  ;;  %v1453_v32 = vpop.f32.mrb[36].mxu1 }
 0x124   :  { %v600_v33 = vadd.f32 %v1389_v31, %v1957_v3  ;;  %v856_v34 = vadd.f32 %v1453_v32, %v1957_v3  ;;  %v591_v35 = vpop.f32.mrb[37].mxu0  ;;  %v847_v36 = vpop.f32.mrb[37].mxu1 }
 0x125   :  { %v592_v37 = vadd.f32 %v1957_v3, %v591_v35  ;;  %v848_v38 = vadd.f32 %v1957_v3, %v847_v36  ;;  %v1390_v39 = vpop.f32.mrb[38].mxu0  ;;  %v1454_v40 = vpop.f32.mrb[38].mxu1 }
 0x126   :  { %v996_v41 = vmax.f32 %v600_v33, 0.0  ;;  %v1060_v42 = vmax.f32 %v856_v34, 0.0  ;;  %v603_v43 = vadd.f32 %v1390_v39, %v1957_v3  ;;  %v859_v44 = vadd.f32 %v1454_v40, %v1957_v3  ;;  %v594_v45 = vpop.f32.mrb[39].mxu0  ;;  %v850_v46 = vpop.f32.mrb[39].mxu1 }
 0x127   :  { %v994_v47 = vmax.f32 %v592_v37, 0.0  ;;  %v1058_v48 = vmax.f32 %v848_v38, 0.0  ;;  %v595_v49 = vadd.f32 %v1957_v3, %v594_v45  ;;  %v851_v50 = vadd.f32 %v1957_v3, %v850_v46 }
 0x128   :  { %1125 = vst.msk [vmem:[%s2602_s3 + $0x130] sm:$0xff] %vm1086_vm2, %v996_v41  ;;  %1189 = vst.msk [vmem:[%s2602_s3 + $0x330] sm:$0xff] %vm1086_vm2, %v1060_v42  ;;  %v997_v51 = vmax.f32 %v603_v43, 0.0  ;;  %v1061_v52 = vmax.f32 %v859_v44, 0.0 }
 0x129   :  { %1123 = vst.msk [vmem:[%s2602_s3 + $0x120] sm:$0xff] %vm1086_vm2, %v994_v47  ;;  %1187 = vst.msk [vmem:[%s2602_s3 + $0x320] sm:$0xff] %vm1086_vm2, %v1058_v48  ;;  %v995_v53 = vmax.f32 %v595_v49, 0.0  ;;  %v1059_v54 = vmax.f32 %v851_v50, 0.0 }
 0x12a   :  { %1126 = vst.msk [vmem:[%s2602_s3 + $0x138] sm:$0xff] %vm1086_vm2, %v997_v51  ;;  %1190 = vst.msk [vmem:[%s2602_s3 + $0x338] sm:$0xff] %vm1086_vm2, %v1061_v52 }
 0x12b   :  { %1124 = vst.msk [vmem:[%s2602_s3 + $0x128] sm:$0xff] %vm1086_vm2, %v995_v53  ;;  %1188 = vst.msk [vmem:[%s2602_s3 + $0x328] sm:$0xff] %vm1086_vm2, %v1059_v54  ;;  %v1393_v55 = vpop.f32.mrb[40].mxu0  ;;  %v1457_v56 = vpop.f32.mrb[40].mxu1 }
 0x12c   :  { %v616_v57 = vadd.f32 %v1393_v55, %v1957_v3  ;;  %v872_v58 = vadd.f32 %v1457_v56, %v1957_v3  ;;  %v607_v59 = vpop.f32.mrb[41].mxu0  ;;  %v863_v60 = vpop.f32.mrb[41].mxu1 }
 0x12d   :  { %v608_v61 = vadd.f32 %v1957_v3, %v607_v59  ;;  %v864_v62 = vadd.f32 %v1957_v3, %v863_v60  ;;  %v1394_v63 = vpop.f32.mrb[42].mxu0  ;;  %v1458_v0 = vpop.f32.mrb[42].mxu1 }
 0x12e   :  { %v1000_v1 = vmax.f32 %v616_v57, 0.0  ;;  %v1064_v2 = vmax.f32 %v872_v58, 0.0  ;;  %v619_v4 = vadd.f32 %v1394_v63, %v1957_v3  ;;  %v875_v5 = vadd.f32 %v1458_v0, %v1957_v3  ;;  %v610_v6 = vpop.f32.mrb[43].mxu0  ;;  %v866_v7 = vpop.f32.mrb[43].mxu1 }
 0x12f   :  { %v998_v8 = vmax.f32 %v608_v61, 0.0  ;;  %v1062_v9 = vmax.f32 %v864_v62, 0.0  ;;  %v611_v10 = vadd.f32 %v1957_v3, %v610_v6  ;;  %v867_v11 = vadd.f32 %v1957_v3, %v866_v7 }
 0x130   :  { %1129 = vst.msk [vmem:[%s2602_s3 + $0x150] sm:$0xff] %vm1086_vm2, %v1000_v1  ;;  %1193 = vst.msk [vmem:[%s2602_s3 + $0x350] sm:$0xff] %vm1086_vm2, %v1064_v2  ;;  %v1001_v12 = vmax.f32 %v619_v4, 0.0  ;;  %v1065_v13 = vmax.f32 %v875_v5, 0.0 }
 0x131   :  { %1127 = vst.msk [vmem:[%s2602_s3 + $0x140] sm:$0xff] %vm1086_vm2, %v998_v8  ;;  %1191 = vst.msk [vmem:[%s2602_s3 + $0x340] sm:$0xff] %vm1086_vm2, %v1062_v9  ;;  %v999_v14 = vmax.f32 %v611_v10, 0.0  ;;  %v1063_v15 = vmax.f32 %v867_v11, 0.0 }
 0x132   :  { %1130 = vst.msk [vmem:[%s2602_s3 + $0x158] sm:$0xff] %vm1086_vm2, %v1001_v12  ;;  %1194 = vst.msk [vmem:[%s2602_s3 + $0x358] sm:$0xff] %vm1086_vm2, %v1065_v13 }
 0x133   :  { %1128 = vst.msk [vmem:[%s2602_s3 + $0x148] sm:$0xff] %vm1086_vm2, %v999_v14  ;;  %1192 = vst.msk [vmem:[%s2602_s3 + $0x348] sm:$0xff] %vm1086_vm2, %v1063_v15  ;;  %v1397_v16 = vpop.f32.mrb[44].mxu0  ;;  %v1461_v17 = vpop.f32.mrb[44].mxu1 }
 0x134   :  { %v632_v18 = vadd.f32 %v1397_v16, %v1957_v3  ;;  %v888_v19 = vadd.f32 %v1461_v17, %v1957_v3  ;;  %v623_v20 = vpop.f32.mrb[45].mxu0  ;;  %v879_v21 = vpop.f32.mrb[45].mxu1 }
 0x135   :  { %v624_v22 = vadd.f32 %v1957_v3, %v623_v20  ;;  %v880_v23 = vadd.f32 %v1957_v3, %v879_v21  ;;  %v1398_v24 = vpop.f32.mrb[46].mxu0  ;;  %v1462_v25 = vpop.f32.mrb[46].mxu1 }
 0x136   :  { %v1004_v26 = vmax.f32 %v632_v18, 0.0  ;;  %v1068_v27 = vmax.f32 %v888_v19, 0.0  ;;  %v635_v28 = vadd.f32 %v1398_v24, %v1957_v3  ;;  %v891_v29 = vadd.f32 %v1462_v25, %v1957_v3  ;;  %v626_v30 = vpop.f32.mrb[47].mxu0  ;;  %v882_v31 = vpop.f32.mrb[47].mxu1 }
 0x137   :  { %v1002_v32 = vmax.f32 %v624_v22, 0.0  ;;  %v1066_v33 = vmax.f32 %v880_v23, 0.0  ;;  %v627_v34 = vadd.f32 %v1957_v3, %v626_v30  ;;  %v883_v35 = vadd.f32 %v1957_v3, %v882_v31 }
 0x138   :  { %1133 = vst.msk [vmem:[%s2602_s3 + $0x170] sm:$0xff] %vm1086_vm2, %v1004_v26  ;;  %1197 = vst.msk [vmem:[%s2602_s3 + $0x370] sm:$0xff] %vm1086_vm2, %v1068_v27  ;;  %v1005_v36 = vmax.f32 %v635_v28, 0.0  ;;  %v1069_v37 = vmax.f32 %v891_v29, 0.0 }
 0x139   :  { %1131 = vst.msk [vmem:[%s2602_s3 + $0x160] sm:$0xff] %vm1086_vm2, %v1002_v32  ;;  %1195 = vst.msk [vmem:[%s2602_s3 + $0x360] sm:$0xff] %vm1086_vm2, %v1066_v33  ;;  %v1003_v38 = vmax.f32 %v627_v34, 0.0  ;;  %v1067_v39 = vmax.f32 %v883_v35, 0.0 }
 0x13a   :  { %1134 = vst.msk [vmem:[%s2602_s3 + $0x178] sm:$0xff] %vm1086_vm2, %v1005_v36  ;;  %1198 = vst.msk [vmem:[%s2602_s3 + $0x378] sm:$0xff] %vm1086_vm2, %v1069_v37 }
 0x13b   :  { %1132 = vst.msk [vmem:[%s2602_s3 + $0x168] sm:$0xff] %vm1086_vm2, %v1003_v38  ;;  %1196 = vst.msk [vmem:[%s2602_s3 + $0x368] sm:$0xff] %vm1086_vm2, %v1067_v39  ;;  %v1401_v40 = vpop.f32.mrb[48].mxu0  ;;  %v1465_v41 = vpop.f32.mrb[48].mxu1 }
 0x13c   :  { %v648_v42 = vadd.f32 %v1401_v40, %v1957_v3  ;;  %v904_v43 = vadd.f32 %v1465_v41, %v1957_v3  ;;  %v639_v44 = vpop.f32.mrb[49].mxu0  ;;  %v895_v45 = vpop.f32.mrb[49].mxu1 }
 0x13d   :  { %v640_v46 = vadd.f32 %v1957_v3, %v639_v44  ;;  %v896_v47 = vadd.f32 %v1957_v3, %v895_v45  ;;  %v1402_v48 = vpop.f32.mrb[50].mxu0  ;;  %v1466_v49 = vpop.f32.mrb[50].mxu1 }
 0x13e   :  { %v1008_v50 = vmax.f32 %v648_v42, 0.0  ;;  %v1072_v51 = vmax.f32 %v904_v43, 0.0  ;;  %v651_v52 = vadd.f32 %v1402_v48, %v1957_v3  ;;  %v907_v53 = vadd.f32 %v1466_v49, %v1957_v3  ;;  %v642_v54 = vpop.f32.mrb[51].mxu0  ;;  %v898_v55 = vpop.f32.mrb[51].mxu1 }
 0x13f   :  { %v1006_v56 = vmax.f32 %v640_v46, 0.0  ;;  %v1070_v57 = vmax.f32 %v896_v47, 0.0  ;;  %v643_v58 = vadd.f32 %v1957_v3, %v642_v54  ;;  %v899_v59 = vadd.f32 %v1957_v3, %v898_v55 }
 0x140   :  { %1137 = vst.msk [vmem:[%s2602_s3 + $0x190] sm:$0xff] %vm1086_vm2, %v1008_v50  ;;  %1201 = vst.msk [vmem:[%s2602_s3 + $0x390] sm:$0xff] %vm1086_vm2, %v1072_v51  ;;  %v1009_v60 = vmax.f32 %v651_v52, 0.0  ;;  %v1073_v61 = vmax.f32 %v907_v53, 0.0 }
 0x141   :  { %1135 = vst.msk [vmem:[%s2602_s3 + $0x180] sm:$0xff] %vm1086_vm2, %v1006_v56  ;;  %1199 = vst.msk [vmem:[%s2602_s3 + $0x380] sm:$0xff] %vm1086_vm2, %v1070_v57  ;;  %v1007_v62 = vmax.f32 %v643_v58, 0.0  ;;  %v1071_v63 = vmax.f32 %v899_v59, 0.0 }
 0x142   :  { %1138 = vst.msk [vmem:[%s2602_s3 + $0x198] sm:$0xff] %vm1086_vm2, %v1009_v60  ;;  %1202 = vst.msk [vmem:[%s2602_s3 + $0x398] sm:$0xff] %vm1086_vm2, %v1073_v61 }
 0x143   :  { %1136 = vst.msk [vmem:[%s2602_s3 + $0x188] sm:$0xff] %vm1086_vm2, %v1007_v62  ;;  %1200 = vst.msk [vmem:[%s2602_s3 + $0x388] sm:$0xff] %vm1086_vm2, %v1071_v63  ;;  %v1405_v0 = vpop.f32.mrb[52].mxu0  ;;  %v1469_v1 = vpop.f32.mrb[52].mxu1 }
 0x144   :  { %v664_v2 = vadd.f32 %v1405_v0, %v1957_v3  ;;  %v920_v4 = vadd.f32 %v1469_v1, %v1957_v3  ;;  %v655_v5 = vpop.f32.mrb[53].mxu0  ;;  %v911_v6 = vpop.f32.mrb[53].mxu1 }
 0x145   :  { %v656_v7 = vadd.f32 %v1957_v3, %v655_v5  ;;  %v912_v8 = vadd.f32 %v1957_v3, %v911_v6  ;;  %v1406_v9 = vpop.f32.mrb[54].mxu0  ;;  %v1470_v10 = vpop.f32.mrb[54].mxu1 }
 0x146   :  { %v1012_v11 = vmax.f32 %v664_v2, 0.0  ;;  %v1076_v12 = vmax.f32 %v920_v4, 0.0  ;;  %v667_v13 = vadd.f32 %v1406_v9, %v1957_v3  ;;  %v923_v14 = vadd.f32 %v1470_v10, %v1957_v3  ;;  %v658_v15 = vpop.f32.mrb[55].mxu0  ;;  %v914_v16 = vpop.f32.mrb[55].mxu1 }
 0x147   :  { %v1010_v17 = vmax.f32 %v656_v7, 0.0  ;;  %v1074_v18 = vmax.f32 %v912_v8, 0.0  ;;  %v659_v19 = vadd.f32 %v1957_v3, %v658_v15  ;;  %v915_v20 = vadd.f32 %v1957_v3, %v914_v16 }
 0x148   :  { %1141 = vst.msk [vmem:[%s2602_s3 + $0x1b0] sm:$0xff] %vm1086_vm2, %v1012_v11  ;;  %1205 = vst.msk [vmem:[%s2602_s3 + $0x3b0] sm:$0xff] %vm1086_vm2, %v1076_v12  ;;  %v1013_v21 = vmax.f32 %v667_v13, 0.0  ;;  %v1077_v22 = vmax.f32 %v923_v14, 0.0 }
 0x149   :  { %1139 = vst.msk [vmem:[%s2602_s3 + $0x1a0] sm:$0xff] %vm1086_vm2, %v1010_v17  ;;  %1203 = vst.msk [vmem:[%s2602_s3 + $0x3a0] sm:$0xff] %vm1086_vm2, %v1074_v18  ;;  %v1011_v23 = vmax.f32 %v659_v19, 0.0  ;;  %v1075_v24 = vmax.f32 %v915_v20, 0.0 }
 0x14a   :  { %1142 = vst.msk [vmem:[%s2602_s3 + $0x1b8] sm:$0xff] %vm1086_vm2, %v1013_v21  ;;  %1206 = vst.msk [vmem:[%s2602_s3 + $0x3b8] sm:$0xff] %vm1086_vm2, %v1077_v22 }
 0x14b   :  { %1140 = vst.msk [vmem:[%s2602_s3 + $0x1a8] sm:$0xff] %vm1086_vm2, %v1011_v23  ;;  %1204 = vst.msk [vmem:[%s2602_s3 + $0x3a8] sm:$0xff] %vm1086_vm2, %v1075_v24  ;;  %v1409_v25 = vpop.f32.mrb[56].mxu0  ;;  %v1473_v26 = vpop.f32.mrb[56].mxu1 }
 0x14c   :  { %v680_v27 = vadd.f32 %v1409_v25, %v1957_v3  ;;  %v936_v28 = vadd.f32 %v1473_v26, %v1957_v3  ;;  %v671_v29 = vpop.f32.mrb[57].mxu0  ;;  %v927_v30 = vpop.f32.mrb[57].mxu1 }
 0x14d   :  { %v672_v31 = vadd.f32 %v1957_v3, %v671_v29  ;;  %v928_v32 = vadd.f32 %v1957_v3, %v927_v30  ;;  %v1410_v33 = vpop.f32.mrb[58].mxu0  ;;  %v1474_v34 = vpop.f32.mrb[58].mxu1 }
 0x14e   :  { %v1016_v35 = vmax.f32 %v680_v27, 0.0  ;;  %v1080_v36 = vmax.f32 %v936_v28, 0.0  ;;  %v683_v37 = vadd.f32 %v1410_v33, %v1957_v3  ;;  %v939_v38 = vadd.f32 %v1474_v34, %v1957_v3  ;;  %v674_v39 = vpop.f32.mrb[59].mxu0  ;;  %v930_v40 = vpop.f32.mrb[59].mxu1 }
 0x14f   :  { %v1014_v41 = vmax.f32 %v672_v31, 0.0  ;;  %v1078_v42 = vmax.f32 %v928_v32, 0.0  ;;  %v675_v43 = vadd.f32 %v1957_v3, %v674_v39  ;;  %v931_v44 = vadd.f32 %v1957_v3, %v930_v40 }
 0x150   :  { %1145 = vst.msk [vmem:[%s2602_s3 + $0x1d0] sm:$0xff] %vm1086_vm2, %v1016_v35  ;;  %1209 = vst.msk [vmem:[%s2602_s3 + $0x3d0] sm:$0xff] %vm1086_vm2, %v1080_v36  ;;  %v1017_v45 = vmax.f32 %v683_v37, 0.0  ;;  %v1081_v46 = vmax.f32 %v939_v38, 0.0 }
 0x151   :  { %1143 = vst.msk [vmem:[%s2602_s3 + $0x1c0] sm:$0xff] %vm1086_vm2, %v1014_v41  ;;  %1207 = vst.msk [vmem:[%s2602_s3 + $0x3c0] sm:$0xff] %vm1086_vm2, %v1078_v42  ;;  %v1015_v47 = vmax.f32 %v675_v43, 0.0  ;;  %v1079_v48 = vmax.f32 %v931_v44, 0.0 }
 0x152   :  { %1146 = vst.msk [vmem:[%s2602_s3 + $0x1d8] sm:$0xff] %vm1086_vm2, %v1017_v45  ;;  %1210 = vst.msk [vmem:[%s2602_s3 + $0x3d8] sm:$0xff] %vm1086_vm2, %v1081_v46 }
 0x153   :  { %1144 = vst.msk [vmem:[%s2602_s3 + $0x1c8] sm:$0xff] %vm1086_vm2, %v1015_v47  ;;  %1208 = vst.msk [vmem:[%s2602_s3 + $0x3c8] sm:$0xff] %vm1086_vm2, %v1079_v48  ;;  %v1413_v49 = vpop.f32.mrb[60].mxu0  ;;  %v1477_v50 = vpop.f32.mrb[60].mxu1 }
 0x154   :  { %v696_v51 = vadd.f32 %v1413_v49, %v1957_v3  ;;  %v952_v52 = vadd.f32 %v1477_v50, %v1957_v3  ;;  %v687_v53 = vpop.f32.mrb[61].mxu0  ;;  %v943_v54 = vpop.f32.mrb[61].mxu1 }
 0x155   :  { %v688_v55 = vadd.f32 %v1957_v3, %v687_v53  ;;  %v944_v56 = vadd.f32 %v1957_v3, %v943_v54  ;;  %v1414_v57 = vpop.f32.mrb[62].mxu0  ;;  %v1478_v58 = vpop.f32.mrb[62].mxu1 }
 0x156   :  { %v1020_v59 = vmax.f32 %v696_v51, 0.0  ;;  %v1084_v60 = vmax.f32 %v952_v52, 0.0  ;;  %v699_v61 = vadd.f32 %v1414_v57, %v1957_v3  ;;  %v955_v62 = vadd.f32 %v1478_v58, %v1957_v3  ;;  %v690_v63 = vpop.f32.mrb[63].mxu0  ;;  %v946_v0 = vpop.f32.mrb[63].mxu1 }
 0x157   :  { %v1018_v1 = vmax.f32 %v688_v55, 0.0  ;;  %v1082_v2 = vmax.f32 %v944_v56, 0.0  ;;  %v691_v4 = vadd.f32 %v1957_v3, %v690_v63  ;;  %v947_v5 = vadd.f32 %v1957_v3, %v946_v0 }
 0x158   :  { %1149 = vst.msk [vmem:[%s2602_s3 + $0x1f0] sm:$0xff] %vm1086_vm2, %v1020_v59  ;;  %1213 = vst.msk [vmem:[%s2602_s3 + $0x3f0] sm:$0xff] %vm1086_vm2, %v1084_v60  ;;  %v1021_v6 = vmax.f32 %v699_v61, 0.0  ;;  %v1085_v7 = vmax.f32 %v955_v62, 0.0 }
 0x159   :  { %1147 = vst.msk [vmem:[%s2602_s3 + $0x1e0] sm:$0xff] %vm1086_vm2, %v1018_v1  ;;  %1211 = vst.msk [vmem:[%s2602_s3 + $0x3e0] sm:$0xff] %vm1086_vm2, %v1082_v2  ;;  %v1019_v3 = vmax.f32 %v691_v4, 0.0  ;;  %v1083_v8 = vmax.f32 %v947_v5, 0.0 }
 0x15a   :  { %1150 = vst.msk [vmem:[%s2602_s3 + $0x1f8] sm:$0xff] %vm1086_vm2, %v1021_v6  ;;  %1214 = vst.msk [vmem:[%s2602_s3 + $0x3f8] sm:$0xff] %vm1086_vm2, %v1085_v7 }
 0x15b   :  { %1148 = vst.msk [vmem:[%s2602_s3 + $0x1e8] sm:$0xff] %vm1086_vm2, %v1019_v3  ;;  %1212 = vst.msk [vmem:[%s2602_s3 + $0x3e8] sm:$0xff] %vm1086_vm2, %v1083_v8 }

// kernel: swin_forward.42
= control target key start
LH: loop header
LB: loop body
LE: loop exit
PB: predicated region body
PF: predicated region fallthrough
CT: control target
= control target key end

     0   :  { %vm58_vm0 = vcmask 523264   ;;  %vm180_vm1 = vcmask 261120   ;;  %s421_s1 = inlined_call_operand.vmem [shape: f32[64,32], index: 1, kind: input, shape index: {}]   ;;  %s422_s0 = inlined_call_operand.vmem [shape: f32[128,64], index: 0, kind: input, shape index: {}]   ;;  %s423_s2 = inlined_call_operand.vmem [shape: f32[1,32], index: 2, kind: input, shape index: {}]   ;;  %s424_s3 = inlined_call_operand.vmem [shape: f32[128,32], index: 3, kind: output, shape index: {}]  }
   0x1   :  { %v39_v0 = vld [vmem:[%s421_s1] sm:$0xff]  ;;  %v40_v1 = vld [vmem:[%s421_s1 + $0x8] sm:$0xff]  ;;  %v41_v2 = vld [vmem:[%s421_s1 + $0x10] sm:$0xff] }
   0x2   :  { %v47_v3 = vpack.c.bf16 %v40_v1, %v39_v0  ;;  %v42_v4 = vld [vmem:[%s421_s1 + $0x18] sm:$0xff]  ;;  %v43_v6 = vld [vmem:[%s421_s1 + $0x20] sm:$0xff]  ;;  %v44_v7 = vld [vmem:[%s421_s1 + $0x28] sm:$0xff] }
   0x3   :  { %v48_v5 = vpack.c.bf16 %v42_v4, %v41_v2  ;;  %v15_v8 = vld [vmem:[%s422_s0] sm:$0xff]  ;;  %v16_v9 = vld [vmem:[%s422_s0 + $0x8] sm:$0xff]  ;;  %v49_v14 = vpack.c.bf16 %v44_v7, %v43_v6  ;;  %v45_v15 = vld [vmem:[%s421_s1 + $0x30] sm:$0xff] }
   0x4   :  { %222 = vmatprep.subr.bf16.mxu0 %v47_v3  ;;  %246 = vmatprep.subr.bf16.mxu1 %v47_v3  ;;  %v23_v10 = vld [vmem:[%s422_s0 + $0x40] sm:$0xff]  ;;  %v24_v11 = vld [vmem:[%s422_s0 + $0x48] sm:$0xff]  ;;  %v31_v12 = vpack.c.bf16 %v16_v9, %v15_v8  ;;  %v46_v16 = vld [vmem:[%s421_s1 + $0x38] sm:$0xff] }
   0x5   :  { %223 = vmatpush3.bf16.msra.mxu0 %v47_v3  ;;  %250 = vmatpush3.bf16.msra.mxu1 %v47_v3  ;;  %v35_v13 = vpack.c.bf16 %v24_v11, %v23_v10  ;;  %v50_v17 = vpack.c.bf16 %v46_v16, %v45_v15  ;;  %v17_v18 = vld [vmem:[%s422_s0 + $0x10] sm:$0xff]  ;;  %v18_v19 = vld [vmem:[%s422_s0 + $0x18] sm:$0xff]  ;;  %v19_v22 = vld [vmem:[%s422_s0 + $0x20] sm:$0xff] }
   0x6   :  { %224 = vmatprep.subr.bf16.mxu0 %v48_v5  ;;  %247 = vmatprep.subr.bf16.mxu1 %v48_v5  ;;  %v25_v20 = vld [vmem:[%s422_s0 + $0x50] sm:$0xff]  ;;  %v26_v21 = vld [vmem:[%s422_s0 + $0x58] sm:$0xff]  ;;  %v20_v23 = vld [vmem:[%s422_s0 + $0x28] sm:$0xff]  ;;  %v32_v26 = vpack.c.bf16 %v18_v19, %v17_v18 }
   0x7   :  { %230 = vmatprep.mubr.msk.bf16.mxu0 %vm58_vm0, %v31_v12  ;;  %238 = vmatprep.mubr.msk.bf16.mxu1 %vm58_vm0, %v35_v13  ;;  %v27_v24 = vld [vmem:[%s422_s0 + $0x60] sm:$0xff]  ;;  %v28_v25 = vld [vmem:[%s422_s0 + $0x68] sm:$0xff]  ;;  %v36_v27 = vpack.c.bf16 %v26_v21, %v25_v20  ;;  %v33_v28 = vpack.c.bf16 %v20_v23, %v19_v22  ;;  %v21_v30 = vld [vmem:[%s422_s0 + $0x30] sm:$0xff] }
   0x8   :  { %v37_v29 = vpack.c.bf16 %v28_v25, %v27_v24  ;;  %v22_v31 = vld [vmem:[%s422_s0 + $0x38] sm:$0xff]  ;;  %v29_v32 = vld [vmem:[%s422_s0 + $0x70] sm:$0xff]  ;;  %v201_v36 = vld [vmem:[%s423_s2] ss:$0 sm:$0xff] }
   0x9   :  { %225 = vmatpush3.bf16.msra.mxu0 %v48_v5  ;;  %251 = vmatpush3.bf16.msra.mxu1 %v48_v5  ;;  %v30_v33 = vld [vmem:[%s422_s0 + $0x78] sm:$0xff]  ;;  %v34_v34 = vpack.c.bf16 %v22_v31, %v21_v30 }
   0xa   :  { %226 = vmatprep.subr.bf16.mxu0 %v49_v14  ;;  %248 = vmatprep.subr.bf16.mxu1 %v49_v14  ;;  %v38_v35 = vpack.c.bf16 %v30_v33, %v29_v32 }
   0xd   :  { %227 = vmatpush3.bf16.msra.mxu0 %v49_v14  ;;  %252 = vmatpush3.bf16.msra.mxu1 %v49_v14 }
   0xe   :  { %228 = vmatprep.subr.bf16.mxu0 %v50_v17  ;;  %249 = vmatprep.subr.bf16.mxu1 %v50_v17 }
  0x11   :  { %229 = vmatpush3.bf16.msra.mxu0 %v50_v17  ;;  %253 = vmatpush3.bf16.msra.mxu1 %v50_v17 }
  0x14   :  { %231 = vmatmul.mubr.msk.bf16.vlgmr.msra.gmra.mrb[0].mxu0 %vm58_vm0, %v32_v26  ;;  %239 = vmatmul.mubr.msk.bf16.vlgmr.msra.gmra.mrb[0].mxu1 %vm58_vm0, %v36_v27 }
  0x15   :  { %234 = vmatprep.mubr.msk.bf16.mxu0 %vm58_vm0, %v33_v28  ;;  %242 = vmatprep.mubr.msk.bf16.mxu1 %vm58_vm0, %v37_v29 }
  0x1c   :  { %235 = vmatmul.mubr.msk.bf16.gmra.mrb[4].mxu0 %vm58_vm0, %v34_v34  ;;  %243 = vmatmul.mubr.msk.bf16.gmra.mrb[4].mxu1 %vm58_vm0, %v38_v35 }
  0xe7   :  { %v232_v37 = vpop.f32.mrb[0].mxu0  ;;  %v240_v38 = vpop.f32.mrb[0].mxu1 }
  0xe8   :  { %v126_v39 = vadd.f32 %v232_v37, %v201_v36  ;;  %v158_v40 = vadd.f32 %v240_v38, %v201_v36  ;;  %v117_v41 = vpop.f32.mrb[1].mxu0  ;;  %v149_v42 = vpop.f32.mrb[1].mxu1 }
  0xe9   :  { %v118_v43 = vadd.f32 %v201_v36, %v117_v41  ;;  %v150_v44 = vadd.f32 %v201_v36, %v149_v42  ;;  %v233_v45 = vpop.f32.mrb[2].mxu0  ;;  %v241_v46 = vpop.f32.mrb[2].mxu1 }
  0xea   :  { %183 = vst.msk [vmem:[%s424_s3 + $0x10] sm:$0xff] %vm180_vm1, %v126_v39  ;;  %191 = vst.msk [vmem:[%s424_s3 + $0x50] sm:$0xff] %vm180_vm1, %v158_v40  ;;  %v129_v47 = vadd.f32 %v233_v45, %v201_v36  ;;  %v161_v48 = vadd.f32 %v241_v46, %v201_v36  ;;  %v120_v49 = vpop.f32.mrb[3].mxu0  ;;  %v152_v50 = vpop.f32.mrb[3].mxu1 }
  0xeb   :  { %181 = vst.msk [vmem:[%s424_s3] sm:$0xff] %vm180_vm1, %v118_v43  ;;  %189 = vst.msk [vmem:[%s424_s3 + $0x40] sm:$0xff] %vm180_vm1, %v150_v44  ;;  %v121_v51 = vadd.f32 %v201_v36, %v120_v49  ;;  %v153_v52 = vadd.f32 %v201_v36, %v152_v50 }
  0xec   :  { %184 = vst.msk [vmem:[%s424_s3 + $0x18] sm:$0xff] %vm180_vm1, %v129_v47  ;;  %192 = vst.msk [vmem:[%s424_s3 + $0x58] sm:$0xff] %vm180_vm1, %v161_v48 }
  0xed   :  { %182 = vst.msk [vmem:[%s424_s3 + $0x8] sm:$0xff] %vm180_vm1, %v121_v51  ;;  %190 = vst.msk [vmem:[%s424_s3 + $0x48] sm:$0xff] %vm180_vm1, %v153_v52 }
  0xef   :  { %v236_v53 = vpop.f32.mrb[4].mxu0  ;;  %v244_v54 = vpop.f32.mrb[4].mxu1 }
  0xf0   :  { %v142_v55 = vadd.f32 %v236_v53, %v201_v36  ;;  %v174_v56 = vadd.f32 %v244_v54, %v201_v36  ;;  %v133_v57 = vpop.f32.mrb[5].mxu0  ;;  %v165_v58 = vpop.f32.mrb[5].mxu1 }
  0xf1   :  { %v134_v59 = vadd.f32 %v201_v36, %v133_v57  ;;  %v166_v60 = vadd.f32 %v201_v36, %v165_v58  ;;  %v237_v61 = vpop.f32.mrb[6].mxu0  ;;  %v245_v62 = vpop.f32.mrb[6].mxu1 }
  0xf2   :  { %187 = vst.msk [vmem:[%s424_s3 + $0x30] sm:$0xff] %vm180_vm1, %v142_v55  ;;  %195 = vst.msk [vmem:[%s424_s3 + $0x70] sm:$0xff] %vm180_vm1, %v174_v56  ;;  %v145_v63 = vadd.f32 %v237_v61, %v201_v36  ;;  %v177_v0 = vadd.f32 %v245_v62, %v201_v36  ;;  %v136_v1 = vpop.f32.mrb[7].mxu0  ;;  %v168_v2 = vpop.f32.mrb[7].mxu1 }
  0xf3   :  { %185 = vst.msk [vmem:[%s424_s3 + $0x20] sm:$0xff] %vm180_vm1, %v134_v59  ;;  %193 = vst.msk [vmem:[%s424_s3 + $0x60] sm:$0xff] %vm180_vm1, %v166_v60  ;;  %v137_v3 = vadd.f32 %v201_v36, %v136_v1  ;;  %v169_v4 = vadd.f32 %v201_v36, %v168_v2 }
  0xf4   :  { %188 = vst.msk [vmem:[%s424_s3 + $0x38] sm:$0xff] %vm180_vm1, %v145_v63  ;;  %196 = vst.msk [vmem:[%s424_s3 + $0x78] sm:$0xff] %vm180_vm1, %v177_v0 }
  0xf5   :  { %186 = vst.msk [vmem:[%s424_s3 + $0x28] sm:$0xff] %vm180_vm1, %v137_v3  ;;  %194 = vst.msk [vmem:[%s424_s3 + $0x68] sm:$0xff] %vm180_vm1, %v169_v4 }

// kernel: swin_forward.41
= control target key start
LH: loop header
LB: loop body
LE: loop exit
PB: predicated region body
PF: predicated region fallthrough
CT: control target
= control target key end

     0   :  { %vm37_vm0 = vcmask 261120   ;;  %vm579_vm1 = vcmask 523264   ;;  %s1163_s0 = inlined_call_operand.vmem [shape: f32[128,32], index: 0, kind: input, shape index: {}]   ;;  %s1164_s3 = inlined_call_operand.vmem [shape: f32[32,64], index: 3, kind: input, shape index: {}]   ;;  %s1165_s1 = inlined_call_operand.vmem [shape: f32[1,32], index: 1, kind: input, shape index: {}]   ;;  %s1166_s2 = inlined_call_operand.vmem [shape: f32[1,32], index: 2, kind: input, shape index: {}]   ;;  %s1167_s4 = inlined_call_operand.vmem [shape: f32[1,64], index: 4, kind: input, shape index: {}]   ;;  %s1168_s5 = inlined_call_operand.vmem [shape: f32[128,64], index: 5, kind: output, shape index: {}]  }
   0x1   :  { %v21_v0 = vld [vmem:[%s1163_s0] sm:$0xff]  ;;  %v22_v2 = vld [vmem:[%s1163_s0 + $0x8] sm:$0xff]  ;;  %v23_v8 = vld [vmem:[%s1163_s0 + $0x10] sm:$0xff] }
   0x2   :  { %v29_v1 = vld [vmem:[%s1163_s0 + $0x40] sm:$0xff]  ;;  %v38_v3 = vsel %vm37_vm0, %v21_v0, 0.0  ;;  %v30_v5 = vld [vmem:[%s1163_s0 + $0x48] sm:$0xff]  ;;  %v41_v6 = vsel %vm37_vm0, %v22_v2, 0.0  ;;  %v24_v9 = vld [vmem:[%s1163_s0 + $0x18] sm:$0xff]  ;;  %v44_v10 = vsel %vm37_vm0, %v23_v8, 0.0 }
   0x3   :  { %v62_v4 = vsel %vm37_vm0, %v29_v1, 0.0  ;;  %39 = vadd.xlane.f32.xlu0 %v38_v3  ;;  %v65_v7 = vsel %vm37_vm0, %v30_v5, 0.0  ;;  %v47_v11 = vsel %vm37_vm0, %v24_v9, 0.0  ;;  %v766_v12 = vld [vmem:[%s1163_s0 + $0x50] sm:$0xff]  ;;  %v771_v13 = vld [vmem:[%s1163_s0 + $0x58] sm:$0xff]  ;;  %v780_v16 = vld [vmem:[%s1163_s0 + $0x20] sm:$0xff] }
   0x4   :  { %63 = vadd.xlane.f32.xlu1 %v62_v4  ;;  %v68_v14 = vsel %vm37_vm0, %v766_v12, 0.0  ;;  %v71_v15 = vsel %vm37_vm0, %v771_v13, 0.0  ;;  %v785_v17 = vld [vmem:[%s1163_s0 + $0x28] sm:$0xff]  ;;  %v50_v18 = vsel %vm37_vm0, %v780_v16, 0.0  ;;  %v794_v20 = vld [vmem:[%s1163_s0 + $0x60] sm:$0xff]  ;;  %v808_v24 = vld [vmem:[%s1163_s0 + $0x30] sm:$0xff] }
   0x5   :  { %v53_v19 = vsel %vm37_vm0, %v785_v17, 0.0  ;;  %v799_v21 = vld [vmem:[%s1163_s0 + $0x68] sm:$0xff]  ;;  %v74_v22 = vsel %vm37_vm0, %v794_v20, 0.0  ;;  %v813_v25 = vld [vmem:[%s1163_s0 + $0x38] sm:$0xff]  ;;  %v56_v26 = vsel %vm37_vm0, %v808_v24, 0.0  ;;  %v822_v28 = vld [vmem:[%s1163_s0 + $0x70] sm:$0xff] }
   0x6   :  { %v77_v23 = vsel %vm37_vm0, %v799_v21, 0.0  ;;  %v59_v27 = vsel %vm37_vm0, %v813_v25, 0.0  ;;  %v827_v29 = vld [vmem:[%s1163_s0 + $0x78] sm:$0xff]  ;;  %v80_v30 = vsel %vm37_vm0, %v822_v28, 0.0 }
   0x7   :  { %42 = vadd.xlane.f32.xlu0 %v41_v6  ;;  %v83_v31 = vsel %vm37_vm0, %v827_v29, 0.0 }
   0x8   :  { %66 = vadd.xlane.f32.xlu1 %v65_v7 }
   0xb   :  { %45 = vadd.xlane.f32.xlu0 %v44_v10 }
   0xc   :  { %48 = vadd.xlane.f32.xlu1 %v47_v11 }
   0xf   :  { %69 = vadd.xlane.f32.xlu0 %v68_v14 }
  0x10   :  { %72 = vadd.xlane.f32.xlu1 %v71_v15 }
  0x13   :  { %51 = vadd.xlane.f32.xlu0 %v50_v18 }
  0x14   :  { %54 = vadd.xlane.f32.xlu1 %v53_v19 }
  0x17   :  { %75 = vadd.xlane.f32.xlu0 %v74_v22 }
  0x18   :  { %78 = vadd.xlane.f32.xlu1 %v77_v23 }
  0x1b   :  { %57 = vadd.xlane.f32.xlu0 %v56_v26 }
  0x1c   :  { %60 = vadd.xlane.f32.xlu1 %v59_v27 }
  0x1f   :  { %81 = vadd.xlane.f32.xlu0 %v80_v30 }
  0x20   :  { %84 = vadd.xlane.f32.xlu1 %v83_v31 }
  0x90   :  { %v40_v32 = vpop.xlane.xlu0 %39 }
  0x91   :  { %v64_v33 = vpop.xlane.xlu1 %63  ;;  %v87_v34 = vmul.f32 0.03125, %v40_v32 }
  0x92   :  { %v95_v35 = vmul.f32 0.03125, %v64_v33 }
  0x93   :  { %v833_v36 = vsub.f32 %v21_v0, %v87_v34 }
  0x94   :  { %v835_v37 = vsub.f32 %v29_v1, %v95_v35  ;;  %v43_v38 = vpop.xlane.xlu0 %42 }
  0x95   :  { %v67_v39 = vpop.xlane.xlu1 %66  ;;  %v88_v40 = vmul.f32 0.03125, %v43_v38  ;;  %v119_v42 = vmul.f32 %v833_v36, %v833_v36 }
  0x96   :  { %v96_v41 = vmul.f32 0.03125, %v67_v39  ;;  %v127_v43 = vmul.f32 %v835_v37, %v835_v37 }
  0x97   :  { %v841_v44 = vsub.f32 %v22_v2, %v88_v40  ;;  %v135_v46 = vsel %vm37_vm0, %v119_v42, 0.0 }
  0x98   :  { %v843_v45 = vsub.f32 %v30_v5, %v96_v41  ;;  %136 = vadd.xlane.f32.xlu0 %v135_v46  ;;  %v46_v47 = vpop.xlane.xlu0 %45  ;;  %v159_v49 = vsel %vm37_vm0, %v127_v43, 0.0 }
  0x99   :  { %v49_v48 = vpop.xlane.xlu1 %48  ;;  %v89_v50 = vmul.f32 0.03125, %v46_v47  ;;  %v120_v52 = vmul.f32 %v841_v44, %v841_v44 }
  0x9a   :  { %v90_v51 = vmul.f32 0.03125, %v49_v48  ;;  %v128_v53 = vmul.f32 %v843_v45, %v843_v45 }
  0x9b   :  { %v851_v54 = vsub.f32 %v23_v8, %v89_v50  ;;  %v138_v56 = vsel %vm37_vm0, %v120_v52, 0.0 }
  0x9c   :  { %v853_v55 = vsub.f32 %v24_v9, %v90_v51  ;;  %160 = vadd.xlane.f32.xlu0 %v159_v49  ;;  %139 = vadd.xlane.f32.xlu1 %v138_v56  ;;  %v70_v57 = vpop.xlane.xlu0 %69  ;;  %v162_v59 = vsel %vm37_vm0, %v128_v53, 0.0  ;;  %v302_v53 = vld [vmem:[%s1164_s3 + $0x8] sm:$0xff] }
  0x9d   :  { %v73_v58 = vpop.xlane.xlu1 %72  ;;  %v97_v60 = vmul.f32 0.03125, %v70_v57  ;;  %v121_v62 = vmul.f32 %v851_v54, %v851_v54  ;;  %v303_v57 = vld [vmem:[%s1164_s3 + $0x10] sm:$0xff] }
  0x9e   :  { %v98_v61 = vmul.f32 0.03125, %v73_v58  ;;  %v122_v63 = vmul.f32 %v853_v55, %v853_v55  ;;  %v304_v58 = vld [vmem:[%s1164_s3 + $0x18] sm:$0xff] }
  0x9f   :  { %v862_v0 = vsub.f32 %v766_v12, %v97_v60  ;;  %v141_v2 = vsel %vm37_vm0, %v121_v62, 0.0 }
  0xa0   :  { %v865_v1 = vsub.f32 %v771_v13, %v98_v61  ;;  %163 = vadd.xlane.f32.xlu1 %v162_v59  ;;  %142 = vadd.xlane.f32.xlu0 %v141_v2  ;;  %v52_v3 = vpop.xlane.xlu0 %51  ;;  %v144_v5 = vsel %vm37_vm0, %v122_v63, 0.0  ;;  %v306_v59 = vpack.c.bf16 %v304_v58, %v303_v57 }
  0xa1   :  { %v55_v4 = vpop.xlane.xlu1 %54  ;;  %v91_v6 = vmul.f32 0.03125, %v52_v3  ;;  %v129_v8 = vmul.f32 %v862_v0, %v862_v0 }
  0xa2   :  { %v92_v7 = vmul.f32 0.03125, %v55_v4  ;;  %v130_v9 = vmul.f32 %v865_v1, %v865_v1 }
  0xa3   :  { %v874_v10 = vsub.f32 %v780_v16, %v91_v6  ;;  %v165_v12 = vsel %vm37_vm0, %v129_v8, 0.0 }
  0xa4   :  { %v877_v11 = vsub.f32 %v785_v17, %v92_v7  ;;  %145 = vadd.xlane.f32.xlu1 %v144_v5  ;;  %166 = vadd.xlane.f32.xlu0 %v165_v12  ;;  %v76_v13 = vpop.xlane.xlu0 %75  ;;  %v168_v15 = vsel %vm37_vm0, %v130_v9, 0.0 }
  0xa5   :  { %v79_v14 = vpop.xlane.xlu1 %78  ;;  %v99_v18 = vmul.f32 0.03125, %v76_v13  ;;  %v123_v22 = vmul.f32 %v874_v10, %v874_v10 }
  0xa6   :  { %v100_v19 = vmul.f32 0.03125, %v79_v14  ;;  %v124_v16 = vmul.f32 %v877_v11, %v877_v11 }
  0xa7   :  { %v886_v23 = vsub.f32 %v794_v20, %v99_v18  ;;  %v147_v26 = vsel %vm37_vm0, %v123_v22, 0.0 }
  0xa8   :  { %v889_v17 = vsub.f32 %v799_v21, %v100_v19  ;;  %169 = vadd.xlane.f32.xlu1 %v168_v15  ;;  %148 = vadd.xlane.f32.xlu0 %v147_v26  ;;  %v58_v27 = vpop.xlane.xlu0 %57  ;;  %v150_v31 = vsel %vm37_vm0, %v124_v16, 0.0 }
  0xa9   :  { %v61_v30 = vpop.xlane.xlu1 %60  ;;  %v93_v32 = vmul.f32 0.03125, %v58_v27  ;;  %v131_v34 = vmul.f32 %v886_v23, %v886_v23 }
  0xaa   :  { %v94_v33 = vmul.f32 0.03125, %v61_v30  ;;  %v132_v20 = vmul.f32 %v889_v17, %v889_v17 }
  0xab   :  { %v898_v35 = vsub.f32 %v808_v24, %v93_v32  ;;  %v171_v38 = vsel %vm37_vm0, %v131_v34, 0.0 }
  0xac   :  { %v901_v21 = vsub.f32 %v813_v25, %v94_v33  ;;  %151 = vadd.xlane.f32.xlu1 %v150_v31  ;;  %172 = vadd.xlane.f32.xlu0 %v171_v38  ;;  %v82_v39 = vpop.xlane.xlu0 %81  ;;  %v174_v41 = vsel %vm37_vm0, %v132_v20, 0.0  ;;  %v939_v20 = vld [vmem:[%s1165_s1] ss:$0 sm:$0xff] }
  0xad   :  { %v85_v40 = vpop.xlane.xlu1 %84  ;;  %v101_v42 = vmul.f32 0.03125, %v82_v39  ;;  %v125_v46 = vmul.f32 %v898_v35, %v898_v35 }
  0xae   :  { %v102_v43 = vmul.f32 0.03125, %v85_v40  ;;  %v126_v24 = vmul.f32 %v901_v21, %v901_v21 }
  0xaf   :  { %v910_v47 = vsub.f32 %v822_v28, %v101_v42  ;;  %v153_v48 = vsel %vm37_vm0, %v125_v46, 0.0 }
  0xb0   :  { %v913_v25 = vsub.f32 %v827_v29, %v102_v43  ;;  %175 = vadd.xlane.f32.xlu1 %v174_v41  ;;  %154 = vadd.xlane.f32.xlu0 %v153_v48  ;;  %v156_v49 = vsel %vm37_vm0, %v126_v24, 0.0  ;;  %v301_v29 = vld [vmem:[%s1164_s3] sm:$0xff] }
  0xb1   :  { %v133_v50 = vmul.f32 %v910_v47, %v910_v47  ;;  %v305_v56 = vpack.c.bf16 %v302_v53, %v301_v29 }
  0xb2   :  { %v134_v51 = vmul.f32 %v913_v25, %v913_v25 }
  0xb3   :  { %v177_v52 = vsel %vm37_vm0, %v133_v50, 0.0  ;;  %621 = vmatprep.subr.bf16.mxu0 %v305_v56  ;;  %641 = vmatprep.subr.bf16.mxu1 %v305_v56 }
  0xb4   :  { %157 = vadd.xlane.f32.xlu1 %v156_v49  ;;  %178 = vadd.xlane.f32.xlu0 %v177_v52  ;;  %v180_v28 = vsel %vm37_vm0, %v134_v51, 0.0  ;;  %v946_v49 = vld [vmem:[%s1166_s2] ss:$0 sm:$0xff] }
  0xb5   :  { %622 = vmatpush3.bf16.msra.mxu0 %v305_v56  ;;  %643 = vmatpush3.bf16.msra.mxu1 %v305_v56 }
  0xb6   :  { %623 = vmatprep.subr.bf16.mxu0 %v306_v59  ;;  %642 = vmatprep.subr.bf16.mxu1 %v306_v59 }
  0xb8   :  { %181 = vadd.xlane.f32.xlu1 %v180_v28 }
  0xb9   :  { %624 = vmatpush3.bf16.msra.mxu0 %v306_v59  ;;  %644 = vmatpush3.bf16.msra.mxu1 %v306_v59 }
 0x125   :  { %v137_v60 = vpop.xlane.xlu0 %136 }
 0x126   :  { %v183_v61 = vmul.f32 0.03125, %v137_v60 }
 0x128   :  { %v199_v62 = vadd.f32 1e-05, %v183_v61 }
 0x129   :  { %v140_v63 = vpop.xlane.xlu1 %139  ;;  %v161_v2 = vpop.xlane.xlu0 %160 }
 0x12a   :  { %645 = vrsqrt.f32 %v199_v62  ;;  %v184_v3 = vmul.f32 0.03125, %v140_v63  ;;  %v191_v4 = vmul.f32 0.03125, %v161_v2 }
 0x12c   :  { %v200_v5 = vadd.f32 1e-05, %v184_v3  ;;  %v207_v6 = vadd.f32 1e-05, %v191_v4 }
 0x12d   :  { %v164_v7 = vpop.xlane.xlu1 %163  ;;  %v143_v8 = vpop.xlane.xlu0 %142 }
 0x12e   :  { %647 = vrsqrt.f32 %v200_v5  ;;  %v192_v9 = vmul.f32 0.03125, %v164_v7  ;;  %v185_v12 = vmul.f32 0.03125, %v143_v8 }
 0x12f   :  { %649 = vrsqrt.f32 %v207_v6 }
 0x130   :  { %v208_v13 = vadd.f32 1e-05, %v192_v9  ;;  %v201_v14 = vadd.f32 1e-05, %v185_v12 }
 0x131   :  { %v146_v15 = vpop.xlane.xlu1 %145  ;;  %v167_v18 = vpop.xlane.xlu0 %166 }
 0x132   :  { %651 = vrsqrt.f32 %v208_v13  ;;  %v186_v19 = vmul.f32 0.03125, %v146_v15  ;;  %v193_v22 = vmul.f32 0.03125, %v167_v18 }
 0x133   :  { %653 = vrsqrt.f32 %v201_v14 }
 0x134   :  { %v646_v16 = vpop.eup %645  ;;  %v202_v26 = vadd.f32 1e-05, %v186_v19  ;;  %v209_v27 = vadd.f32 1e-05, %v193_v22 }
 0x135   :  { %v170_v30 = vpop.xlane.xlu1 %169  ;;  %v149_v31 = vpop.xlane.xlu0 %148  ;;  %v231_v32 = vmul.f32 %v646_v16, %v833_v36 }
 0x136   :  { %655 = vrsqrt.f32 %v202_v26  ;;  %v194_v33 = vmul.f32 0.03125, %v170_v30  ;;  %v187_v34 = vmul.f32 0.03125, %v149_v31 }
 0x137   :  { %657 = vrsqrt.f32 %v209_v27  ;;  %v254_v24 = vmul.f32 %v939_v20, %v231_v32 }
 0x138   :  { %v648_v38 = vpop.eup %647  ;;  %v210_v39 = vadd.f32 1e-05, %v194_v33  ;;  %v203_v40 = vadd.f32 1e-05, %v187_v34 }
 0x139   :  { %v650_v41 = vpop.eup %649  ;;  %v152_v42 = vpop.xlane.xlu1 %151  ;;  %v232_v46 = vmul.f32 %v648_v38, %v841_v44  ;;  %v277_v57 = vadd.f32 %v946_v49, %v254_v24 }
 0x13a   :  { %v173_v43 = vpop.xlane.xlu0 %172  ;;  %659 = vrsqrt.f32 %v210_v39  ;;  %v188_v36 = vmul.f32 0.03125, %v152_v42  ;;  %v239_v50 = vmul.f32 %v650_v41, %v835_v37 }
 0x13b   :  { %v195_v48 = vmul.f32 0.03125, %v173_v43  ;;  %661 = vrsqrt.f32 %v203_v40  ;;  %v255_v51 = vmul.f32 %v939_v20, %v232_v46 }
 0x13c   :  { %v652_v52 = vpop.eup %651  ;;  %v204_v28 = vadd.f32 1e-05, %v188_v36  ;;  %v262_v60 = vmul.f32 %v939_v20, %v239_v50 }
 0x13d   :  { %v211_v29 = vadd.f32 1e-05, %v195_v48  ;;  %v654_v53 = vpop.eup %653  ;;  %v176_v44 = vpop.xlane.xlu1 %175  ;;  %v278_v58 = vadd.f32 %v946_v49, %v255_v51  ;;  %v240_v59 = vmul.f32 %v652_v52, %v843_v45 }
 0x13e   :  { %v155_v56 = vpop.xlane.xlu0 %154  ;;  %v233_v61 = vmul.f32 %v654_v53, %v851_v54  ;;  %663 = vrsqrt.f32 %v204_v28  ;;  %v196_v37 = vmul.f32 0.03125, %v176_v44  ;;  %v285_v9 = vadd.f32 %v946_v49, %v262_v60 }
 0x13f   :  { %v189_v62 = vmul.f32 0.03125, %v155_v56  ;;  %665 = vrsqrt.f32 %v211_v29  ;;  %v293_v63 = vpack.c.bf16 %v278_v58, %v277_v57  ;;  %v263_v2 = vmul.f32 %v939_v20, %v240_v59 }
 0x140   :  { %v656_v3 = vpop.eup %655  ;;  %v212_v4 = vadd.f32 1e-05, %v196_v37  ;;  %v256_v12 = vmul.f32 %v939_v20, %v233_v61 }
 0x141   :  { %v205_v5 = vadd.f32 1e-05, %v189_v62  ;;  %v658_v6 = vpop.eup %657  ;;  %v234_v7 = vmul.f32 %v656_v3, %v853_v55  ;;  %v158_v8 = vpop.xlane.xlu1 %157  ;;  %625 = vmatprep.mubr.msk.bf16.mxu0 %vm37_vm0, %v293_v63  ;;  %v286_v54 = vadd.f32 %v946_v49, %v263_v2 }
 0x142   :  { %v179_v45 = vpop.xlane.xlu0 %178  ;;  %v241_v13 = vmul.f32 %v658_v6, %v862_v0  ;;  %667 = vrsqrt.f32 %v212_v4  ;;  %v190_v14 = vmul.f32 0.03125, %v158_v8  ;;  %v279_v31 = vadd.f32 %v946_v49, %v256_v12 }
 0x143   :  { %v197_v15 = vmul.f32 0.03125, %v179_v45  ;;  %669 = vrsqrt.f32 %v205_v5  ;;  %v297_v18 = vpack.c.bf16 %v286_v54, %v285_v9  ;;  %v257_v19 = vmul.f32 %v939_v20, %v234_v7 }
 0x144   :  { %v660_v55 = vpop.eup %659  ;;  %v206_v22 = vadd.f32 1e-05, %v190_v14  ;;  %v264_v32 = vmul.f32 %v939_v20, %v241_v13 }
 0x145   :  { %v213_v16 = vadd.f32 1e-05, %v197_v15  ;;  %v662_v26 = vpop.eup %661  ;;  %v242_v27 = vmul.f32 %v660_v55, %v865_v1  ;;  %v182_v30 = vpop.xlane.xlu1 %181  ;;  %633 = vmatprep.mubr.msk.bf16.mxu1 %vm37_vm0, %v297_v18  ;;  %v280_v0 = vadd.f32 %v946_v49, %v257_v19 }
 0x146   :  { %v235_v33 = vmul.f32 %v662_v26, %v874_v10  ;;  %671 = vrsqrt.f32 %v206_v22  ;;  %v198_v34 = vmul.f32 0.03125, %v182_v30  ;;  %v287_v43 = vadd.f32 %v946_v49, %v264_v32 }
 0x147   :  { %673 = vrsqrt.f32 %v213_v16  ;;  %v294_v38 = vpack.c.bf16 %v280_v0, %v279_v31  ;;  %v265_v39 = vmul.f32 %v939_v20, %v242_v27 }
 0x148   :  { %v664_v40 = vpop.eup %663  ;;  %v214_v41 = vadd.f32 1e-05, %v198_v34  ;;  %v258_v24 = vmul.f32 %v939_v20, %v235_v33 }
 0x149   :  { %v666_v1 = vpop.eup %665  ;;  %v236_v42 = vmul.f32 %v664_v40, %v877_v11  ;;  %626 = vmatmul.mubr.msk.bf16.vlgmr.msra.gmra.mrb[0].mxu0 %vm37_vm0, %v294_v38  ;;  %v288_v46 = vadd.f32 %v946_v49, %v265_v39 }
 0x14a   :  { %v243_v10 = vmul.f32 %v666_v1, %v886_v23  ;;  %675 = vrsqrt.f32 %v214_v41  ;;  %v281_v11 = vadd.f32 %v946_v49, %v258_v24 }
 0x14b   :  { %v298_v36 = vpack.c.bf16 %v288_v46, %v287_v43  ;;  %v259_v48 = vmul.f32 %v939_v20, %v236_v42 }
 0x14c   :  { %v668_v50 = vpop.eup %667  ;;  %v266_v29 = vmul.f32 %v939_v20, %v243_v10 }
 0x14d   :  { %v670_v51 = vpop.eup %669  ;;  %v244_v52 = vmul.f32 %v668_v50, %v889_v17  ;;  %634 = vmatmul.mubr.msk.bf16.vlgmr.msra.gmra.mrb[0].mxu1 %vm37_vm0, %v298_v36  ;;  %v282_v28 = vadd.f32 %v946_v49, %v259_v48 }
 0x14e   :  { %v237_v53 = vmul.f32 %v670_v51, %v898_v35  ;;  %v289_v17 = vadd.f32 %v946_v49, %v266_v29 }
 0x14f   :  { %v295_v44 = vpack.c.bf16 %v282_v28, %v281_v11  ;;  %v267_v23 = vmul.f32 %v939_v20, %v244_v52 }
 0x150   :  { %v672_v56 = vpop.eup %671  ;;  %v260_v60 = vmul.f32 %v939_v20, %v237_v53 }
 0x151   :  { %v674_v57 = vpop.eup %673  ;;  %v238_v58 = vmul.f32 %v672_v56, %v901_v21  ;;  %629 = vmatprep.mubr.msk.bf16.mxu0 %vm37_vm0, %v295_v44  ;;  %v290_v59 = vadd.f32 %v946_v49, %v267_v23 }
 0x152   :  { %v245_v61 = vmul.f32 %v674_v57, %v910_v47  ;;  %v283_v21 = vadd.f32 %v946_v49, %v260_v60 }
 0x153   :  { %v299_v37 = vpack.c.bf16 %v290_v59, %v289_v17  ;;  %v261_v35 = vmul.f32 %v939_v20, %v238_v58 }
 0x154   :  { %v676_v62 = vpop.eup %675  ;;  %v268_v3 = vmul.f32 %v939_v20, %v245_v61 }
 0x155   :  { %v246_v63 = vmul.f32 %v676_v62, %v913_v25  ;;  %637 = vmatprep.mubr.msk.bf16.mxu1 %vm37_vm0, %v299_v37  ;;  %v284_v2 = vadd.f32 %v946_v49, %v261_v35  ;;  %v1004_v25 = vld [vmem:[%s1167_s4] ss:$0 sm:$0xff] }
 0x156   :  { %v291_v47 = vadd.f32 %v946_v49, %v268_v3 }
 0x157   :  { %v296_v4 = vpack.c.bf16 %v284_v2, %v283_v21  ;;  %v269_v5 = vmul.f32 %v939_v20, %v246_v63 }
 0x159   :  { %630 = vmatmul.mubr.msk.bf16.gmra.mrb[4].mxu0 %vm37_vm0, %v296_v4  ;;  %v292_v6 = vadd.f32 %v946_v49, %v269_v5 }
 0x15b   :  { %v300_v7 = vpack.c.bf16 %v292_v6, %v291_v47 }
 0x15d   :  { %638 = vmatmul.mubr.msk.bf16.gmra.mrb[4].mxu1 %vm37_vm0, %v300_v7 }
 0x21c   :  { %v627_v8 = vpop.f32.mrb[0].mxu0 }
 0x21d   :  { %v381_v45 = vadd.f32 %v627_v8, %v1004_v25  ;;  %v372_v9 = vpop.f32.mrb[1].mxu0 }
 0x21e   :  { %v373_v20 = vadd.f32 %v1004_v25, %v372_v9  ;;  %v628_v54 = vpop.f32.mrb[2].mxu0 }
 0x21f   :  { %v453_v12 = vmul.f32 0.044715, %v381_v45  ;;  %v384_v13 = vadd.f32 %v628_v54, %v1004_v25  ;;  %v375_v14 = vpop.f32.mrb[3].mxu0  ;;  %v437_v37 = vmul.f32 0.5, %v381_v45 }
 0x220   :  { %v451_v49 = vmul.f32 0.044715, %v373_v20  ;;  %v376_v15 = vadd.f32 %v1004_v25, %v375_v14  ;;  %v635_v18 = vpop.f32.mrb[0].mxu1  ;;  %v435_v21 = vmul.f32 0.5, %v373_v20 }
 0x221   :  { %v469_v19 = vmul.f32 %v453_v12, %v381_v45  ;;  %v454_v55 = vmul.f32 0.044715, %v384_v13  ;;  %v413_v22 = vadd.f32 %v635_v18, %v1004_v25  ;;  %v404_v16 = vpop.f32.mrb[1].mxu1  ;;  %v438_v5 = vmul.f32 0.5, %v384_v13 }
 0x222   :  { %v467_v26 = vmul.f32 %v451_v49, %v373_v20  ;;  %v452_v27 = vmul.f32 0.044715, %v376_v15  ;;  %v1012_v30 = vadd.f32 %v1004_v25, %v404_v16  ;;  %v636_v31 = vpop.f32.mrb[2].mxu1 }
 0x223   :  { %v485_v0 = vmul.f32 %v469_v19, %v381_v45  ;;  %v470_v32 = vmul.f32 %v454_v55, %v384_v13  ;;  %v461_v33 = vmul.f32 0.044715, %v413_v22  ;;  %v407_v34 = vpop.f32.mrb[3].mxu1  ;;  %v1016_v43 = vadd.f32 %v636_v31, %v1004_v25 }
 0x224   :  { %v483_v38 = vmul.f32 %v467_v26, %v373_v20  ;;  %v468_v39 = vmul.f32 %v452_v27, %v376_v15  ;;  %v459_v40 = vmul.f32 0.044715, %v1012_v30  ;;  %v1020_v51 = vadd.f32 %v1004_v25, %v407_v34 }
 0x225   :  { %v501_v41 = vadd.f32 %v485_v0, %v381_v45  ;;  %v486_v1 = vmul.f32 %v470_v32, %v384_v13  ;;  %v477_v42 = vmul.f32 %v461_v33, %v413_v22  ;;  %v462_v29 = vmul.f32 0.044715, %v1016_v43 }
 0x226   :  { %v499_v46 = vadd.f32 %v483_v38, %v373_v20  ;;  %v484_v24 = vmul.f32 %v468_v39, %v376_v15  ;;  %v475_v10 = vmul.f32 %v459_v40, %v1012_v30  ;;  %v460_v17 = vmul.f32 0.044715, %v1020_v51 }
 0x227   :  { %v517_v36 = vmul.f32 0.7978846, %v501_v41  ;;  %v502_v48 = vadd.f32 %v486_v1, %v384_v13  ;;  %v493_v50 = vmul.f32 %v477_v42, %v413_v22  ;;  %v478_v57 = vmul.f32 %v462_v29, %v1016_v43 }
 0x228   :  { %v515_v52 = vmul.f32 0.7978846, %v499_v46  ;;  %v500_v11 = vadd.f32 %v484_v24, %v376_v15  ;;  %v491_v28 = vmul.f32 %v475_v10, %v1012_v30  ;;  %v476_v35 = vmul.f32 %v460_v17, %v1020_v51 }
 0x229   :  { %677 = vtanh.f32 %v517_v36  ;;  %v518_v53 = vmul.f32 0.7978846, %v502_v48  ;;  %v509_v44 = vadd.f32 %v493_v50, %v413_v22  ;;  %v494_v60 = vmul.f32 %v478_v57, %v1016_v43 }
 0x22a   :  { %679 = vtanh.f32 %v515_v52  ;;  %v516_v23 = vmul.f32 0.7978846, %v500_v11  ;;  %v507_v56 = vadd.f32 %v491_v28, %v1012_v30  ;;  %v492_v47 = vmul.f32 %v476_v35, %v1020_v51 }
 0x22b   :  { %681 = vtanh.f32 %v518_v53  ;;  %v525_v58 = vmul.f32 0.7978846, %v509_v44  ;;  %v510_v2 = vadd.f32 %v494_v60, %v1016_v43  ;;  %v436_v45 = vmul.f32 0.5, %v376_v15 }
 0x22c   :  { %683 = vtanh.f32 %v516_v23  ;;  %v523_v59 = vmul.f32 0.7978846, %v507_v56  ;;  %v631_v61 = vpop.f32.mrb[4].mxu0  ;;  %v445_v14 = vmul.f32 0.5, %v413_v22  ;;  %v508_v49 = vadd.f32 %v492_v47, %v1020_v51 }
 0x22d   :  { %685 = vtanh.f32 %v525_v58  ;;  %v1030_v62 = vadd.f32 %v631_v61, %v1004_v25  ;;  %v388_v63 = vpop.f32.mrb[5].mxu0  ;;  %v526_v9 = vmul.f32 0.7978846, %v510_v2  ;;  %v443_v55 = vmul.f32 0.5, %v1012_v30 }
 0x22e   :  { %687 = vtanh.f32 %v523_v59  ;;  %v1034_v3 = vadd.f32 %v1004_v25, %v388_v63  ;;  %v632_v4 = vpop.f32.mrb[6].mxu0  ;;  %v524_v31 = vmul.f32 0.7978846, %v508_v49  ;;  %v446_v47 = vmul.f32 0.5, %v1016_v43 }
 0x22f   :  { %v457_v6 = vmul.f32 0.044715, %v1030_v62  ;;  %v1039_v7 = vadd.f32 %v632_v4, %v1004_v25  ;;  %v391_v8 = vpop.f32.mrb[7].mxu0  ;;  %689 = vtanh.f32 %v526_v9  ;;  %v444_v49 = vmul.f32 0.5, %v1020_v51 }
 0x230   :  { %v455_v20 = vmul.f32 0.044715, %v1034_v3  ;;  %v1043_v54 = vadd.f32 %v1004_v25, %v391_v8  ;;  %v639_v12 = vpop.f32.mrb[4].mxu1  ;;  %691 = vtanh.f32 %v524_v31 }
 0x231   :  { %v473_v13 = vmul.f32 %v457_v6, %v1030_v62  ;;  %v458_v18 = vmul.f32 0.044715, %v1039_v7  ;;  %v420_v19 = vpop.f32.mrb[5].mxu1  ;;  %v1054_v32 = vadd.f32 %v639_v12, %v1004_v25 }
 0x232   :  { %v471_v15 = vmul.f32 %v455_v20, %v1034_v3  ;;  %v456_v16 = vmul.f32 0.044715, %v1043_v54  ;;  %v640_v26 = vpop.f32.mrb[6].mxu1  ;;  %v1059_v40 = vadd.f32 %v1004_v25, %v420_v19 }
 0x233   :  { %v678_v27 = vpop.eup %677  ;;  %v489_v0 = vmul.f32 %v473_v13, %v1030_v62  ;;  %v474_v22 = vmul.f32 %v458_v18, %v1039_v7  ;;  %v423_v33 = vpop.f32.mrb[7].mxu1  ;;  %v465_v63 = vmul.f32 0.044715, %v1054_v32  ;;  %v1090_v4 = vadd.f32 %v640_v26, %v1004_v25 }
 0x234   :  { %v680_v34 = vpop.eup %679  ;;  %v549_v38 = vadd.f32 1.0, %v678_v27  ;;  %v487_v30 = vmul.f32 %v471_v15, %v1034_v3  ;;  %v472_v39 = vmul.f32 %v456_v16, %v1043_v54  ;;  %v463_v2 = vmul.f32 0.044715, %v1059_v40 }
 0x235   :  { %v682_v41 = vpop.eup %681  ;;  %v547_v1 = vadd.f32 1.0, %v680_v34  ;;  %v505_v42 = vadd.f32 %v489_v0, %v1030_v62  ;;  %v490_v46 = vmul.f32 %v474_v22, %v1039_v7  ;;  %v481_v8 = vmul.f32 %v465_v63, %v1054_v32 }
 0x236   :  { %v684_v24 = vpop.eup %683  ;;  %v565_v10 = vmul.f32 %v549_v38, %v437_v37  ;;  %v550_v36 = vadd.f32 1.0, %v682_v41  ;;  %v503_v48 = vadd.f32 %v487_v30, %v1034_v3  ;;  %v488_v50 = vmul.f32 %v472_v39, %v1043_v54 }
 0x237   :  { %v686_v52 = vpop.eup %685  ;;  %v563_v11 = vmul.f32 %v547_v1, %v435_v21  ;;  %v548_v28 = vadd.f32 1.0, %v684_v24  ;;  %v521_v29 = vmul.f32 0.7978846, %v505_v42  ;;  %v506_v53 = vadd.f32 %v490_v46, %v1039_v7 }
 0x238   :  { %v688_v44 = vpop.eup %687  ;;  %582 = vst.msk [vmem:[%s1168_s5 + $0x10] sm:$0xff] %vm579_vm1, %v565_v10  ;;  %v566_v23 = vmul.f32 %v550_v36, %v438_v5  ;;  %v557_v56 = vadd.f32 1.0, %v686_v52  ;;  %v519_v57 = vmul.f32 0.7978846, %v503_v48  ;;  %v504_v58 = vadd.f32 %v488_v50, %v1043_v54 }
 0x239   :  { %580 = vst.msk [vmem:[%s1168_s5] sm:$0xff] %vm579_vm1, %v563_v11  ;;  %v564_v17 = vmul.f32 %v548_v28, %v436_v45  ;;  %v555_v59 = vadd.f32 1.0, %v688_v44  ;;  %693 = vtanh.f32 %v521_v29  ;;  %v522_v60 = vmul.f32 0.7978846, %v506_v53  ;;  %v690_v21 = vpop.eup %689 }
 0x23a   :  { %583 = vst.msk [vmem:[%s1168_s5 + $0x18] sm:$0xff] %vm579_vm1, %v566_v23  ;;  %v573_v61 = vmul.f32 %v557_v56, %v445_v14  ;;  %695 = vtanh.f32 %v519_v57  ;;  %v520_v37 = vmul.f32 0.7978846, %v504_v58  ;;  %v1093_v5 = vadd.f32 %v1004_v25, %v423_v33  ;;  %v692_v20 = vpop.eup %691 }
 0x23b   :  { %581 = vst.msk [vmem:[%s1168_s5 + $0x8] sm:$0xff] %vm579_vm1, %v564_v17  ;;  %v571_v35 = vmul.f32 %v555_v59, %v443_v55  ;;  %697 = vtanh.f32 %v522_v60  ;;  %v558_v6 = vadd.f32 1.0, %v690_v21  ;;  %v479_v45 = vmul.f32 %v463_v2, %v1059_v40 }
 0x23c   :  { %590 = vst.msk [vmem:[%s1168_s5 + $0x50] sm:$0xff] %vm579_vm1, %v573_v61  ;;  %699 = vtanh.f32 %v520_v37  ;;  %v466_v9 = vmul.f32 0.044715, %v1090_v4  ;;  %v497_v14 = vmul.f32 %v481_v8, %v1054_v32  ;;  %v464_v25 = vmul.f32 0.044715, %v1093_v5 }
 0x23d   :  { %588 = vst.msk [vmem:[%s1168_s5 + $0x40] sm:$0xff] %vm579_vm1, %v571_v35  ;;  %v574_v12 = vmul.f32 %v558_v6, %v446_v47  ;;  %v556_v13 = vadd.f32 1.0, %v692_v20  ;;  %v495_v18 = vmul.f32 %v479_v45, %v1059_v40  ;;  %v441_v27 = vmul.f32 0.5, %v1030_v62 }
 0x23e   :  { %v482_v43 = vmul.f32 %v466_v9, %v1090_v4  ;;  %v513_v19 = vadd.f32 %v497_v14, %v1054_v32  ;;  %v480_v55 = vmul.f32 %v464_v25, %v1093_v5  ;;  %v439_v34 = vmul.f32 0.5, %v1034_v3 }
 0x23f   :  { %591 = vst.msk [vmem:[%s1168_s5 + $0x58] sm:$0xff] %vm579_vm1, %v574_v12  ;;  %v572_v15 = vmul.f32 %v556_v13, %v444_v49  ;;  %v511_v16 = vadd.f32 %v495_v18, %v1059_v40  ;;  %v442_v1 = vmul.f32 0.5, %v1039_v7  ;;  %v440_v48 = vmul.f32 0.5, %v1043_v54 }
 0x240   :  { %v498_v26 = vmul.f32 %v482_v43, %v1090_v4  ;;  %v529_v31 = vmul.f32 0.7978846, %v513_v19  ;;  %v496_v0 = vmul.f32 %v480_v55, %v1093_v5  ;;  %v449_v28 = vmul.f32 0.5, %v1054_v32 }
 0x241   :  { %589 = vst.msk [vmem:[%s1168_s5 + $0x48] sm:$0xff] %vm579_vm1, %v572_v15  ;;  %v527_v38 = vmul.f32 0.7978846, %v511_v16  ;;  %v447_v53 = vmul.f32 0.5, %v1059_v40  ;;  %v450_v17 = vmul.f32 0.5, %v1090_v4  ;;  %v448_v60 = vmul.f32 0.5, %v1093_v5 }
 0x242   :  { %v514_v30 = vadd.f32 %v498_v26, %v1090_v4  ;;  %701 = vtanh.f32 %v529_v31  ;;  %v512_v62 = vadd.f32 %v496_v0, %v1093_v5 }
 0x243   :  { %v694_v51 = vpop.eup %693  ;;  %703 = vtanh.f32 %v527_v38 }
 0x244   :  { %v696_v22 = vpop.eup %695  ;;  %v553_v33 = vadd.f32 1.0, %v694_v51  ;;  %v530_v10 = vmul.f32 0.7978846, %v514_v30  ;;  %v528_v3 = vmul.f32 0.7978846, %v512_v62 }
 0x245   :  { %v698_v39 = vpop.eup %697  ;;  %v551_v41 = vadd.f32 1.0, %v696_v22 }
 0x246   :  { %v700_v42 = vpop.eup %699  ;;  %v569_v46 = vmul.f32 %v553_v33, %v441_v27  ;;  %v554_v24 = vadd.f32 1.0, %v698_v39  ;;  %705 = vtanh.f32 %v530_v10 }
 0x247   :  { %v567_v36 = vmul.f32 %v551_v41, %v439_v34  ;;  %v552_v50 = vadd.f32 1.0, %v700_v42  ;;  %707 = vtanh.f32 %v528_v3 }
 0x248   :  { %586 = vst.msk [vmem:[%s1168_s5 + $0x30] sm:$0xff] %vm579_vm1, %v569_v46  ;;  %v570_v52 = vmul.f32 %v554_v24, %v442_v1 }
 0x249   :  { %584 = vst.msk [vmem:[%s1168_s5 + $0x20] sm:$0xff] %vm579_vm1, %v567_v36  ;;  %v568_v7 = vmul.f32 %v552_v50, %v440_v48 }
 0x24a   :  { %587 = vst.msk [vmem:[%s1168_s5 + $0x38] sm:$0xff] %vm579_vm1, %v570_v52 }
 0x24b   :  { %585 = vst.msk [vmem:[%s1168_s5 + $0x28] sm:$0xff] %vm579_vm1, %v568_v7 }
 0x24c   :  { %v702_v54 = vpop.eup %701 }
 0x24d   :  { %v704_v11 = vpop.eup %703  ;;  %v561_v29 = vadd.f32 1.0, %v702_v54 }
 0x24e   :  { %v559_v44 = vadd.f32 1.0, %v704_v11 }
 0x24f   :  { %v577_v56 = vmul.f32 %v561_v29, %v449_v28 }
 0x250   :  { %v706_v23 = vpop.eup %705  ;;  %v575_v58 = vmul.f32 %v559_v44, %v447_v53 }
 0x251   :  { %v708_v57 = vpop.eup %707  ;;  %v562_v59 = vadd.f32 1.0, %v706_v23  ;;  %594 = vst.msk [vmem:[%s1168_s5 + $0x70] sm:$0xff] %vm579_vm1, %v577_v56 }
 0x252   :  { %v560_v61 = vadd.f32 1.0, %v708_v57  ;;  %592 = vst.msk [vmem:[%s1168_s5 + $0x60] sm:$0xff] %vm579_vm1, %v575_v58 }
 0x253   :  { %v578_v32 = vmul.f32 %v562_v59, %v450_v17 }
 0x254   :  { %v576_v40 = vmul.f32 %v560_v61, %v448_v60 }
 0x255   :  { %595 = vst.msk [vmem:[%s1168_s5 + $0x78] sm:$0xff] %vm579_vm1, %v578_v32 }
 0x256   :  { %593 = vst.msk [vmem:[%s1168_s5 + $0x68] sm:$0xff] %vm579_vm1, %v576_v40 }

// kernel: swin_forward.50
= control target key start
LH: loop header
LB: loop body
LE: loop exit
PB: predicated region body
PF: predicated region fallthrough
CT: control target
= control target key end

     0   :  { %vm101_vm0 = vcmask 523264   ;;  %s236_s1 = inlined_call_operand.vmem [shape: f32[128,64], index: 1, kind: input, shape index: {}]   ;;  %s237_s0 = inlined_call_operand.vmem [shape: f32[32,128], index: 0, kind: input, shape index: {}]   ;;  %s238_s2 = inlined_call_operand.vmem [shape: f32[1,64], index: 2, kind: input, shape index: {}]   ;;  %s239_s3 = inlined_call_operand.vmem [shape: f32[32,64], index: 3, kind: output, shape index: {}]  }
   0x1   :  { %v21_v0 = vld [vmem:[%s236_s1] sm:$0xff]  ;;  %v22_v1 = vld [vmem:[%s236_s1 + $0x8] sm:$0xff]  ;;  %v23_v2 = vld [vmem:[%s236_s1 + $0x10] sm:$0xff] }
   0x2   :  { %v37_v3 = vpack.c.bf16 %v22_v1, %v21_v0  ;;  %v24_v4 = vld [vmem:[%s236_s1 + $0x18] sm:$0xff]  ;;  %v25_v6 = vld [vmem:[%s236_s1 + $0x20] sm:$0xff]  ;;  %v26_v7 = vld [vmem:[%s236_s1 + $0x28] sm:$0xff] }
   0x3   :  { %v38_v5 = vpack.c.bf16 %v24_v4, %v23_v2  ;;  %v39_v8 = vpack.c.bf16 %v26_v7, %v25_v6  ;;  %v15_v9 = vld [vmem:[%s237_s0] sm:$0xff]  ;;  %v16_v10 = vld [vmem:[%s237_s0 + $0x8] sm:$0xff]  ;;  %v27_v11 = vld [vmem:[%s236_s1 + $0x30] sm:$0xff] }
   0x4   :  { %121 = vmatprep.subr.bf16.mxu0 %v37_v3  ;;  %v28_v12 = vld [vmem:[%s236_s1 + $0x38] sm:$0xff]  ;;  %v19_v13 = vpack.c.bf16 %v16_v10, %v15_v9  ;;  %v29_v15 = vld [vmem:[%s236_s1 + $0x40] sm:$0xff]  ;;  %v30_v16 = vld [vmem:[%s236_s1 + $0x48] sm:$0xff] }
   0x5   :  { %122 = vmatpush3.bf16.msra.mxu0 %v37_v3  ;;  %v40_v14 = vpack.c.bf16 %v28_v12, %v27_v11  ;;  %v41_v17 = vpack.c.bf16 %v30_v16, %v29_v15  ;;  %v31_v18 = vld [vmem:[%s236_s1 + $0x50] sm:$0xff]  ;;  %v32_v19 = vld [vmem:[%s236_s1 + $0x58] sm:$0xff]  ;;  %v33_v21 = vld [vmem:[%s236_s1 + $0x60] sm:$0xff] }
   0x6   :  { %123 = vmatprep.subr.bf16.mxu0 %v38_v5  ;;  %137 = vmatprep.mubr.bf16.mxu0 %v19_v13  ;;  %v42_v20 = vpack.c.bf16 %v32_v19, %v31_v18  ;;  %v34_v22 = vld [vmem:[%s236_s1 + $0x68] sm:$0xff]  ;;  %v35_v24 = vld [vmem:[%s236_s1 + $0x70] sm:$0xff]  ;;  %v36_v25 = vld [vmem:[%s236_s1 + $0x78] sm:$0xff] }
   0x7   :  { %v43_v23 = vpack.c.bf16 %v34_v22, %v33_v21  ;;  %v44_v26 = vpack.c.bf16 %v36_v25, %v35_v24  ;;  %v17_v27 = vld [vmem:[%s237_s0 + $0x10] sm:$0xff]  ;;  %v18_v28 = vld [vmem:[%s237_s0 + $0x18] sm:$0xff]  ;;  %v110_v30 = vld [vmem:[%s238_s2] ss:$0 sm:$0xff] }
   0x8   :  { %v20_v29 = vpack.c.bf16 %v18_v28, %v17_v27 }
   0x9   :  { %124 = vmatpush3.bf16.msra.mxu0 %v38_v5 }
   0xa   :  { %125 = vmatprep.subr.bf16.mxu0 %v39_v8 }
   0xd   :  { %126 = vmatpush3.bf16.msra.mxu0 %v39_v8 }
   0xe   :  { %127 = vmatprep.subr.bf16.mxu0 %v40_v14 }
  0x11   :  { %128 = vmatpush3.bf16.msra.mxu0 %v40_v14 }
  0x12   :  { %129 = vmatprep.subr.bf16.mxu0 %v41_v17 }
  0x15   :  { %130 = vmatpush3.bf16.msra.mxu0 %v41_v17 }
  0x16   :  { %131 = vmatprep.subr.bf16.mxu0 %v42_v20 }
  0x19   :  { %132 = vmatpush3.bf16.msra.mxu0 %v42_v20 }
  0x1a   :  { %133 = vmatprep.subr.bf16.mxu0 %v43_v23 }
  0x1d   :  { %134 = vmatpush3.bf16.msra.mxu0 %v43_v23 }
  0x1e   :  { %135 = vmatprep.subr.bf16.mxu0 %v44_v26 }
  0x21   :  { %136 = vmatpush3.bf16.msra.mxu0 %v44_v26 }
  0x24   :  { %138 = vmatmul.mubr.bf16.vlgmr.msra.gmra.mrb[0].mxu0 %v20_v29 }
  0xf7   :  { %v139_v31 = vpop.f32.mrb[0].mxu0 }
  0xf8   :  { %v95_v32 = vadd.f32 %v139_v31, %v110_v30  ;;  %v86_v33 = vpop.f32.mrb[1].mxu0 }
  0xf9   :  { %v87_v34 = vadd.f32 %v110_v30, %v86_v33  ;;  %v140_v35 = vpop.f32.mrb[2].mxu0 }
  0xfa   :  { %104 = vst.msk [vmem:[%s239_s3 + $0x10] sm:$0xff] %vm101_vm0, %v95_v32  ;;  %v98_v36 = vadd.f32 %v140_v35, %v110_v30  ;;  %v89_v37 = vpop.f32.mrb[3].mxu0 }
  0xfb   :  { %102 = vst.msk [vmem:[%s239_s3] sm:$0xff] %vm101_vm0, %v87_v34  ;;  %v90_v38 = vadd.f32 %v110_v30, %v89_v37 }
  0xfc   :  { %105 = vst.msk [vmem:[%s239_s3 + $0x18] sm:$0xff] %vm101_vm0, %v98_v36 }
  0xfd   :  { %103 = vst.msk [vmem:[%s239_s3 + $0x8] sm:$0xff] %vm101_vm0, %v90_v38 }

// kernel: swin_forward.51
= control target key start
LH: loop header
LB: loop body
LE: loop exit
PB: predicated region body
PF: predicated region fallthrough
CT: control target
= control target key end

     0   :  { %vm18_vm0 = vcmask 523264   ;;  %s174_s0 = inlined_call_operand.vmem [shape: f32[32,64], index: 0, kind: input, shape index: {}]   ;;  %s175_s1 = inlined_call_operand.vmem [shape: f32[1,64], index: 1, kind: input, shape index: {}]   ;;  %s176_s2 = inlined_call_operand.vmem [shape: f32[1,64], index: 2, kind: input, shape index: {}]   ;;  %s177_s3 = inlined_call_operand.vmem [shape: f32[32,64], index: 3, kind: output, shape index: {}]  }
   0x1   :  { %v14_v0 = vld [vmem:[%s174_s0] sm:$0xff]  ;;  %v16_v1 = vld [vmem:[%s174_s0 + $0x10] sm:$0xff]  ;;  %v15_v2 = vld [vmem:[%s174_s0 + $0x8] sm:$0xff] }
   0x2   :  { %v19_v3 = vsel %vm18_vm0, %v14_v0, 0.0  ;;  %v25_v4 = vsel %vm18_vm0, %v16_v1, 0.0  ;;  %v17_v5 = vld [vmem:[%s174_s0 + $0x18] sm:$0xff]  ;;  %v22_v6 = vsel %vm18_vm0, %v15_v2, 0.0  ;;  %v102_v41 = vld [vmem:[%s175_s1] ss:$0 sm:$0xff] }
   0x3   :  { %20 = vadd.xlane.f32.xlu0 %v19_v3  ;;  %26 = vadd.xlane.f32.xlu1 %v25_v4  ;;  %v28_v7 = vsel %vm18_vm0, %v17_v5, 0.0  ;;  %v103_v43 = vld [vmem:[%s176_s2] ss:$0 sm:$0xff] }
   0x7   :  { %23 = vadd.xlane.f32.xlu0 %v22_v6  ;;  %29 = vadd.xlane.f32.xlu1 %v28_v7 }
  0x90   :  { %v21_v8 = vpop.xlane.xlu0 %20  ;;  %v27_v9 = vpop.xlane.xlu1 %26 }
  0x91   :  { %v32_v10 = vmul.f32 0.015625, %v21_v8  ;;  %v34_v11 = vmul.f32 0.015625, %v27_v9 }
  0x93   :  { %v36_v12 = vsub.f32 %v14_v0, %v32_v10  ;;  %v38_v13 = vsub.f32 %v16_v1, %v34_v11 }
  0x94   :  { %v24_v14 = vpop.xlane.xlu0 %23  ;;  %v30_v15 = vpop.xlane.xlu1 %29 }
  0x95   :  { %v33_v16 = vmul.f32 0.015625, %v24_v14  ;;  %v35_v17 = vmul.f32 0.015625, %v30_v15  ;;  %v40_v18 = vmul.f32 %v36_v12, %v36_v12  ;;  %v42_v19 = vmul.f32 %v38_v13, %v38_v13 }
  0x97   :  { %v37_v20 = vsub.f32 %v15_v2, %v33_v16  ;;  %v39_v21 = vsub.f32 %v17_v5, %v35_v17  ;;  %v44_v22 = vsel %vm18_vm0, %v40_v18, 0.0  ;;  %v50_v23 = vsel %vm18_vm0, %v42_v19, 0.0 }
  0x98   :  { %45 = vadd.xlane.f32.xlu0 %v44_v22 }
  0x99   :  { %v41_v24 = vmul.f32 %v37_v20, %v37_v20  ;;  %v43_v25 = vmul.f32 %v39_v21, %v39_v21 }
  0x9b   :  { %v47_v26 = vsel %vm18_vm0, %v41_v24, 0.0  ;;  %v53_v27 = vsel %vm18_vm0, %v43_v25, 0.0 }
  0x9c   :  { %51 = vadd.xlane.f32.xlu0 %v50_v23  ;;  %48 = vadd.xlane.f32.xlu1 %v47_v26 }
  0xa0   :  { %54 = vadd.xlane.f32.xlu1 %v53_v27 }
 0x125   :  { %v46_v28 = vpop.xlane.xlu0 %45 }
 0x126   :  { %v56_v29 = vmul.f32 0.015625, %v46_v28 }
 0x128   :  { %v60_v30 = vadd.f32 1e-05, %v56_v29 }
 0x129   :  { %v49_v31 = vpop.xlane.xlu1 %48  ;;  %v52_v32 = vpop.xlane.xlu0 %51 }
 0x12a   :  { %104 = vrsqrt.f32 %v60_v30  ;;  %v57_v33 = vmul.f32 0.015625, %v49_v31  ;;  %v58_v34 = vmul.f32 0.015625, %v52_v32 }
 0x12c   :  { %v61_v35 = vadd.f32 1e-05, %v57_v33  ;;  %v62_v36 = vadd.f32 1e-05, %v58_v34 }
 0x12d   :  { %v55_v37 = vpop.xlane.xlu1 %54 }
 0x12e   :  { %106 = vrsqrt.f32 %v61_v35  ;;  %v59_v38 = vmul.f32 0.015625, %v55_v37 }
 0x12f   :  { %108 = vrsqrt.f32 %v62_v36 }
 0x130   :  { %v63_v39 = vadd.f32 1e-05, %v59_v38 }
 0x132   :  { %110 = vrsqrt.f32 %v63_v39 }
 0x134   :  { %v105_v40 = vpop.eup %104 }
 0x135   :  { %v68_v42 = vmul.f32 %v105_v40, %v36_v12 }
 0x137   :  { %v79_v44 = vmul.f32 %v102_v41, %v68_v42 }
 0x138   :  { %v107_v45 = vpop.eup %106 }
 0x139   :  { %v109_v46 = vpop.eup %108  ;;  %v90_v47 = vadd.f32 %v103_v43, %v79_v44  ;;  %v69_v48 = vmul.f32 %v107_v45, %v37_v20 }
 0x13a   :  { %v70_v49 = vmul.f32 %v109_v46, %v38_v13 }
 0x13b   :  { %94 = vst.msk [vmem:[%s177_s3] sm:$0xff] %vm18_vm0, %v90_v47  ;;  %v80_v50 = vmul.f32 %v102_v41, %v69_v48 }
 0x13c   :  { %v111_v51 = vpop.eup %110  ;;  %v81_v52 = vmul.f32 %v102_v41, %v70_v49 }
 0x13d   :  { %v91_v53 = vadd.f32 %v103_v43, %v80_v50  ;;  %v71_v54 = vmul.f32 %v111_v51, %v39_v21 }
 0x13e   :  { %v92_v55 = vadd.f32 %v103_v43, %v81_v52 }
 0x13f   :  { %95 = vst.msk [vmem:[%s177_s3 + $0x8] sm:$0xff] %vm18_vm0, %v91_v53  ;;  %v82_v56 = vmul.f32 %v102_v41, %v71_v54 }
 0x140   :  { %96 = vst.msk [vmem:[%s177_s3 + $0x10] sm:$0xff] %vm18_vm0, %v92_v55 }
 0x141   :  { %v93_v57 = vadd.f32 %v103_v43, %v82_v56 }
 0x143   :  { %97 = vst.msk [vmem:[%s177_s3 + $0x18] sm:$0xff] %vm18_vm0, %v93_v57 }

// kernel: swin_forward.54
= control target key start
LH: loop header
LB: loop body
LE: loop exit
PB: predicated region body
PF: predicated region fallthrough
CT: control target
= control target key end

     0   :  { %vm25_vm0 = vcmask 523264   ;;  %v231_v52 = vmov 0   ;;  %s389_s0 = inlined_call_operand.vmem [shape: f32[32,64], index: 0, kind: input, shape index: {}]   ;;  %s390_s3 = inlined_call_operand.vmem [shape: f32[64,192], index: 3, kind: input, shape index: {}]   ;;  %s391_s1 = inlined_call_operand.vmem [shape: f32[1,64], index: 1, kind: input, shape index: {}]   ;;  %s392_s2 = inlined_call_operand.vmem [shape: f32[1,64], index: 2, kind: input, shape index: {}]   ;;  %s393_s4 = inlined_call_operand.vmem [shape: f32[1,192], index: 4, kind: input, shape index: {}]   ;;  %s394_s5 = inlined_call_operand.vmem [shape: f32[32,192], index: 5, kind: output, shape index: {}]  }
   0x1   :  { %v21_v0 = vld [vmem:[%s389_s0] sm:$0xff]  ;;  %v23_v1 = vld [vmem:[%s389_s0 + $0x10] sm:$0xff]  ;;  %v22_v2 = vld [vmem:[%s389_s0 + $0x8] sm:$0xff]  ;;  %177 = vmatprep.mubr.bf16.mxu0 %v231_v52  ;;  %187 = vmatprep.mubr.bf16.mxu1 %v231_v52 }
   0x2   :  { %v26_v3 = vsel %vm25_vm0, %v21_v0, 0.0  ;;  %v32_v4 = vsel %vm25_vm0, %v23_v1, 0.0  ;;  %v24_v5 = vld [vmem:[%s389_s0 + $0x18] sm:$0xff]  ;;  %v29_v6 = vsel %vm25_vm0, %v22_v2, 0.0  ;;  %v104_v28 = vld [vmem:[%s390_s3 + $0x8] sm:$0xff]  ;;  %v103_v31 = vld [vmem:[%s390_s3] sm:$0xff] }
   0x3   :  { %27 = vadd.xlane.f32.xlu0 %v26_v3  ;;  %33 = vadd.xlane.f32.xlu1 %v32_v4  ;;  %v35_v7 = vsel %vm25_vm0, %v24_v5, 0.0  ;;  %v106_v29 = vld [vmem:[%s390_s3 + $0x18] sm:$0xff]  ;;  %v105_v32 = vld [vmem:[%s390_s3 + $0x10] sm:$0xff]  ;;  %v108_v34 = vld [vmem:[%s390_s3 + $0x28] sm:$0xff] }
   0x4   :  { %v120_v30 = vpack.c.bf16 %v106_v29, %v104_v28  ;;  %v119_v33 = vpack.c.bf16 %v105_v32, %v103_v31  ;;  %v110_v35 = vld [vmem:[%s390_s3 + $0x38] sm:$0xff]  ;;  %v107_v37 = vld [vmem:[%s390_s3 + $0x20] sm:$0xff]  ;;  %v109_v38 = vld [vmem:[%s390_s3 + $0x30] sm:$0xff] }
   0x5   :  { %v122_v36 = vpack.c.bf16 %v110_v35, %v108_v34  ;;  %v121_v39 = vpack.c.bf16 %v109_v38, %v107_v37  ;;  %v112_v40 = vld [vmem:[%s390_s3 + $0x48] sm:$0xff]  ;;  %v114_v41 = vld [vmem:[%s390_s3 + $0x58] sm:$0xff]  ;;  %v111_v43 = vld [vmem:[%s390_s3 + $0x40] sm:$0xff] }
   0x6   :  { %145 = vmatprep.subr.bf16.mxu0 %v120_v30  ;;  %214 = vmatprep.subr.bf16.mxu1 %v120_v30  ;;  %v124_v42 = vpack.c.bf16 %v114_v41, %v112_v40  ;;  %v113_v44 = vld [vmem:[%s390_s3 + $0x50] sm:$0xff]  ;;  %v116_v46 = vld [vmem:[%s390_s3 + $0x68] sm:$0xff]  ;;  %v118_v47 = vld [vmem:[%s390_s3 + $0x78] sm:$0xff] }
   0x7   :  { %30 = vadd.xlane.f32.xlu0 %v29_v6  ;;  %36 = vadd.xlane.f32.xlu1 %v35_v7  ;;  %v123_v45 = vpack.c.bf16 %v113_v44, %v111_v43  ;;  %v126_v48 = vpack.c.bf16 %v118_v47, %v116_v46  ;;  %v115_v49 = vld [vmem:[%s390_s3 + $0x60] sm:$0xff]  ;;  %v117_v50 = vld [vmem:[%s390_s3 + $0x70] sm:$0xff] }
   0x8   :  { %146 = vmatpush1.bf16.msra.mxu0 %v119_v33  ;;  %218 = vmatpush1.bf16.msra.mxu1 %v119_v33  ;;  %v125_v51 = vpack.c.bf16 %v117_v50, %v115_v49  ;;  %v210_v3 = vld [vmem:[%s391_s1] ss:$0 sm:$0xff] }
   0x9   :  { %147 = vmatprep.subr.bf16.mxu0 %v122_v36  ;;  %215 = vmatprep.subr.bf16.mxu1 %v122_v36 }
   0xc   :  { %148 = vmatpush1.bf16.msra.mxu0 %v121_v39  ;;  %219 = vmatpush1.bf16.msra.mxu1 %v121_v39 }
   0xd   :  { %149 = vmatprep.subr.bf16.mxu0 %v124_v42  ;;  %216 = vmatprep.subr.bf16.mxu1 %v124_v42 }
  0x10   :  { %150 = vmatpush1.bf16.msra.mxu0 %v123_v45  ;;  %220 = vmatpush1.bf16.msra.mxu1 %v123_v45 }
  0x11   :  { %151 = vmatprep.subr.bf16.mxu0 %v126_v48  ;;  %217 = vmatprep.subr.bf16.mxu1 %v126_v48 }
  0x14   :  { %152 = vmatpush1.bf16.msra.mxu0 %v125_v51  ;;  %221 = vmatpush1.bf16.msra.mxu1 %v125_v51 }
  0x90   :  { %v28_v8 = vpop.xlane.xlu0 %27  ;;  %v34_v9 = vpop.xlane.xlu1 %33 }
  0x91   :  { %v39_v10 = vmul.f32 0.015625, %v28_v8  ;;  %v41_v11 = vmul.f32 0.015625, %v34_v9  ;;  %v211_v9 = vld [vmem:[%s392_s2] ss:$0 sm:$0xff] }
  0x93   :  { %v278_v12 = vsub.f32 %v21_v0, %v39_v10  ;;  %v280_v13 = vsub.f32 %v23_v1, %v41_v11 }
  0x94   :  { %v31_v14 = vpop.xlane.xlu0 %30  ;;  %v37_v15 = vpop.xlane.xlu1 %36 }
  0x95   :  { %v40_v16 = vmul.f32 0.015625, %v31_v14  ;;  %v42_v17 = vmul.f32 0.015625, %v37_v15  ;;  %v47_v18 = vmul.f32 %v278_v12, %v278_v12  ;;  %v49_v19 = vmul.f32 %v280_v13, %v280_v13 }
  0x97   :  { %v286_v20 = vsub.f32 %v22_v2, %v40_v16  ;;  %v288_v21 = vsub.f32 %v24_v5, %v42_v17  ;;  %v51_v22 = vsel %vm25_vm0, %v47_v18, 0.0  ;;  %v57_v23 = vsel %vm25_vm0, %v49_v19, 0.0 }
  0x98   :  { %52 = vadd.xlane.f32.xlu0 %v51_v22 }
  0x99   :  { %v48_v24 = vmul.f32 %v286_v20, %v286_v20  ;;  %v50_v25 = vmul.f32 %v288_v21, %v288_v21 }
  0x9b   :  { %v54_v26 = vsel %vm25_vm0, %v48_v24, 0.0  ;;  %v60_v27 = vsel %vm25_vm0, %v50_v25, 0.0  ;;  %v127_v25 = vld [vmem:[%s393_s4] sm:$0x3] }
  0x9c   :  { %58 = vadd.xlane.f32.xlu0 %v57_v23  ;;  %55 = vadd.xlane.f32.xlu1 %v54_v26 }
  0xa0   :  { %61 = vadd.xlane.f32.xlu1 %v60_v27 }
 0x125   :  { %v53_v53 = vpop.xlane.xlu0 %52 }
 0x126   :  { %v63_v54 = vmul.f32 0.015625, %v53_v53 }
 0x128   :  { %v67_v55 = vadd.f32 1e-05, %v63_v54 }
 0x129   :  { %v56_v56 = vpop.xlane.xlu1 %55  ;;  %v59_v57 = vpop.xlane.xlu0 %58 }
 0x12a   :  { %223 = vrsqrt.f32 %v67_v55  ;;  %v64_v58 = vmul.f32 0.015625, %v56_v56  ;;  %v65_v59 = vmul.f32 0.015625, %v59_v57 }
 0x12c   :  { %v68_v60 = vadd.f32 1e-05, %v64_v58  ;;  %v69_v61 = vadd.f32 1e-05, %v65_v59 }
 0x12d   :  { %v62_v62 = vpop.xlane.xlu1 %61 }
 0x12e   :  { %225 = vrsqrt.f32 %v68_v60  ;;  %v66_v63 = vmul.f32 0.015625, %v62_v62 }
 0x12f   :  { %227 = vrsqrt.f32 %v69_v61 }
 0x130   :  { %v70_v0 = vadd.f32 1e-05, %v66_v63 }
 0x132   :  { %229 = vrsqrt.f32 %v70_v0 }
 0x134   :  { %v224_v1 = vpop.eup %223 }
 0x135   :  { %v75_v2 = vmul.f32 %v224_v1, %v278_v12 }
 0x137   :  { %v86_v7 = vmul.f32 %v210_v3, %v75_v2 }
 0x138   :  { %v226_v4 = vpop.eup %225 }
 0x139   :  { %v228_v5 = vpop.eup %227  ;;  %v76_v6 = vmul.f32 %v226_v4, %v286_v20  ;;  %v97_v12 = vadd.f32 %v211_v9, %v86_v7 }
 0x13a   :  { %v77_v8 = vmul.f32 %v228_v5, %v280_v13  ;;  %v129_v13 = vlaneseq }
 0x13b   :  { %v87_v10 = vmul.f32 %v210_v3, %v76_v6 }
 0x13c   :  { %v230_v11 = vpop.eup %229  ;;  %v88_v16 = vmul.f32 %v210_v3, %v77_v8  ;;  %v130_v23 = vshrl.u32 %v129_v13, 7 }
 0x13d   :  { %v78_v14 = vmul.f32 %v230_v11, %v288_v21  ;;  %v98_v15 = vadd.f32 %v211_v9, %v87_v10 }
 0x13e   :  { %v99_v19 = vadd.f32 %v211_v9, %v88_v16  ;;  %v131_v24 = vsub.s32 0, %v130_v23  ;;  %v135_v21 = vsub.s32 1, %v130_v23 }
 0x13f   :  { %v101_v17 = vpack.c.bf16 %v98_v15, %v97_v12  ;;  %v89_v18 = vmul.f32 %v210_v3, %v78_v14 }
 0x140   :  { %v132_v26 = vrot.slane %v127_v25, %v131_v24  ;;  %v136_v27 = vrot.slane %v127_v25, %v135_v21 }
 0x141   :  { %212 = vmatmul.mubr.msk.bf16.vlgmr.msra.gmra.mrb[0].mxu0 %vm25_vm0, %v101_v17  ;;  %v100_v20 = vadd.f32 %v211_v9, %v89_v18 }
 0x143   :  { %v102_v22 = vpack.c.bf16 %v100_v20, %v99_v19 }
 0x145   :  { %213 = vmatmul.mubr.msk.bf16.vlgmr.msra.gmra.mrb[0].mxu1 %vm25_vm0, %v102_v22 }
 0x214   :  { %v179_v28 = vpop.f32.mrb[0].mxu0 }
 0x215   :  { %v180_v29 = vadd.f32 %v179_v28, %v132_v26  ;;  %v181_v30 = vpop.f32.mrb[1].mxu0 }
 0x216   :  { %v182_v31 = vadd.f32 %v181_v30, %v136_v27  ;;  %v183_v32 = vpop.f32.mrb[2].mxu0 }
 0x217   :  { %198 = vst [vmem:[%s394_s5] sm:$0xff] %v180_v29  ;;  %v184_v33 = vadd.f32 %v183_v32, %v132_v26  ;;  %v185_v34 = vpop.f32.mrb[3].mxu0 }
 0x218   :  { %199 = vst.msk [vmem:[%s394_s5 + $0x8] sm:$0xff] %vm25_vm0, %v182_v31  ;;  %v186_v35 = vadd.f32 %v185_v34, %v136_v27  ;;  %v189_v36 = vpop.f32.mrb[0].mxu1 }
 0x219   :  { %200 = vst [vmem:[%s394_s5 + $0x10] sm:$0xff] %v184_v33  ;;  %v190_v37 = vadd.f32 %v189_v36, %v132_v26  ;;  %v191_v38 = vpop.f32.mrb[1].mxu1 }
 0x21a   :  { %201 = vst.msk [vmem:[%s394_s5 + $0x18] sm:$0xff] %vm25_vm0, %v186_v35  ;;  %v192_v39 = vadd.f32 %v191_v38, %v136_v27  ;;  %v193_v40 = vpop.f32.mrb[2].mxu1 }
 0x21b   :  { %202 = vst [vmem:[%s394_s5 + $0x20] sm:$0xff] %v190_v37  ;;  %v194_v41 = vadd.f32 %v193_v40, %v132_v26  ;;  %v195_v42 = vpop.f32.mrb[3].mxu1 }
 0x21c   :  { %203 = vst.msk [vmem:[%s394_s5 + $0x28] sm:$0xff] %vm25_vm0, %v192_v39  ;;  %v196_v43 = vadd.f32 %v195_v42, %v136_v27 }
 0x21d   :  { %204 = vst [vmem:[%s394_s5 + $0x30] sm:$0xff] %v194_v41 }
 0x21e   :  { %205 = vst.msk [vmem:[%s394_s5 + $0x38] sm:$0xff] %vm25_vm0, %v196_v43 }

// kernel: swin_forward.52
= control target key start
LH: loop header
LB: loop body
LE: loop exit
PB: predicated region body
PF: predicated region fallthrough
CT: control target
= control target key end

     0   :  { %vm121_vm0 = vcmask 1040384   ;;  %vm72_vm1 = vcmask 15360   ;;  %vm318_vm2 = vcmask 64512   ;;  %s727_s1 = inlined_call_operand.vmem [shape: f32[2,8], index: 1, kind: input, shape index: {}]   ;;  %s728_s0 = inlined_call_operand.vmem [shape: f32[256,2], index: 0, kind: input, shape index: {}]   ;;  %s729_s2 = inlined_call_operand.vmem [shape: f32[1,8], index: 2, kind: input, shape index: {}]   ;;  %s730_s3 = inlined_call_operand.vmem [shape: f32[256,8], index: 3, kind: output, shape index: {}]  }
   0x1   :  { %v63_v0 = vld [vmem:[%s727_s1] sm:$0x3]  ;;  %v16_v2 = vld [vmem:[%s728_s0 + $0x8] sm:$0xff]  ;;  %v17_v7 = vld [vmem:[%s728_s0 + $0x10] sm:$0xff] }
   0x2   :  { %v15_v1 = vld [vmem:[%s728_s0] sm:$0xff]  ;;  %v64_v3 = vpack.c.bf16 %v63_v0, %v63_v0  ;;  %v32_v6 = vld [vmem:[%s728_s0 + $0x88] sm:$0xff]  ;;  %v18_v9 = vld [vmem:[%s728_s0 + $0x18] sm:$0xff] }
   0x3   :  { %v47_v4 = vpack.c.bf16 %v16_v2, %v15_v1  ;;  %v31_v5 = vld [vmem:[%s728_s0 + $0x80] sm:$0xff]  ;;  %v33_v10 = vld [vmem:[%s728_s0 + $0x90] sm:$0xff]  ;;  %v34_v11 = vld [vmem:[%s728_s0 + $0x98] sm:$0xff]  ;;  %v48_v13 = vpack.c.bf16 %v18_v9, %v17_v7 }
   0x4   :  { %v55_v8 = vpack.c.bf16 %v32_v6, %v31_v5  ;;  %425 = vmatprep.subr.msk.bf16.mxu0 %vm121_vm0, %v64_v3  ;;  %426 = vmatprep.subr.msk.bf16.mxu1 %vm121_vm0, %v64_v3  ;;  %v123_v12 = vsel %vm121_vm0, %v64_v3, 0  ;;  %v56_v14 = vpack.c.bf16 %v34_v11, %v33_v10  ;;  %v19_v15 = vld [vmem:[%s728_s0 + $0x20] sm:$0xff]  ;;  %v20_v16 = vld [vmem:[%s728_s0 + $0x28] sm:$0xff]  ;;  %v21_v21 = vld [vmem:[%s728_s0 + $0x30] sm:$0xff] }
   0x5   :  { %v35_v17 = vld [vmem:[%s728_s0 + $0xa0] sm:$0xff]  ;;  %390 = vmatpush3.bf16.msra.mxu0 %v123_v12  ;;  %424 = vmatpush3.bf16.msra.mxu1 %v123_v12  ;;  %v49_v18 = vpack.c.bf16 %v20_v16, %v19_v15  ;;  %v36_v19 = vld [vmem:[%s728_s0 + $0xa8] sm:$0xff]  ;;  %v22_v22 = vld [vmem:[%s728_s0 + $0x38] sm:$0xff] }
   0x6   :  { %391 = vmatprep.mubr.msk.bf16.mxu0 %vm72_vm1, %v47_v4  ;;  %407 = vmatprep.mubr.msk.bf16.mxu1 %vm72_vm1, %v55_v8  ;;  %v57_v20 = vpack.c.bf16 %v36_v19, %v35_v17  ;;  %v37_v23 = vld [vmem:[%s728_s0 + $0xb0] sm:$0xff]  ;;  %v38_v24 = vld [vmem:[%s728_s0 + $0xb8] sm:$0xff]  ;;  %v23_v25 = vld [vmem:[%s728_s0 + $0x40] sm:$0xff]  ;;  %v50_v29 = vpack.c.bf16 %v22_v22, %v21_v21 }
   0x7   :  { %v24_v26 = vld [vmem:[%s728_s0 + $0x48] sm:$0xff]  ;;  %v39_v27 = vld [vmem:[%s728_s0 + $0xc0] sm:$0xff]  ;;  %v58_v30 = vpack.c.bf16 %v38_v24, %v37_v23  ;;  %v25_v33 = vld [vmem:[%s728_s0 + $0x50] sm:$0xff] }
   0x8   :  { %392 = vmatmul.mubr.msk.bf16.vlgmr.msra.gmra.mrb[0].mxu0 %vm72_vm1, %v48_v13  ;;  %408 = vmatmul.mubr.msk.bf16.vlgmr.msra.gmra.mrb[0].mxu1 %vm72_vm1, %v56_v14  ;;  %v40_v28 = vld [vmem:[%s728_s0 + $0xc8] sm:$0xff]  ;;  %v51_v31 = vpack.c.bf16 %v24_v26, %v23_v25  ;;  %v26_v34 = vld [vmem:[%s728_s0 + $0x58] sm:$0xff]  ;;  %v41_v35 = vld [vmem:[%s728_s0 + $0xd0] sm:$0xff] }
   0x9   :  { %395 = vmatprep.mubr.msk.bf16.mxu0 %vm72_vm1, %v49_v18  ;;  %411 = vmatprep.mubr.msk.bf16.mxu1 %vm72_vm1, %v57_v20  ;;  %v59_v32 = vpack.c.bf16 %v40_v28, %v39_v27  ;;  %v42_v36 = vld [vmem:[%s728_s0 + $0xd8] sm:$0xff]  ;;  %v27_v37 = vld [vmem:[%s728_s0 + $0x60] sm:$0xff]  ;;  %v28_v38 = vld [vmem:[%s728_s0 + $0x68] sm:$0xff]  ;;  %v52_v41 = vpack.c.bf16 %v26_v34, %v25_v33 }
   0xa   :  { %v43_v39 = vld [vmem:[%s728_s0 + $0xe0] sm:$0xff]  ;;  %v44_v40 = vld [vmem:[%s728_s0 + $0xe8] sm:$0xff]  ;;  %v60_v42 = vpack.c.bf16 %v42_v36, %v41_v35  ;;  %v53_v43 = vpack.c.bf16 %v28_v38, %v27_v37  ;;  %v29_v45 = vld [vmem:[%s728_s0 + $0x70] sm:$0xff] }
   0xb   :  { %v61_v44 = vpack.c.bf16 %v44_v40, %v43_v39  ;;  %v30_v46 = vld [vmem:[%s728_s0 + $0x78] sm:$0xff]  ;;  %v45_v47 = vld [vmem:[%s728_s0 + $0xf0] sm:$0xff]  ;;  %v565_v51 = vld [vmem:[%s729_s2] ss:$0 sm:$0xff] }
   0xc   :  { %v46_v48 = vld [vmem:[%s728_s0 + $0xf8] sm:$0xff]  ;;  %v54_v49 = vpack.c.bf16 %v30_v46, %v29_v45 }
   0xd   :  { %v62_v50 = vpack.c.bf16 %v46_v48, %v45_v47 }
  0x10   :  { %396 = vmatmul.mubr.msk.bf16.gmra.mrb[4].mxu0 %vm72_vm1, %v50_v29  ;;  %412 = vmatmul.mubr.msk.bf16.gmra.mrb[4].mxu1 %vm72_vm1, %v58_v30 }
  0x11   :  { %399 = vmatprep.mubr.msk.bf16.mxu0 %vm72_vm1, %v51_v31  ;;  %415 = vmatprep.mubr.msk.bf16.mxu1 %vm72_vm1, %v59_v32 }
  0x18   :  { %400 = vmatmul.mubr.msk.bf16.gmra.mrb[8].mxu0 %vm72_vm1, %v52_v41  ;;  %416 = vmatmul.mubr.msk.bf16.gmra.mrb[8].mxu1 %vm72_vm1, %v60_v42 }
  0x19   :  { %403 = vmatprep.mubr.msk.bf16.mxu0 %vm72_vm1, %v53_v43  ;;  %419 = vmatprep.mubr.msk.bf16.mxu1 %vm72_vm1, %v61_v44 }
  0x20   :  { %404 = vmatmul.mubr.msk.bf16.gmra.mrb[12].mxu0 %vm72_vm1, %v54_v49  ;;  %420 = vmatmul.mubr.msk.bf16.gmra.mrb[12].mxu1 %vm72_vm1, %v62_v50 }
  0xdb   :  { %v393_v52 = vpop.f32.mrb[0].mxu0  ;;  %v409_v53 = vpop.f32.mrb[0].mxu1 }
  0xdc   :  { %v168_v54 = vadd.f32 %v393_v52, %v565_v51  ;;  %v232_v55 = vadd.f32 %v409_v53, %v565_v51  ;;  %v159_v56 = vpop.f32.mrb[1].mxu0  ;;  %v223_v57 = vpop.f32.mrb[1].mxu1 }
  0xdd   :  { %v160_v58 = vadd.f32 %v565_v51, %v159_v56  ;;  %v224_v59 = vadd.f32 %v565_v51, %v223_v57  ;;  %v394_v60 = vpop.f32.mrb[2].mxu0  ;;  %v410_v61 = vpop.f32.mrb[2].mxu1 }
  0xde   :  { %v288_v62 = vmax.f32 %v168_v54, 0.0  ;;  %v304_v63 = vmax.f32 %v232_v55, 0.0  ;;  %v171_v0 = vadd.f32 %v394_v60, %v565_v51  ;;  %v235_v1 = vadd.f32 %v410_v61, %v565_v51  ;;  %v162_v2 = vpop.f32.mrb[3].mxu0  ;;  %v226_v3 = vpop.f32.mrb[3].mxu1 }
  0xdf   :  { %v286_v4 = vmax.f32 %v160_v58, 0.0  ;;  %v302_v5 = vmax.f32 %v224_v59, 0.0  ;;  %v163_v6 = vadd.f32 %v565_v51, %v162_v2  ;;  %v227_v7 = vadd.f32 %v565_v51, %v226_v3 }
  0xe0   :  { %321 = vst.msk [vmem:[%s730_s3 + $0x10] sm:$0xff] %vm318_vm2, %v288_v62  ;;  %337 = vst.msk [vmem:[%s730_s3 + $0x90] sm:$0xff] %vm318_vm2, %v304_v63  ;;  %v289_v8 = vmax.f32 %v171_v0, 0.0  ;;  %v305_v9 = vmax.f32 %v235_v1, 0.0 }
  0xe1   :  { %319 = vst.msk [vmem:[%s730_s3] sm:$0xff] %vm318_vm2, %v286_v4  ;;  %335 = vst.msk [vmem:[%s730_s3 + $0x80] sm:$0xff] %vm318_vm2, %v302_v5  ;;  %v287_v10 = vmax.f32 %v163_v6, 0.0  ;;  %v303_v11 = vmax.f32 %v227_v7, 0.0 }
  0xe2   :  { %322 = vst.msk [vmem:[%s730_s3 + $0x18] sm:$0xff] %vm318_vm2, %v289_v8  ;;  %338 = vst.msk [vmem:[%s730_s3 + $0x98] sm:$0xff] %vm318_vm2, %v305_v9 }
  0xe3   :  { %320 = vst.msk [vmem:[%s730_s3 + $0x8] sm:$0xff] %vm318_vm2, %v287_v10  ;;  %336 = vst.msk [vmem:[%s730_s3 + $0x88] sm:$0xff] %vm318_vm2, %v303_v11  ;;  %v397_v12 = vpop.f32.mrb[4].mxu0  ;;  %v413_v13 = vpop.f32.mrb[4].mxu1 }
  0xe4   :  { %v184_v14 = vadd.f32 %v397_v12, %v565_v51  ;;  %v248_v15 = vadd.f32 %v413_v13, %v565_v51  ;;  %v175_v16 = vpop.f32.mrb[5].mxu0  ;;  %v239_v17 = vpop.f32.mrb[5].mxu1 }
  0xe5   :  { %v176_v18 = vadd.f32 %v565_v51, %v175_v16  ;;  %v240_v19 = vadd.f32 %v565_v51, %v239_v17  ;;  %v398_v20 = vpop.f32.mrb[6].mxu0  ;;  %v414_v21 = vpop.f32.mrb[6].mxu1 }
  0xe6   :  { %v292_v22 = vmax.f32 %v184_v14, 0.0  ;;  %v308_v23 = vmax.f32 %v248_v15, 0.0  ;;  %v187_v24 = vadd.f32 %v398_v20, %v565_v51  ;;  %v251_v25 = vadd.f32 %v414_v21, %v565_v51  ;;  %v178_v26 = vpop.f32.mrb[7].mxu0  ;;  %v242_v27 = vpop.f32.mrb[7].mxu1 }
  0xe7   :  { %v290_v28 = vmax.f32 %v176_v18, 0.0  ;;  %v306_v29 = vmax.f32 %v240_v19, 0.0  ;;  %v179_v30 = vadd.f32 %v565_v51, %v178_v26  ;;  %v243_v31 = vadd.f32 %v565_v51, %v242_v27 }
  0xe8   :  { %325 = vst.msk [vmem:[%s730_s3 + $0x30] sm:$0xff] %vm318_vm2, %v292_v22  ;;  %341 = vst.msk [vmem:[%s730_s3 + $0xb0] sm:$0xff] %vm318_vm2, %v308_v23  ;;  %v293_v32 = vmax.f32 %v187_v24, 0.0  ;;  %v309_v33 = vmax.f32 %v251_v25, 0.0 }
  0xe9   :  { %323 = vst.msk [vmem:[%s730_s3 + $0x20] sm:$0xff] %vm318_vm2, %v290_v28  ;;  %339 = vst.msk [vmem:[%s730_s3 + $0xa0] sm:$0xff] %vm318_vm2, %v306_v29  ;;  %v291_v34 = vmax.f32 %v179_v30, 0.0  ;;  %v307_v35 = vmax.f32 %v243_v31, 0.0 }
  0xea   :  { %326 = vst.msk [vmem:[%s730_s3 + $0x38] sm:$0xff] %vm318_vm2, %v293_v32  ;;  %342 = vst.msk [vmem:[%s730_s3 + $0xb8] sm:$0xff] %vm318_vm2, %v309_v33 }
  0xeb   :  { %324 = vst.msk [vmem:[%s730_s3 + $0x28] sm:$0xff] %vm318_vm2, %v291_v34  ;;  %340 = vst.msk [vmem:[%s730_s3 + $0xa8] sm:$0xff] %vm318_vm2, %v307_v35  ;;  %v401_v36 = vpop.f32.mrb[8].mxu0  ;;  %v417_v37 = vpop.f32.mrb[8].mxu1 }
  0xec   :  { %v200_v38 = vadd.f32 %v401_v36, %v565_v51  ;;  %v264_v39 = vadd.f32 %v417_v37, %v565_v51  ;;  %v191_v40 = vpop.f32.mrb[9].mxu0  ;;  %v255_v41 = vpop.f32.mrb[9].mxu1 }
  0xed   :  { %v192_v42 = vadd.f32 %v565_v51, %v191_v40  ;;  %v256_v43 = vadd.f32 %v565_v51, %v255_v41  ;;  %v402_v44 = vpop.f32.mrb[10].mxu0  ;;  %v418_v45 = vpop.f32.mrb[10].mxu1 }
  0xee   :  { %v296_v46 = vmax.f32 %v200_v38, 0.0  ;;  %v312_v47 = vmax.f32 %v264_v39, 0.0  ;;  %v203_v48 = vadd.f32 %v402_v44, %v565_v51  ;;  %v267_v49 = vadd.f32 %v418_v45, %v565_v51  ;;  %v194_v50 = vpop.f32.mrb[11].mxu0  ;;  %v258_v52 = vpop.f32.mrb[11].mxu1 }
  0xef   :  { %v294_v53 = vmax.f32 %v192_v42, 0.0  ;;  %v310_v54 = vmax.f32 %v256_v43, 0.0  ;;  %v195_v55 = vadd.f32 %v565_v51, %v194_v50  ;;  %v259_v56 = vadd.f32 %v565_v51, %v258_v52 }
  0xf0   :  { %329 = vst.msk [vmem:[%s730_s3 + $0x50] sm:$0xff] %vm318_vm2, %v296_v46  ;;  %345 = vst.msk [vmem:[%s730_s3 + $0xd0] sm:$0xff] %vm318_vm2, %v312_v47  ;;  %v297_v57 = vmax.f32 %v203_v48, 0.0  ;;  %v313_v58 = vmax.f32 %v267_v49, 0.0 }
  0xf1   :  { %327 = vst.msk [vmem:[%s730_s3 + $0x40] sm:$0xff] %vm318_vm2, %v294_v53  ;;  %343 = vst.msk [vmem:[%s730_s3 + $0xc0] sm:$0xff] %vm318_vm2, %v310_v54  ;;  %v295_v59 = vmax.f32 %v195_v55, 0.0  ;;  %v311_v60 = vmax.f32 %v259_v56, 0.0 }
  0xf2   :  { %330 = vst.msk [vmem:[%s730_s3 + $0x58] sm:$0xff] %vm318_vm2, %v297_v57  ;;  %346 = vst.msk [vmem:[%s730_s3 + $0xd8] sm:$0xff] %vm318_vm2, %v313_v58 }
  0xf3   :  { %328 = vst.msk [vmem:[%s730_s3 + $0x48] sm:$0xff] %vm318_vm2, %v295_v59  ;;  %344 = vst.msk [vmem:[%s730_s3 + $0xc8] sm:$0xff] %vm318_vm2, %v311_v60  ;;  %v405_v61 = vpop.f32.mrb[12].mxu0  ;;  %v421_v62 = vpop.f32.mrb[12].mxu1 }
  0xf4   :  { %v216_v63 = vadd.f32 %v405_v61, %v565_v51  ;;  %v280_v0 = vadd.f32 %v421_v62, %v565_v51  ;;  %v207_v1 = vpop.f32.mrb[13].mxu0  ;;  %v271_v2 = vpop.f32.mrb[13].mxu1 }
  0xf5   :  { %v208_v3 = vadd.f32 %v565_v51, %v207_v1  ;;  %v272_v4 = vadd.f32 %v565_v51, %v271_v2  ;;  %v406_v5 = vpop.f32.mrb[14].mxu0  ;;  %v422_v6 = vpop.f32.mrb[14].mxu1 }
  0xf6   :  { %v300_v7 = vmax.f32 %v216_v63, 0.0  ;;  %v316_v8 = vmax.f32 %v280_v0, 0.0  ;;  %v219_v9 = vadd.f32 %v406_v5, %v565_v51  ;;  %v283_v10 = vadd.f32 %v422_v6, %v565_v51  ;;  %v210_v11 = vpop.f32.mrb[15].mxu0  ;;  %v274_v12 = vpop.f32.mrb[15].mxu1 }
  0xf7   :  { %v298_v13 = vmax.f32 %v208_v3, 0.0  ;;  %v314_v14 = vmax.f32 %v272_v4, 0.0  ;;  %v211_v15 = vadd.f32 %v565_v51, %v210_v11  ;;  %v275_v16 = vadd.f32 %v565_v51, %v274_v12 }
  0xf8   :  { %333 = vst.msk [vmem:[%s730_s3 + $0x70] sm:$0xff] %vm318_vm2, %v300_v7  ;;  %349 = vst.msk [vmem:[%s730_s3 + $0xf0] sm:$0xff] %vm318_vm2, %v316_v8  ;;  %v301_v17 = vmax.f32 %v219_v9, 0.0  ;;  %v317_v18 = vmax.f32 %v283_v10, 0.0 }
  0xf9   :  { %331 = vst.msk [vmem:[%s730_s3 + $0x60] sm:$0xff] %vm318_vm2, %v298_v13  ;;  %347 = vst.msk [vmem:[%s730_s3 + $0xe0] sm:$0xff] %vm318_vm2, %v314_v14  ;;  %v299_v51 = vmax.f32 %v211_v15, 0.0  ;;  %v315_v19 = vmax.f32 %v275_v16, 0.0 }
  0xfa   :  { %334 = vst.msk [vmem:[%s730_s3 + $0x78] sm:$0xff] %vm318_vm2, %v301_v17  ;;  %350 = vst.msk [vmem:[%s730_s3 + $0xf8] sm:$0xff] %vm318_vm2, %v317_v18 }
  0xfb   :  { %332 = vst.msk [vmem:[%s730_s3 + $0x68] sm:$0xff] %vm318_vm2, %v299_v51  ;;  %348 = vst.msk [vmem:[%s730_s3 + $0xe8] sm:$0xff] %vm318_vm2, %v315_v19 }

// kernel: swin_forward.53
= control target key start
LH: loop header
LB: loop body
LE: loop exit
PB: predicated region body
PF: predicated region fallthrough
CT: control target
= control target key end

     0   :  { %vm121_vm0 = vcmask 1043456   ;;  %vm72_vm1 = vcmask 64512   ;;  %vm286_vm2 = vcmask 31744   ;;  %s695_s1 = inlined_call_operand.vmem [shape: f32[8,4], index: 1, kind: input, shape index: {}]   ;;  %s696_s0 = inlined_call_operand.vmem [shape: f32[256,8], index: 0, kind: input, shape index: {}]   ;;  %s697_s2 = inlined_call_operand.vmem [shape: f32[1,4], index: 2, kind: input, shape index: {}]   ;;  %s698_s3 = inlined_call_operand.vmem [shape: f32[256,4], index: 3, kind: output, shape index: {}]  }
   0x1   :  { %v63_v0 = vld [vmem:[%s695_s1] sm:$0xff]  ;;  %v16_v2 = vld [vmem:[%s696_s0 + $0x8] sm:$0xff]  ;;  %v17_v7 = vld [vmem:[%s696_s0 + $0x10] sm:$0xff] }
   0x2   :  { %v15_v1 = vld [vmem:[%s696_s0] sm:$0xff]  ;;  %v64_v3 = vpack.c.bf16 %v63_v0, %v63_v0  ;;  %v32_v6 = vld [vmem:[%s696_s0 + $0x88] sm:$0xff]  ;;  %v18_v9 = vld [vmem:[%s696_s0 + $0x18] sm:$0xff] }
   0x3   :  { %v47_v4 = vpack.c.bf16 %v16_v2, %v15_v1  ;;  %v31_v5 = vld [vmem:[%s696_s0 + $0x80] sm:$0xff]  ;;  %v33_v10 = vld [vmem:[%s696_s0 + $0x90] sm:$0xff]  ;;  %v34_v11 = vld [vmem:[%s696_s0 + $0x98] sm:$0xff]  ;;  %v48_v13 = vpack.c.bf16 %v18_v9, %v17_v7 }
   0x4   :  { %v55_v8 = vpack.c.bf16 %v32_v6, %v31_v5  ;;  %393 = vmatprep.subr.msk.bf16.mxu0 %vm121_vm0, %v64_v3  ;;  %394 = vmatprep.subr.msk.bf16.mxu1 %vm121_vm0, %v64_v3  ;;  %v123_v12 = vsel %vm121_vm0, %v64_v3, 0  ;;  %v56_v14 = vpack.c.bf16 %v34_v11, %v33_v10  ;;  %v19_v15 = vld [vmem:[%s696_s0 + $0x20] sm:$0xff]  ;;  %v20_v16 = vld [vmem:[%s696_s0 + $0x28] sm:$0xff]  ;;  %v21_v21 = vld [vmem:[%s696_s0 + $0x30] sm:$0xff] }
   0x5   :  { %v35_v17 = vld [vmem:[%s696_s0 + $0xa0] sm:$0xff]  ;;  %358 = vmatpush3.bf16.msra.mxu0 %v123_v12  ;;  %392 = vmatpush3.bf16.msra.mxu1 %v123_v12  ;;  %v49_v18 = vpack.c.bf16 %v20_v16, %v19_v15  ;;  %v36_v19 = vld [vmem:[%s696_s0 + $0xa8] sm:$0xff]  ;;  %v22_v22 = vld [vmem:[%s696_s0 + $0x38] sm:$0xff] }
   0x6   :  { %359 = vmatprep.mubr.msk.bf16.mxu0 %vm72_vm1, %v47_v4  ;;  %375 = vmatprep.mubr.msk.bf16.mxu1 %vm72_vm1, %v55_v8  ;;  %v57_v20 = vpack.c.bf16 %v36_v19, %v35_v17  ;;  %v37_v23 = vld [vmem:[%s696_s0 + $0xb0] sm:$0xff]  ;;  %v38_v24 = vld [vmem:[%s696_s0 + $0xb8] sm:$0xff]  ;;  %v23_v25 = vld [vmem:[%s696_s0 + $0x40] sm:$0xff]  ;;  %v50_v29 = vpack.c.bf16 %v22_v22, %v21_v21 }
   0x7   :  { %v24_v26 = vld [vmem:[%s696_s0 + $0x48] sm:$0xff]  ;;  %v39_v27 = vld [vmem:[%s696_s0 + $0xc0] sm:$0xff]  ;;  %v58_v30 = vpack.c.bf16 %v38_v24, %v37_v23  ;;  %v25_v33 = vld [vmem:[%s696_s0 + $0x50] sm:$0xff] }
   0x8   :  { %360 = vmatmul.mubr.msk.bf16.vlgmr.msra.gmra.mrb[0].mxu0 %vm72_vm1, %v48_v13  ;;  %376 = vmatmul.mubr.msk.bf16.vlgmr.msra.gmra.mrb[0].mxu1 %vm72_vm1, %v56_v14  ;;  %v40_v28 = vld [vmem:[%s696_s0 + $0xc8] sm:$0xff]  ;;  %v51_v31 = vpack.c.bf16 %v24_v26, %v23_v25  ;;  %v26_v34 = vld [vmem:[%s696_s0 + $0x58] sm:$0xff]  ;;  %v41_v35 = vld [vmem:[%s696_s0 + $0xd0] sm:$0xff] }
   0x9   :  { %363 = vmatprep.mubr.msk.bf16.mxu0 %vm72_vm1, %v49_v18  ;;  %379 = vmatprep.mubr.msk.bf16.mxu1 %vm72_vm1, %v57_v20  ;;  %v59_v32 = vpack.c.bf16 %v40_v28, %v39_v27  ;;  %v42_v36 = vld [vmem:[%s696_s0 + $0xd8] sm:$0xff]  ;;  %v27_v37 = vld [vmem:[%s696_s0 + $0x60] sm:$0xff]  ;;  %v28_v38 = vld [vmem:[%s696_s0 + $0x68] sm:$0xff]  ;;  %v52_v41 = vpack.c.bf16 %v26_v34, %v25_v33 }
   0xa   :  { %v43_v39 = vld [vmem:[%s696_s0 + $0xe0] sm:$0xff]  ;;  %v44_v40 = vld [vmem:[%s696_s0 + $0xe8] sm:$0xff]  ;;  %v60_v42 = vpack.c.bf16 %v42_v36, %v41_v35  ;;  %v53_v43 = vpack.c.bf16 %v28_v38, %v27_v37  ;;  %v29_v45 = vld [vmem:[%s696_s0 + $0x70] sm:$0xff] }
   0xb   :  { %v61_v44 = vpack.c.bf16 %v44_v40, %v43_v39  ;;  %v30_v46 = vld [vmem:[%s696_s0 + $0x78] sm:$0xff]  ;;  %v45_v47 = vld [vmem:[%s696_s0 + $0xf0] sm:$0xff]  ;;  %v533_v51 = vld [vmem:[%s697_s2] ss:$0 sm:$0xff] }
   0xc   :  { %v46_v48 = vld [vmem:[%s696_s0 + $0xf8] sm:$0xff]  ;;  %v54_v49 = vpack.c.bf16 %v30_v46, %v29_v45 }
   0xd   :  { %v62_v50 = vpack.c.bf16 %v46_v48, %v45_v47 }
  0x10   :  { %364 = vmatmul.mubr.msk.bf16.gmra.mrb[4].mxu0 %vm72_vm1, %v50_v29  ;;  %380 = vmatmul.mubr.msk.bf16.gmra.mrb[4].mxu1 %vm72_vm1, %v58_v30 }
  0x11   :  { %367 = vmatprep.mubr.msk.bf16.mxu0 %vm72_vm1, %v51_v31  ;;  %383 = vmatprep.mubr.msk.bf16.mxu1 %vm72_vm1, %v59_v32 }
  0x18   :  { %368 = vmatmul.mubr.msk.bf16.gmra.mrb[8].mxu0 %vm72_vm1, %v52_v41  ;;  %384 = vmatmul.mubr.msk.bf16.gmra.mrb[8].mxu1 %vm72_vm1, %v60_v42 }
  0x19   :  { %371 = vmatprep.mubr.msk.bf16.mxu0 %vm72_vm1, %v53_v43  ;;  %387 = vmatprep.mubr.msk.bf16.mxu1 %vm72_vm1, %v61_v44 }
  0x20   :  { %372 = vmatmul.mubr.msk.bf16.gmra.mrb[12].mxu0 %vm72_vm1, %v54_v49  ;;  %388 = vmatmul.mubr.msk.bf16.gmra.mrb[12].mxu1 %vm72_vm1, %v62_v50 }
  0xdb   :  { %v361_v52 = vpop.f32.mrb[0].mxu0  ;;  %v377_v53 = vpop.f32.mrb[0].mxu1 }
  0xdc   :  { %v168_v54 = vadd.f32 %v361_v52, %v533_v51  ;;  %v232_v55 = vadd.f32 %v377_v53, %v533_v51  ;;  %v159_v56 = vpop.f32.mrb[1].mxu0  ;;  %v223_v57 = vpop.f32.mrb[1].mxu1 }
  0xdd   :  { %v160_v58 = vadd.f32 %v533_v51, %v159_v56  ;;  %v224_v59 = vadd.f32 %v533_v51, %v223_v57  ;;  %v362_v60 = vpop.f32.mrb[2].mxu0  ;;  %v378_v61 = vpop.f32.mrb[2].mxu1 }
  0xde   :  { %289 = vst.msk [vmem:[%s698_s3 + $0x10] sm:$0xff] %vm286_vm2, %v168_v54  ;;  %305 = vst.msk [vmem:[%s698_s3 + $0x90] sm:$0xff] %vm286_vm2, %v232_v55  ;;  %v171_v62 = vadd.f32 %v362_v60, %v533_v51  ;;  %v235_v63 = vadd.f32 %v378_v61, %v533_v51  ;;  %v162_v0 = vpop.f32.mrb[3].mxu0  ;;  %v226_v1 = vpop.f32.mrb[3].mxu1 }
  0xdf   :  { %287 = vst.msk [vmem:[%s698_s3] sm:$0xff] %vm286_vm2, %v160_v58  ;;  %303 = vst.msk [vmem:[%s698_s3 + $0x80] sm:$0xff] %vm286_vm2, %v224_v59  ;;  %v163_v2 = vadd.f32 %v533_v51, %v162_v0  ;;  %v227_v3 = vadd.f32 %v533_v51, %v226_v1 }
  0xe0   :  { %290 = vst.msk [vmem:[%s698_s3 + $0x18] sm:$0xff] %vm286_vm2, %v171_v62  ;;  %306 = vst.msk [vmem:[%s698_s3 + $0x98] sm:$0xff] %vm286_vm2, %v235_v63 }
  0xe1   :  { %288 = vst.msk [vmem:[%s698_s3 + $0x8] sm:$0xff] %vm286_vm2, %v163_v2  ;;  %304 = vst.msk [vmem:[%s698_s3 + $0x88] sm:$0xff] %vm286_vm2, %v227_v3 }
  0xe3   :  { %v365_v4 = vpop.f32.mrb[4].mxu0  ;;  %v381_v5 = vpop.f32.mrb[4].mxu1 }
  0xe4   :  { %v184_v6 = vadd.f32 %v365_v4, %v533_v51  ;;  %v248_v7 = vadd.f32 %v381_v5, %v533_v51  ;;  %v175_v8 = vpop.f32.mrb[5].mxu0  ;;  %v239_v9 = vpop.f32.mrb[5].mxu1 }
  0xe5   :  { %v176_v10 = vadd.f32 %v533_v51, %v175_v8  ;;  %v240_v11 = vadd.f32 %v533_v51, %v239_v9  ;;  %v366_v12 = vpop.f32.mrb[6].mxu0  ;;  %v382_v13 = vpop.f32.mrb[6].mxu1 }
  0xe6   :  { %293 = vst.msk [vmem:[%s698_s3 + $0x30] sm:$0xff] %vm286_vm2, %v184_v6  ;;  %309 = vst.msk [vmem:[%s698_s3 + $0xb0] sm:$0xff] %vm286_vm2, %v248_v7  ;;  %v187_v14 = vadd.f32 %v366_v12, %v533_v51  ;;  %v251_v15 = vadd.f32 %v382_v13, %v533_v51  ;;  %v178_v16 = vpop.f32.mrb[7].mxu0  ;;  %v242_v17 = vpop.f32.mrb[7].mxu1 }
  0xe7   :  { %291 = vst.msk [vmem:[%s698_s3 + $0x20] sm:$0xff] %vm286_vm2, %v176_v10  ;;  %307 = vst.msk [vmem:[%s698_s3 + $0xa0] sm:$0xff] %vm286_vm2, %v240_v11  ;;  %v179_v18 = vadd.f32 %v533_v51, %v178_v16  ;;  %v243_v19 = vadd.f32 %v533_v51, %v242_v17 }
  0xe8   :  { %294 = vst.msk [vmem:[%s698_s3 + $0x38] sm:$0xff] %vm286_vm2, %v187_v14  ;;  %310 = vst.msk [vmem:[%s698_s3 + $0xb8] sm:$0xff] %vm286_vm2, %v251_v15 }
  0xe9   :  { %292 = vst.msk [vmem:[%s698_s3 + $0x28] sm:$0xff] %vm286_vm2, %v179_v18  ;;  %308 = vst.msk [vmem:[%s698_s3 + $0xa8] sm:$0xff] %vm286_vm2, %v243_v19 }
  0xeb   :  { %v369_v20 = vpop.f32.mrb[8].mxu0  ;;  %v385_v21 = vpop.f32.mrb[8].mxu1 }
  0xec   :  { %v200_v22 = vadd.f32 %v369_v20, %v533_v51  ;;  %v264_v23 = vadd.f32 %v385_v21, %v533_v51  ;;  %v191_v24 = vpop.f32.mrb[9].mxu0  ;;  %v255_v25 = vpop.f32.mrb[9].mxu1 }
  0xed   :  { %v192_v26 = vadd.f32 %v533_v51, %v191_v24  ;;  %v256_v27 = vadd.f32 %v533_v51, %v255_v25  ;;  %v370_v28 = vpop.f32.mrb[10].mxu0  ;;  %v386_v29 = vpop.f32.mrb[10].mxu1 }
  0xee   :  { %297 = vst.msk [vmem:[%s698_s3 + $0x50] sm:$0xff] %vm286_vm2, %v200_v22  ;;  %313 = vst.msk [vmem:[%s698_s3 + $0xd0] sm:$0xff] %vm286_vm2, %v264_v23  ;;  %v203_v30 = vadd.f32 %v370_v28, %v533_v51  ;;  %v267_v31 = vadd.f32 %v386_v29, %v533_v51  ;;  %v194_v32 = vpop.f32.mrb[11].mxu0  ;;  %v258_v33 = vpop.f32.mrb[11].mxu1 }
  0xef   :  { %295 = vst.msk [vmem:[%s698_s3 + $0x40] sm:$0xff] %vm286_vm2, %v192_v26  ;;  %311 = vst.msk [vmem:[%s698_s3 + $0xc0] sm:$0xff] %vm286_vm2, %v256_v27  ;;  %v195_v34 = vadd.f32 %v533_v51, %v194_v32  ;;  %v259_v35 = vadd.f32 %v533_v51, %v258_v33 }
  0xf0   :  { %298 = vst.msk [vmem:[%s698_s3 + $0x58] sm:$0xff] %vm286_vm2, %v203_v30  ;;  %314 = vst.msk [vmem:[%s698_s3 + $0xd8] sm:$0xff] %vm286_vm2, %v267_v31 }
  0xf1   :  { %296 = vst.msk [vmem:[%s698_s3 + $0x48] sm:$0xff] %vm286_vm2, %v195_v34  ;;  %312 = vst.msk [vmem:[%s698_s3 + $0xc8] sm:$0xff] %vm286_vm2, %v259_v35 }
  0xf3   :  { %v373_v36 = vpop.f32.mrb[12].mxu0  ;;  %v389_v37 = vpop.f32.mrb[12].mxu1 }
  0xf4   :  { %v216_v38 = vadd.f32 %v373_v36, %v533_v51  ;;  %v280_v39 = vadd.f32 %v389_v37, %v533_v51  ;;  %v207_v40 = vpop.f32.mrb[13].mxu0  ;;  %v271_v41 = vpop.f32.mrb[13].mxu1 }
  0xf5   :  { %v208_v42 = vadd.f32 %v533_v51, %v207_v40  ;;  %v272_v43 = vadd.f32 %v533_v51, %v271_v41  ;;  %v374_v44 = vpop.f32.mrb[14].mxu0  ;;  %v390_v45 = vpop.f32.mrb[14].mxu1 }
  0xf6   :  { %301 = vst.msk [vmem:[%s698_s3 + $0x70] sm:$0xff] %vm286_vm2, %v216_v38  ;;  %317 = vst.msk [vmem:[%s698_s3 + $0xf0] sm:$0xff] %vm286_vm2, %v280_v39  ;;  %v219_v46 = vadd.f32 %v374_v44, %v533_v51  ;;  %v283_v47 = vadd.f32 %v390_v45, %v533_v51  ;;  %v210_v48 = vpop.f32.mrb[15].mxu0  ;;  %v274_v49 = vpop.f32.mrb[15].mxu1 }
  0xf7   :  { %299 = vst.msk [vmem:[%s698_s3 + $0x60] sm:$0xff] %vm286_vm2, %v208_v42  ;;  %315 = vst.msk [vmem:[%s698_s3 + $0xe0] sm:$0xff] %vm286_vm2, %v272_v43  ;;  %v211_v50 = vadd.f32 %v533_v51, %v210_v48  ;;  %v275_v52 = vadd.f32 %v533_v51, %v274_v49 }
  0xf8   :  { %302 = vst.msk [vmem:[%s698_s3 + $0x78] sm:$0xff] %vm286_vm2, %v219_v46  ;;  %318 = vst.msk [vmem:[%s698_s3 + $0xf8] sm:$0xff] %vm286_vm2, %v283_v47 }
  0xf9   :  { %300 = vst.msk [vmem:[%s698_s3 + $0x68] sm:$0xff] %vm286_vm2, %v211_v50  ;;  %316 = vst.msk [vmem:[%s698_s3 + $0xe8] sm:$0xff] %vm286_vm2, %v275_v52 }

// kernel: swin_forward.56
= control target key start
LH: loop header
LB: loop body
LE: loop exit
PB: predicated region body
PF: predicated region fallthrough
CT: control target
= control target key end

     0   :  { %vm40_vm0 = vcmask 523264   ;;  %s202_s1 = inlined_call_operand.vmem [shape: f32[64,64], index: 1, kind: input, shape index: {}]   ;;  %s203_s0 = inlined_call_operand.vmem [shape: f32[32,64], index: 0, kind: input, shape index: {}]   ;;  %s204_s2 = inlined_call_operand.vmem [shape: f32[1,64], index: 2, kind: input, shape index: {}]   ;;  %s205_s3 = inlined_call_operand.vmem [shape: f32[32,64], index: 3, kind: output, shape index: {}]  }
   0x1   :  { %v21_v0 = vld [vmem:[%s202_s1] sm:$0xff]  ;;  %v22_v1 = vld [vmem:[%s202_s1 + $0x8] sm:$0xff]  ;;  %v23_v2 = vld [vmem:[%s202_s1 + $0x10] sm:$0xff] }
   0x2   :  { %v29_v3 = vpack.c.bf16 %v22_v1, %v21_v0  ;;  %v24_v4 = vld [vmem:[%s202_s1 + $0x18] sm:$0xff]  ;;  %v25_v6 = vld [vmem:[%s202_s1 + $0x20] sm:$0xff]  ;;  %v26_v7 = vld [vmem:[%s202_s1 + $0x28] sm:$0xff] }
   0x3   :  { %v30_v5 = vpack.c.bf16 %v24_v4, %v23_v2  ;;  %v15_v8 = vld [vmem:[%s203_s0] sm:$0xff]  ;;  %v16_v9 = vld [vmem:[%s203_s0 + $0x8] sm:$0xff]  ;;  %v31_v11 = vpack.c.bf16 %v26_v7, %v25_v6  ;;  %v27_v12 = vld [vmem:[%s202_s1 + $0x30] sm:$0xff] }
   0x4   :  { %113 = vmatprep.subr.bf16.mxu0 %v29_v3  ;;  %v19_v10 = vpack.c.bf16 %v16_v9, %v15_v8  ;;  %v28_v13 = vld [vmem:[%s202_s1 + $0x38] sm:$0xff]  ;;  %v17_v15 = vld [vmem:[%s203_s0 + $0x10] sm:$0xff]  ;;  %v104_v18 = vld [vmem:[%s204_s2] ss:$0 sm:$0xff] }
   0x5   :  { %114 = vmatpush3.bf16.msra.mxu0 %v29_v3  ;;  %v32_v14 = vpack.c.bf16 %v28_v13, %v27_v12  ;;  %v18_v16 = vld [vmem:[%s203_s0 + $0x18] sm:$0xff] }
   0x6   :  { %115 = vmatprep.subr.bf16.mxu0 %v30_v5  ;;  %121 = vmatprep.mubr.msk.bf16.mxu0 %vm40_vm0, %v19_v10  ;;  %v20_v17 = vpack.c.bf16 %v18_v16, %v17_v15 }
   0x9   :  { %116 = vmatpush3.bf16.msra.mxu0 %v30_v5 }
   0xa   :  { %117 = vmatprep.subr.bf16.mxu0 %v31_v11 }
   0xd   :  { %118 = vmatpush3.bf16.msra.mxu0 %v31_v11 }
   0xe   :  { %119 = vmatprep.subr.bf16.mxu0 %v32_v14 }
  0x11   :  { %120 = vmatpush3.bf16.msra.mxu0 %v32_v14 }
  0x14   :  { %122 = vmatmul.mubr.msk.bf16.vlgmr.msra.gmra.mrb[0].mxu0 %vm40_vm0, %v20_v17 }
  0xe7   :  { %v123_v19 = vpop.f32.mrb[0].mxu0 }
  0xe8   :  { %v90_v20 = vadd.f32 %v123_v19, %v104_v18  ;;  %v81_v21 = vpop.f32.mrb[1].mxu0 }
  0xe9   :  { %v82_v22 = vadd.f32 %v104_v18, %v81_v21  ;;  %v124_v23 = vpop.f32.mrb[2].mxu0 }
  0xea   :  { %98 = vst.msk [vmem:[%s205_s3 + $0x10] sm:$0xff] %vm40_vm0, %v90_v20  ;;  %v93_v24 = vadd.f32 %v124_v23, %v104_v18  ;;  %v84_v25 = vpop.f32.mrb[3].mxu0 }
  0xeb   :  { %96 = vst.msk [vmem:[%s205_s3] sm:$0xff] %vm40_vm0, %v82_v22  ;;  %v85_v26 = vadd.f32 %v104_v18, %v84_v25 }
  0xec   :  { %99 = vst.msk [vmem:[%s205_s3 + $0x18] sm:$0xff] %vm40_vm0, %v93_v24 }
  0xed   :  { %97 = vst.msk [vmem:[%s205_s3 + $0x8] sm:$0xff] %vm40_vm0, %v85_v26 }

// kernel: swin_forward.55
= control target key start
LH: loop header
LB: loop body
LE: loop exit
PB: predicated region body
PF: predicated region fallthrough
CT: control target
= control target key end

     0   :  { %s913_s9 = smov 0   ;;  %s1045_s0 = inlined_call_operand.vmem [shape: f32[2,16,192], index: 0, kind: input, shape index: {}]   ;;  %s1046_s1 = inlined_call_operand.vmem [shape: f32[1,4,16,16], index: 1, kind: input, shape index: {}]   ;;  %s1047_s2 = inlined_call_operand.vmem [shape: f32[2,16,64], index: 2, kind: output, shape index: {}]  }
   0x1 LB: > { %s747_s10 = sadd.s32 4294967295, %s887_s9   ;;  %p751_p0 = scmp.ge.s32.totalorder %s887_s9, 1  ;;  %s887_s9 = sphi %s913_s9, %s12_s9  }
   0x2   : > { %p112_p1 = scmp.lt.s32.totalorder %s887_s9, 3 }
   0x4   : > { %p113_p2 = pnand %p751_p0, %p112_p1 }
   0x5   : > { %p134_p3 = scmp.lt.s32.totalorder (!%p113_p2), %s747_s10, 1  ;;  %v889_v0 = vmov (!%p113_p2), 0.0   ;;  %vm890_vm0 = vmmov (!%p113_p2), 0   ;;  %s891_s15 = smov (!%p113_p2), 64   ;;  %vm162_vm1 = vcmask (!%p113_p2), 130048   ;;  %v149_v7 = vld [vmem:[%s1046_s1] sm:$0xff] (!%p113_p2) }
   0x6   : > { %116 = sbr.rel (%p113_p2) target bundleno = 1614 (0x64e), region = 28  ;;  %784 = vmatprep.subr.bf16.mxu0 (!%p113_p2), %v889_v0  ;;  %786 = vmatprep.mubr.msk.bf16.mxu0 (!%p113_p2), %vm890_vm0, %v889_v0  ;;  %v150_v11 = vld [vmem:[%s1046_s1 + $0x8] sm:$0xff] (!%p113_p2)  ;;  %s892_s20 = smov (!%p113_p2), 48   ;;  %v151_v52 = vld [vmem:[%s1046_s1 + $0x10] sm:$0xff] (!%p113_p2)  ;;  %v152_v56 = vld [vmem:[%s1046_s1 + $0x18] sm:$0xff] (!%p113_p2)  ;;  %vm683_vm2 = vcmask (!%p113_p2), 261120  }
   0x7   : > { %790 = vmatprep.subr.bf16.mxu1 (!%p113_p2), %v889_v0  ;;  %792 = vmatprep.mubr.msk.bf16.mxu1 (!%p113_p2), %vm890_vm0, %v889_v0  ;;  %s893_s21 = smov (!%p113_p2), 96   ;;  %s894_s22 = smov (!%p113_p2), 112   ;;  %vm686_vm3 = vcmask (!%p113_p2), 392192   ;;  %vm689_vm4 = vcmask (!%p113_p2), 523264  }
   0x8   : > { %s895_s23 = smov (!%p113_p2), 32   ;;  %s896_s24 = smov (!%p113_p2), 16  }
   0x9   : > { %s897_s25 = smov (!%p113_p2), 80  }
   0xd   : > { %s1049_s10 = smov (!%p134_p3, %s747_s10), 1 }
   0xe   : > { %s766_s11 = sshll.u32 %s1049_s10, 5  ;;  %s767_s12 = sshll.u32 %s1049_s10, 4 }
   0xf   : > { %s933_s14 = scalar_lea.vmem %s1045_s0, %s766_s11 }
  0x10   : > { %v145_v1 = vld [vmem:[%s933_s14] sm:$0xff]  ;;  %v147_v2 = vld [vmem:[%s933_s14 + $0x10] sm:$0xff]  ;;  %v146_v28 = vld [vmem:[%s933_s14 + $0x8] sm:$0xff] }
  0x11   : > { %v157_v3 = vpack.c.bf16 %v147_v2, %v145_v1  ;;  %v148_v29 = vld [vmem:[%s933_s14 + $0x18] sm:$0xff]  ;;  %v153_v1 = vld [vmem:[%s1046_s1 + $0x20] sm:$0xff] }
  0x12   : > { %v956_v30 = vpack.c.bf16 %v148_v29, %v146_v28 }
  0x13   : > { %160 = vrot.lane.b32.xlu0 %v157_v3, %s891_s15  ;;  %s143_s15 = scalar_lea.vmem %s1047_s2, %s767_s12 }
  0x14   : > { %791 = vmatpush3.bf16.msra.mxu1 %v956_v30 }
  0x15   : > { %796 = vmatprep.subr.bf16.mxu1 %v889_v0 }
  0x85   : > { %v161_v4 = vpop.permute.xlu0 %160 }
  0x86   : > { %v167_v5 = vsel %vm162_vm1, %v161_v4, 0 }
  0x87   : > { %785 = vmatpush3.bf16.xpose.msra.mxu0 %v167_v5  ;;  %v154_v5 = vld [vmem:[%s1046_s1 + $0x28] sm:$0xff] }
  0x88   : > { %802 = vmatprep.subr.bf16.mxu0 %v889_v0 }
  0x8e   : > { %787 = vmatmul.mubr.msk.bf16.vlgmr.msra.gmra.mrb[0].mxu0 %vm162_vm1, %v157_v3 }
  0x8f   : > { %804 = vmatprep.mubr.msk.bf16.mxu0 %vm890_vm0, %v889_v0 }
 0x161   : > { %v203_v6 = vpop.f32.mrb[0].mxu0 }
 0x162   : > { %v210_v8 = vmul.f32 0.25, %v203_v6  ;;  %v788_v9 = vpop.f32.mrb[1].mxu0 }
 0x163   : > { %v206_v10 = vpop.f32.mrb[2].mxu0 }
 0x164   : > { %v211_v12 = vmul.f32 0.25, %v206_v10  ;;  %v789_v13 = vpop.f32.mrb[3].mxu0  ;;  %v212_v14 = vadd.f32 %v210_v8, %v149_v7 }
 0x166   : > { %v214_v15 = vsel %vm162_vm1, %v212_v14, -inf  ;;  %v213_v16 = vadd.f32 %v211_v12, %v150_v11  ;;  %v155_v12 = vld [vmem:[%s1046_s1 + $0x30] sm:$0xff] }
 0x167   : > { %215 = vmax.xlane.f32.xlu0 %v214_v15 }
 0x168   : > { %v217_v17 = vsel %vm162_vm1, %v213_v16, -inf }
 0x169   : > { %218 = vmax.xlane.f32.xlu1 %v217_v17  ;;  %v156_v17 = vld [vmem:[%s1046_s1 + $0x38] sm:$0xff] }
 0x17a   : > { %283 = vrot.lane.b32.xlu1 %v157_v3, %s892_s20 }
 0x17d   : > { %407 = vrot.lane.b32.xlu0 %v157_v3, %s893_s21 }
 0x1f4   : > { %v216_v18 = vpop.xlane.xlu0 %215 }
 0x1f5   : > { %v220_v19 = vsub.f32 %v212_v14, %v216_v18 }
 0x1f6   : > { %v219_v20 = vpop.xlane.xlu1 %218 }
 0x1f7   : > { %v222_v21 = vmul.f32 1.442695, %v220_v19  ;;  %v221_v22 = vsub.f32 %v213_v16, %v219_v20 }
 0x1f8   : > { %v408_v44 = vpop.permute.xlu0 %407 }
 0x1f9   : > { %849 = vpow2.f32 %v222_v21  ;;  %v224_v23 = vmul.f32 1.442695, %v221_v22 }
 0x1fa   : > { %v284_v31 = vpop.permute.xlu1 %283 }
 0x1fb   : > { %851 = vpow2.f32 %v224_v23  ;;  %v289_v40 = vsel %vm162_vm1, %v284_v31, 0 }
 0x203   : > { %v850_v24 = vpop.eup %849 }
 0x204   : > { %v226_v25 = vsel %vm162_vm1, %v850_v24, 0.0 }
 0x205   : > { %v852_v26 = vpop.eup %851  ;;  %227 = vadd.xlane.f32.xlu1 %v226_v25 }
 0x206   : > { %v229_v27 = vsel %vm162_vm1, %v852_v26, 0.0 }
 0x209   : > { %230 = vadd.xlane.f32.xlu1 %v229_v27 }
 0x21a   : > { %281 = vrot.lane.b32.xlu1 %v157_v3, %s894_s22 }
 0x21e   : > { %409 = vrot.lane.b32.xlu1 %v157_v3, %s895_s23 }
 0x222   : > { %534 = vrot.lane.b32.xlu1 %v157_v3, %s896_s24 }
 0x226   : > { %532 = vrot.lane.b32.xlu1 %v157_v3, %s897_s25 }
 0x292   : > { %v228_v32 = vpop.xlane.xlu1 %227 }
 0x293   : > { %853 = vrcp.f32 %v228_v32 }
 0x296   : > { %v231_v33 = vpop.xlane.xlu1 %230 }
 0x297   : > { %855 = vrcp.f32 %v231_v33 }
 0x29a   : > { %v282_v38 = vpop.permute.xlu1 %281 }
 0x29d   : > { %v854_v34 = vpop.eup %853 }
 0x29e   : > { %v234_v36 = vmul.f32 %v854_v34, %v850_v24  ;;  %v410_v41 = vpop.permute.xlu1 %409 }
 0x29f   : > { %v415_v42 = vsel %vm162_vm1, %v410_v41, 0 }
 0x2a1   : > { %v856_v35 = vpop.eup %855 }
 0x2a2   : > { %v235_v37 = vmul.f32 %v856_v35, %v852_v26  ;;  %v535_v43 = vpop.permute.xlu1 %534 }
 0x2a3   : > { %v540_v45 = vsel %vm162_vm1, %v535_v43, 0 }
 0x2a4   : > { %v236_v39 = vpack.c.bf16 %v235_v37, %v234_v36 }
 0x2a6   : > { %793 = vmatmul.mubr.msk.bf16.vlgmr.msra.gmra.mrb[0].mxu1 %vm162_vm1, %v236_v39  ;;  %v533_v46 = vpop.permute.xlu1 %532 }
 0x2a7   : > { %797 = vmatpush3.bf16.xpose.msra.mxu1 %v289_v40  ;;  %798 = vmatprep.mubr.msk.bf16.mxu1 %vm890_vm0, %v889_v0 }
 0x2a8   : > { %808 = vmatprep.subr.bf16.mxu1 %v889_v0 }
 0x2ae   : > { %799 = vmatmul.mubr.msk.bf16.vlgmr.msra.gmra.mrb[4].mxu1 %vm162_vm1, %v282_v38 }
 0x2af   : > { %809 = vmatpush3.bf16.xpose.msra.mxu1 %v415_v42  ;;  %810 = vmatprep.mubr.msk.bf16.mxu1 %vm890_vm0, %v889_v0 }
 0x2b0   : > { %820 = vmatprep.subr.bf16.mxu1 %v889_v0 }
 0x2b6   : > { %811 = vmatmul.mubr.msk.bf16.vlgmr.msra.gmra.mrb[8].mxu1 %vm162_vm1, %v408_v44 }
 0x2b7   : > { %821 = vmatpush3.bf16.xpose.msra.mxu1 %v540_v45  ;;  %822 = vmatprep.mubr.msk.bf16.mxu1 %vm890_vm0, %v889_v0 }
 0x2be   : > { %823 = vmatmul.mubr.msk.bf16.vlgmr.msra.gmra.mrb[12].mxu1 %vm162_vm1, %v533_v46 }
 0x379   : > { %v979_v47 = vpop.f32.mrb[0].mxu1 }
 0x37a   : > { %v794_v48 = vpop.f32.mrb[1].mxu1 }
 0x37b   : > { %v981_v49 = vpop.f32.mrb[2].mxu1 }
 0x37c   : > { %v795_v50 = vpop.f32.mrb[3].mxu1 }
 0x381   : > { %v325_v51 = vpop.f32.mrb[4].mxu1 }
 0x382   : > { %v332_v53 = vmul.f32 0.25, %v325_v51  ;;  %v800_v54 = vpop.f32.mrb[5].mxu1 }
 0x383   : > { %v328_v55 = vpop.f32.mrb[6].mxu1 }
 0x384   : > { %v333_v57 = vmul.f32 0.25, %v328_v55  ;;  %v801_v58 = vpop.f32.mrb[7].mxu1  ;;  %v334_v59 = vadd.f32 %v332_v53, %v151_v52 }
 0x386   : > { %v336_v60 = vsel %vm162_vm1, %v334_v59, -inf  ;;  %v335_v61 = vadd.f32 %v333_v57, %v152_v56 }
 0x387   : > { %337 = vmax.xlane.f32.xlu1 %v336_v60 }
 0x388   : > { %v339_v62 = vsel %vm162_vm1, %v335_v61, -inf }
 0x389   : > { %340 = vmax.xlane.f32.xlu0 %v339_v62  ;;  %v451_v63 = vpop.f32.mrb[8].mxu1 }
 0x38a   : > { %v458_v2 = vmul.f32 0.25, %v451_v63  ;;  %v812_v3 = vpop.f32.mrb[9].mxu1 }
 0x38b   : > { %v454_v4 = vpop.f32.mrb[10].mxu1 }
 0x38c   : > { %v459_v6 = vmul.f32 0.25, %v454_v4  ;;  %v813_v7 = vpop.f32.mrb[11].mxu1  ;;  %v460_v8 = vadd.f32 %v458_v2, %v153_v1 }
 0x38e   : > { %v462_v9 = vsel %vm162_vm1, %v460_v8, -inf  ;;  %v461_v10 = vadd.f32 %v459_v6, %v154_v5 }
 0x38f   : > { %463 = vmax.xlane.f32.xlu1 %v462_v9 }
 0x390   : > { %v465_v15 = vsel %vm162_vm1, %v461_v10, -inf }
 0x391   : > { %v576_v11 = vpop.f32.mrb[12].mxu1 }
 0x392   : > { %v583_v13 = vmul.f32 0.25, %v576_v11  ;;  %v824_v14 = vpop.f32.mrb[13].mxu1 }
 0x393   : > { %466 = vmax.xlane.f32.xlu1 %v465_v15  ;;  %v579_v16 = vpop.f32.mrb[14].mxu1 }
 0x394   : > { %v584_v18 = vmul.f32 0.25, %v579_v16  ;;  %v585_v19 = vadd.f32 %v583_v13, %v155_v12  ;;  %v825_v20 = vpop.f32.mrb[15].mxu1 }
 0x396   : > { %v587_v21 = vsel %vm162_vm1, %v585_v19, -inf  ;;  %v586_v22 = vadd.f32 %v584_v18, %v156_v17 }
 0x397   : > { %588 = vmax.xlane.f32.xlu0 %v587_v21 }
 0x398   : > { %v590_v23 = vsel %vm162_vm1, %v586_v22, -inf }
 0x399   : > { %591 = vmax.xlane.f32.xlu1 %v590_v23 }
 0x414   : > { %v338_v24 = vpop.xlane.xlu1 %337 }
 0x415   : > { %v342_v25 = vsub.f32 %v334_v59, %v338_v24 }
 0x416   : > { %v341_v26 = vpop.xlane.xlu0 %340 }
 0x417   : > { %v344_v27 = vmul.f32 1.442695, %v342_v25  ;;  %v343_v28 = vsub.f32 %v335_v61, %v341_v26 }
 0x419   : > { %857 = vpow2.f32 %v344_v27  ;;  %v346_v29 = vmul.f32 1.442695, %v343_v28 }
 0x41b   : > { %859 = vpow2.f32 %v346_v29 }
 0x41c   : > { %v464_v31 = vpop.xlane.xlu1 %463 }
 0x41d   : > { %v468_v32 = vsub.f32 %v460_v8, %v464_v31 }
 0x41f   : > { %v470_v33 = vmul.f32 1.442695, %v468_v32 }
 0x420   : > { %v467_v34 = vpop.xlane.xlu1 %466 }
 0x421   : > { %861 = vpow2.f32 %v470_v33  ;;  %v469_v35 = vsub.f32 %v461_v10, %v467_v34 }
 0x423   : > { %v858_v36 = vpop.eup %857  ;;  %v472_v37 = vmul.f32 1.442695, %v469_v35 }
 0x424   : > { %v589_v38 = vpop.xlane.xlu0 %588  ;;  %v348_v39 = vsel %vm162_vm1, %v858_v36, 0.0 }
 0x425   : > { %v860_v40 = vpop.eup %859  ;;  %863 = vpow2.f32 %v472_v37  ;;  %v593_v41 = vsub.f32 %v585_v19, %v589_v38  ;;  %349 = vadd.xlane.f32.xlu0 %v348_v39 }
 0x426   : > { %v351_v42 = vsel %vm162_vm1, %v860_v40, 0.0  ;;  %v592_v52 = vpop.xlane.xlu1 %591 }
 0x427   : > { %v595_v43 = vmul.f32 1.442695, %v593_v41  ;;  %352 = vadd.xlane.f32.xlu1 %v351_v42  ;;  %v594_v53 = vsub.f32 %v586_v22, %v592_v52 }
 0x429   : > { %865 = vpow2.f32 %v595_v43  ;;  %v597_v54 = vmul.f32 1.442695, %v594_v53 }
 0x42b   : > { %v862_v44 = vpop.eup %861  ;;  %867 = vpow2.f32 %v597_v54 }
 0x42c   : > { %v474_v45 = vsel %vm162_vm1, %v862_v44, 0.0 }
 0x42d   : > { %475 = vadd.xlane.f32.xlu0 %v474_v45 }
 0x42f   : > { %v864_v46 = vpop.eup %863 }
 0x430   : > { %v477_v48 = vsel %vm162_vm1, %v864_v46, 0.0 }
 0x431   : > { %478 = vadd.xlane.f32.xlu1 %v477_v48 }
 0x433   : > { %v866_v50 = vpop.eup %865 }
 0x434   : > { %v599_v51 = vsel %vm162_vm1, %v866_v50, 0.0 }
 0x435   : > { %600 = vadd.xlane.f32.xlu0 %v599_v51  ;;  %v868_v55 = vpop.eup %867 }
 0x436   : > { %v602_v56 = vsel %vm162_vm1, %v868_v55, 0.0 }
 0x442   : > { %485 = vrot.lane.b32.xlu1 %v956_v30, %s893_s21 }
 0x44b   : > { %360 = vrot.lane.b32.xlu0 %v956_v30, %s894_s22 }
 0x466   : > { %603 = vadd.xlane.f32.xlu1 %v602_v56 }
 0x477   : > { %610 = vrot.lane.b32.xlu1 %v956_v30, %s897_s25 }
 0x4b2   : > { %v350_v58 = vpop.xlane.xlu0 %349 }
 0x4b4   : > { %v353_v57 = vpop.xlane.xlu1 %352 }
 0x4b5   : > { %869 = vrcp.f32 %v353_v57 }
 0x4b6   : > { %871 = vrcp.f32 %v350_v58 }
 0x4ba   : > { %v476_v59 = vpop.xlane.xlu0 %475 }
 0x4be   : > { %v479_v60 = vpop.xlane.xlu1 %478 }
 0x4bf   : > { %873 = vrcp.f32 %v479_v60  ;;  %v870_v61 = vpop.eup %869 }
 0x4c0   : > { %875 = vrcp.f32 %v476_v59  ;;  %v872_v63 = vpop.eup %871  ;;  %v357_v1 = vmul.f32 %v870_v61, %v860_v40 }
 0x4c1   : > { %v356_v2 = vmul.f32 %v872_v63, %v858_v36 }
 0x4c2   : > { %v601_v62 = vpop.xlane.xlu0 %600  ;;  %v486_v30 = vpop.permute.xlu1 %485 }
 0x4c3   : > { %v358_v4 = vpack.c.bf16 %v357_v1, %v356_v2  ;;  %877 = vrcp.f32 %v601_v62 }
 0x4c6   : > { %v361_v3 = vpop.permute.xlu0 %360 }
 0x4c7   : > { %803 = vmatpush3.bf16.msra.mxu0 %v361_v3 }
 0x4c8   : > { %814 = vmatprep.subr.bf16.mxu0 %v889_v0 }
 0x4c9   : > { %v874_v5 = vpop.eup %873 }
 0x4ca   : > { %805 = vmatmul.mubr.msk.bf16.vlgmr.msra.gmra.mrb[4].mxu0 %vm162_vm1, %v358_v4  ;;  %v876_v6 = vpop.eup %875  ;;  %v483_v7 = vmul.f32 %v874_v5, %v864_v46 }
 0x4cb   : > { %815 = vmatpush3.bf16.msra.mxu0 %v486_v30  ;;  %816 = vmatprep.mubr.msk.bf16.mxu0 %vm890_vm0, %v889_v0  ;;  %v482_v8 = vmul.f32 %v876_v6, %v862_v44 }
 0x4cc   : > { %826 = vmatprep.subr.bf16.mxu0 %v889_v0 }
 0x4cd   : > { %v484_v9 = vpack.c.bf16 %v483_v7, %v482_v8  ;;  %v878_v12 = vpop.eup %877 }
 0x4ce   : > { %v607_v14 = vmul.f32 %v878_v12, %v866_v50 }
 0x4d2   : > { %817 = vmatmul.mubr.msk.bf16.vlgmr.msra.gmra.mrb[8].mxu0 %vm162_vm1, %v484_v9 }
 0x4d3   : > { %828 = vmatprep.mubr.msk.bf16.mxu0 %vm890_vm0, %v889_v0 }
 0x4f3   : > { %v604_v10 = vpop.xlane.xlu1 %603 }
 0x4f4   : > { %879 = vrcp.f32 %v604_v10 }
 0x4f7   : > { %v611_v11 = vpop.permute.xlu1 %610 }
 0x4f8   : > { %827 = vmatpush3.bf16.msra.mxu0 %v611_v11 }
 0x4fe   : > { %v880_v13 = vpop.eup %879 }
 0x4ff   : > { %v608_v15 = vmul.f32 %v880_v13, %v868_v55 }
 0x501   : > { %v609_v16 = vpack.c.bf16 %v608_v15, %v607_v14 }
 0x503   : > { %829 = vmatmul.mubr.msk.bf16.vlgmr.msra.gmra.mrb[12].mxu0 %vm162_vm1, %v609_v16 }
 0x59d   : > { %v400_v17 = vpop.f32.mrb[4].mxu0 }
 0x59e   : > { %659 = vrot.lane.b32.xlu0 %v400_v17, %s896_s24  ;;  %v806_v18 = vpop.f32.mrb[5].mxu0 }
 0x59f   : > { %v403_v19 = vpop.f32.mrb[6].mxu0 }
 0x5a0   : > { %661 = vrot.lane.b32.xlu1 %v403_v19, %s896_s24  ;;  %v807_v0 = vpop.f32.mrb[7].mxu0 }
 0x5a5   : > { %v525_v20 = vpop.f32.mrb[8].mxu0 }
 0x5a6   : > { %667 = vrot.lane.b32.xlu0 %v525_v20, %s895_s23  ;;  %v818_v21 = vpop.f32.mrb[9].mxu0 }
 0x5a7   : > { %v528_v22 = vpop.f32.mrb[10].mxu0 }
 0x5a8   : > { %669 = vrot.lane.b32.xlu1 %v528_v22, %s895_s23  ;;  %v819_v23 = vpop.f32.mrb[11].mxu0 }
 0x5d6   : > { %v650_v24 = vpop.f32.mrb[12].mxu0 }
 0x5d7   : > { %675 = vrot.lane.b32.xlu0 %v650_v24, %s892_s20  ;;  %v830_v25 = vpop.f32.mrb[13].mxu0 }
 0x5d8   : > { %v653_v26 = vpop.f32.mrb[14].mxu0 }
 0x5d9   : > { %677 = vrot.lane.b32.xlu1 %v653_v26, %s892_s20  ;;  %v831_v27 = vpop.f32.mrb[15].mxu0 }
 0x610   : > { %v660_v28 = vpop.permute.xlu0 %659 }
 0x611   : > { %v681_v33 = vsel %vm162_vm1, %v979_v47, %v660_v28 }
 0x612   : > { %v662_v29 = vpop.permute.xlu1 %661 }
 0x613   : > { %v682_v36 = vsel %vm162_vm1, %v981_v49, %v662_v29 }
 0x618   : > { %v668_v31 = vpop.permute.xlu0 %667 }
 0x619   : > { %v684_v34 = vsel %vm683_vm2, %v681_v33, %v668_v31 }
 0x61a   : > { %v670_v32 = vpop.permute.xlu1 %669 }
 0x61b   : > { %v685_v38 = vsel %vm683_vm2, %v682_v36, %v670_v32 }
 0x649   : > { %v676_v35 = vpop.permute.xlu0 %675 }
 0x64a   : > { %v687_v37 = vsel %vm686_vm3, %v684_v34, %v676_v35 }
 0x64b   : > { %690 = vst.msk [vmem:[%s143_s15] sm:$0xff] %vm689_vm4, %v687_v37  ;;  %v678_v39 = vpop.permute.xlu1 %677 }
 0x64c   : > { %v688_v40 = vsel %vm686_vm3, %v685_v38, %v678_v39 }
 0x64d   : > { %691 = vst.msk [vmem:[%s143_s15 + $0x8] sm:$0xff] %vm689_vm4, %v688_v40 }
 0x64e PF: > { %s12_s9 = sadd.s32 1, %s887_s9  }
 0x64f   : > { %p9_p4 = scmp.ge.s32.totalorder %s12_s9, 4  }
 0x651   :  { %11 = sbr.rel (!%p9_p4) target bundleno = 1 (0x1), region = 58 }

// kernel: swin_forward.57
= control target key start
LH: loop header
LB: loop body
LE: loop exit
PB: predicated region body
PF: predicated region fallthrough
CT: control target
= control target key end

     0   :  { %vm25_vm0 = vcmask 523264   ;;  %s362_s0 = inlined_call_operand.vmem [shape: f32[32,64], index: 0, kind: input, shape index: {}]   ;;  %s363_s3 = inlined_call_operand.vmem [shape: f32[64,128], index: 3, kind: input, shape index: {}]   ;;  %s364_s1 = inlined_call_operand.vmem [shape: f32[1,64], index: 1, kind: input, shape index: {}]   ;;  %s365_s2 = inlined_call_operand.vmem [shape: f32[1,64], index: 2, kind: input, shape index: {}]   ;;  %s366_s4 = inlined_call_operand.vmem [shape: f32[1,128], index: 4, kind: input, shape index: {}]   ;;  %s367_s5 = inlined_call_operand.vmem [shape: f32[32,128], index: 5, kind: output, shape index: {}]  }
   0x1   :  { %v21_v0 = vld [vmem:[%s362_s0] sm:$0xff]  ;;  %v23_v1 = vld [vmem:[%s362_s0 + $0x10] sm:$0xff]  ;;  %v22_v2 = vld [vmem:[%s362_s0 + $0x8] sm:$0xff] }
   0x2   :  { %v26_v3 = vsel %vm25_vm0, %v21_v0, 0.0  ;;  %v32_v4 = vsel %vm25_vm0, %v23_v1, 0.0  ;;  %v24_v5 = vld [vmem:[%s362_s0 + $0x18] sm:$0xff]  ;;  %v29_v6 = vsel %vm25_vm0, %v22_v2, 0.0  ;;  %v103_v28 = vld [vmem:[%s363_s3] sm:$0xff]  ;;  %v104_v29 = vld [vmem:[%s363_s3 + $0x8] sm:$0xff] }
   0x3   :  { %27 = vadd.xlane.f32.xlu0 %v26_v3  ;;  %33 = vadd.xlane.f32.xlu1 %v32_v4  ;;  %v35_v7 = vsel %vm25_vm0, %v24_v5, 0.0  ;;  %v111_v30 = vpack.c.bf16 %v104_v29, %v103_v28  ;;  %v105_v31 = vld [vmem:[%s363_s3 + $0x10] sm:$0xff]  ;;  %v106_v32 = vld [vmem:[%s363_s3 + $0x18] sm:$0xff]  ;;  %v107_v34 = vld [vmem:[%s363_s3 + $0x20] sm:$0xff] }
   0x4   :  { %v112_v33 = vpack.c.bf16 %v106_v32, %v105_v31  ;;  %v108_v35 = vld [vmem:[%s363_s3 + $0x28] sm:$0xff]  ;;  %v109_v37 = vld [vmem:[%s363_s3 + $0x30] sm:$0xff]  ;;  %v110_v38 = vld [vmem:[%s363_s3 + $0x38] sm:$0xff] }
   0x5   :  { %232 = vmatprep.subr.bf16.mxu0 %v111_v30  ;;  %v113_v36 = vpack.c.bf16 %v108_v35, %v107_v34  ;;  %v114_v39 = vpack.c.bf16 %v110_v38, %v109_v37  ;;  %v221_v54 = vld [vmem:[%s364_s1] ss:$0 sm:$0xff] }
   0x6   :  { %233 = vmatpush3.bf16.msra.mxu0 %v111_v30  ;;  %v222_v60 = vld [vmem:[%s365_s2] ss:$0 sm:$0xff] }
   0x7   :  { %30 = vadd.xlane.f32.xlu0 %v29_v6  ;;  %36 = vadd.xlane.f32.xlu1 %v35_v7 }
   0x8   :  { %234 = vmatprep.subr.bf16.mxu0 %v112_v33 }
   0xa   :  { %235 = vmatpush3.bf16.msra.mxu0 %v112_v33 }
   0xb   :  { %236 = vmatprep.subr.bf16.mxu0 %v113_v36 }
   0xe   :  { %237 = vmatpush3.bf16.msra.mxu0 %v113_v36 }
   0xf   :  { %238 = vmatprep.subr.bf16.mxu0 %v114_v39 }
  0x12   :  { %239 = vmatpush3.bf16.msra.mxu0 %v114_v39 }
  0x90   :  { %v28_v8 = vpop.xlane.xlu0 %27  ;;  %v34_v9 = vpop.xlane.xlu1 %33 }
  0x91   :  { %v39_v10 = vmul.f32 0.015625, %v28_v8  ;;  %v41_v11 = vmul.f32 0.015625, %v34_v9  ;;  %v223_v8 = vld [vmem:[%s366_s4] ss:$0 sm:$0xff] }
  0x93   :  { %v43_v12 = vsub.f32 %v21_v0, %v39_v10  ;;  %v306_v13 = vsub.f32 %v23_v1, %v41_v11 }
  0x94   :  { %v31_v14 = vpop.xlane.xlu0 %30  ;;  %v37_v15 = vpop.xlane.xlu1 %36 }
  0x95   :  { %v40_v16 = vmul.f32 0.015625, %v31_v14  ;;  %v42_v17 = vmul.f32 0.015625, %v37_v15  ;;  %v47_v18 = vmul.f32 %v43_v12, %v43_v12  ;;  %v49_v19 = vmul.f32 %v306_v13, %v306_v13 }
  0x97   :  { %v44_v20 = vsub.f32 %v22_v2, %v40_v16  ;;  %v46_v21 = vsub.f32 %v24_v5, %v42_v17  ;;  %v51_v22 = vsel %vm25_vm0, %v47_v18, 0.0  ;;  %v57_v23 = vsel %vm25_vm0, %v49_v19, 0.0 }
  0x98   :  { %52 = vadd.xlane.f32.xlu0 %v51_v22 }
  0x99   :  { %v48_v24 = vmul.f32 %v44_v20, %v44_v20  ;;  %v50_v25 = vmul.f32 %v46_v21, %v46_v21 }
  0x9b   :  { %v54_v26 = vsel %vm25_vm0, %v48_v24, 0.0  ;;  %v60_v27 = vsel %vm25_vm0, %v50_v25, 0.0 }
  0x9c   :  { %58 = vadd.xlane.f32.xlu0 %v57_v23  ;;  %55 = vadd.xlane.f32.xlu1 %v54_v26 }
  0xa0   :  { %61 = vadd.xlane.f32.xlu1 %v60_v27 }
 0x125   :  { %v53_v40 = vpop.xlane.xlu0 %52 }
 0x126   :  { %v63_v41 = vmul.f32 0.015625, %v53_v40 }
 0x128   :  { %v67_v42 = vadd.f32 1e-05, %v63_v41 }
 0x129   :  { %v56_v43 = vpop.xlane.xlu1 %55  ;;  %v59_v44 = vpop.xlane.xlu0 %58 }
 0x12a   :  { %244 = vrsqrt.f32 %v67_v42  ;;  %v64_v45 = vmul.f32 0.015625, %v56_v43  ;;  %v65_v46 = vmul.f32 0.015625, %v59_v44 }
 0x12c   :  { %v68_v47 = vadd.f32 1e-05, %v64_v45  ;;  %v69_v48 = vadd.f32 1e-05, %v65_v46 }
 0x12d   :  { %v62_v49 = vpop.xlane.xlu1 %61 }
 0x12e   :  { %246 = vrsqrt.f32 %v68_v47  ;;  %v66_v50 = vmul.f32 0.015625, %v62_v49 }
 0x12f   :  { %248 = vrsqrt.f32 %v69_v48 }
 0x130   :  { %v70_v51 = vadd.f32 1e-05, %v66_v50 }
 0x132   :  { %250 = vrsqrt.f32 %v70_v51 }
 0x134   :  { %v245_v52 = vpop.eup %244 }
 0x135   :  { %v75_v53 = vmul.f32 %v245_v52, %v43_v12 }
 0x137   :  { %v86_v58 = vmul.f32 %v221_v54, %v75_v53 }
 0x138   :  { %v247_v55 = vpop.eup %246 }
 0x139   :  { %v249_v56 = vpop.eup %248  ;;  %v76_v57 = vmul.f32 %v247_v55, %v44_v20  ;;  %v97_v0 = vadd.f32 %v222_v60, %v86_v58 }
 0x13a   :  { %v77_v59 = vmul.f32 %v249_v56, %v306_v13 }
 0x13b   :  { %v87_v61 = vmul.f32 %v221_v54, %v76_v57 }
 0x13c   :  { %v251_v62 = vpop.eup %250  ;;  %v88_v2 = vmul.f32 %v221_v54, %v77_v59 }
 0x13d   :  { %v78_v63 = vmul.f32 %v251_v62, %v46_v21  ;;  %v98_v1 = vadd.f32 %v222_v60, %v87_v61 }
 0x13e   :  { %v99_v5 = vadd.f32 %v222_v60, %v88_v2 }
 0x13f   :  { %v101_v3 = vpack.c.bf16 %v98_v1, %v97_v0  ;;  %v89_v4 = vmul.f32 %v221_v54, %v78_v63 }
 0x141   :  { %240 = vmatprep.mubr.msk.bf16.mxu0 %vm25_vm0, %v101_v3  ;;  %v100_v6 = vadd.f32 %v222_v60, %v89_v4 }
 0x143   :  { %v102_v7 = vpack.c.bf16 %v100_v6, %v99_v5 }
 0x145   :  { %241 = vmatmul.mubr.msk.bf16.vlgmr.msra.gmra.mrb[0].mxu0 %vm25_vm0, %v102_v7 }
 0x218   :  { %v242_v9 = vpop.f32.mrb[0].mxu0 }
 0x219   :  { %v171_v10 = vadd.f32 %v242_v9, %v223_v8  ;;  %v162_v11 = vpop.f32.mrb[1].mxu0 }
 0x21a   :  { %v163_v12 = vadd.f32 %v223_v8, %v162_v11  ;;  %v243_v13 = vpop.f32.mrb[2].mxu0 }
 0x21b   :  { %v183_v14 = vmul.f32 0.044715, %v171_v10  ;;  %v174_v15 = vadd.f32 %v243_v13, %v223_v8  ;;  %v165_v16 = vpop.f32.mrb[3].mxu0  ;;  %v179_v39 = vmul.f32 0.5, %v171_v10 }
 0x21c   :  { %v181_v17 = vmul.f32 0.044715, %v163_v12  ;;  %v166_v18 = vadd.f32 %v223_v8, %v165_v16  ;;  %v177_v42 = vmul.f32 0.5, %v163_v12 }
 0x21d   :  { %v187_v19 = vmul.f32 %v183_v14, %v171_v10  ;;  %v184_v20 = vmul.f32 0.044715, %v174_v15  ;;  %v180_v46 = vmul.f32 0.5, %v174_v15 }
 0x21e   :  { %v185_v21 = vmul.f32 %v181_v17, %v163_v12  ;;  %v182_v22 = vmul.f32 0.044715, %v166_v18  ;;  %v178_v49 = vmul.f32 0.5, %v166_v18 }
 0x21f   :  { %v191_v23 = vmul.f32 %v187_v19, %v171_v10  ;;  %v188_v24 = vmul.f32 %v184_v20, %v174_v15 }
 0x220   :  { %v189_v25 = vmul.f32 %v185_v21, %v163_v12  ;;  %v186_v26 = vmul.f32 %v182_v22, %v166_v18 }
 0x221   :  { %v195_v27 = vadd.f32 %v191_v23, %v171_v10  ;;  %v192_v28 = vmul.f32 %v188_v24, %v174_v15 }
 0x222   :  { %v193_v29 = vadd.f32 %v189_v25, %v163_v12  ;;  %v190_v30 = vmul.f32 %v186_v26, %v166_v18 }
 0x223   :  { %v199_v31 = vmul.f32 0.7978846, %v195_v27  ;;  %v196_v32 = vadd.f32 %v192_v28, %v174_v15 }
 0x224   :  { %v197_v33 = vmul.f32 0.7978846, %v193_v29  ;;  %v194_v34 = vadd.f32 %v190_v30, %v166_v18 }
 0x225   :  { %252 = vtanh.f32 %v199_v31  ;;  %v200_v35 = vmul.f32 0.7978846, %v196_v32 }
 0x226   :  { %254 = vtanh.f32 %v197_v33  ;;  %v198_v36 = vmul.f32 0.7978846, %v194_v34 }
 0x227   :  { %256 = vtanh.f32 %v200_v35 }
 0x228   :  { %258 = vtanh.f32 %v198_v36 }
 0x22f   :  { %v253_v37 = vpop.eup %252 }
 0x230   :  { %v255_v38 = vpop.eup %254  ;;  %v207_v40 = vadd.f32 1.0, %v253_v37 }
 0x231   :  { %v257_v41 = vpop.eup %256  ;;  %v205_v43 = vadd.f32 1.0, %v255_v38 }
 0x232   :  { %v259_v44 = vpop.eup %258  ;;  %v211_v45 = vmul.f32 %v207_v40, %v179_v39  ;;  %v208_v47 = vadd.f32 1.0, %v257_v41 }
 0x233   :  { %v209_v48 = vmul.f32 %v205_v43, %v177_v42  ;;  %v206_v50 = vadd.f32 1.0, %v259_v44 }
 0x234   :  { %215 = vst [vmem:[%s367_s5 + $0x10] sm:$0xff] %v211_v45  ;;  %v212_v51 = vmul.f32 %v208_v47, %v180_v46 }
 0x235   :  { %213 = vst [vmem:[%s367_s5] sm:$0xff] %v209_v48  ;;  %v210_v52 = vmul.f32 %v206_v50, %v178_v49 }
 0x236   :  { %216 = vst [vmem:[%s367_s5 + $0x18] sm:$0xff] %v212_v51 }
 0x237   :  { %214 = vst [vmem:[%s367_s5 + $0x8] sm:$0xff] %v210_v52 }

// kernel: swin_forward.66
= control target key start
LH: loop header
LB: loop body
LE: loop exit
PB: predicated region body
PF: predicated region fallthrough
CT: control target
= control target key end

     0   :  { %vm12_vm0 = vcmask 523264   ;;  %vm36_vm1 = vcmask 1041409   ;;  %vm39_vm2 = vcmask 517120   ;;  %s70_s0 = inlined_call_operand.vmem [shape: f32[2,16,64], index: 0, kind: input, shape index: {}]   ;;  %s71_s1 = inlined_call_operand.vmem [shape: f32[2,64], index: 1, kind: output, shape index: {}]  }
   0x1   :  { %v8_v0 = vld [vmem:[%s70_s0] sm:$0xff]  ;;  %v9_v1 = vld [vmem:[%s70_s0 + $0x8] sm:$0xff]  ;;  %v10_v2 = vld [vmem:[%s70_s0 + $0x10] sm:$0xff] }
   0x2   :  { %v11_v3 = vld [vmem:[%s70_s0 + $0x18] sm:$0xff]  ;;  %v13_v4 = vsel %vm12_vm0, %v8_v0, 0.0  ;;  %v14_v5 = vsel %vm12_vm0, %v9_v1, 0.0  ;;  %v22_v6 = vsel %vm12_vm0, %v10_v2, 0.0 }
   0x3   :  { %v15_v7 = vadd.f32 %v14_v5, %v13_v4  ;;  %v23_v8 = vsel %vm12_vm0, %v11_v3, 0.0 }
   0x4   :  { %v24_v9 = vadd.f32 %v23_v8, %v22_v6 }
   0x5   :  { %v16_v10 = vrot.slane %v15_v7, 4 }
   0x6   :  { %v25_v11 = vrot.slane %v24_v9, 4 }
   0x7   :  { %v17_v12 = vadd.f32 %v16_v10, %v15_v7 }
   0x8   :  { %v26_v13 = vadd.f32 %v25_v11, %v24_v9 }
   0x9   :  { %v18_v14 = vrot.slane %v17_v12, 2 }
   0xa   :  { %v27_v15 = vrot.slane %v26_v13, 2 }
   0xb   :  { %v19_v16 = vadd.f32 %v18_v14, %v17_v12 }
   0xc   :  { %v28_v17 = vadd.f32 %v27_v15, %v26_v13 }
   0xd   :  { %v20_v18 = vrot.slane %v19_v16, 1 }
   0xe   :  { %v29_v19 = vrot.slane %v28_v17, 1 }
   0xf   :  { %v21_v20 = vadd.f32 %v20_v18, %v19_v16 }
  0x10   :  { %v30_v21 = vadd.f32 %v29_v19, %v28_v17 }
  0x11   :  { %v32_v22 = vmul.f32 0.0625, %v21_v20 }
  0x12   :  { %v33_v23 = vmul.f32 0.0625, %v30_v21 }
  0x14   :  { %v37_v24 = vsel %vm36_vm1, %v33_v23, %v32_v22 }
  0x15   :  { %40 = vst.msk [vmem:[%s71_s1] sm:$0x3] %vm39_vm2, %v37_v24 }

// kernel: swin_forward.67
= control target key start
LH: loop header
LB: loop body
LE: loop exit
PB: predicated region body
PF: predicated region fallthrough
CT: control target
= control target key end

     0   :  { %vm23_vm0 = vcmask 517120   ;;  %s265_s0 = inlined_call_operand.vmem [shape: f32[2,64], index: 0, kind: input, shape index: {}]   ;;  %s266_s1 = inlined_call_operand.vmem [shape: f32[1,64], index: 1, kind: input, shape index: {}]   ;;  %s267_s2 = inlined_call_operand.vmem [shape: f32[1,64], index: 2, kind: input, shape index: {}]   ;;  %s268_s3 = inlined_call_operand.vmem [shape: f32[64,8], index: 3, kind: input, shape index: {}]   ;;  %s269_s4 = inlined_call_operand.vmem [shape: f32[1,8], index: 4, kind: input, shape index: {}]   ;;  %s270_s5 = inlined_call_operand.hbm [shape: f32[2,8], index: 5, kind: output, shape index: {}]  }
   0x1   :  { %v22_v0 = vld [vmem:[%s265_s0] sm:$0x3] }
   0x2   :  { %10 = vsyncpa [#allocation3], 0  ;;  %v24_v1 = vsel %vm23_vm0, %v22_v0, 0.0  ;;  %v55_v7 = vld [vmem:[%s268_s3] sm:$0xff]  ;;  %v56_v8 = vld [vmem:[%s268_s3 + $0x8] sm:$0xff]  ;;  %v184_v10 = vmov 0.0  }
   0x3   :  { %25 = vadd.xlane.f32.xlu0 %v24_v1  ;;  %v63_v9 = vpack.c.bf16 %v56_v8, %v55_v7  ;;  %143 = vmatprep.subr.bf16.mxu0 %v184_v10  ;;  %v57_v11 = vld [vmem:[%s268_s3 + $0x10] sm:$0xff]  ;;  %v58_v12 = vld [vmem:[%s268_s3 + $0x18] sm:$0xff]  ;;  %v59_v14 = vld [vmem:[%s268_s3 + $0x20] sm:$0xff]  ;;  %vm185_vm1 = vmmov 0   ;;  %vm74_vm2 = vcmask 523264   ;;  %s186_s15 = smov [#allocation2]  }
   0x4   :  { %v64_v13 = vpack.c.bf16 %v58_v12, %v57_v11  ;;  %v60_v15 = vld [vmem:[%s268_s3 + $0x28] sm:$0xff]  ;;  %v61_v17 = vld [vmem:[%s268_s3 + $0x30] sm:$0xff]  ;;  %v62_v18 = vld [vmem:[%s268_s3 + $0x38] sm:$0xff]  ;;  %151 = vmatprep.mubr.msk.bf16.mxu0 %vm185_vm1, %v184_v10  ;;  %s126_s16 = sshll.u32 %s186_s15, 4  ;;  %vm118_vm3 = vcmask 58368   ;;  %s127_s16 = int_to_ptr.vmem [resolvable:$true] %s126_s16 }
   0x5   :  { %144 = vmatpush3.bf16.msra.mxu0 %v63_v9  ;;  %v65_v16 = vpack.c.bf16 %v60_v15, %v59_v14  ;;  %v66_v19 = vpack.c.bf16 %v62_v18, %v61_v17  ;;  %v134_v24 = vld [vmem:[%s266_s1] ss:$0 sm:$0xff]  ;;  %s160_s1 = scalar_lea.vmem %s127_s16, 32  ;;  %p165_p1 = scmp.lt.s32.totalorder %s127_s16, %s127_s16 }
   0x6   :  { %145 = vmatprep.subr.bf16.mxu0 %v184_v10  ;;  %v135_v26 = vld [vmem:[%s267_s2] ss:$0 sm:$0xff]  ;;  %p161_p0 = scmp.ne.s32.totalorder %s127_s16, %s160_s1  ;;  %p166_p2 = scmp.lt.s32.totalorder %s160_s1, %s160_s1 }
   0x7   :  { %v136_v30 = vld [vmem:[%s269_s4] ss:$0 sm:$0xff] }
   0x8   :  { %p167_p3 = por %p166_p2, %p165_p1 }
   0x9   :  { %146 = vmatpush3.bf16.msra.mxu0 %v64_v13 }
   0xa   :  { %147 = vmatprep.subr.bf16.mxu0 %v184_v10  ;;  %p168_p4 = pnand %p167_p3, %p161_p0 }
   0xd   :  { %148 = vmatpush3.bf16.msra.mxu0 %v65_v16 }
   0xe   :  { %149 = vmatprep.subr.bf16.mxu0 %v184_v10 }
  0x11   :  { %150 = vmatpush3.bf16.msra.mxu0 %v66_v19 }
  0x90   :  { %v26_v2 = vpop.xlane.xlu0 %25 }
  0x91   :  { %v28_v3 = vmul.f32 0.015625, %v26_v2 }
  0x93   :  { %v29_v4 = vsub.f32 %v22_v0, %v28_v3 }
  0x95   :  { %v30_v5 = vmul.f32 %v29_v4, %v29_v4 }
  0x97   :  { %v31_v6 = vsel %vm23_vm0, %v30_v5, 0.0 }
  0x98   :  { %32 = vadd.xlane.f32.xlu0 %v31_v6 }
 0x125   :  { %v33_v20 = vpop.xlane.xlu0 %32 }
 0x126   :  { %v34_v21 = vmul.f32 0.015625, %v33_v20 }
 0x128   :  { %v35_v22 = vadd.f32 1e-05, %v34_v21 }
 0x12a   :  { %158 = vrsqrt.f32 %v35_v22 }
 0x134   :  { %v159_v23 = vpop.eup %158 }
 0x135   :  { %v37_v25 = vmul.f32 %v159_v23, %v29_v4 }
 0x137   :  { %v45_v27 = vmul.f32 %v134_v24, %v37_v25 }
 0x139   :  { %v53_v28 = vadd.f32 %v135_v26, %v45_v27 }
 0x13b   :  { %v54_v29 = vpack.c.bf16 %v53_v28, %v53_v28 }
 0x13d   :  { %152 = vmatmul.mubr.msk.bf16.vlgmr.msra.gmra.mrb[0].mxu0 %vm74_vm2, %v54_v29 }
 0x210   :  { %v112_v31 = vpop.f32.mrb[0].mxu0 }
 0x211   :  { %v113_v32 = vadd.f32 %v136_v30, %v112_v31  ;;  %v153_v33 = vpop.f32.mrb[1].mxu0 }
 0x212   :  { %v115_v34 = vpop.f32.mrb[2].mxu0 }
 0x213   :  { %v154_v35 = vpop.f32.mrb[3].mxu0  ;;  %119 = vst.msk [vmem:[#allocation2] sm:$0x3] %vm118_vm3, %v113_v32 }
 0x214   :  { %171 = shalt.err (!%p168_p4)
}
 0x215   :  { %s172_s4 = scalar_lea.hbm %s270_s5, 32 }
 0x216   :  { %p173_p5 = scmp.ne.s32.totalorder %s270_s5, %s172_s4  ;;  %p176_p6 = scmp.lt.u32.totalorder %s172_s4, %s270_s5 }
 0x218   :  { %p178_p7 = pnand %p176_p6, %p173_p5 }
 0x21a   :  { %181 = shalt.err (!%p178_p7)
}
 0x21b   :  { %129 = dma.vmem_to_hbm [thread:$0]  %s127_s16, 32, %s270_s5, [#allocation3]  }
 0x21c   :  { %182 = dma.done.wait [#allocation3], 32  }
 0x21d   :  { %183 = vsyncadd [#allocation3], 4294967264 }
 0x21e   :  { %133 = vsyncpa [#allocation3], 1 }

</bundles_post_ra>
